<compile_context>
chip_gen: v6e
topology: v6e:2x2x1
jax: 0.10.0
libtpu: 0.0.40
codegen_flags: <defaults>
</compile_context>

<pallas_src>
import jax
import jax.numpy as jnp
from jax import lax
from jax.experimental import pallas as pl
from jax.experimental.pallas import tpu as pltpu

LANE = 128
SUBLANE = 8


def _round_up(x, m):
    return ((x + m - 1) // m) * m


# -----------------------------------------------------------------------------
# Pallas kernel: fused direct conv (sum of shifted matmuls) + BN bias + SiLU.
# -----------------------------------------------------------------------------
def _make_conv_kernel(taps, n_inputs, m_out):
    """taps: tuple of (input_index, row_offset); BN scale already folded in w."""

    def kernel(*refs):
        x_refs = refs[:n_inputs]
        w_ref = refs[n_inputs]
        b_ref = refs[n_inputs + 1]
        o_ref = refs[n_inputs + 2]

        acc = None
        for t, (xi, off) in enumerate(taps):
            lhs = x_refs[xi][off:off + m_out, :]          # bf16 (m_out, Cp)
            part = jnp.dot(lhs, w_ref[t],                  # bf16 matmul, f32 acc
                           preferred_element_type=jnp.float32)
            acc = part if acc is None else acc + part

        y = acc + b_ref[...]                               # f32 epilogue
        yc = jnp.maximum(y, -60.0)                         # keep exp finite
        sig = pl.reciprocal(1.0 + jnp.exp(-yc), approx=True)
        o_ref[...] = (y * sig).astype(o_ref.dtype)         # SiLU, cast to bf16

    return kernel


def fused_conv_bn_silu(xs, w, b, taps, m_rows):
    """
    xs:   list of flattened inputs, each (N, M_i, Cp) bf16, Cp multiple of 128
    w:    (T, Cp, Coutp) bf16 weight (BN scale folded), Coutp multiple of 128
    b:    (1, Coutp) f32 folded BN bias
    taps: length-T list of static (input_index, row_offset)
    m_rows: number of valid output rows
    returns (N, m_rows, Coutp) bf16
    """
    n_in = len(xs)
    N = xs[0].shape[0]
    cp = xs[0].shape[-1]
    T, wcp, coutp = w.shape
    assert T == len(taps) and wcp == cp
    assert all(x.shape[0] == N and x.shape[-1] == cp for x in xs)

    m_out = _round_up(m_rows, SUBLANE)

    # Pad each flattened input so every tap window [off, off + m_out) is valid.
    xs_p = []
    for i, xi in enumerate(xs):
        offs = [off for idx, off in taps if idx == i]
        need = (max(offs) if offs else 0) + m_out
        mi = xi.shape[1]
        mi_p = _round_up(max(need, mi), SUBLANE)
        if mi_p != mi:
            xi = jnp.pad(xi, ((0, 0), (0, mi_p - mi), (0, 0)))
        xs_p.append(xi)

    tn = LANE                      # lane-dense output tiles
    grid = (N, coutp // tn)

    in_specs = []
    for xi in xs_p:
        mi_p = xi.shape[1]
        in_specs.append(pl.BlockSpec((None, mi_p, cp), lambda n, j: (n, 0, 0)))
    in_specs.append(pl.BlockSpec((T, cp, tn), lambda n, j: (0, 0, j)))
    in_specs.append(pl.BlockSpec((1, tn), lambda n, j: (0, j)))
    out_spec = pl.BlockSpec((None, m_out, tn), lambda n, j: (n, 0, j))

    flops = 2 * N * m_out * cp * coutp * T
    bytes_accessed = (sum(int(x.size) * 2 for x in xs_p) + int(w.size) * 2
                      + int(b.size) * 4 + N * m_out * coutp * 2)
    cost = pl.CostEstimate(flops=flops,
                           transcendentals=N * m_out * coutp,
                           bytes_accessed=bytes_accessed)

    out = pl.pallas_call(
        _make_conv_kernel(tuple(taps), n_in, m_out),
        out_shape=jax.ShapeDtypeStruct((N, m_out, coutp), jnp.bfloat16),
        grid_spec=pltpu.PrefetchScalarGridSpec(
            num_scalar_prefetch=0,
            grid=grid,
            in_specs=in_specs,
            out_specs=out_spec),
        compiler_params=pltpu.CompilerParams(
            dimension_semantics=("parallel", "parallel"),
            vmem_limit_bytes=32 * 1024 * 1024),
        cost_estimate=cost,
    )(*xs_p, w, b)
    return out[:, :m_rows, :]


# -----------------------------------------------------------------------------
# Conv wrappers (padding / flattening glue in JAX, the hot path in Pallas)
# -----------------------------------------------------------------------------
def conv3x3_s1(x, p):
    """3x3 stride-1 SAME conv. x: (N,H,W,Cp) bf16 -> (N,H,W,Coutp) bf16."""
    N, H, W, cp = x.shape
    xp = jnp.pad(x, ((0, 0), (1, 1), (1, 1), (0, 0)))
    Wp = W + 2
    xf = xp.reshape(N, (H + 2) * Wp, cp)
    taps = [(0, kh * Wp + kw) for kh in range(3) for kw in range(3)]
    y = fused_conv_bn_silu([xf], p["w"], p["b"], taps, H * Wp)
    coutp = p["w"].shape[-1]
    return y.reshape(N, H, Wp, coutp)[:, :, :W, :]


def conv1x1_s1(x, p):
    """1x1 conv: plain fused matmul, no patch extraction."""
    N, H, W, cp = x.shape
    xf = x.reshape(N, H * W, cp)
    y = fused_conv_bn_silu([xf], p["w"], p["b"], [(0, 0)], H * W)
    coutp = p["w"].shape[-1]
    return y.reshape(N, H, W, coutp)


def conv3x3_s2(x, p):
    """3x3 stride-2 SAME conv == parity reorg + valid 2x2 stride-1 conv."""
    N, H, W, cp = x.shape
    xp = jnp.pad(x, ((0, 0), (1, 1), (1, 1), (0, 0)))
    xq = jnp.concatenate(
        [xp[:, ::2, ::2, :], xp[:, 1::2, ::2, :],
         xp[:, ::2, 1::2, :], xp[:, 1::2, 1::2, :]], axis=-1)
    Hq, Wq = (H + 2) // 2, (W + 2) // 2
    xf = xq.reshape(N, Hq * Wq, 4 * cp)
    Ho, Wo = H // 2, W // 2
    taps = [(0, dh * Wq + dw) for dh in range(2) for dw in range(2)]
    y = fused_conv_bn_silu([xf], p["w"], p["b"], taps, Ho * Wq)
    coutp = p["w"].shape[-1]
    return y.reshape(N, Ho, Wq, coutp)[:, :, :Wo, :]


def mix1x1(branches, p):
    """ELAN 1x1 mix over an implicit channel-concat (one matmul tap/branch)."""
    N, H, W, cp = branches[0].shape
    xs = [br.reshape(N, H * W, cp) for br in branches]
    taps = [(i, 0) for i in range(len(branches))]
    y = fused_conv_bn_silu(xs, p["w"], p["b"], taps, H * W)
    coutp = p["w"].shape[-1]
    return y.reshape(N, H, W, coutp)


# -----------------------------------------------------------------------------
# Model pieces (structure mirrors the PyTorch module)
# -----------------------------------------------------------------------------
def reorg(x):
    """PixelUnshuffle-style ReOrg: (N,H,W,C) -> (N,H/2,W/2,4C). Order tl,bl,tr,br."""
    return jnp.concatenate(
        [x[:, ::2, ::2, :], x[:, 1::2, ::2, :],
         x[:, ::2, 1::2, :], x[:, 1::2, 1::2, :]], axis=-1)


def pad_channels(x, cp):
    c = x.shape[-1]
    if c == cp:
        return x
    return jnp.pad(x, ((0, 0),) * (x.ndim - 1) + ((0, cp - c),))


def yolov7_backbone(x, params):
    """x: (N,H,W,Cin) f32 NHWC. Returns list of bf16 maps with padded channels."""
    x = reorg(x)
    x = pad_channels(x, _round_up(x.shape[-1], LANE)).astype(jnp.bfloat16)
    x = conv3x3_s1(x, params["stem"])
    outputs = []
    for sp in params["stages"]:
        x = conv3x3_s2(x, sp["down"])
        branches = [conv1x1_s1(x, sp["split1"]), conv1x1_s1(x, sp["split2"])]
        y = branches[-1]
        for block in sp["blocks"]:
            for cw in block:
                y = conv3x3_s1(y, cw)
            branches.append(y)
        x = mix1x1(branches, sp["mix"])
        outputs.append(x)
    return outputs


# -----------------------------------------------------------------------------
# Deterministic synthetic parameters (kernel-ready + raw copies for reference)
# -----------------------------------------------------------------------------
def _bn_scale_bias(cout):
    idx = jnp.arange(cout, dtype=jnp.float32)
    gamma = 1.0 + 0.01 * idx
    beta = 0.01 * idx
    mean = 0.02 * idx
    var = 1.0 + 0.03 * idx
    scale = gamma / jnp.sqrt(var + 1e-5)
    bias = beta - mean * scale
    return scale, bias


def _pad_bias(bias, coutp):
    return jnp.zeros((1, coutp), jnp.float32).at[0, :bias.shape[0]].set(bias)


def make_conv_params(key, cin, cout, k):
    """k in {1, 3}, stride 1."""
    fan_in = cin * k * k
    w = jax.random.normal(key, (k, k, cin, cout), jnp.float32) / jnp.sqrt(
        jnp.float32(fan_in))
    scale, bias = _bn_scale_bias(cout)
    w_bf = (w * scale).astype(jnp.bfloat16)                # fold BN scale
    cinp, coutp = _round_up(cin, LANE), _round_up(cout, LANE)
    wp = jnp.zeros((k * k, cinp, coutp), jnp.bfloat16)
    wp = wp.at[:, :cin, :cout].set(w_bf.reshape(k * k, cin, cout))
    kern = {"w": wp, "b": _pad_bias(bias, coutp)}
    raw = {"w": w_bf.astype(jnp.float32), "b": bias}
    return kern, raw


def make_down_conv_params(key, cin, cout):
    """3x3 stride-2 conv, rearranged into a 2x2 conv over the parity reorg."""
    w = jax.random.normal(key, (3, 3, cin, cout), jnp.float32) / jnp.sqrt(
        jnp.float32(cin * 9))
    scale, bias = _bn_scale_bias(cout)
    w_bf = (w * scale).astype(jnp.bfloat16)
    cinp, coutp = _round_up(cin, LANE), _round_up(cout, LANE)
    wq = jnp.zeros((4, 4 * cinp, coutp), jnp.bfloat16)
    for kh in range(3):
        ph, dh = kh % 2, kh // 2
        for kw in range(3):
            pw, dw = kw % 2, kw // 2
            t = dh * 2 + dw                  # tap (dh, dw) of the 2x2 conv
            blk = ph + 2 * pw                # parity channel block in reorg
            wq = wq.at[t, blk * cinp:blk * cinp + cin, :cout].set(w_bf[kh, kw])
    kern = {"w": wq, "b": _pad_bias(bias, coutp)}
    raw = {"w": w_bf.astype(jnp.float32), "b": bias}
    return kern, raw


def make_mix_params(key, branch_channels, cout):
    total = sum(branch_channels)
    w = jax.random.normal(key, (total, cout), jnp.float32) / jnp.sqrt(
        jnp.float32(total))
    scale, bias = _bn_scale_bias(cout)
    w_bf = (w * scale).astype(jnp.bfloat16)
    cinp = _round_up(max(branch_channels), LANE)
    coutp = _round_up(cout, LANE)
    wp = jnp.zeros((len(branch_channels), cinp, coutp), jnp.bfloat16)
    off = 0
    for i, c in enumerate(branch_channels):
        wp = wp.at[i, :c, :cout].set(w_bf[off:off + c])
        off += c
    kern = {"w": wp, "b": _pad_bias(bias, coutp)}
    raw = {"w": w_bf.astype(jnp.float32), "b": bias}
    return kern, raw


def make_backbone_params(key, in_channels, widths, depth, block_depth):
    key, k_stem = jax.random.split(key)
    stem_k, stem_r = make_conv_params(k_stem, in_channels * 4, widths[0], 3)
    params = {"stem": stem_k, "stages": []}
    raw = {"stem": stem_r, "stages": []}
    for cin, cout in zip(widths[:-1], widths[1:]):
        key, kd, k1, k2, km = jax.random.split(key, 5)
        down_k, down_r = make_down_conv_params(kd, cin, cout)
        hidden = cout // 2
        split = hidden
        s1_k, s1_r = make_conv_params(k1, cout, split, 1)
        s2_k, s2_r = make_conv_params(k2, cout, split, 1)
        blocks_k, blocks_r = [], []
        for d in range(depth):
            c_in = split if d == 0 else hidden
            chans = [c_in] + [hidden] * block_depth
            blk_k, blk_r = [], []
            for j in range(block_depth):
                key, kb = jax.random.split(key)
                ck, cr = make_conv_params(kb, chans[j], chans[j + 1], 3)
                blk_k.append(ck)
                blk_r.append(cr)
            blocks_k.append(blk_k)
            blocks_r.append(blk_r)
        mix_k, mix_r = make_mix_params(km, [split, split] + [hidden] * depth,
                                       cout)
        params["stages"].append(dict(down=down_k, split1=s1_k, split2=s2_k,
                                     blocks=blocks_k, mix=mix_k))
        raw["stages"].append(dict(down=down_r, split1=s1_r, split2=s2_r,
                                  blocks=blocks_r, mix=mix_r))
    return params, raw


# -----------------------------------------------------------------------------
# Pure-JAX (XLA conv) reference of the same network, for validation.
# -----------------------------------------------------------------------------
def _ref_conv(x, w, b, stride):
    k = w.shape[0]
    pad = k // 2
    y = lax.conv_general_dilated(
        x, w, window_strides=(stride, stride),
        padding=((pad, pad), (pad, pad)),
        dimension_numbers=("NHWC", "HWIO", "NHWC"))
    y = y + b
    return y * jax.nn.sigmoid(y)


def _ref_mix(branches, w, b):
    x = jnp.concatenate(branches, axis=-1)
    y = jnp.einsum("nhwc,cd->nhwd", x, w) + b
    return y * jax.nn.sigmoid(y)


def reference_backbone(x, raw):
    x = reorg(x)
    x = _ref_conv(x, raw["stem"]["w"], raw["stem"]["b"], 1)
    outs = []
    for sp in raw["stages"]:
        x = _ref_conv(x, sp["down"]["w"], sp["down"]["b"], 2)
        branches = [_ref_conv(x, sp["split1"]["w"], sp["split1"]["b"], 1),
                    _ref_conv(x, sp["split2"]["w"], sp["split2"]["b"], 1)]
        y = branches[-1]
        for block in sp["blocks"]:
            for cw in block:
                y = _ref_conv(y, cw["w"], cw["b"], 1)
            branches.append(y)
        x = _ref_mix(branches, sp["mix"]["w"], sp["mix"]["b"])
        outs.append(x)
    return outs


# -----------------------------------------------------------------------------
if __name__ == "__main__":
    key = jax.random.PRNGKey(0)
    kx, kp = jax.random.split(key)

    in_channels = 4
    widths = (8, 16, 32)      # small-width analogue of the W6 (64..1024) config
    depth = 2
    block_depth = 2

    # PyTorch-convention input (NCHW), transposed once to NHWC for the kernels.
    x_nchw = jax.random.normal(kx, (2, in_channels, 16, 16), jnp.float32)
    x_nhwc = jnp.transpose(x_nchw, (0, 2, 3, 1))

    params, raw = make_backbone_params(kp, in_channels, widths, depth,
                                       block_depth)

    fwd = jax.jit(yolov7_backbone)
    outs = jax.block_until_ready(fwd(x_nhwc, params))

    real = [o[..., :w].astype(jnp.float32) for o, w in zip(outs, widths[1:])]
    expected = [(2, 4, 4, widths[1]), (2, 2, 2, widths[2])]
    assert [tuple(o.shape) for o in real] == expected, \
        [tuple(o.shape) for o in real]
    assert all(bool(jnp.all(jnp.isfinite(o))) for o in real)

    # Numerical check against the pure-JAX reference (bf16 activation tolerance).
    refs = reference_backbone(x_nhwc, raw)
    for got, want in zip(real, refs):
        assert got.shape == want.shape
        assert bool(jnp.allclose(got, want, rtol=0.2, atol=0.25)), \
            float(jnp.max(jnp.abs(got - want)))

    print("KERNEL_OK")
</pallas_src>

<mosaic_0001>
module attributes {stable_mosaic.version = 11 : i64} {
  func.func @kernel(%arg0: i32, %arg1: i32, %arg2: memref<1x104x128xbf16, #tpu.memory_space<vmem>>, %arg3: memref<9x128x128xbf16, #tpu.memory_space<vmem>>, %arg4: memref<1x128xf32, #tpu.memory_space<vmem>>, %arg5: memref<1x80x128xbf16, #tpu.memory_space<vmem>>) attributes {dimension_semantics = [#tpu.dimension_semantics<parallel>, #tpu.dimension_semantics<parallel>], iteration_bounds = array<i64: 2, 1>, scalar_prefetch = 0 : i64, scratch_operands = 0 : i64, tpu.core_type = #tpu.core_type<tc>, window_params = [{transform_indices = @transform_0, window_bounds = array<i64: 1, 104, 128>}, {transform_indices = @transform_1, window_bounds = array<i64: 9, 128, 128>}, {transform_indices = @transform_2, window_bounds = array<i64: 1, 128>}, {transform_indices = @transform_3, window_bounds = array<i64: 1, 80, 128>}]} {
    %c0 = arith.constant 0 : index
    %c0_0 = arith.constant 0 : index
    %c0_1 = arith.constant 0 : index
    %0 = vector.load %arg2[%c0, %c0_0, %c0_1] : memref<1x104x128xbf16, #tpu.memory_space<vmem>>, vector<1x80x128xbf16>
    %1 = vector.shape_cast %0 : vector<1x80x128xbf16> to vector<80x128xbf16>
    %c0_2 = arith.constant 0 : index
    %c0_3 = arith.constant 0 : index
    %c0_4 = arith.constant 0 : index
    %2 = vector.load %arg3[%c0_2, %c0_3, %c0_4] : memref<9x128x128xbf16, #tpu.memory_space<vmem>>, vector<1x128x128xbf16>
    %3 = vector.shape_cast %2 : vector<1x128x128xbf16> to vector<128x128xbf16>
    %cst = arith.constant dense<0.000000e+00> : vector<80x128xf32>
    %4 = tpu.matmul %1, %3, %cst {dimension_numbers = #tpu.dot_dimension_numbers<[1], [0], [0], [1], [0, 0, 1, 1], [], []>} : vector<80x128xbf16>, vector<128x128xbf16>, vector<80x128xf32> -> vector<80x128xf32>
    %c0_5 = arith.constant 0 : index
    %c1 = arith.constant 1 : index
    %c0_6 = arith.constant 0 : index
    %5 = vector.load %arg2[%c0_5, %c1, %c0_6] : memref<1x104x128xbf16, #tpu.memory_space<vmem>>, vector<1x80x128xbf16>
    %6 = vector.shape_cast %5 : vector<1x80x128xbf16> to vector<80x128xbf16>
    %c1_7 = arith.constant 1 : index
    %c0_8 = arith.constant 0 : index
    %c0_9 = arith.constant 0 : index
    %7 = vector.load %arg3[%c1_7, %c0_8, %c0_9] : memref<9x128x128xbf16, #tpu.memory_space<vmem>>, vector<1x128x128xbf16>
    %8 = vector.shape_cast %7 : vector<1x128x128xbf16> to vector<128x128xbf16>
    %cst_10 = arith.constant dense<0.000000e+00> : vector<80x128xf32>
    %9 = tpu.matmul %6, %8, %cst_10 {dimension_numbers = #tpu.dot_dimension_numbers<[1], [0], [0], [1], [0, 0, 1, 1], [], []>} : vector<80x128xbf16>, vector<128x128xbf16>, vector<80x128xf32> -> vector<80x128xf32>
    %10 = arith.addf %4, %9 : vector<80x128xf32>
    %c0_11 = arith.constant 0 : index
    %c2 = arith.constant 2 : index
    %c0_12 = arith.constant 0 : index
    %11 = vector.load %arg2[%c0_11, %c2, %c0_12] : memref<1x104x128xbf16, #tpu.memory_space<vmem>>, vector<1x80x128xbf16>
    %12 = vector.shape_cast %11 : vector<1x80x128xbf16> to vector<80x128xbf16>
    %c2_13 = arith.constant 2 : index
    %c0_14 = arith.constant 0 : index
    %c0_15 = arith.constant 0 : index
    %13 = vector.load %arg3[%c2_13, %c0_14, %c0_15] : memref<9x128x128xbf16, #tpu.memory_space<vmem>>, vector<1x128x128xbf16>
    %14 = vector.shape_cast %13 : vector<1x128x128xbf16> to vector<128x128xbf16>
    %cst_16 = arith.constant dense<0.000000e+00> : vector<80x128xf32>
    %15 = tpu.matmul %12, %14, %cst_16 {dimension_numbers = #tpu.dot_dimension_numbers<[1], [0], [0], [1], [0, 0, 1, 1], [], []>} : vector<80x128xbf16>, vector<128x128xbf16>, vector<80x128xf32> -> vector<80x128xf32>
    %16 = arith.addf %10, %15 : vector<80x128xf32>
    %c0_17 = arith.constant 0 : index
    %c10 = arith.constant 10 : index
    %c0_18 = arith.constant 0 : index
    %17 = vector.load %arg2[%c0_17, %c10, %c0_18] : memref<1x104x128xbf16, #tpu.memory_space<vmem>>, vector<1x80x128xbf16>
    %18 = vector.shape_cast %17 : vector<1x80x128xbf16> to vector<80x128xbf16>
    %c3 = arith.constant 3 : index
    %c0_19 = arith.constant 0 : index
    %c0_20 = arith.constant 0 : index
    %19 = vector.load %arg3[%c3, %c0_19, %c0_20] : memref<9x128x128xbf16, #tpu.memory_space<vmem>>, vector<1x128x128xbf16>
    %20 = vector.shape_cast %19 : vector<1x128x128xbf16> to vector<128x128xbf16>
    %cst_21 = arith.constant dense<0.000000e+00> : vector<80x128xf32>
    %21 = tpu.matmul %18, %20, %cst_21 {dimension_numbers = #tpu.dot_dimension_numbers<[1], [0], [0], [1], [0, 0, 1, 1], [], []>} : vector<80x128xbf16>, vector<128x128xbf16>, vector<80x128xf32> -> vector<80x128xf32>
    %22 = arith.addf %16, %21 : vector<80x128xf32>
    %c0_22 = arith.constant 0 : index
    %c11 = arith.constant 11 : index
    %c0_23 = arith.constant 0 : index
    %23 = vector.load %arg2[%c0_22, %c11, %c0_23] : memref<1x104x128xbf16, #tpu.memory_space<vmem>>, vector<1x80x128xbf16>
    %24 = vector.shape_cast %23 : vector<1x80x128xbf16> to vector<80x128xbf16>
    %c4 = arith.constant 4 : index
    %c0_24 = arith.constant 0 : index
    %c0_25 = arith.constant 0 : index
    %25 = vector.load %arg3[%c4, %c0_24, %c0_25] : memref<9x128x128xbf16, #tpu.memory_space<vmem>>, vector<1x128x128xbf16>
    %26 = vector.shape_cast %25 : vector<1x128x128xbf16> to vector<128x128xbf16>
    %cst_26 = arith.constant dense<0.000000e+00> : vector<80x128xf32>
    %27 = tpu.matmul %24, %26, %cst_26 {dimension_numbers = #tpu.dot_dimension_numbers<[1], [0], [0], [1], [0, 0, 1, 1], [], []>} : vector<80x128xbf16>, vector<128x128xbf16>, vector<80x128xf32> -> vector<80x128xf32>
    %28 = arith.addf %22, %27 : vector<80x128xf32>
    %c0_27 = arith.constant 0 : index
    %c12 = arith.constant 12 : index
    %c0_28 = arith.constant 0 : index
    %29 = vector.load %arg2[%c0_27, %c12, %c0_28] : memref<1x104x128xbf16, #tpu.memory_space<vmem>>, vector<1x80x128xbf16>
    %30 = vector.shape_cast %29 : vector<1x80x128xbf16> to vector<80x128xbf16>
    %c5 = arith.constant 5 : index
    %c0_29 = arith.constant 0 : index
    %c0_30 = arith.constant 0 : index
    %31 = vector.load %arg3[%c5, %c0_29, %c0_30] : memref<9x128x128xbf16, #tpu.memory_space<vmem>>, vector<1x128x128xbf16>
    %32 = vector.shape_cast %31 : vector<1x128x128xbf16> to vector<128x128xbf16>
    %cst_31 = arith.constant dense<0.000000e+00> : vector<80x128xf32>
    %33 = tpu.matmul %30, %32, %cst_31 {dimension_numbers = #tpu.dot_dimension_numbers<[1], [0], [0], [1], [0, 0, 1, 1], [], []>} : vector<80x128xbf16>, vector<128x128xbf16>, vector<80x128xf32> -> vector<80x128xf32>
    %34 = arith.addf %28, %33 : vector<80x128xf32>
    %c0_32 = arith.constant 0 : index
    %c20 = arith.constant 20 : index
    %c0_33 = arith.constant 0 : index
    %35 = vector.load %arg2[%c0_32, %c20, %c0_33] : memref<1x104x128xbf16, #tpu.memory_space<vmem>>, vector<1x80x128xbf16>
    %36 = vector.shape_cast %35 : vector<1x80x128xbf16> to vector<80x128xbf16>
    %c6 = arith.constant 6 : index
    %c0_34 = arith.constant 0 : index
    %c0_35 = arith.constant 0 : index
    %37 = vector.load %arg3[%c6, %c0_34, %c0_35] : memref<9x128x128xbf16, #tpu.memory_space<vmem>>, vector<1x128x128xbf16>
    %38 = vector.shape_cast %37 : vector<1x128x128xbf16> to vector<128x128xbf16>
    %cst_36 = arith.constant dense<0.000000e+00> : vector<80x128xf32>
    %39 = tpu.matmul %36, %38, %cst_36 {dimension_numbers = #tpu.dot_dimension_numbers<[1], [0], [0], [1], [0, 0, 1, 1], [], []>} : vector<80x128xbf16>, vector<128x128xbf16>, vector<80x128xf32> -> vector<80x128xf32>
    %40 = arith.addf %34, %39 : vector<80x128xf32>
    %c0_37 = arith.constant 0 : index
    %c21 = arith.constant 21 : index
    %c0_38 = arith.constant 0 : index
    %41 = vector.load %arg2[%c0_37, %c21, %c0_38] : memref<1x104x128xbf16, #tpu.memory_space<vmem>>, vector<1x80x128xbf16>
    %42 = vector.shape_cast %41 : vector<1x80x128xbf16> to vector<80x128xbf16>
    %c7 = arith.constant 7 : index
    %c0_39 = arith.constant 0 : index
    %c0_40 = arith.constant 0 : index
    %43 = vector.load %arg3[%c7, %c0_39, %c0_40] : memref<9x128x128xbf16, #tpu.memory_space<vmem>>, vector<1x128x128xbf16>
    %44 = vector.shape_cast %43 : vector<1x128x128xbf16> to vector<128x128xbf16>
    %cst_41 = arith.constant dense<0.000000e+00> : vector<80x128xf32>
    %45 = tpu.matmul %42, %44, %cst_41 {dimension_numbers = #tpu.dot_dimension_numbers<[1], [0], [0], [1], [0, 0, 1, 1], [], []>} : vector<80x128xbf16>, vector<128x128xbf16>, vector<80x128xf32> -> vector<80x128xf32>
    %46 = arith.addf %40, %45 : vector<80x128xf32>
    %c0_42 = arith.constant 0 : index
    %c22 = arith.constant 22 : index
    %c0_43 = arith.constant 0 : index
    %47 = vector.load %arg2[%c0_42, %c22, %c0_43] : memref<1x104x128xbf16, #tpu.memory_space<vmem>>, vector<1x80x128xbf16>
    %48 = vector.shape_cast %47 : vector<1x80x128xbf16> to vector<80x128xbf16>
    %c8 = arith.constant 8 : index
    %c0_44 = arith.constant 0 : index
    %c0_45 = arith.constant 0 : index
    %49 = vector.load %arg3[%c8, %c0_44, %c0_45] : memref<9x128x128xbf16, #tpu.memory_space<vmem>>, vector<1x128x128xbf16>
    %50 = vector.shape_cast %49 : vector<1x128x128xbf16> to vector<128x128xbf16>
    %cst_46 = arith.constant dense<0.000000e+00> : vector<80x128xf32>
    %51 = tpu.matmul %48, %50, %cst_46 {dimension_numbers = #tpu.dot_dimension_numbers<[1], [0], [0], [1], [0, 0, 1, 1], [], []>} : vector<80x128xbf16>, vector<128x128xbf16>, vector<80x128xf32> -> vector<80x128xf32>
    %52 = arith.addf %46, %51 : vector<80x128xf32>
    %c0_47 = arith.constant 0 : index
    %c0_48 = arith.constant 0 : index
    %53 = vector.load %arg4[%c0_47, %c0_48] : memref<1x128xf32, #tpu.memory_space<vmem>>, vector<1x128xf32>
    %54 = vector.broadcast %53 : vector<1x128xf32> to vector<80x128xf32>
    %55 = arith.addf %52, %54 : vector<80x128xf32>
    %cst_49 = arith.constant -6.000000e+01 : f32
    %56 = vector.broadcast %cst_49 : f32 to vector<80x128xf32>
    %57 = arith.maximumf %55, %56 : vector<80x128xf32>
    %cst_50 = arith.constant 0.000000e+00 : f32
    %58 = vector.broadcast %cst_50 : f32 to vector<80x128xf32>
    %59 = arith.subf %58, %57 : vector<80x128xf32>
    %60 = math.exp %59 : vector<80x128xf32>
    %cst_51 = arith.constant 1.000000e+00 : f32
    %61 = vector.broadcast %cst_51 : f32 to vector<80x128xf32>
    %62 = arith.addf %61, %60 : vector<80x128xf32>
    %63 = tpu.reciprocal %62 {approx = true} : vector<80x128xf32> -> vector<80x128xf32>
    %64 = arith.mulf %55, %63 : vector<80x128xf32>
    %65 = arith.truncf %64 : vector<80x128xf32> to vector<80x128xbf16>
    %c0_52 = arith.constant 0 : index
    %c0_53 = arith.constant 0 : index
    %c0_54 = arith.constant 0 : index
    %66 = vector.load %arg5[%c0_52, %c0_53, %c0_54] : memref<1x80x128xbf16, #tpu.memory_space<vmem>>, vector<1x80x128xbf16>
    %67 = vector.shape_cast %66 : vector<1x80x128xbf16> to vector<80x128xbf16>
    %68 = vector.shape_cast %65 : vector<80x128xbf16> to vector<1x80x128xbf16>
    tpu.vector_store %arg5[%c0_52, %c0_53, %c0_54], %68 {strides = array<i32>} : memref<1x80x128xbf16, #tpu.memory_space<vmem>>, vector<1x80x128xbf16>,
    return
  }
  func.func @transform_0(%arg0: i32, %arg1: i32) -> (i32, i32, i32) {
    %c0_i32 = arith.constant 0 : i32
    %c0_i32_0 = arith.constant 0 : i32
    %c0_i32_1 = arith.constant 0 : i32
    return %arg0, %c0_i32, %c0_i32_0 : i32, i32, i32
  }
  func.func @transform_1(%arg0: i32, %arg1: i32) -> (i32, i32, i32) {
    %c0_i32 = arith.constant 0 : i32
    %c0_i32_0 = arith.constant 0 : i32
    %c0_i32_1 = arith.constant 0 : i32
    return %c0_i32, %c0_i32_0, %arg1 : i32, i32, i32
  }
  func.func @transform_2(%arg0: i32, %arg1: i32) -> (i32, i32) {
    %c0_i32 = arith.constant 0 : i32
    %c0_i32_0 = arith.constant 0 : i32
    return %c0_i32, %arg1 : i32, i32
  }
  func.func @transform_3(%arg0: i32, %arg1: i32) -> (i32, i32, i32) {
    %c0_i32 = arith.constant 0 : i32
    %c0_i32_0 = arith.constant 0 : i32
    return %arg0, %c0_i32, %arg1 : i32, i32, i32
  }
}

module attributes {stable_mosaic.version = 11 : i64} {
  func.func @kernel(%arg0: i32, %arg1: i32, %arg2: memref<1x32x512xbf16, #tpu.memory_space<vmem>>, %arg3: memref<4x512x128xbf16, #tpu.memory_space<vmem>>, %arg4: memref<1x128xf32, #tpu.memory_space<vmem>>, %arg5: memref<1x24x128xbf16, #tpu.memory_space<vmem>>) attributes {dimension_semantics = [#tpu.dimension_semantics<parallel>, #tpu.dimension_semantics<parallel>], iteration_bounds = array<i64: 2, 1>, scalar_prefetch = 0 : i64, scratch_operands = 0 : i64, tpu.core_type = #tpu.core_type<tc>, window_params = [{transform_indices = @transform_0, window_bounds = array<i64: 1, 32, 512>}, {transform_indices = @transform_1, window_bounds = array<i64: 4, 512, 128>}, {transform_indices = @transform_2, window_bounds = array<i64: 1, 128>}, {transform_indices = @transform_3, window_bounds = array<i64: 1, 24, 128>}]} {
    %c0 = arith.constant 0 : index
    %c0_0 = arith.constant 0 : index
    %c0_1 = arith.constant 0 : index
    %0 = vector.load %arg2[%c0, %c0_0, %c0_1] : memref<1x32x512xbf16, #tpu.memory_space<vmem>>, vector<1x24x512xbf16>
    %1 = vector.shape_cast %0 : vector<1x24x512xbf16> to vector<24x512xbf16>
    %c0_2 = arith.constant 0 : index
    %c0_3 = arith.constant 0 : index
    %c0_4 = arith.constant 0 : index
    %2 = vector.load %arg3[%c0_2, %c0_3, %c0_4] : memref<4x512x128xbf16, #tpu.memory_space<vmem>>, vector<1x512x128xbf16>
    %3 = vector.shape_cast %2 : vector<1x512x128xbf16> to vector<512x128xbf16>
    %cst = arith.constant dense<0.000000e+00> : vector<24x128xf32>
    %4 = tpu.matmul %1, %3, %cst {dimension_numbers = #tpu.dot_dimension_numbers<[1], [0], [0], [1], [0, 0, 1, 1], [], []>} : vector<24x512xbf16>, vector<512x128xbf16>, vector<24x128xf32> -> vector<24x128xf32>
    %c0_5 = arith.constant 0 : index
    %c1 = arith.constant 1 : index
    %c0_6 = arith.constant 0 : index
    %5 = vector.load %arg2[%c0_5, %c1, %c0_6] : memref<1x32x512xbf16, #tpu.memory_space<vmem>>, vector<1x24x512xbf16>
    %6 = vector.shape_cast %5 : vector<1x24x512xbf16> to vector<24x512xbf16>
    %c1_7 = arith.constant 1 : index
    %c0_8 = arith.constant 0 : index
    %c0_9 = arith.constant 0 : index
    %7 = vector.load %arg3[%c1_7, %c0_8, %c0_9] : memref<4x512x128xbf16, #tpu.memory_space<vmem>>, vector<1x512x128xbf16>
    %8 = vector.shape_cast %7 : vector<1x512x128xbf16> to vector<512x128xbf16>
    %cst_10 = arith.constant dense<0.000000e+00> : vector<24x128xf32>
    %9 = tpu.matmul %6, %8, %cst_10 {dimension_numbers = #tpu.dot_dimension_numbers<[1], [0], [0], [1], [0, 0, 1, 1], [], []>} : vector<24x512xbf16>, vector<512x128xbf16>, vector<24x128xf32> -> vector<24x128xf32>
    %10 = arith.addf %4, %9 : vector<24x128xf32>
    %c0_11 = arith.constant 0 : index
    %c5 = arith.constant 5 : index
    %c0_12 = arith.constant 0 : index
    %11 = vector.load %arg2[%c0_11, %c5, %c0_12] : memref<1x32x512xbf16, #tpu.memory_space<vmem>>, vector<1x24x512xbf16>
    %12 = vector.shape_cast %11 : vector<1x24x512xbf16> to vector<24x512xbf16>
    %c2 = arith.constant 2 : index
    %c0_13 = arith.constant 0 : index
    %c0_14 = arith.constant 0 : index
    %13 = vector.load %arg3[%c2, %c0_13, %c0_14] : memref<4x512x128xbf16, #tpu.memory_space<vmem>>, vector<1x512x128xbf16>
    %14 = vector.shape_cast %13 : vector<1x512x128xbf16> to vector<512x128xbf16>
    %cst_15 = arith.constant dense<0.000000e+00> : vector<24x128xf32>
    %15 = tpu.matmul %12, %14, %cst_15 {dimension_numbers = #tpu.dot_dimension_numbers<[1], [0], [0], [1], [0, 0, 1, 1], [], []>} : vector<24x512xbf16>, vector<512x128xbf16>, vector<24x128xf32> -> vector<24x128xf32>
    %16 = arith.addf %10, %15 : vector<24x128xf32>
    %c0_16 = arith.constant 0 : index
    %c6 = arith.constant 6 : index
    %c0_17 = arith.constant 0 : index
    %17 = vector.load %arg2[%c0_16, %c6, %c0_17] : memref<1x32x512xbf16, #tpu.memory_space<vmem>>, vector<1x24x512xbf16>
    %18 = vector.shape_cast %17 : vector<1x24x512xbf16> to vector<24x512xbf16>
    %c3 = arith.constant 3 : index
    %c0_18 = arith.constant 0 : index
    %c0_19 = arith.constant 0 : index
    %19 = vector.load %arg3[%c3, %c0_18, %c0_19] : memref<4x512x128xbf16, #tpu.memory_space<vmem>>, vector<1x512x128xbf16>
    %20 = vector.shape_cast %19 : vector<1x512x128xbf16> to vector<512x128xbf16>
    %cst_20 = arith.constant dense<0.000000e+00> : vector<24x128xf32>
    %21 = tpu.matmul %18, %20, %cst_20 {dimension_numbers = #tpu.dot_dimension_numbers<[1], [0], [0], [1], [0, 0, 1, 1], [], []>} : vector<24x512xbf16>, vector<512x128xbf16>, vector<24x128xf32> -> vector<24x128xf32>
    %22 = arith.addf %16, %21 : vector<24x128xf32>
    %c0_21 = arith.constant 0 : index
    %c0_22 = arith.constant 0 : index
    %23 = vector.load %arg4[%c0_21, %c0_22] : memref<1x128xf32, #tpu.memory_space<vmem>>, vector<1x128xf32>
    %24 = vector.broadcast %23 : vector<1x128xf32> to vector<24x128xf32>
    %25 = arith.addf %22, %24 : vector<24x128xf32>
    %cst_23 = arith.constant -6.000000e+01 : f32
    %26 = vector.broadcast %cst_23 : f32 to vector<24x128xf32>
    %27 = arith.maximumf %25, %26 : vector<24x128xf32>
    %cst_24 = arith.constant 0.000000e+00 : f32
    %28 = vector.broadcast %cst_24 : f32 to vector<24x128xf32>
    %29 = arith.subf %28, %27 : vector<24x128xf32>
    %30 = math.exp %29 : vector<24x128xf32>
    %cst_25 = arith.constant 1.000000e+00 : f32
    %31 = vector.broadcast %cst_25 : f32 to vector<24x128xf32>
    %32 = arith.addf %31, %30 : vector<24x128xf32>
    %33 = tpu.reciprocal %32 {approx = true} : vector<24x128xf32> -> vector<24x128xf32>
    %34 = arith.mulf %25, %33 : vector<24x128xf32>
    %35 = arith.truncf %34 : vector<24x128xf32> to vector<24x128xbf16>
    %c0_26 = arith.constant 0 : index
    %c0_27 = arith.constant 0 : index
    %c0_28 = arith.constant 0 : index
    %36 = vector.load %arg5[%c0_26, %c0_27, %c0_28] : memref<1x24x128xbf16, #tpu.memory_space<vmem>>, vector<1x24x128xbf16>
    %37 = vector.shape_cast %36 : vector<1x24x128xbf16> to vector<24x128xbf16>
    %38 = vector.shape_cast %35 : vector<24x128xbf16> to vector<1x24x128xbf16>
    tpu.vector_store %arg5[%c0_26, %c0_27, %c0_28], %38 {strides = array<i32>} : memref<1x24x128xbf16, #tpu.memory_space<vmem>>, vector<1x24x128xbf16>,
    return
  }
  func.func @transform_0(%arg0: i32, %arg1: i32) -> (i32, i32, i32) {
    %c0_i32 = arith.constant 0 : i32
    %c0_i32_0 = arith.constant 0 : i32
    %c0_i32_1 = arith.constant 0 : i32
    return %arg0, %c0_i32, %c0_i32_0 : i32, i32, i32
  }
  func.func @transform_1(%arg0: i32, %arg1: i32) -> (i32, i32, i32) {
    %c0_i32 = arith.constant 0 : i32
    %c0_i32_0 = arith.constant 0 : i32
    %c0_i32_1 = arith.constant 0 : i32
    return %c0_i32, %c0_i32_0, %arg1 : i32, i32, i32
  }
  func.func @transform_2(%arg0: i32, %arg1: i32) -> (i32, i32) {
    %c0_i32 = arith.constant 0 : i32
    %c0_i32_0 = arith.constant 0 : i32
    return %c0_i32, %arg1 : i32, i32
  }
  func.func @transform_3(%arg0: i32, %arg1: i32) -> (i32, i32, i32) {
    %c0_i32 = arith.constant 0 : i32
    %c0_i32_0 = arith.constant 0 : i32
    return %arg0, %c0_i32, %arg1 : i32, i32, i32
  }
}

module attributes {stable_mosaic.version = 11 : i64} {
  func.func @kernel(%arg0: i32, %arg1: i32, %arg2: memref<1x16x128xbf16, #tpu.memory_space<vmem>>, %arg3: memref<1x128x128xbf16, #tpu.memory_space<vmem>>, %arg4: memref<1x128xf32, #tpu.memory_space<vmem>>, %arg5: memref<1x16x128xbf16, #tpu.memory_space<vmem>>) attributes {dimension_semantics = [#tpu.dimension_semantics<parallel>, #tpu.dimension_semantics<parallel>], iteration_bounds = array<i64: 2, 1>, scalar_prefetch = 0 : i64, scratch_operands = 0 : i64, tpu.core_type = #tpu.core_type<tc>, window_params = [{transform_indices = @transform_0, window_bounds = array<i64: 1, 16, 128>}, {transform_indices = @transform_1, window_bounds = array<i64: 1, 128, 128>}, {transform_indices = @transform_2, window_bounds = array<i64: 1, 128>}, {transform_indices = @transform_3, window_bounds = array<i64: 1, 16, 128>}]} {
    %c0 = arith.constant 0 : index
    %c0_0 = arith.constant 0 : index
    %c0_1 = arith.constant 0 : index
    %0 = vector.load %arg2[%c0, %c0_0, %c0_1] : memref<1x16x128xbf16, #tpu.memory_space<vmem>>, vector<1x16x128xbf16>
    %1 = vector.shape_cast %0 : vector<1x16x128xbf16> to vector<16x128xbf16>
    %c0_2 = arith.constant 0 : index
    %c0_3 = arith.constant 0 : index
    %c0_4 = arith.constant 0 : index
    %2 = vector.load %arg3[%c0_2, %c0_3, %c0_4] : memref<1x128x128xbf16, #tpu.memory_space<vmem>>, vector<1x128x128xbf16>
    %3 = vector.shape_cast %2 : vector<1x128x128xbf16> to vector<128x128xbf16>
    %cst = arith.constant dense<0.000000e+00> : vector<16x128xf32>
    %4 = tpu.matmul %1, %3, %cst {dimension_numbers = #tpu.dot_dimension_numbers<[1], [0], [0], [1], [0, 0, 1, 1], [], []>} : vector<16x128xbf16>, vector<128x128xbf16>, vector<16x128xf32> -> vector<16x128xf32>
    %c0_5 = arith.constant 0 : index
    %c0_6 = arith.constant 0 : index
    %5 = vector.load %arg4[%c0_5, %c0_6] : memref<1x128xf32, #tpu.memory_space<vmem>>, vector<1x128xf32>
    %6 = vector.broadcast %5 : vector<1x128xf32> to vector<16x128xf32>
    %7 = arith.addf %4, %6 : vector<16x128xf32>
    %cst_7 = arith.constant -6.000000e+01 : f32
    %8 = vector.broadcast %cst_7 : f32 to vector<16x128xf32>
    %9 = arith.maximumf %7, %8 : vector<16x128xf32>
    %cst_8 = arith.constant 0.000000e+00 : f32
    %10 = vector.broadcast %cst_8 : f32 to vector<16x128xf32>
    %11 = arith.subf %10, %9 : vector<16x128xf32>
    %12 = math.exp %11 : vector<16x128xf32>
    %cst_9 = arith.constant 1.000000e+00 : f32
    %13 = vector.broadcast %cst_9 : f32 to vector<16x128xf32>
    %14 = arith.addf %13, %12 : vector<16x128xf32>
    %15 = tpu.reciprocal %14 {approx = true} : vector<16x128xf32> -> vector<16x128xf32>
    %16 = arith.mulf %7, %15 : vector<16x128xf32>
    %17 = arith.truncf %16 : vector<16x128xf32> to vector<16x128xbf16>
    %c0_10 = arith.constant 0 : index
    %c0_11 = arith.constant 0 : index
    %c0_12 = arith.constant 0 : index
    %18 = vector.load %arg5[%c0_10, %c0_11, %c0_12] : memref<1x16x128xbf16, #tpu.memory_space<vmem>>, vector<1x16x128xbf16>
    %19 = vector.shape_cast %18 : vector<1x16x128xbf16> to vector<16x128xbf16>
    %20 = vector.shape_cast %17 : vector<16x128xbf16> to vector<1x16x128xbf16>
    tpu.vector_store %arg5[%c0_10, %c0_11, %c0_12], %20 {strides = array<i32>} : memref<1x16x128xbf16, #tpu.memory_space<vmem>>, vector<1x16x128xbf16>,
    return
  }
  func.func @transform_0(%arg0: i32, %arg1: i32) -> (i32, i32, i32) {
    %c0_i32 = arith.constant 0 : i32
    %c0_i32_0 = arith.constant 0 : i32
    %c0_i32_1 = arith.constant 0 : i32
    return %arg0, %c0_i32, %c0_i32_0 : i32, i32, i32
  }
  func.func @transform_1(%arg0: i32, %arg1: i32) -> (i32, i32, i32) {
    %c0_i32 = arith.constant 0 : i32
    %c0_i32_0 = arith.constant 0 : i32
    %c0_i32_1 = arith.constant 0 : i32
    return %c0_i32, %c0_i32_0, %arg1 : i32, i32, i32
  }
  func.func @transform_2(%arg0: i32, %arg1: i32) -> (i32, i32) {
    %c0_i32 = arith.constant 0 : i32
    %c0_i32_0 = arith.constant 0 : i32
    return %c0_i32, %arg1 : i32, i32
  }
  func.func @transform_3(%arg0: i32, %arg1: i32) -> (i32, i32, i32) {
    %c0_i32 = arith.constant 0 : i32
    %c0_i32_0 = arith.constant 0 : i32
    return %arg0, %c0_i32, %arg1 : i32, i32, i32
  }
}

module attributes {stable_mosaic.version = 11 : i64} {
  func.func @kernel(%arg0: i32, %arg1: i32, %arg2: memref<1x40x128xbf16, #tpu.memory_space<vmem>>, %arg3: memref<9x128x128xbf16, #tpu.memory_space<vmem>>, %arg4: memref<1x128xf32, #tpu.memory_space<vmem>>, %arg5: memref<1x24x128xbf16, #tpu.memory_space<vmem>>) attributes {dimension_semantics = [#tpu.dimension_semantics<parallel>, #tpu.dimension_semantics<parallel>], iteration_bounds = array<i64: 2, 1>, scalar_prefetch = 0 : i64, scratch_operands = 0 : i64, tpu.core_type = #tpu.core_type<tc>, window_params = [{transform_indices = @transform_0, window_bounds = array<i64: 1, 40, 128>}, {transform_indices = @transform_1, window_bounds = array<i64: 9, 128, 128>}, {transform_indices = @transform_2, window_bounds = array<i64: 1, 128>}, {transform_indices = @transform_3, window_bounds = array<i64: 1, 24, 128>}]} {
    %c0 = arith.constant 0 : index
    %c0_0 = arith.constant 0 : index
    %c0_1 = arith.constant 0 : index
    %0 = vector.load %arg2[%c0, %c0_0, %c0_1] : memref<1x40x128xbf16, #tpu.memory_space<vmem>>, vector<1x24x128xbf16>
    %1 = vector.shape_cast %0 : vector<1x24x128xbf16> to vector<24x128xbf16>
    %c0_2 = arith.constant 0 : index
    %c0_3 = arith.constant 0 : index
    %c0_4 = arith.constant 0 : index
    %2 = vector.load %arg3[%c0_2, %c0_3, %c0_4] : memref<9x128x128xbf16, #tpu.memory_space<vmem>>, vector<1x128x128xbf16>
    %3 = vector.shape_cast %2 : vector<1x128x128xbf16> to vector<128x128xbf16>
    %cst = arith.constant dense<0.000000e+00> : vector<24x128xf32>
    %4 = tpu.matmul %1, %3, %cst {dimension_numbers = #tpu.dot_dimension_numbers<[1], [0], [0], [1], [0, 0, 1, 1], [], []>} : vector<24x128xbf16>, vector<128x128xbf16>, vector<24x128xf32> -> vector<24x128xf32>
    %c0_5 = arith.constant 0 : index
    %c1 = arith.constant 1 : index
    %c0_6 = arith.constant 0 : index
    %5 = vector.load %arg2[%c0_5, %c1, %c0_6] : memref<1x40x128xbf16, #tpu.memory_space<vmem>>, vector<1x24x128xbf16>
    %6 = vector.shape_cast %5 : vector<1x24x128xbf16> to vector<24x128xbf16>
    %c1_7 = arith.constant 1 : index
    %c0_8 = arith.constant 0 : index
    %c0_9 = arith.constant 0 : index
    %7 = vector.load %arg3[%c1_7, %c0_8, %c0_9] : memref<9x128x128xbf16, #tpu.memory_space<vmem>>, vector<1x128x128xbf16>
    %8 = vector.shape_cast %7 : vector<1x128x128xbf16> to vector<128x128xbf16>
    %cst_10 = arith.constant dense<0.000000e+00> : vector<24x128xf32>
    %9 = tpu.matmul %6, %8, %cst_10 {dimension_numbers = #tpu.dot_dimension_numbers<[1], [0], [0], [1], [0, 0, 1, 1], [], []>} : vector<24x128xbf16>, vector<128x128xbf16>, vector<24x128xf32> -> vector<24x128xf32>
    %10 = arith.addf %4, %9 : vector<24x128xf32>
    %c0_11 = arith.constant 0 : index
    %c2 = arith.constant 2 : index
    %c0_12 = arith.constant 0 : index
    %11 = vector.load %arg2[%c0_11, %c2, %c0_12] : memref<1x40x128xbf16, #tpu.memory_space<vmem>>, vector<1x24x128xbf16>
    %12 = vector.shape_cast %11 : vector<1x24x128xbf16> to vector<24x128xbf16>
    %c2_13 = arith.constant 2 : index
    %c0_14 = arith.constant 0 : index
    %c0_15 = arith.constant 0 : index
    %13 = vector.load %arg3[%c2_13, %c0_14, %c0_15] : memref<9x128x128xbf16, #tpu.memory_space<vmem>>, vector<1x128x128xbf16>
    %14 = vector.shape_cast %13 : vector<1x128x128xbf16> to vector<128x128xbf16>
    %cst_16 = arith.constant dense<0.000000e+00> : vector<24x128xf32>
    %15 = tpu.matmul %12, %14, %cst_16 {dimension_numbers = #tpu.dot_dimension_numbers<[1], [0], [0], [1], [0, 0, 1, 1], [], []>} : vector<24x128xbf16>, vector<128x128xbf16>, vector<24x128xf32> -> vector<24x128xf32>
    %16 = arith.addf %10, %15 : vector<24x128xf32>
    %c0_17 = arith.constant 0 : index
    %c6 = arith.constant 6 : index
    %c0_18 = arith.constant 0 : index
    %17 = vector.load %arg2[%c0_17, %c6, %c0_18] : memref<1x40x128xbf16, #tpu.memory_space<vmem>>, vector<1x24x128xbf16>
    %18 = vector.shape_cast %17 : vector<1x24x128xbf16> to vector<24x128xbf16>
    %c3 = arith.constant 3 : index
    %c0_19 = arith.constant 0 : index
    %c0_20 = arith.constant 0 : index
    %19 = vector.load %arg3[%c3, %c0_19, %c0_20] : memref<9x128x128xbf16, #tpu.memory_space<vmem>>, vector<1x128x128xbf16>
    %20 = vector.shape_cast %19 : vector<1x128x128xbf16> to vector<128x128xbf16>
    %cst_21 = arith.constant dense<0.000000e+00> : vector<24x128xf32>
    %21 = tpu.matmul %18, %20, %cst_21 {dimension_numbers = #tpu.dot_dimension_numbers<[1], [0], [0], [1], [0, 0, 1, 1], [], []>} : vector<24x128xbf16>, vector<128x128xbf16>, vector<24x128xf32> -> vector<24x128xf32>
    %22 = arith.addf %16, %21 : vector<24x128xf32>
    %c0_22 = arith.constant 0 : index
    %c7 = arith.constant 7 : index
    %c0_23 = arith.constant 0 : index
    %23 = vector.load %arg2[%c0_22, %c7, %c0_23] : memref<1x40x128xbf16, #tpu.memory_space<vmem>>, vector<1x24x128xbf16>
    %24 = vector.shape_cast %23 : vector<1x24x128xbf16> to vector<24x128xbf16>
    %c4 = arith.constant 4 : index
    %c0_24 = arith.constant 0 : index
    %c0_25 = arith.constant 0 : index
    %25 = vector.load %arg3[%c4, %c0_24, %c0_25] : memref<9x128x128xbf16, #tpu.memory_space<vmem>>, vector<1x128x128xbf16>
    %26 = vector.shape_cast %25 : vector<1x128x128xbf16> to vector<128x128xbf16>
    %cst_26 = arith.constant dense<0.000000e+00> : vector<24x128xf32>
    %27 = tpu.matmul %24, %26, %cst_26 {dimension_numbers = #tpu.dot_dimension_numbers<[1], [0], [0], [1], [0, 0, 1, 1], [], []>} : vector<24x128xbf16>, vector<128x128xbf16>, vector<24x128xf32> -> vector<24x128xf32>
    %28 = arith.addf %22, %27 : vector<24x128xf32>
    %c0_27 = arith.constant 0 : index
    %c8 = arith.constant 8 : index
    %c0_28 = arith.constant 0 : index
    %29 = vector.load %arg2[%c0_27, %c8, %c0_28] : memref<1x40x128xbf16, #tpu.memory_space<vmem>>, vector<1x24x128xbf16>
    %30 = vector.shape_cast %29 : vector<1x24x128xbf16> to vector<24x128xbf16>
    %c5 = arith.constant 5 : index
    %c0_29 = arith.constant 0 : index
    %c0_30 = arith.constant 0 : index
    %31 = vector.load %arg3[%c5, %c0_29, %c0_30] : memref<9x128x128xbf16, #tpu.memory_space<vmem>>, vector<1x128x128xbf16>
    %32 = vector.shape_cast %31 : vector<1x128x128xbf16> to vector<128x128xbf16>
    %cst_31 = arith.constant dense<0.000000e+00> : vector<24x128xf32>
    %33 = tpu.matmul %30, %32, %cst_31 {dimension_numbers = #tpu.dot_dimension_numbers<[1], [0], [0], [1], [0, 0, 1, 1], [], []>} : vector<24x128xbf16>, vector<128x128xbf16>, vector<24x128xf32> -> vector<24x128xf32>
    %34 = arith.addf %28, %33 : vector<24x128xf32>
    %c0_32 = arith.constant 0 : index
    %c12 = arith.constant 12 : index
    %c0_33 = arith.constant 0 : index
    %35 = vector.load %arg2[%c0_32, %c12, %c0_33] : memref<1x40x128xbf16, #tpu.memory_space<vmem>>, vector<1x24x128xbf16>
    %36 = vector.shape_cast %35 : vector<1x24x128xbf16> to vector<24x128xbf16>
    %c6_34 = arith.constant 6 : index
    %c0_35 = arith.constant 0 : index
    %c0_36 = arith.constant 0 : index
    %37 = vector.load %arg3[%c6_34, %c0_35, %c0_36] : memref<9x128x128xbf16, #tpu.memory_space<vmem>>, vector<1x128x128xbf16>
    %38 = vector.shape_cast %37 : vector<1x128x128xbf16> to vector<128x128xbf16>
    %cst_37 = arith.constant dense<0.000000e+00> : vector<24x128xf32>
    %39 = tpu.matmul %36, %38, %cst_37 {dimension_numbers = #tpu.dot_dimension_numbers<[1], [0], [0], [1], [0, 0, 1, 1], [], []>} : vector<24x128xbf16>, vector<128x128xbf16>, vector<24x128xf32> -> vector<24x128xf32>
    %40 = arith.addf %34, %39 : vector<24x128xf32>
    %c0_38 = arith.constant 0 : index
    %c13 = arith.constant 13 : index
    %c0_39 = arith.constant 0 : index
    %41 = vector.load %arg2[%c0_38, %c13, %c0_39] : memref<1x40x128xbf16, #tpu.memory_space<vmem>>, vector<1x24x128xbf16>
    %42 = vector.shape_cast %41 : vector<1x24x128xbf16> to vector<24x128xbf16>
    %c7_40 = arith.constant 7 : index
    %c0_41 = arith.constant 0 : index
    %c0_42 = arith.constant 0 : index
    %43 = vector.load %arg3[%c7_40, %c0_41, %c0_42] : memref<9x128x128xbf16, #tpu.memory_space<vmem>>, vector<1x128x128xbf16>
    %44 = vector.shape_cast %43 : vector<1x128x128xbf16> to vector<128x128xbf16>
    %cst_43 = arith.constant dense<0.000000e+00> : vector<24x128xf32>
    %45 = tpu.matmul %42, %44, %cst_43 {dimension_numbers = #tpu.dot_dimension_numbers<[1], [0], [0], [1], [0, 0, 1, 1], [], []>} : vector<24x128xbf16>, vector<128x128xbf16>, vector<24x128xf32> -> vector<24x128xf32>
    %46 = arith.addf %40, %45 : vector<24x128xf32>
    %c0_44 = arith.constant 0 : index
    %c14 = arith.constant 14 : index
    %c0_45 = arith.constant 0 : index
    %47 = vector.load %arg2[%c0_44, %c14, %c0_45] : memref<1x40x128xbf16, #tpu.memory_space<vmem>>, vector<1x24x128xbf16>
    %48 = vector.shape_cast %47 : vector<1x24x128xbf16> to vector<24x128xbf16>
    %c8_46 = arith.constant 8 : index
    %c0_47 = arith.constant 0 : index
    %c0_48 = arith.constant 0 : index
    %49 = vector.load %arg3[%c8_46, %c0_47, %c0_48] : memref<9x128x128xbf16, #tpu.memory_space<vmem>>, vector<1x128x128xbf16>
    %50 = vector.shape_cast %49 : vector<1x128x128xbf16> to vector<128x128xbf16>
    %cst_49 = arith.constant dense<0.000000e+00> : vector<24x128xf32>
    %51 = tpu.matmul %48, %50, %cst_49 {dimension_numbers = #tpu.dot_dimension_numbers<[1], [0], [0], [1], [0, 0, 1, 1], [], []>} : vector<24x128xbf16>, vector<128x128xbf16>, vector<24x128xf32> -> vector<24x128xf32>
    %52 = arith.addf %46, %51 : vector<24x128xf32>
    %c0_50 = arith.constant 0 : index
    %c0_51 = arith.constant 0 : index
    %53 = vector.load %arg4[%c0_50, %c0_51] : memref<1x128xf32, #tpu.memory_space<vmem>>, vector<1x128xf32>
    %54 = vector.broadcast %53 : vector<1x128xf32> to vector<24x128xf32>
    %55 = arith.addf %52, %54 : vector<24x128xf32>
    %cst_52 = arith.constant -6.000000e+01 : f32
    %56 = vector.broadcast %cst_52 : f32 to vector<24x128xf32>
    %57 = arith.maximumf %55, %56 : vector<24x128xf32>
    %cst_53 = arith.constant 0.000000e+00 : f32
    %58 = vector.broadcast %cst_53 : f32 to vector<24x128xf32>
    %59 = arith.subf %58, %57 : vector<24x128xf32>
    %60 = math.exp %59 : vector<24x128xf32>
    %cst_54 = arith.constant 1.000000e+00 : f32
    %61 = vector.broadcast %cst_54 : f32 to vector<24x128xf32>
    %62 = arith.addf %61, %60 : vector<24x128xf32>
    %63 = tpu.reciprocal %62 {approx = true} : vector<24x128xf32> -> vector<24x128xf32>
    %64 = arith.mulf %55, %63 : vector<24x128xf32>
    %65 = arith.truncf %64 : vector<24x128xf32> to vector<24x128xbf16>
    %c0_55 = arith.constant 0 : index
    %c0_56 = arith.constant 0 : index
    %c0_57 = arith.constant 0 : index
    %66 = vector.load %arg5[%c0_55, %c0_56, %c0_57] : memref<1x24x128xbf16, #tpu.memory_space<vmem>>, vector<1x24x128xbf16>
    %67 = vector.shape_cast %66 : vector<1x24x128xbf16> to vector<24x128xbf16>
    %68 = vector.shape_cast %65 : vector<24x128xbf16> to vector<1x24x128xbf16>
    tpu.vector_store %arg5[%c0_55, %c0_56, %c0_57], %68 {strides = array<i32>} : memref<1x24x128xbf16, #tpu.memory_space<vmem>>, vector<1x24x128xbf16>,
    return
  }
  func.func @transform_0(%arg0: i32, %arg1: i32) -> (i32, i32, i32) {
    %c0_i32 = arith.constant 0 : i32
    %c0_i32_0 = arith.constant 0 : i32
    %c0_i32_1 = arith.constant 0 : i32
    return %arg0, %c0_i32, %c0_i32_0 : i32, i32, i32
  }
  func.func @transform_1(%arg0: i32, %arg1: i32) -> (i32, i32, i32) {
    %c0_i32 = arith.constant 0 : i32
    %c0_i32_0 = arith.constant 0 : i32
    %c0_i32_1 = arith.constant 0 : i32
    return %c0_i32, %c0_i32_0, %arg1 : i32, i32, i32
  }
  func.func @transform_2(%arg0: i32, %arg1: i32) -> (i32, i32) {
    %c0_i32 = arith.constant 0 : i32
    %c0_i32_0 = arith.constant 0 : i32
    return %c0_i32, %arg1 : i32, i32
  }
  func.func @transform_3(%arg0: i32, %arg1: i32) -> (i32, i32, i32) {
    %c0_i32 = arith.constant 0 : i32
    %c0_i32_0 = arith.constant 0 : i32
    return %arg0, %c0_i32, %arg1 : i32, i32, i32
  }
}

module attributes {stable_mosaic.version = 11 : i64} {
  func.func @kernel(%arg0: i32, %arg1: i32, %arg2: memref<1x16x128xbf16, #tpu.memory_space<vmem>>, %arg3: memref<1x16x128xbf16, #tpu.memory_space<vmem>>, %arg4: memref<1x16x128xbf16, #tpu.memory_space<vmem>>, %arg5: memref<1x16x128xbf16, #tpu.memory_space<vmem>>, %arg6: memref<4x128x128xbf16, #tpu.memory_space<vmem>>, %arg7: memref<1x128xf32, #tpu.memory_space<vmem>>, %arg8: memref<1x16x128xbf16, #tpu.memory_space<vmem>>) attributes {dimension_semantics = [#tpu.dimension_semantics<parallel>, #tpu.dimension_semantics<parallel>], iteration_bounds = array<i64: 2, 1>, scalar_prefetch = 0 : i64, scratch_operands = 0 : i64, tpu.core_type = #tpu.core_type<tc>, window_params = [{transform_indices = @transform_0, window_bounds = array<i64: 1, 16, 128>}, {transform_indices = @transform_1, window_bounds = array<i64: 1, 16, 128>}, {transform_indices = @transform_2, window_bounds = array<i64: 1, 16, 128>}, {transform_indices = @transform_3, window_bounds = array<i64: 1, 16, 128>}, {transform_indices = @transform_4, window_bounds = array<i64: 4, 128, 128>}, {transform_indices = @transform_5, window_bounds = array<i64: 1, 128>}, {transform_indices = @transform_6, window_bounds = array<i64: 1, 16, 128>}]} {
    %c0 = arith.constant 0 : index
    %c0_0 = arith.constant 0 : index
    %c0_1 = arith.constant 0 : index
    %0 = vector.load %arg2[%c0, %c0_0, %c0_1] : memref<1x16x128xbf16, #tpu.memory_space<vmem>>, vector<1x16x128xbf16>
    %1 = vector.shape_cast %0 : vector<1x16x128xbf16> to vector<16x128xbf16>
    %c0_2 = arith.constant 0 : index
    %c0_3 = arith.constant 0 : index
    %c0_4 = arith.constant 0 : index
    %2 = vector.load %arg6[%c0_2, %c0_3, %c0_4] : memref<4x128x128xbf16, #tpu.memory_space<vmem>>, vector<1x128x128xbf16>
    %3 = vector.shape_cast %2 : vector<1x128x128xbf16> to vector<128x128xbf16>
    %cst = arith.constant dense<0.000000e+00> : vector<16x128xf32>
    %4 = tpu.matmul %1, %3, %cst {dimension_numbers = #tpu.dot_dimension_numbers<[1], [0], [0], [1], [0, 0, 1, 1], [], []>} : vector<16x128xbf16>, vector<128x128xbf16>, vector<16x128xf32> -> vector<16x128xf32>
    %c0_5 = arith.constant 0 : index
    %c0_6 = arith.constant 0 : index
    %c0_7 = arith.constant 0 : index
    %5 = vector.load %arg3[%c0_5, %c0_6, %c0_7] : memref<1x16x128xbf16, #tpu.memory_space<vmem>>, vector<1x16x128xbf16>
    %6 = vector.shape_cast %5 : vector<1x16x128xbf16> to vector<16x128xbf16>
    %c1 = arith.constant 1 : index
    %c0_8 = arith.constant 0 : index
    %c0_9 = arith.constant 0 : index
    %7 = vector.load %arg6[%c1, %c0_8, %c0_9] : memref<4x128x128xbf16, #tpu.memory_space<vmem>>, vector<1x128x128xbf16>
    %8 = vector.shape_cast %7 : vector<1x128x128xbf16> to vector<128x128xbf16>
    %cst_10 = arith.constant dense<0.000000e+00> : vector<16x128xf32>
    %9 = tpu.matmul %6, %8, %cst_10 {dimension_numbers = #tpu.dot_dimension_numbers<[1], [0], [0], [1], [0, 0, 1, 1], [], []>} : vector<16x128xbf16>, vector<128x128xbf16>, vector<16x128xf32> -> vector<16x128xf32>
    %10 = arith.addf %4, %9 : vector<16x128xf32>
    %c0_11 = arith.constant 0 : index
    %c0_12 = arith.constant 0 : index
    %c0_13 = arith.constant 0 : index
    %11 = vector.load %arg4[%c0_11, %c0_12, %c0_13] : memref<1x16x128xbf16, #tpu.memory_space<vmem>>, vector<1x16x128xbf16>
    %12 = vector.shape_cast %11 : vector<1x16x128xbf16> to vector<16x128xbf16>
    %c2 = arith.constant 2 : index
    %c0_14 = arith.constant 0 : index
    %c0_15 = arith.constant 0 : index
    %13 = vector.load %arg6[%c2, %c0_14, %c0_15] : memref<4x128x128xbf16, #tpu.memory_space<vmem>>, vector<1x128x128xbf16>
    %14 = vector.shape_cast %13 : vector<1x128x128xbf16> to vector<128x128xbf16>
    %cst_16 = arith.constant dense<0.000000e+00> : vector<16x128xf32>
    %15 = tpu.matmul %12, %14, %cst_16 {dimension_numbers = #tpu.dot_dimension_numbers<[1], [0], [0], [1], [0, 0, 1, 1], [], []>} : vector<16x128xbf16>, vector<128x128xbf16>, vector<16x128xf32> -> vector<16x128xf32>
    %16 = arith.addf %10, %15 : vector<16x128xf32>
    %c0_17 = arith.constant 0 : index
    %c0_18 = arith.constant 0 : index
    %c0_19 = arith.constant 0 : index
    %17 = vector.load %arg5[%c0_17, %c0_18, %c0_19] : memref<1x16x128xbf16, #tpu.memory_space<vmem>>, vector<1x16x128xbf16>
    %18 = vector.shape_cast %17 : vector<1x16x128xbf16> to vector<16x128xbf16>
    %c3 = arith.constant 3 : index
    %c0_20 = arith.constant 0 : index
    %c0_21 = arith.constant 0 : index
    %19 = vector.load %arg6[%c3, %c0_20, %c0_21] : memref<4x128x128xbf16, #tpu.memory_space<vmem>>, vector<1x128x128xbf16>
    %20 = vector.shape_cast %19 : vector<1x128x128xbf16> to vector<128x128xbf16>
    %cst_22 = arith.constant dense<0.000000e+00> : vector<16x128xf32>
    %21 = tpu.matmul %18, %20, %cst_22 {dimension_numbers = #tpu.dot_dimension_numbers<[1], [0], [0], [1], [0, 0, 1, 1], [], []>} : vector<16x128xbf16>, vector<128x128xbf16>, vector<16x128xf32> -> vector<16x128xf32>
    %22 = arith.addf %16, %21 : vector<16x128xf32>
    %c0_23 = arith.constant 0 : index
    %c0_24 = arith.constant 0 : index
    %23 = vector.load %arg7[%c0_23, %c0_24] : memref<1x128xf32, #tpu.memory_space<vmem>>, vector<1x128xf32>
    %24 = vector.broadcast %23 : vector<1x128xf32> to vector<16x128xf32>
    %25 = arith.addf %22, %24 : vector<16x128xf32>
    %cst_25 = arith.constant -6.000000e+01 : f32
    %26 = vector.broadcast %cst_25 : f32 to vector<16x128xf32>
    %27 = arith.maximumf %25, %26 : vector<16x128xf32>
    %cst_26 = arith.constant 0.000000e+00 : f32
    %28 = vector.broadcast %cst_26 : f32 to vector<16x128xf32>
    %29 = arith.subf %28, %27 : vector<16x128xf32>
    %30 = math.exp %29 : vector<16x128xf32>
    %cst_27 = arith.constant 1.000000e+00 : f32
    %31 = vector.broadcast %cst_27 : f32 to vector<16x128xf32>
    %32 = arith.addf %31, %30 : vector<16x128xf32>
    %33 = tpu.reciprocal %32 {approx = true} : vector<16x128xf32> -> vector<16x128xf32>
    %34 = arith.mulf %25, %33 : vector<16x128xf32>
    %35 = arith.truncf %34 : vector<16x128xf32> to vector<16x128xbf16>
    %c0_28 = arith.constant 0 : index
    %c0_29 = arith.constant 0 : index
    %c0_30 = arith.constant 0 : index
    %36 = vector.load %arg8[%c0_28, %c0_29, %c0_30] : memref<1x16x128xbf16, #tpu.memory_space<vmem>>, vector<1x16x128xbf16>
    %37 = vector.shape_cast %36 : vector<1x16x128xbf16> to vector<16x128xbf16>
    %38 = vector.shape_cast %35 : vector<16x128xbf16> to vector<1x16x128xbf16>
    tpu.vector_store %arg8[%c0_28, %c0_29, %c0_30], %38 {strides = array<i32>} : memref<1x16x128xbf16, #tpu.memory_space<vmem>>, vector<1x16x128xbf16>,
    return
  }
  func.func @transform_0(%arg0: i32, %arg1: i32) -> (i32, i32, i32) {
    %c0_i32 = arith.constant 0 : i32
    %c0_i32_0 = arith.constant 0 : i32
    %c0_i32_1 = arith.constant 0 : i32
    return %arg0, %c0_i32, %c0_i32_0 : i32, i32, i32
  }
  func.func @transform_1(%arg0: i32, %arg1: i32) -> (i32, i32, i32) {
    %c0_i32 = arith.constant 0 : i32
    %c0_i32_0 = arith.constant 0 : i32
    %c0_i32_1 = arith.constant 0 : i32
    return %arg0, %c0_i32, %c0_i32_0 : i32, i32, i32
  }
  func.func @transform_2(%arg0: i32, %arg1: i32) -> (i32, i32, i32) {
    %c0_i32 = arith.constant 0 : i32
    %c0_i32_0 = arith.constant 0 : i32
    %c0_i32_1 = arith.constant 0 : i32
    return %arg0, %c0_i32, %c0_i32_0 : i32, i32, i32
  }
  func.func @transform_3(%arg0: i32, %arg1: i32) -> (i32, i32, i32) {
    %c0_i32 = arith.constant 0 : i32
    %c0_i32_0 = arith.constant 0 : i32
    %c0_i32_1 = arith.constant 0 : i32
    return %arg0, %c0_i32, %c0_i32_0 : i32, i32, i32
  }
  func.func @transform_4(%arg0: i32, %arg1: i32) -> (i32, i32, i32) {
    %c0_i32 = arith.constant 0 : i32
    %c0_i32_0 = arith.constant 0 : i32
    %c0_i32_1 = arith.constant 0 : i32
    return %c0_i32, %c0_i32_0, %arg1 : i32, i32, i32
  }
  func.func @transform_5(%arg0: i32, %arg1: i32) -> (i32, i32) {
    %c0_i32 = arith.constant 0 : i32
    %c0_i32_0 = arith.constant 0 : i32
    return %c0_i32, %arg1 : i32, i32
  }
  func.func @transform_6(%arg0: i32, %arg1: i32) -> (i32, i32, i32) {
    %c0_i32 = arith.constant 0 : i32
    %c0_i32_0 = arith.constant 0 : i32
    return %arg0, %c0_i32, %arg1 : i32, i32, i32
  }
}

module attributes {stable_mosaic.version = 11 : i64} {
  func.func @kernel(%arg0: i32, %arg1: i32, %arg2: memref<1x16x512xbf16, #tpu.memory_space<vmem>>, %arg3: memref<4x512x128xbf16, #tpu.memory_space<vmem>>, %arg4: memref<1x128xf32, #tpu.memory_space<vmem>>, %arg5: memref<1x8x128xbf16, #tpu.memory_space<vmem>>) attributes {dimension_semantics = [#tpu.dimension_semantics<parallel>, #tpu.dimension_semantics<parallel>], iteration_bounds = array<i64: 2, 1>, scalar_prefetch = 0 : i64, scratch_operands = 0 : i64, tpu.core_type = #tpu.core_type<tc>, window_params = [{transform_indices = @transform_0, window_bounds = array<i64: 1, 16, 512>}, {transform_indices = @transform_1, window_bounds = array<i64: 4, 512, 128>}, {transform_indices = @transform_2, window_bounds = array<i64: 1, 128>}, {transform_indices = @transform_3, window_bounds = array<i64: 1, 8, 128>}]} {
    %c0 = arith.constant 0 : index
    %c0_0 = arith.constant 0 : index
    %c0_1 = arith.constant 0 : index
    %0 = vector.load %arg2[%c0, %c0_0, %c0_1] : memref<1x16x512xbf16, #tpu.memory_space<vmem>>, vector<1x8x512xbf16>
    %1 = vector.shape_cast %0 : vector<1x8x512xbf16> to vector<8x512xbf16>
    %c0_2 = arith.constant 0 : index
    %c0_3 = arith.constant 0 : index
    %c0_4 = arith.constant 0 : index
    %2 = vector.load %arg3[%c0_2, %c0_3, %c0_4] : memref<4x512x128xbf16, #tpu.memory_space<vmem>>, vector<1x512x128xbf16>
    %3 = vector.shape_cast %2 : vector<1x512x128xbf16> to vector<512x128xbf16>
    %cst = arith.constant dense<0.000000e+00> : vector<8x128xf32>
    %4 = tpu.matmul %1, %3, %cst {dimension_numbers = #tpu.dot_dimension_numbers<[1], [0], [0], [1], [0, 0, 1, 1], [], []>} : vector<8x512xbf16>, vector<512x128xbf16>, vector<8x128xf32> -> vector<8x128xf32>
    %c0_5 = arith.constant 0 : index
    %c1 = arith.constant 1 : index
    %c0_6 = arith.constant 0 : index
    %5 = vector.load %arg2[%c0_5, %c1, %c0_6] : memref<1x16x512xbf16, #tpu.memory_space<vmem>>, vector<1x8x512xbf16>
    %6 = vector.shape_cast %5 : vector<1x8x512xbf16> to vector<8x512xbf16>
    %c1_7 = arith.constant 1 : index
    %c0_8 = arith.constant 0 : index
    %c0_9 = arith.constant 0 : index
    %7 = vector.load %arg3[%c1_7, %c0_8, %c0_9] : memref<4x512x128xbf16, #tpu.memory_space<vmem>>, vector<1x512x128xbf16>
    %8 = vector.shape_cast %7 : vector<1x512x128xbf16> to vector<512x128xbf16>
    %cst_10 = arith.constant dense<0.000000e+00> : vector<8x128xf32>
    %9 = tpu.matmul %6, %8, %cst_10 {dimension_numbers = #tpu.dot_dimension_numbers<[1], [0], [0], [1], [0, 0, 1, 1], [], []>} : vector<8x512xbf16>, vector<512x128xbf16>, vector<8x128xf32> -> vector<8x128xf32>
    %10 = arith.addf %4, %9 : vector<8x128xf32>
    %c0_11 = arith.constant 0 : index
    %c3 = arith.constant 3 : index
    %c0_12 = arith.constant 0 : index
    %11 = vector.load %arg2[%c0_11, %c3, %c0_12] : memref<1x16x512xbf16, #tpu.memory_space<vmem>>, vector<1x8x512xbf16>
    %12 = vector.shape_cast %11 : vector<1x8x512xbf16> to vector<8x512xbf16>
    %c2 = arith.constant 2 : index
    %c0_13 = arith.constant 0 : index
    %c0_14 = arith.constant 0 : index
    %13 = vector.load %arg3[%c2, %c0_13, %c0_14] : memref<4x512x128xbf16, #tpu.memory_space<vmem>>, vector<1x512x128xbf16>
    %14 = vector.shape_cast %13 : vector<1x512x128xbf16> to vector<512x128xbf16>
    %cst_15 = arith.constant dense<0.000000e+00> : vector<8x128xf32>
    %15 = tpu.matmul %12, %14, %cst_15 {dimension_numbers = #tpu.dot_dimension_numbers<[1], [0], [0], [1], [0, 0, 1, 1], [], []>} : vector<8x512xbf16>, vector<512x128xbf16>, vector<8x128xf32> -> vector<8x128xf32>
    %16 = arith.addf %10, %15 : vector<8x128xf32>
    %c0_16 = arith.constant 0 : index
    %c4 = arith.constant 4 : index
    %c0_17 = arith.constant 0 : index
    %17 = vector.load %arg2[%c0_16, %c4, %c0_17] : memref<1x16x512xbf16, #tpu.memory_space<vmem>>, vector<1x8x512xbf16>
    %18 = vector.shape_cast %17 : vector<1x8x512xbf16> to vector<8x512xbf16>
    %c3_18 = arith.constant 3 : index
    %c0_19 = arith.constant 0 : index
    %c0_20 = arith.constant 0 : index
    %19 = vector.load %arg3[%c3_18, %c0_19, %c0_20] : memref<4x512x128xbf16, #tpu.memory_space<vmem>>, vector<1x512x128xbf16>
    %20 = vector.shape_cast %19 : vector<1x512x128xbf16> to vector<512x128xbf16>
    %cst_21 = arith.constant dense<0.000000e+00> : vector<8x128xf32>
    %21 = tpu.matmul %18, %20, %cst_21 {dimension_numbers = #tpu.dot_dimension_numbers<[1], [0], [0], [1], [0, 0, 1, 1], [], []>} : vector<8x512xbf16>, vector<512x128xbf16>, vector<8x128xf32> -> vector<8x128xf32>
    %22 = arith.addf %16, %21 : vector<8x128xf32>
    %c0_22 = arith.constant 0 : index
    %c0_23 = arith.constant 0 : index
    %23 = vector.load %arg4[%c0_22, %c0_23] : memref<1x128xf32, #tpu.memory_space<vmem>>, vector<1x128xf32>
    %24 = vector.broadcast %23 : vector<1x128xf32> to vector<8x128xf32>
    %25 = arith.addf %22, %24 : vector<8x128xf32>
    %cst_24 = arith.constant -6.000000e+01 : f32
    %26 = vector.broadcast %cst_24 : f32 to vector<8x128xf32>
    %27 = arith.maximumf %25, %26 : vector<8x128xf32>
    %cst_25 = arith.constant 0.000000e+00 : f32
    %28 = vector.broadcast %cst_25 : f32 to vector<8x128xf32>
    %29 = arith.subf %28, %27 : vector<8x128xf32>
    %30 = math.exp %29 : vector<8x128xf32>
    %cst_26 = arith.constant 1.000000e+00 : f32
    %31 = vector.broadcast %cst_26 : f32 to vector<8x128xf32>
    %32 = arith.addf %31, %30 : vector<8x128xf32>
    %33 = tpu.reciprocal %32 {approx = true} : vector<8x128xf32> -> vector<8x128xf32>
    %34 = arith.mulf %25, %33 : vector<8x128xf32>
    %35 = arith.truncf %34 : vector<8x128xf32> to vector<8x128xbf16>
    %c0_27 = arith.constant 0 : index
    %c0_28 = arith.constant 0 : index
    %c0_29 = arith.constant 0 : index
    %36 = vector.load %arg5[%c0_27, %c0_28, %c0_29] : memref<1x8x128xbf16, #tpu.memory_space<vmem>>, vector<1x8x128xbf16>
    %37 = vector.shape_cast %36 : vector<1x8x128xbf16> to vector<8x128xbf16>
    %38 = vector.shape_cast %35 : vector<8x128xbf16> to vector<1x8x128xbf16>
    tpu.vector_store %arg5[%c0_27, %c0_28, %c0_29], %38 {strides = array<i32>} : memref<1x8x128xbf16, #tpu.memory_space<vmem>>, vector<1x8x128xbf16>,
    return
  }
  func.func @transform_0(%arg0: i32, %arg1: i32) -> (i32, i32, i32) {
    %c0_i32 = arith.constant 0 : i32
    %c0_i32_0 = arith.constant 0 : i32
    %c0_i32_1 = arith.constant 0 : i32
    return %arg0, %c0_i32, %c0_i32_0 : i32, i32, i32
  }
  func.func @transform_1(%arg0: i32, %arg1: i32) -> (i32, i32, i32) {
    %c0_i32 = arith.constant 0 : i32
    %c0_i32_0 = arith.constant 0 : i32
    %c0_i32_1 = arith.constant 0 : i32
    return %c0_i32, %c0_i32_0, %arg1 : i32, i32, i32
  }
  func.func @transform_2(%arg0: i32, %arg1: i32) -> (i32, i32) {
    %c0_i32 = arith.constant 0 : i32
    %c0_i32_0 = arith.constant 0 : i32
    return %c0_i32, %arg1 : i32, i32
  }
  func.func @transform_3(%arg0: i32, %arg1: i32) -> (i32, i32, i32) {
    %c0_i32 = arith.constant 0 : i32
    %c0_i32_0 = arith.constant 0 : i32
    return %arg0, %c0_i32, %arg1 : i32, i32, i32
  }
}

module attributes {stable_mosaic.version = 11 : i64} {
  func.func @kernel(%arg0: i32, %arg1: i32, %arg2: memref<1x8x128xbf16, #tpu.memory_space<vmem>>, %arg3: memref<1x128x128xbf16, #tpu.memory_space<vmem>>, %arg4: memref<1x128xf32, #tpu.memory_space<vmem>>, %arg5: memref<1x8x128xbf16, #tpu.memory_space<vmem>>) attributes {dimension_semantics = [#tpu.dimension_semantics<parallel>, #tpu.dimension_semantics<parallel>], iteration_bounds = array<i64: 2, 1>, scalar_prefetch = 0 : i64, scratch_operands = 0 : i64, tpu.core_type = #tpu.core_type<tc>, window_params = [{transform_indices = @transform_0, window_bounds = array<i64: 1, 8, 128>}, {transform_indices = @transform_1, window_bounds = array<i64: 1, 128, 128>}, {transform_indices = @transform_2, window_bounds = array<i64: 1, 128>}, {transform_indices = @transform_3, window_bounds = array<i64: 1, 8, 128>}]} {
    %c0 = arith.constant 0 : index
    %c0_0 = arith.constant 0 : index
    %c0_1 = arith.constant 0 : index
    %0 = vector.load %arg2[%c0, %c0_0, %c0_1] : memref<1x8x128xbf16, #tpu.memory_space<vmem>>, vector<1x8x128xbf16>
    %1 = vector.shape_cast %0 : vector<1x8x128xbf16> to vector<8x128xbf16>
    %c0_2 = arith.constant 0 : index
    %c0_3 = arith.constant 0 : index
    %c0_4 = arith.constant 0 : index
    %2 = vector.load %arg3[%c0_2, %c0_3, %c0_4] : memref<1x128x128xbf16, #tpu.memory_space<vmem>>, vector<1x128x128xbf16>
    %3 = vector.shape_cast %2 : vector<1x128x128xbf16> to vector<128x128xbf16>
    %cst = arith.constant dense<0.000000e+00> : vector<8x128xf32>
    %4 = tpu.matmul %1, %3, %cst {dimension_numbers = #tpu.dot_dimension_numbers<[1], [0], [0], [1], [0, 0, 1, 1], [], []>} : vector<8x128xbf16>, vector<128x128xbf16>, vector<8x128xf32> -> vector<8x128xf32>
    %c0_5 = arith.constant 0 : index
    %c0_6 = arith.constant 0 : index
    %5 = vector.load %arg4[%c0_5, %c0_6] : memref<1x128xf32, #tpu.memory_space<vmem>>, vector<1x128xf32>
    %6 = vector.broadcast %5 : vector<1x128xf32> to vector<8x128xf32>
    %7 = arith.addf %4, %6 : vector<8x128xf32>
    %cst_7 = arith.constant -6.000000e+01 : f32
    %8 = vector.broadcast %cst_7 : f32 to vector<8x128xf32>
    %9 = arith.maximumf %7, %8 : vector<8x128xf32>
    %cst_8 = arith.constant 0.000000e+00 : f32
    %10 = vector.broadcast %cst_8 : f32 to vector<8x128xf32>
    %11 = arith.subf %10, %9 : vector<8x128xf32>
    %12 = math.exp %11 : vector<8x128xf32>
    %cst_9 = arith.constant 1.000000e+00 : f32
    %13 = vector.broadcast %cst_9 : f32 to vector<8x128xf32>
    %14 = arith.addf %13, %12 : vector<8x128xf32>
    %15 = tpu.reciprocal %14 {approx = true} : vector<8x128xf32> -> vector<8x128xf32>
    %16 = arith.mulf %7, %15 : vector<8x128xf32>
    %17 = arith.truncf %16 : vector<8x128xf32> to vector<8x128xbf16>
    %c0_10 = arith.constant 0 : index
    %c0_11 = arith.constant 0 : index
    %c0_12 = arith.constant 0 : index
    %18 = vector.load %arg5[%c0_10, %c0_11, %c0_12] : memref<1x8x128xbf16, #tpu.memory_space<vmem>>, vector<1x8x128xbf16>
    %19 = vector.shape_cast %18 : vector<1x8x128xbf16> to vector<8x128xbf16>
    %20 = vector.shape_cast %17 : vector<8x128xbf16> to vector<1x8x128xbf16>
    tpu.vector_store %arg5[%c0_10, %c0_11, %c0_12], %20 {strides = array<i32>} : memref<1x8x128xbf16, #tpu.memory_space<vmem>>, vector<1x8x128xbf16>,
    return
  }
  func.func @transform_0(%arg0: i32, %arg1: i32) -> (i32, i32, i32) {
    %c0_i32 = arith.constant 0 : i32
    %c0_i32_0 = arith.constant 0 : i32
    %c0_i32_1 = arith.constant 0 : i32
    return %arg0, %c0_i32, %c0_i32_0 : i32, i32, i32
  }
  func.func @transform_1(%arg0: i32, %arg1: i32) -> (i32, i32, i32) {
    %c0_i32 = arith.constant 0 : i32
    %c0_i32_0 = arith.constant 0 : i32
    %c0_i32_1 = arith.constant 0 : i32
    return %c0_i32, %c0_i32_0, %arg1 : i32, i32, i32
  }
  func.func @transform_2(%arg0: i32, %arg1: i32) -> (i32, i32) {
    %c0_i32 = arith.constant 0 : i32
    %c0_i32_0 = arith.constant 0 : i32
    return %c0_i32, %arg1 : i32, i32
  }
  func.func @transform_3(%arg0: i32, %arg1: i32) -> (i32, i32, i32) {
    %c0_i32 = arith.constant 0 : i32
    %c0_i32_0 = arith.constant 0 : i32
    return %arg0, %c0_i32, %arg1 : i32, i32, i32
  }
}

module attributes {stable_mosaic.version = 11 : i64} {
  func.func @kernel(%arg0: i32, %arg1: i32, %arg2: memref<1x8x128xbf16, #tpu.memory_space<vmem>>, %arg3: memref<1x8x128xbf16, #tpu.memory_space<vmem>>, %arg4: memref<1x8x128xbf16, #tpu.memory_space<vmem>>, %arg5: memref<1x8x128xbf16, #tpu.memory_space<vmem>>, %arg6: memref<4x128x128xbf16, #tpu.memory_space<vmem>>, %arg7: memref<1x128xf32, #tpu.memory_space<vmem>>, %arg8: memref<1x8x128xbf16, #tpu.memory_space<vmem>>) attributes {dimension_semantics = [#tpu.dimension_semantics<parallel>, #tpu.dimension_semantics<parallel>], iteration_bounds = array<i64: 2, 1>, scalar_prefetch = 0 : i64, scratch_operands = 0 : i64, tpu.core_type = #tpu.core_type<tc>, window_params = [{transform_indices = @transform_0, window_bounds = array<i64: 1, 8, 128>}, {transform_indices = @transform_1, window_bounds = array<i64: 1, 8, 128>}, {transform_indices = @transform_2, window_bounds = array<i64: 1, 8, 128>}, {transform_indices = @transform_3, window_bounds = array<i64: 1, 8, 128>}, {transform_indices = @transform_4, window_bounds = array<i64: 4, 128, 128>}, {transform_indices = @transform_5, window_bounds = array<i64: 1, 128>}, {transform_indices = @transform_6, window_bounds = array<i64: 1, 8, 128>}]} {
    %c0 = arith.constant 0 : index
    %c0_0 = arith.constant 0 : index
    %c0_1 = arith.constant 0 : index
    %0 = vector.load %arg2[%c0, %c0_0, %c0_1] : memref<1x8x128xbf16, #tpu.memory_space<vmem>>, vector<1x8x128xbf16>
    %1 = vector.shape_cast %0 : vector<1x8x128xbf16> to vector<8x128xbf16>
    %c0_2 = arith.constant 0 : index
    %c0_3 = arith.constant 0 : index
    %c0_4 = arith.constant 0 : index
    %2 = vector.load %arg6[%c0_2, %c0_3, %c0_4] : memref<4x128x128xbf16, #tpu.memory_space<vmem>>, vector<1x128x128xbf16>
    %3 = vector.shape_cast %2 : vector<1x128x128xbf16> to vector<128x128xbf16>
    %cst = arith.constant dense<0.000000e+00> : vector<8x128xf32>
    %4 = tpu.matmul %1, %3, %cst {dimension_numbers = #tpu.dot_dimension_numbers<[1], [0], [0], [1], [0, 0, 1, 1], [], []>} : vector<8x128xbf16>, vector<128x128xbf16>, vector<8x128xf32> -> vector<8x128xf32>
    %c0_5 = arith.constant 0 : index
    %c0_6 = arith.constant 0 : index
    %c0_7 = arith.constant 0 : index
    %5 = vector.load %arg3[%c0_5, %c0_6, %c0_7] : memref<1x8x128xbf16, #tpu.memory_space<vmem>>, vector<1x8x128xbf16>
    %6 = vector.shape_cast %5 : vector<1x8x128xbf16> to vector<8x128xbf16>
    %c1 = arith.constant 1 : index
    %c0_8 = arith.constant 0 : index
    %c0_9 = arith.constant 0 : index
    %7 = vector.load %arg6[%c1, %c0_8, %c0_9] : memref<4x128x128xbf16, #tpu.memory_space<vmem>>, vector<1x128x128xbf16>
    %8 = vector.shape_cast %7 : vector<1x128x128xbf16> to vector<128x128xbf16>
    %cst_10 = arith.constant dense<0.000000e+00> : vector<8x128xf32>
    %9 = tpu.matmul %6, %8, %cst_10 {dimension_numbers = #tpu.dot_dimension_numbers<[1], [0], [0], [1], [0, 0, 1, 1], [], []>} : vector<8x128xbf16>, vector<128x128xbf16>, vector<8x128xf32> -> vector<8x128xf32>
    %10 = arith.addf %4, %9 : vector<8x128xf32>
    %c0_11 = arith.constant 0 : index
    %c0_12 = arith.constant 0 : index
    %c0_13 = arith.constant 0 : index
    %11 = vector.load %arg4[%c0_11, %c0_12, %c0_13] : memref<1x8x128xbf16, #tpu.memory_space<vmem>>, vector<1x8x128xbf16>
    %12 = vector.shape_cast %11 : vector<1x8x128xbf16> to vector<8x128xbf16>
    %c2 = arith.constant 2 : index
    %c0_14 = arith.constant 0 : index
    %c0_15 = arith.constant 0 : index
    %13 = vector.load %arg6[%c2, %c0_14, %c0_15] : memref<4x128x128xbf16, #tpu.memory_space<vmem>>, vector<1x128x128xbf16>
    %14 = vector.shape_cast %13 : vector<1x128x128xbf16> to vector<128x128xbf16>
    %cst_16 = arith.constant dense<0.000000e+00> : vector<8x128xf32>
    %15 = tpu.matmul %12, %14, %cst_16 {dimension_numbers = #tpu.dot_dimension_numbers<[1], [0], [0], [1], [0, 0, 1, 1], [], []>} : vector<8x128xbf16>, vector<128x128xbf16>, vector<8x128xf32> -> vector<8x128xf32>
    %16 = arith.addf %10, %15 : vector<8x128xf32>
    %c0_17 = arith.constant 0 : index
    %c0_18 = arith.constant 0 : index
    %c0_19 = arith.constant 0 : index
    %17 = vector.load %arg5[%c0_17, %c0_18, %c0_19] : memref<1x8x128xbf16, #tpu.memory_space<vmem>>, vector<1x8x128xbf16>
    %18 = vector.shape_cast %17 : vector<1x8x128xbf16> to vector<8x128xbf16>
    %c3 = arith.constant 3 : index
    %c0_20 = arith.constant 0 : index
    %c0_21 = arith.constant 0 : index
    %19 = vector.load %arg6[%c3, %c0_20, %c0_21] : memref<4x128x128xbf16, #tpu.memory_space<vmem>>, vector<1x128x128xbf16>
    %20 = vector.shape_cast %19 : vector<1x128x128xbf16> to vector<128x128xbf16>
    %cst_22 = arith.constant dense<0.000000e+00> : vector<8x128xf32>
    %21 = tpu.matmul %18, %20, %cst_22 {dimension_numbers = #tpu.dot_dimension_numbers<[1], [0], [0], [1], [0, 0, 1, 1], [], []>} : vector<8x128xbf16>, vector<128x128xbf16>, vector<8x128xf32> -> vector<8x128xf32>
    %22 = arith.addf %16, %21 : vector<8x128xf32>
    %c0_23 = arith.constant 0 : index
    %c0_24 = arith.constant 0 : index
    %23 = vector.load %arg7[%c0_23, %c0_24] : memref<1x128xf32, #tpu.memory_space<vmem>>, vector<1x128xf32>
    %24 = vector.broadcast %23 : vector<1x128xf32> to vector<8x128xf32>
    %25 = arith.addf %22, %24 : vector<8x128xf32>
    %cst_25 = arith.constant -6.000000e+01 : f32
    %26 = vector.broadcast %cst_25 : f32 to vector<8x128xf32>
    %27 = arith.maximumf %25, %26 : vector<8x128xf32>
    %cst_26 = arith.constant 0.000000e+00 : f32
    %28 = vector.broadcast %cst_26 : f32 to vector<8x128xf32>
    %29 = arith.subf %28, %27 : vector<8x128xf32>
    %30 = math.exp %29 : vector<8x128xf32>
    %cst_27 = arith.constant 1.000000e+00 : f32
    %31 = vector.broadcast %cst_27 : f32 to vector<8x128xf32>
    %32 = arith.addf %31, %30 : vector<8x128xf32>
    %33 = tpu.reciprocal %32 {approx = true} : vector<8x128xf32> -> vector<8x128xf32>
    %34 = arith.mulf %25, %33 : vector<8x128xf32>
    %35 = arith.truncf %34 : vector<8x128xf32> to vector<8x128xbf16>
    %c0_28 = arith.constant 0 : index
    %c0_29 = arith.constant 0 : index
    %c0_30 = arith.constant 0 : index
    %36 = vector.load %arg8[%c0_28, %c0_29, %c0_30] : memref<1x8x128xbf16, #tpu.memory_space<vmem>>, vector<1x8x128xbf16>
    %37 = vector.shape_cast %36 : vector<1x8x128xbf16> to vector<8x128xbf16>
    %38 = vector.shape_cast %35 : vector<8x128xbf16> to vector<1x8x128xbf16>
    tpu.vector_store %arg8[%c0_28, %c0_29, %c0_30], %38 {strides = array<i32>} : memref<1x8x128xbf16, #tpu.memory_space<vmem>>, vector<1x8x128xbf16>,
    return
  }
  func.func @transform_0(%arg0: i32, %arg1: i32) -> (i32, i32, i32) {
    %c0_i32 = arith.constant 0 : i32
    %c0_i32_0 = arith.constant 0 : i32
    %c0_i32_1 = arith.constant 0 : i32
    return %arg0, %c0_i32, %c0_i32_0 : i32, i32, i32
  }
  func.func @transform_1(%arg0: i32, %arg1: i32) -> (i32, i32, i32) {
    %c0_i32 = arith.constant 0 : i32
    %c0_i32_0 = arith.constant 0 : i32
    %c0_i32_1 = arith.constant 0 : i32
    return %arg0, %c0_i32, %c0_i32_0 : i32, i32, i32
  }
  func.func @transform_2(%arg0: i32, %arg1: i32) -> (i32, i32, i32) {
    %c0_i32 = arith.constant 0 : i32
    %c0_i32_0 = arith.constant 0 : i32
    %c0_i32_1 = arith.constant 0 : i32
    return %arg0, %c0_i32, %c0_i32_0 : i32, i32, i32
  }
  func.func @transform_3(%arg0: i32, %arg1: i32) -> (i32, i32, i32) {
    %c0_i32 = arith.constant 0 : i32
    %c0_i32_0 = arith.constant 0 : i32
    %c0_i32_1 = arith.constant 0 : i32
    return %arg0, %c0_i32, %c0_i32_0 : i32, i32, i32
  }
  func.func @transform_4(%arg0: i32, %arg1: i32) -> (i32, i32, i32) {
    %c0_i32 = arith.constant 0 : i32
    %c0_i32_0 = arith.constant 0 : i32
    %c0_i32_1 = arith.constant 0 : i32
    return %c0_i32, %c0_i32_0, %arg1 : i32, i32, i32
  }
  func.func @transform_5(%arg0: i32, %arg1: i32) -> (i32, i32) {
    %c0_i32 = arith.constant 0 : i32
    %c0_i32_0 = arith.constant 0 : i32
    return %c0_i32, %arg1 : i32, i32
  }
  func.func @transform_6(%arg0: i32, %arg1: i32) -> (i32, i32, i32) {
    %c0_i32 = arith.constant 0 : i32
    %c0_i32_0 = arith.constant 0 : i32
    return %arg0, %c0_i32, %arg1 : i32, i32, i32
  }
}

module attributes {stable_mosaic.version = 11 : i64} {
  func.func @kernel(%arg0: i32, %arg1: i32, %arg2: memref<1x24x128xbf16, #tpu.memory_space<vmem>>, %arg3: memref<9x128x128xbf16, #tpu.memory_space<vmem>>, %arg4: memref<1x128xf32, #tpu.memory_space<vmem>>, %arg5: memref<1x8x128xbf16, #tpu.memory_space<vmem>>) attributes {dimension_semantics = [#tpu.dimension_semantics<parallel>, #tpu.dimension_semantics<parallel>], iteration_bounds = array<i64: 2, 1>, scalar_prefetch = 0 : i64, scratch_operands = 0 : i64, tpu.core_type = #tpu.core_type<tc>, window_params = [{transform_indices = @transform_0, window_bounds = array<i64: 1, 24, 128>}, {transform_indices = @transform_1, window_bounds = array<i64: 9, 128, 128>}, {transform_indices = @transform_2, window_bounds = array<i64: 1, 128>}, {transform_indices = @transform_3, window_bounds = array<i64: 1, 8, 128>}]} {
    %c0 = arith.constant 0 : index
    %c0_0 = arith.constant 0 : index
    %c0_1 = arith.constant 0 : index
    %0 = vector.load %arg2[%c0, %c0_0, %c0_1] : memref<1x24x128xbf16, #tpu.memory_space<vmem>>, vector<1x8x128xbf16>
    %1 = vector.shape_cast %0 : vector<1x8x128xbf16> to vector<8x128xbf16>
    %c0_2 = arith.constant 0 : index
    %c0_3 = arith.constant 0 : index
    %c0_4 = arith.constant 0 : index
    %2 = vector.load %arg3[%c0_2, %c0_3, %c0_4] : memref<9x128x128xbf16, #tpu.memory_space<vmem>>, vector<1x128x128xbf16>
    %3 = vector.shape_cast %2 : vector<1x128x128xbf16> to vector<128x128xbf16>
    %cst = arith.constant dense<0.000000e+00> : vector<8x128xf32>
    %4 = tpu.matmul %1, %3, %cst {dimension_numbers = #tpu.dot_dimension_numbers<[1], [0], [0], [1], [0, 0, 1, 1], [], []>} : vector<8x128xbf16>, vector<128x128xbf16>, vector<8x128xf32> -> vector<8x128xf32>
    %c0_5 = arith.constant 0 : index
    %c1 = arith.constant 1 : index
    %c0_6 = arith.constant 0 : index
    %5 = vector.load %arg2[%c0_5, %c1, %c0_6] : memref<1x24x128xbf16, #tpu.memory_space<vmem>>, vector<1x8x128xbf16>
    %6 = vector.shape_cast %5 : vector<1x8x128xbf16> to vector<8x128xbf16>
    %c1_7 = arith.constant 1 : index
    %c0_8 = arith.constant 0 : index
    %c0_9 = arith.constant 0 : index
    %7 = vector.load %arg3[%c1_7, %c0_8, %c0_9] : memref<9x128x128xbf16, #tpu.memory_space<vmem>>, vector<1x128x128xbf16>
    %8 = vector.shape_cast %7 : vector<1x128x128xbf16> to vector<128x128xbf16>
    %cst_10 = arith.constant dense<0.000000e+00> : vector<8x128xf32>
    %9 = tpu.matmul %6, %8, %cst_10 {dimension_numbers = #tpu.dot_dimension_numbers<[1], [0], [0], [1], [0, 0, 1, 1], [], []>} : vector<8x128xbf16>, vector<128x128xbf16>, vector<8x128xf32> -> vector<8x128xf32>
    %10 = arith.addf %4, %9 : vector<8x128xf32>
    %c0_11 = arith.constant 0 : index
    %c2 = arith.constant 2 : index
    %c0_12 = arith.constant 0 : index
    %11 = vector.load %arg2[%c0_11, %c2, %c0_12] : memref<1x24x128xbf16, #tpu.memory_space<vmem>>, vector<1x8x128xbf16>
    %12 = vector.shape_cast %11 : vector<1x8x128xbf16> to vector<8x128xbf16>
    %c2_13 = arith.constant 2 : index
    %c0_14 = arith.constant 0 : index
    %c0_15 = arith.constant 0 : index
    %13 = vector.load %arg3[%c2_13, %c0_14, %c0_15] : memref<9x128x128xbf16, #tpu.memory_space<vmem>>, vector<1x128x128xbf16>
    %14 = vector.shape_cast %13 : vector<1x128x128xbf16> to vector<128x128xbf16>
    %cst_16 = arith.constant dense<0.000000e+00> : vector<8x128xf32>
    %15 = tpu.matmul %12, %14, %cst_16 {dimension_numbers = #tpu.dot_dimension_numbers<[1], [0], [0], [1], [0, 0, 1, 1], [], []>} : vector<8x128xbf16>, vector<128x128xbf16>, vector<8x128xf32> -> vector<8x128xf32>
    %16 = arith.addf %10, %15 : vector<8x128xf32>
    %c0_17 = arith.constant 0 : index
    %c4 = arith.constant 4 : index
    %c0_18 = arith.constant 0 : index
    %17 = vector.load %arg2[%c0_17, %c4, %c0_18] : memref<1x24x128xbf16, #tpu.memory_space<vmem>>, vector<1x8x128xbf16>
    %18 = vector.shape_cast %17 : vector<1x8x128xbf16> to vector<8x128xbf16>
    %c3 = arith.constant 3 : index
    %c0_19 = arith.constant 0 : index
    %c0_20 = arith.constant 0 : index
    %19 = vector.load %arg3[%c3, %c0_19, %c0_20] : memref<9x128x128xbf16, #tpu.memory_space<vmem>>, vector<1x128x128xbf16>
    %20 = vector.shape_cast %19 : vector<1x128x128xbf16> to vector<128x128xbf16>
    %cst_21 = arith.constant dense<0.000000e+00> : vector<8x128xf32>
    %21 = tpu.matmul %18, %20, %cst_21 {dimension_numbers = #tpu.dot_dimension_numbers<[1], [0], [0], [1], [0, 0, 1, 1], [], []>} : vector<8x128xbf16>, vector<128x128xbf16>, vector<8x128xf32> -> vector<8x128xf32>
    %22 = arith.addf %16, %21 : vector<8x128xf32>
    %c0_22 = arith.constant 0 : index
    %c5 = arith.constant 5 : index
    %c0_23 = arith.constant 0 : index
    %23 = vector.load %arg2[%c0_22, %c5, %c0_23] : memref<1x24x128xbf16, #tpu.memory_space<vmem>>, vector<1x8x128xbf16>
    %24 = vector.shape_cast %23 : vector<1x8x128xbf16> to vector<8x128xbf16>
    %c4_24 = arith.constant 4 : index
    %c0_25 = arith.constant 0 : index
    %c0_26 = arith.constant 0 : index
    %25 = vector.load %arg3[%c4_24, %c0_25, %c0_26] : memref<9x128x128xbf16, #tpu.memory_space<vmem>>, vector<1x128x128xbf16>
    %26 = vector.shape_cast %25 : vector<1x128x128xbf16> to vector<128x128xbf16>
    %cst_27 = arith.constant dense<0.000000e+00> : vector<8x128xf32>
    %27 = tpu.matmul %24, %26, %cst_27 {dimension_numbers = #tpu.dot_dimension_numbers<[1], [0], [0], [1], [0, 0, 1, 1], [], []>} : vector<8x128xbf16>, vector<128x128xbf16>, vector<8x128xf32> -> vector<8x128xf32>
    %28 = arith.addf %22, %27 : vector<8x128xf32>
    %c0_28 = arith.constant 0 : index
    %c6 = arith.constant 6 : index
    %c0_29 = arith.constant 0 : index
    %29 = vector.load %arg2[%c0_28, %c6, %c0_29] : memref<1x24x128xbf16, #tpu.memory_space<vmem>>, vector<1x8x128xbf16>
    %30 = vector.shape_cast %29 : vector<1x8x128xbf16> to vector<8x128xbf16>
    %c5_30 = arith.constant 5 : index
    %c0_31 = arith.constant 0 : index
    %c0_32 = arith.constant 0 : index
    %31 = vector.load %arg3[%c5_30, %c0_31, %c0_32] : memref<9x128x128xbf16, #tpu.memory_space<vmem>>, vector<1x128x128xbf16>
    %32 = vector.shape_cast %31 : vector<1x128x128xbf16> to vector<128x128xbf16>
    %cst_33 = arith.constant dense<0.000000e+00> : vector<8x128xf32>
    %33 = tpu.matmul %30, %32, %cst_33 {dimension_numbers = #tpu.dot_dimension_numbers<[1], [0], [0], [1], [0, 0, 1, 1], [], []>} : vector<8x128xbf16>, vector<128x128xbf16>, vector<8x128xf32> -> vector<8x128xf32>
    %34 = arith.addf %28, %33 : vector<8x128xf32>
    %c0_34 = arith.constant 0 : index
    %c8 = arith.constant 8 : index
    %c0_35 = arith.constant 0 : index
    %35 = vector.load %arg2[%c0_34, %c8, %c0_35] : memref<1x24x128xbf16, #tpu.memory_space<vmem>>, vector<1x8x128xbf16>
    %36 = vector.shape_cast %35 : vector<1x8x128xbf16> to vector<8x128xbf16>
    %c6_36 = arith.constant 6 : index
    %c0_37 = arith.constant 0 : index
    %c0_38 = arith.constant 0 : index
    %37 = vector.load %arg3[%c6_36, %c0_37, %c0_38] : memref<9x128x128xbf16, #tpu.memory_space<vmem>>, vector<1x128x128xbf16>
    %38 = vector.shape_cast %37 : vector<1x128x128xbf16> to vector<128x128xbf16>
    %cst_39 = arith.constant dense<0.000000e+00> : vector<8x128xf32>
    %39 = tpu.matmul %36, %38, %cst_39 {dimension_numbers = #tpu.dot_dimension_numbers<[1], [0], [0], [1], [0, 0, 1, 1], [], []>} : vector<8x128xbf16>, vector<128x128xbf16>, vector<8x128xf32> -> vector<8x128xf32>
    %40 = arith.addf %34, %39 : vector<8x128xf32>
    %c0_40 = arith.constant 0 : index
    %c9 = arith.constant 9 : index
    %c0_41 = arith.constant 0 : index
    %41 = vector.load %arg2[%c0_40, %c9, %c0_41] : memref<1x24x128xbf16, #tpu.memory_space<vmem>>, vector<1x8x128xbf16>
    %42 = vector.shape_cast %41 : vector<1x8x128xbf16> to vector<8x128xbf16>
    %c7 = arith.constant 7 : index
    %c0_42 = arith.constant 0 : index
    %c0_43 = arith.constant 0 : index
    %43 = vector.load %arg3[%c7, %c0_42, %c0_43] : memref<9x128x128xbf16, #tpu.memory_space<vmem>>, vector<1x128x128xbf16>
    %44 = vector.shape_cast %43 : vector<1x128x128xbf16> to vector<128x128xbf16>
    %cst_44 = arith.constant dense<0.000000e+00> : vector<8x128xf32>
    %45 = tpu.matmul %42, %44, %cst_44 {dimension_numbers = #tpu.dot_dimension_numbers<[1], [0], [0], [1], [0, 0, 1, 1], [], []>} : vector<8x128xbf16>, vector<128x128xbf16>, vector<8x128xf32> -> vector<8x128xf32>
    %46 = arith.addf %40, %45 : vector<8x128xf32>
    %c0_45 = arith.constant 0 : index
    %c10 = arith.constant 10 : index
    %c0_46 = arith.constant 0 : index
    %47 = vector.load %arg2[%c0_45, %c10, %c0_46] : memref<1x24x128xbf16, #tpu.memory_space<vmem>>, vector<1x8x128xbf16>
    %48 = vector.shape_cast %47 : vector<1x8x128xbf16> to vector<8x128xbf16>
    %c8_47 = arith.constant 8 : index
    %c0_48 = arith.constant 0 : index
    %c0_49 = arith.constant 0 : index
    %49 = vector.load %arg3[%c8_47, %c0_48, %c0_49] : memref<9x128x128xbf16, #tpu.memory_space<vmem>>, vector<1x128x128xbf16>
    %50 = vector.shape_cast %49 : vector<1x128x128xbf16> to vector<128x128xbf16>
    %cst_50 = arith.constant dense<0.000000e+00> : vector<8x128xf32>
    %51 = tpu.matmul %48, %50, %cst_50 {dimension_numbers = #tpu.dot_dimension_numbers<[1], [0], [0], [1], [0, 0, 1, 1], [], []>} : vector<8x128xbf16>, vector<128x128xbf16>, vector<8x128xf32> -> vector<8x128xf32>
    %52 = arith.addf %46, %51 : vector<8x128xf32>
    %c0_51 = arith.constant 0 : index
    %c0_52 = arith.constant 0 : index
    %53 = vector.load %arg4[%c0_51, %c0_52] : memref<1x128xf32, #tpu.memory_space<vmem>>, vector<1x128xf32>
    %54 = vector.broadcast %53 : vector<1x128xf32> to vector<8x128xf32>
    %55 = arith.addf %52, %54 : vector<8x128xf32>
    %cst_53 = arith.constant -6.000000e+01 : f32
    %56 = vector.broadcast %cst_53 : f32 to vector<8x128xf32>
    %57 = arith.maximumf %55, %56 : vector<8x128xf32>
    %cst_54 = arith.constant 0.000000e+00 : f32
    %58 = vector.broadcast %cst_54 : f32 to vector<8x128xf32>
    %59 = arith.subf %58, %57 : vector<8x128xf32>
    %60 = math.exp %59 : vector<8x128xf32>
    %cst_55 = arith.constant 1.000000e+00 : f32
    %61 = vector.broadcast %cst_55 : f32 to vector<8x128xf32>
    %62 = arith.addf %61, %60 : vector<8x128xf32>
    %63 = tpu.reciprocal %62 {approx = true} : vector<8x128xf32> -> vector<8x128xf32>
    %64 = arith.mulf %55, %63 : vector<8x128xf32>
    %65 = arith.truncf %64 : vector<8x128xf32> to vector<8x128xbf16>
    %c0_56 = arith.constant 0 : index
    %c0_57 = arith.constant 0 : index
    %c0_58 = arith.constant 0 : index
    %66 = vector.load %arg5[%c0_56, %c0_57, %c0_58] : memref<1x8x128xbf16, #tpu.memory_space<vmem>>, vector<1x8x128xbf16>
    %67 = vector.shape_cast %66 : vector<1x8x128xbf16> to vector<8x128xbf16>
    %68 = vector.shape_cast %65 : vector<8x128xbf16> to vector<1x8x128xbf16>
    tpu.vector_store %arg5[%c0_56, %c0_57, %c0_58], %68 {strides = array<i32>} : memref<1x8x128xbf16, #tpu.memory_space<vmem>>, vector<1x8x128xbf16>,
    return
  }
  func.func @transform_0(%arg0: i32, %arg1: i32) -> (i32, i32, i32) {
    %c0_i32 = arith.constant 0 : i32
    %c0_i32_0 = arith.constant 0 : i32
    %c0_i32_1 = arith.constant 0 : i32
    return %arg0, %c0_i32, %c0_i32_0 : i32, i32, i32
  }
  func.func @transform_1(%arg0: i32, %arg1: i32) -> (i32, i32, i32) {
    %c0_i32 = arith.constant 0 : i32
    %c0_i32_0 = arith.constant 0 : i32
    %c0_i32_1 = arith.constant 0 : i32
    return %c0_i32, %c0_i32_0, %arg1 : i32, i32, i32
  }
  func.func @transform_2(%arg0: i32, %arg1: i32) -> (i32, i32) {
    %c0_i32 = arith.constant 0 : i32
    %c0_i32_0 = arith.constant 0 : i32
    return %c0_i32, %arg1 : i32, i32
  }
  func.func @transform_3(%arg0: i32, %arg1: i32) -> (i32, i32, i32) {
    %c0_i32 = arith.constant 0 : i32
    %c0_i32_0 = arith.constant 0 : i32
    return %arg0, %c0_i32, %arg1 : i32, i32, i32
  }
}

</mosaic_0001>

<bundles_post_ra>
// kernel: yolov7_backbone.20
= control target key start
LH: loop header
LB: loop body
LE: loop exit
PB: predicated region body
PF: predicated region fallthrough
CT: control target
= control target key end

     0   :  { %s624_s12 = smov 0   ;;  %s626_s13 = smov 0   ;;  %s691_s0 = inlined_call_operand.vmem [shape: bf16[2,16,128], index: 0, kind: input, shape index: {}]   ;;  %s692_s1 = inlined_call_operand.vmem [shape: bf16[1,128,128], index: 1, kind: input, shape index: {}]   ;;  %s693_s2 = inlined_call_operand.vmem [shape: f32[1,128], index: 2, kind: input, shape index: {}]   ;;  %s694_s3 = inlined_call_operand.vmem [shape: bf16[2,16,128], index: 3, kind: output, shape index: {}]  }
   0x1   :  { %s628_s14 = smov 0  }
   0x2 LB: > { %s25_s15 = sadd.s32 1, %s596_s13  ;;  %p478_p0 = scmp.ge.s32.totalorder %s600_s14, 1  ;;  %s600_s14 = sphi %s628_s14, %s13_s14   ;;  %s596_s13 = sphi %s626_s13, %s696_s13   ;;  %s592_s12 = sphi %s624_s12, %s695_s12  }
   0x3   : > { %p27_p1 = scmp.ge.s32.totalorder %s25_s15, 2  ;;  %p168_p2 = scmp.lt.s32.totalorder %s600_s14, 3 }
   0x5   : > { %s698_s15 = smov (%p27_p1, %s25_s15), 0  ;;  %p169_p3 = pnand %p478_p0, %p168_p2 }
   0x6   : > { %p202_p4 = scmp.lt.s32.totalorder (!%p169_p3), %s592_s12, 1 }
   0x7   : > { %172 = sbr.rel (%p169_p3) target bundleno = 285 (0x11d), region = 32 }
   0xc   : > { %v561_v0 = vld [vmem:[%s692_s1 + $0x38] sm:$0xff]   ;;  %v602_v1 = vmov 0.0   ;;  %v562_v2 = vld [vmem:[%s692_s1 + $0x30] sm:$0xff]   ;;  %vm603_vm0 = vmmov 0   ;;  %s700_s12 = smov (!%p202_p4, %s592_s12), 1  ;;  %v563_v3 = vld [vmem:[%s692_s1 + $0x28] sm:$0xff]  }
   0xd   : > { %515 = vmatprep.subr.bf16.mxu0 %v602_v1  ;;  %531 = vmatprep.mubr.msk.bf16.mxu0 %vm603_vm0, %v602_v1  ;;  %s497_s22 = sshll.u32 %s700_s12, 3  ;;  %v564_v4 = vld [vmem:[%s692_s1 + $0x20] sm:$0xff]   ;;  %v565_v5 = vld [vmem:[%s692_s1 + $0x18] sm:$0xff]   ;;  %v566_v6 = vld [vmem:[%s692_s1 + $0x10] sm:$0xff]  }
   0xe   : > { %516 = vmatpush3.bf16.msra.mxu0 %v561_v0  ;;  %s206_s25 = scalar_lea.vmem %s691_s0, %s497_s22  ;;  %v567_v7 = vld [vmem:[%s692_s1 + $0x8] sm:$0xff]   ;;  %v568_v8 = vld [vmem:[%s692_s1] sm:$0xff]   ;;  %s221_s17 = scalar_lea.vmem %s694_s3, %s497_s22 }
   0xf   : > { %517 = vmatprep.subr.bf16.mxu0 %v602_v1  ;;  %v569_v9 = vld [vmem:[%s206_s25] sm:$0xff]  }
  0x10   : > { %v483_v10 = vld [vmem:[%s693_s2] ss:$0 sm:$0xff] }
  0x12   : > { %518 = vmatpush3.bf16.msra.mxu0 %v562_v2 }
  0x13   : > { %519 = vmatprep.subr.bf16.mxu0 %v602_v1 }
  0x16   : > { %520 = vmatpush3.bf16.msra.mxu0 %v563_v3 }
  0x17   : > { %521 = vmatprep.subr.bf16.mxu0 %v602_v1 }
  0x1a   : > { %522 = vmatpush3.bf16.msra.mxu0 %v564_v4 }
  0x1b   : > { %523 = vmatprep.subr.bf16.mxu0 %v602_v1 }
  0x1e   : > { %524 = vmatpush3.bf16.msra.mxu0 %v565_v5 }
  0x1f   : > { %525 = vmatprep.subr.bf16.mxu0 %v602_v1 }
  0x22   : > { %526 = vmatpush3.bf16.msra.mxu0 %v566_v6 }
  0x23   : > { %527 = vmatprep.subr.bf16.mxu0 %v602_v1 }
  0x26   : > { %528 = vmatpush3.bf16.msra.mxu0 %v567_v7 }
  0x27   : > { %529 = vmatprep.subr.bf16.mxu0 %v602_v1 }
  0x2a   : > { %530 = vmatpush3.bf16.msra.mxu0 %v568_v8 }
  0x2d   : > { %532 = vmatmul.mubr.bf16.vlgmr.msra.gmra.mxu0 %v569_v9 }
  0xed   : > { %v336_v11 = vpop.f32.mrf.mxu0 }
  0xee   : > { %v337_v12 = vadd.f32 %v483_v10, %v336_v11 }
  0xef   : > { %v533_v13 = vpop.f32.mrf.mxu0 }
  0xf0   : > { %v343_v14 = vmax.f32 %v337_v12, -60.0 }
  0xf1   : > { %v339_v15 = vpop.f32.mrf.mxu0 }
  0xf2   : > { %v345_v16 = vsub.f32 0.0, %v343_v14  ;;  %v340_v17 = vadd.f32 %v483_v10, %v339_v15 }
  0xf3   : > { %v534_v18 = vpop.f32.mrf.mxu0 }
  0xf4   : > { %v347_v19 = vmul.f32 1.442695, %v345_v16  ;;  %v344_v20 = vmax.f32 %v340_v17, -60.0 }
  0xf6   : > { %570 = vpow2.f32 %v347_v19  ;;  %v346_v21 = vsub.f32 0.0, %v344_v20 }
  0xf8   : > { %v349_v22 = vmul.f32 1.442695, %v346_v21 }
  0xfa   : > { %572 = vpow2.f32 %v349_v22 }
 0x103   : > { %v571_v23 = vpop.eup %570 }
 0x104   : > { %v351_v24 = vadd.f32 1.0, %v571_v23 }
 0x106   : > { %574 = vrcp.f32 %v351_v24 }
 0x107   : > { %v573_v25 = vpop.eup %572 }
 0x108   : > { %v352_v26 = vadd.f32 1.0, %v573_v25 }
 0x10a   : > { %576 = vrcp.f32 %v352_v26 }
 0x113   : > { %v575_v27 = vpop.eup %574 }
 0x114   : > { %v355_v29 = vmul.f32 %v575_v27, %v337_v12 }
 0x117   : > { %v577_v28 = vpop.eup %576 }
 0x118   : > { %v356_v30 = vmul.f32 %v577_v28, %v340_v17 }
 0x11a   : > { %v504_v31 = vpack.c.bf16 %v356_v30, %v355_v29 }
 0x11c   : > { %505 = vst [vmem:[%s221_s17] sm:$0xff] %v504_v31  }
 0x11d PF: > { %s13_s14 = sadd.s32 1, %s600_s14   ;;  %s695_s12 = smov %s596_s13 }
 0x11e   : > { %p10_p5 = scmp.ge.s32.totalorder %s13_s14, 4   ;;  %s696_s13 = smov %s698_s15 }
 0x120   :  { %12 = sbr.rel (!%p10_p5) target bundleno = 2 (0x2), region = 68 }

// kernel: yolov7_backbone.17
= control target key start
LH: loop header
LB: loop body
LE: loop exit
PB: predicated region body
PF: predicated region fallthrough
CT: control target
= control target key end

     0   :  { %s3119_s12 = smov 0   ;;  %s3121_s13 = smov 0   ;;  %s3817_s0 = inlined_call_operand.vmem [shape: bf16[2,104,128], index: 0, kind: input, shape index: {}]   ;;  %s3818_s1 = inlined_call_operand.vmem [shape: bf16[9,128,128], index: 1, kind: input, shape index: {}]   ;;  %s3819_s2 = inlined_call_operand.vmem [shape: f32[1,128], index: 2, kind: input, shape index: {}]   ;;  %s3820_s3 = inlined_call_operand.vmem [shape: bf16[2,80,128], index: 3, kind: output, shape index: {}]  }
   0x1   :  { %s3123_s14 = smov 0  }
   0x2 LB: > { %s25_s15 = sadd.s32 1, %s3091_s13  ;;  %p2175_p0 = scmp.ge.s32.totalorder %s3095_s14, 1  ;;  %s3095_s14 = sphi %s3123_s14, %s13_s14   ;;  %s3091_s13 = sphi %s3121_s13, %s3822_s13   ;;  %s3087_s12 = sphi %s3119_s12, %s3821_s12  }
   0x3   : > { %p27_p1 = scmp.ge.s32.totalorder %s25_s15, 2  ;;  %p168_p2 = scmp.lt.s32.totalorder %s3095_s14, 3 }
   0x5   : > { %s3824_s15 = smov (%p27_p1, %s25_s15), 0  ;;  %p169_p3 = pnand %p2175_p0, %p168_p2 }
   0x6   : > { %p202_p4 = scmp.lt.s32.totalorder (!%p169_p3), %s3087_s12, 1 }
   0x7   : > { %172 = sbr.rel (%p169_p3) target bundleno = 465 (0x1d1), region = 32 }
   0xc   : > { %v2938_v0 = vld [vmem:[%s3818_s1 + $0x78] sm:$0xff]   ;;  %v3097_v1 = vmov 0.0   ;;  %v2940_v3 = vld [vmem:[%s3818_s1 + $0x70] sm:$0xff]   ;;  %vm3098_vm0 = vmmov 0   ;;  %s3826_s12 = smov (!%p202_p4, %s3087_s12), 1  ;;  %v2942_v5 = vld [vmem:[%s3818_s1 + $0x68] sm:$0xff]  }
   0xd   : > { %2570 = vmatprep.subr.bf16.mxu0 %v3097_v1  ;;  %2606 = vmatprep.subr.bf16.mxu1 %v3097_v1  ;;  %v2939_v2 = vld [vmem:[%s3818_s1 + $0x38] sm:$0xff]   ;;  %v2941_v4 = vld [vmem:[%s3818_s1 + $0x30] sm:$0xff]   ;;  %v2943_v6 = vld [vmem:[%s3818_s1 + $0x28] sm:$0xff]   ;;  %s2910_s28 = smul.u32 52, %s3826_s12  ;;  %vm295_vm1 = vsmask.f32 7424 }
   0xe   : > { %2571 = vmatpush3.bf16.msra.mxu0 %v2938_v0  ;;  %2586 = vmatprep.mubr.msk.bf16.mxu0 %vm3098_vm0, %v3097_v1  ;;  %v2944_v7 = vld [vmem:[%s3818_s1 + $0x60] sm:$0xff]   ;;  %v2946_v9 = vld [vmem:[%s3818_s1 + $0x58] sm:$0xff]   ;;  %v2948_v13 = vld [vmem:[%s3818_s1 + $0x50] sm:$0xff]   ;;  %vm613_vm2 = vcmask 1046528   ;;  %vm985_vm3 = vsmask.f32 6400 }
   0xf   : > { %2607 = vmatpush3.bf16.msra.mxu1 %v2939_v2  ;;  %2572 = vmatprep.subr.bf16.mxu0 %v3097_v1  ;;  %v2945_v8 = vld [vmem:[%s3818_s1 + $0x20] sm:$0xff]   ;;  %s3179_s8 = scalar_lea.vmem %s3817_s0, %s2910_s28  ;;  %v2947_v10 = vld [vmem:[%s3818_s1 + $0x18] sm:$0xff]   ;;  %v2949_v16 = vld [vmem:[%s3818_s1 + $0x10] sm:$0xff]   ;;  %vm1196_vm4 = vcmask 1045504   ;;  %vm1568_vm5 = vsmask.f32 5376 }
  0x10   : > { %2608 = vmatprep.subr.bf16.mxu1 %v3097_v1  ;;  %2622 = vmatprep.mubr.msk.bf16.mxu1 %vm3098_vm0, %v3097_v1  ;;  %v223_v11 = vld [vmem:[%s3179_s8] sm:$0xf]  ;;  %v3191_v12 = vld [vmem:[%s3179_s8 + $0x4] sm:$0xf]  ;;  %v3198_v15 = vld [vmem:[%s3179_s8 + $0x8] sm:$0xff]   ;;  %vm1779_vm6 = vcmask 1044480  }
  0x11   : > { %v2194_v14 = vcombine.low %v223_v11, %v3191_v12  ;;  %v2950_v18 = vld [vmem:[%s3818_s1 + $0x48] sm:$0xff]   ;;  %v304_v21 = vshll.u32 %v3198_v15, 16  ;;  %v2952_v23 = vld [vmem:[%s3818_s1 + $0x40] sm:$0xff]   ;;  %v3221_v27 = vld [vmem:[%s3179_s8 + $0x10] sm:$0xff]   ;;  %v308_v30 = vshrl.u32 %v3198_v15, 16  ;;  %s2911_s5 = smul.u32 40, %s3826_s12 }
  0x12   : > { %2573 = vmatpush3.bf16.msra.mxu0 %v2940_v3  ;;  %v2951_v22 = vld [vmem:[%s3818_s1 + $0x8] sm:$0xff]   ;;  %v2953_v24 = vld [vmem:[%s3818_s1] sm:$0xff]   ;;  %v2956_v28 = vld [vmem:[%s3818_s1 + $0xb8] sm:$0xff]   ;;  %v312_v31 = vshll.u32 %v3221_v27, 16  ;;  %v316_v41 = vshrl.u32 %v3221_v27, 16 }
  0x13   : > { %2609 = vmatpush3.bf16.msra.mxu1 %v2941_v4  ;;  %2574 = vmatprep.subr.bf16.mxu0 %v3097_v1  ;;  %v299_v17 = vshll.u32 %v2194_v14, 16  ;;  %v297_v19 = vshrl.u32 %v2194_v14, 16  ;;  %v306_v26 = vrot.slane %v304_v21, 1  ;;  %v2959_v32 = vld [vmem:[%s3818_s1 + $0xf8] sm:$0xff]   ;;  %v2957_v34 = vld [vmem:[%s3818_s1 + $0xb0] sm:$0xff]   ;;  %v2960_v40 = vld [vmem:[%s3818_s1 + $0xa8] sm:$0xff]   ;;  %s221_s9 = scalar_lea.vmem %s3820_s3, %s2911_s5 }
  0x14   : > { %2610 = vmatprep.subr.bf16.mxu1 %v3097_v1  ;;  %v3237_v33 = vld [vmem:[%s3179_s8 + $0x18] sm:$0xff]   ;;  %v314_v36 = vrot.slane %v312_v31, 1  ;;  %v2961_v37 = vld [vmem:[%s3818_s1 + $0xf0] sm:$0xff]   ;;  %v2964_v42 = vld [vmem:[%s3818_s1 + $0xe8] sm:$0xff]   ;;  %v617_v21 = vrot.slane %v3221_v27, 1 }
  0x15   : > { %v301_v20 = vrot.slane %v299_v17, 1  ;;  %v310_v35 = vor.u32 %v308_v30, %v306_v26  ;;  %v320_v38 = vshll.u32 %v3237_v33, 16  ;;  %v2963_v44 = vld [vmem:[%s3818_s1 + $0xa0] sm:$0xff]   ;;  %v2965_v48 = vld [vmem:[%s3818_s1 + $0x98] sm:$0xff]   ;;  %v324_v50 = vshrl.u32 %v3237_v33, 16  ;;  %v2969_v56 = vld [vmem:[%s3818_s1 + $0x90] sm:$0xff]  }
  0x16   : > { %2575 = vmatpush3.bf16.msra.mxu0 %v2942_v5  ;;  %v3266_v45 = vld [vmem:[%s3179_s8 + $0x20] sm:$0xff]   ;;  %v318_v46 = vor.u32 %v316_v41, %v314_v36  ;;  %v2968_v52 = vld [vmem:[%s3818_s1 + $0xd8] sm:$0xff]   ;;  %v3289_v53 = vld [vmem:[%s3179_s8 + $0x28] ss:$0 sps:$4 sm:$0x11]  }
  0x17   : > { %2611 = vmatpush3.bf16.msra.mxu1 %v2943_v6  ;;  %2576 = vmatprep.subr.bf16.mxu0 %v3097_v1  ;;  %v302_v25 = vor.u32 %v301_v20, %v297_v19  ;;  %v315_v39 = vsel %vm295_vm1, %v310_v35, %v314_v36  ;;  %v322_v43 = vrot.slane %v320_v38, 1  ;;  %v2966_v47 = vld [vmem:[%s3818_s1 + $0xe0] sm:$0xff]   ;;  %v328_v51 = vshll.u32 %v3266_v45, 16  ;;  %v2970_v57 = vld [vmem:[%s3818_s1 + $0xd0] sm:$0xff]   ;;  %v2971_v61 = vld [vmem:[%s3818_s1 + $0x88] sm:$0xff]  }
  0x18   : > { %2612 = vmatprep.subr.bf16.mxu1 %v3097_v1  ;;  %v332_v59 = vshrl.u32 %v3266_v45, 16  ;;  %v336_v60 = vshll.u32 %v3289_v53, 16  ;;  %v2973_v62 = vld [vmem:[%s3818_s1 + $0xc8] sm:$0xff]   ;;  %v2974_v63 = vld [vmem:[%s3818_s1 + $0x80] sm:$0xff]   ;;  %v2979_v17 = vld [vmem:[%s3818_s1 + $0x138] sm:$0xff]   ;;  %v621_v38 = vrot.slane %v3266_v45, 1 }
  0x19   : > { %v307_v29 = vsel %vm295_vm1, %v302_v25, %v306_v26  ;;  %v323_v49 = vsel %vm295_vm1, %v318_v46, %v322_v43  ;;  %v326_v54 = vor.u32 %v324_v50, %v322_v43  ;;  %v330_v55 = vrot.slane %v328_v51, 1  ;;  %v2975_v3 = vld [vmem:[%s3818_s1 + $0xc0] sm:$0xff]   ;;  %v3331_v6 = vld [vmem:[%s3179_s8 + $0x8] sm:$0xf]  ;;  %v3358_v19 = vld [vmem:[%s3179_s8 + $0x14] sm:$0xff]  }
  0x1a   : > { %2577 = vmatpush3.bf16.msra.mxu0 %v2944_v7  ;;  %v338_v2 = vrot.slane %v336_v60, 1  ;;  %v592_v4 = vld [vmem:[%s3179_s8] sm:$0xe]  ;;  %v761_v5 = vld [vmem:[%s3179_s8 + $0x4] sm:$0xe]  ;;  %v2980_v20 = vld [vmem:[%s3818_s1 + $0x130] sm:$0xff]  }
  0x1b   : > { %2613 = vmatpush3.bf16.msra.mxu1 %v2945_v8  ;;  %2578 = vmatprep.subr.bf16.mxu0 %v3097_v1  ;;  %v331_v58 = vsel %vm295_vm1, %v326_v54, %v330_v55  ;;  %v334_v0 = vor.u32 %v332_v59, %v330_v55  ;;  %v2232_v8 = vcombine.low %v592_v4, %v3191_v12  ;;  %v615_v12 = vrot.slane %v3198_v15, 1  ;;  %v2983_v25 = vld [vmem:[%s3818_s1 + $0x128] sm:$0xff]   ;;  %v2986_v30 = vld [vmem:[%s3818_s1 + $0x120] sm:$0xff]   ;;  %v2993_v41 = vld [vmem:[%s3818_s1 + $0x150] sm:$0xff]  }
  0x1c   : > { %2614 = vmatprep.subr.bf16.mxu1 %v3097_v1  ;;  %v3411_v36 = vld [vmem:[%s3179_s8 + $0x24] sm:$0xff]   ;;  %v2995_v43 = vld [vmem:[%s3179_s8 + $0x2c] ss:$0 sps:$4 sm:$0x11]  }
  0x1d   : > { %v339_v7 = vsel %vm295_vm1, %v334_v0, %v338_v2  ;;  %v614_v11 = vrot.slane %v2232_v8, 1  ;;  %v2996_v46 = vld [vmem:[%s3818_s1 + $0x148] sm:$0xff]   ;;  %v2998_v54 = vld [vmem:[%s3818_s1 + $0x140] sm:$0xff]   ;;  %v1004_v2 = vshrl.u32 %v3358_v19, 16 }
  0x1e   : > { %2579 = vmatpush3.bf16.msra.mxu0 %v2946_v9  ;;  %v3337_v9 = vcombine.low %v761_v5, %v3331_v6  ;;  %v1175_v55 = vld [vmem:[%s3179_s8 + $0x4] sm:$0xc] }
  0x1f   : > { %2615 = vmatpush3.bf16.msra.mxu1 %v2947_v10  ;;  %2580 = vmatprep.subr.bf16.mxu0 %v3097_v1  ;;  %v3340_v10 = vld [vmem:[%s3179_s8 + $0xc] sm:$0xff]   ;;  %v1006_v8 = vrot.slane %v1004_v2, 1 }
  0x20   : > { %2616 = vmatprep.subr.bf16.mxu1 %v3097_v1  ;;  %v995_v50 = vshrl.u32 %v3340_v10, 16  ;;  %v998_v51 = vshll.u32 %v3340_v10, 16  ;;  %v1198_v5 = vrot.slane %v3340_v10, 2 }
  0x22   : > { %2581 = vmatpush3.bf16.msra.mxu0 %v2948_v13  ;;  %v817_v13 = vrot.slane %v3337_v9, 1  ;;  %v997_v59 = vrot.slane %v995_v50, 1  ;;  %v1000_v60 = vrot.slane %v998_v51, 2  ;;  %v3556_v51 = vld [vmem:[%s3179_s8 + $0x10] sm:$0xff]  }
  0x23   : > { %2617 = vmatpush3.bf16.msra.mxu1 %v2949_v16  ;;  %2582 = vmatprep.subr.bf16.mxu0 %v3097_v1  ;;  %v616_v16 = vsel %vm613_vm2, %v614_v11, %v615_v12 }
  0x24   : > { %2618 = vmatprep.subr.bf16.mxu1 %v3097_v1  ;;  %v1001_v0 = vor.u32 %v1000_v60, %v997_v59  ;;  %v1581_v59 = vshll.u32 %v3556_v51, 16  ;;  %v3016_v60 = vld [vmem:[%s3818_s1 + $0x1c0] sm:$0xff]  }
  0x26   : > { %2583 = vmatpush3.bf16.msra.mxu0 %v2950_v18 }
  0x27   : > { %2619 = vmatpush3.bf16.msra.mxu1 %v2951_v22  ;;  %2584 = vmatprep.subr.bf16.mxu0 %v3097_v1  ;;  %v820_v22 = vrot.slane %v3358_v19, 1 }
  0x28   : > { %2620 = vmatprep.subr.bf16.mxu1 %v3097_v1 }
  0x2a   : > { %2585 = vmatpush3.bf16.msra.mxu0 %v2952_v23  ;;  %v2984_v23 = vld [vmem:[%s3818_s1 + $0x170] sm:$0xff]  }
  0x2b   : > { %2621 = vmatpush3.bf16.msra.mxu1 %v2953_v24  ;;  %2642 = vmatprep.subr.bf16.mxu0 %v3097_v1  ;;  %v618_v24 = vsel %vm613_vm2, %v615_v12, %v617_v21  ;;  %v3002_v12 = vld [vmem:[%s3818_s1 + $0x1f8] sm:$0xff]  }
  0x2c   : > { %2678 = vmatprep.subr.bf16.mxu1 %v3097_v1 }
  0x2d   : > { %2587 = vmatmul.mubr.bf16.vlgmr.msra.gmra.mxu0 %v307_v29  ;;  %v619_v29 = vrot.slane %v3237_v33, 1 }
  0x2e   : > { %2623 = vmatmul.mubr.bf16.vlgmr.msra.gmra.mxu1 %v2194_v14  ;;  %2643 = vmatpush3.bf16.msra.mxu0 %v2956_v28  ;;  %v818_v14 = vrot.slane %v3340_v10, 1  ;;  %v2987_v28 = vld [vmem:[%s3818_s1 + $0x168] sm:$0xff]   ;;  %v3001_v10 = vld [vmem:[%s3818_s1 + $0x1b0] sm:$0xff]  }
  0x2f   : > { %2644 = vmatprep.subr.bf16.mxu0 %v3097_v1  ;;  %2590 = vmatprep.mubr.msk.bf16.mxu0 %vm3098_vm0, %v3097_v1 }
  0x30   : > { %2626 = vmatprep.mubr.msk.bf16.mxu1 %vm3098_vm0, %v3097_v1  ;;  %2679 = vmatpush3.bf16.msra.mxu1 %v2959_v32  ;;  %v819_v18 = vsel %vm613_vm2, %v817_v13, %v818_v14  ;;  %v821_v26 = vsel %vm613_vm2, %v818_v14, %v820_v22  ;;  %v2989_v32 = vld [vmem:[%s3818_s1 + $0x160] sm:$0xff]  }
  0x31   : > { %2680 = vmatprep.subr.bf16.mxu1 %v3097_v1 }
  0x32   : > { %2645 = vmatpush3.bf16.msra.mxu0 %v2957_v34  ;;  %v2988_v34 = vld [vmem:[%s3818_s1 + $0x118] sm:$0xff]  }
  0x33   : > { %2646 = vmatprep.subr.bf16.mxu0 %v3097_v1 }
  0x34   : > { %2681 = vmatpush3.bf16.msra.mxu1 %v2961_v37  ;;  %v2991_v37 = vld [vmem:[%s3818_s1 + $0x158] sm:$0xff]  }
  0x35   : > { %2591 = vmatmul.mubr.bf16.gmra.mxu0 %v315_v39  ;;  %2682 = vmatprep.subr.bf16.mxu1 %v3097_v1  ;;  %v2992_v39 = vld [vmem:[%s3818_s1 + $0x110] sm:$0xff]  }
  0x36   : > { %2627 = vmatmul.mubr.bf16.gmra.mxu1 %v3198_v15  ;;  %2647 = vmatpush3.bf16.msra.mxu0 %v2960_v40  ;;  %v2982_v15 = vld [vmem:[%s3818_s1 + $0x178] sm:$0xff]   ;;  %v824_v40 = vrot.slane %v3411_v36, 1 }
  0x37   : > { %2594 = vmatprep.mubr.msk.bf16.mxu0 %vm3098_vm0, %v3097_v1  ;;  %2630 = vmatprep.mubr.msk.bf16.mxu1 %vm3098_vm0, %v3097_v1 }
  0x38   : > { %2648 = vmatprep.subr.bf16.mxu0 %v3097_v1  ;;  %2683 = vmatpush3.bf16.msra.mxu1 %v2964_v42  ;;  %v622_v42 = vsel %vm613_vm2, %v619_v29, %v621_v38 }
  0x39   : > { %2684 = vmatprep.subr.bf16.mxu1 %v3097_v1 }
  0x3a   : > { %2649 = vmatpush3.bf16.msra.mxu0 %v2963_v44 }
  0x3b   : > { %2650 = vmatprep.subr.bf16.mxu0 %v3097_v1 }
  0x3c   : > { %2685 = vmatpush3.bf16.msra.mxu1 %v2966_v47  ;;  %v623_v47 = vrot.slane %v3289_v53, 1  ;;  %v2997_v53 = vld [vmem:[%s3818_s1 + $0x100] sm:$0xff]  }
  0x3d   : > { %2595 = vmatmul.mubr.bf16.gmra.mxu0 %v323_v49  ;;  %2686 = vmatprep.subr.bf16.mxu1 %v3097_v1  ;;  %v990_v49 = vshll.u32 %v3337_v9, 16 }
  0x3e   : > { %2631 = vmatmul.mubr.bf16.gmra.mxu1 %v3221_v27  ;;  %2651 = vmatpush3.bf16.msra.mxu0 %v2965_v48  ;;  %v3384_v27 = vld [vmem:[%s3179_s8 + $0x1c] sm:$0xff]   ;;  %v987_v48 = vshrl.u32 %v3337_v9, 16 }
  0x3f   : > { %2598 = vmatprep.mubr.msk.bf16.mxu0 %vm3098_vm0, %v3097_v1  ;;  %2634 = vmatprep.mubr.msk.bf16.mxu1 %vm3098_vm0, %v3097_v1  ;;  %v822_v31 = vrot.slane %v3384_v27, 1  ;;  %v1013_v14 = vshrl.u32 %v3384_v27, 16 }
  0x40   : > { %2652 = vmatprep.subr.bf16.mxu0 %v3097_v1  ;;  %2687 = vmatpush3.bf16.msra.mxu1 %v2968_v52  ;;  %v826_v52 = vrot.slane %v2995_v43, 1  ;;  %v3011_v43 = vld [vmem:[%s3818_s1 + $0x1d0] sm:$0xff]  }
  0x41   : > { %2688 = vmatprep.subr.bf16.mxu1 %v3097_v1  ;;  %v823_v35 = vsel %vm613_vm2, %v820_v22, %v822_v31  ;;  %v825_v44 = vsel %vm613_vm2, %v822_v31, %v824_v40 }
  0x42   : > { %2653 = vmatpush3.bf16.msra.mxu0 %v2969_v56  ;;  %v624_v56 = vsel %vm613_vm2, %v621_v38, %v623_v47 }
  0x43   : > { %2654 = vmatprep.subr.bf16.mxu0 %v3097_v1 }
  0x44   : > { %2689 = vmatpush3.bf16.msra.mxu1 %v2970_v57  ;;  %v989_v57 = vrot.slane %v987_v48, 1 }
  0x45   : > { %2599 = vmatmul.mubr.bf16.gmra.mxu0 %v331_v58  ;;  %2690 = vmatprep.subr.bf16.mxu1 %v3097_v1  ;;  %v992_v58 = vrot.slane %v990_v49, 2 }
  0x46   : > { %2635 = vmatmul.mubr.bf16.gmra.mxu1 %v3237_v33  ;;  %2602 = vmatprep.mubr.msk.bf16.mxu0 %vm3098_vm0, %v3097_v1  ;;  %v620_v33 = vsel %vm613_vm2, %v617_v21, %v619_v29  ;;  %v1015_v21 = vrot.slane %v1013_v14, 1  ;;  %v1202_v29 = vrot.slane %v3384_v27, 2 }
  0x47   : > { %2638 = vmatprep.mubr.msk.bf16.mxu1 %vm3098_vm0, %v3097_v1  ;;  %2655 = vmatpush3.bf16.msra.mxu0 %v2971_v61  ;;  %v827_v61 = vsel %vm613_vm2, %v824_v40, %v826_v52  ;;  %v3014_v52 = vld [vmem:[%s3818_s1 + $0x1c8] sm:$0xff]  }
  0x48   : > { %2691 = vmatpush3.bf16.msra.mxu1 %v2973_v62  ;;  %2656 = vmatprep.subr.bf16.mxu0 %v3097_v1  ;;  %v2312_v62 = vcombine.low %v1175_v55, %v3331_v6  ;;  %v3015_v55 = vld [vmem:[%s3818_s1 + $0x180] sm:$0xff]  }
  0x49   : > { %2692 = vmatprep.subr.bf16.mxu1 %v3097_v1 }
  0x4a   : > { %v1197_v4 = vrot.slane %v2312_v62, 2 }
  0x4b   : > { %2657 = vmatpush3.bf16.msra.mxu0 %v2974_v63  ;;  %v993_v63 = vor.u32 %v992_v58, %v989_v57  ;;  %v1578_v58 = vshrl.u32 %v3556_v51, 16 }
  0x4c   : > { %2693 = vmatpush3.bf16.msra.mxu1 %v2975_v3  ;;  %2714 = vmatprep.subr.bf16.mxu0 %v3097_v1  ;;  %v1007_v3 = vshll.u32 %v3358_v19, 16  ;;  %v1199_v11 = vsel %vm1196_vm4, %v1197_v4, %v1198_v5  ;;  %v3579_v4 = vld [vmem:[%s3179_s8 + $0x18] sm:$0xff]  }
  0x4d   : > { %2603 = vmatmul.mubr.bf16.gmra.mxu0 %v339_v7  ;;  %2750 = vmatprep.subr.bf16.mxu1 %v3097_v1  ;;  %v1002_v6 = vsel %vm985_vm3, %v993_v63, %v1001_v0  ;;  %v3000_v7 = vld [vmem:[%s3818_s1 + $0x1b8] sm:$0xff]   ;;  %v1580_v2 = vrot.slane %v1578_v58, 2 }
  0x4e   : > { %2639 = vmatmul.mubr.bf16.gmra.mxu1 %v3266_v45  ;;  %2658 = vmatprep.mubr.msk.bf16.mxu0 %vm3098_vm0, %v3097_v1  ;;  %v2994_v45 = vld [vmem:[%s3818_s1 + $0x108] sm:$0xff]   ;;  %v1009_v9 = vrot.slane %v1007_v3, 2  ;;  %v1583_v3 = vrot.slane %v1581_v59, 3 }
  0x4f   : > { %2694 = vmatprep.mubr.msk.bf16.mxu1 %vm3098_vm0, %v3097_v1 }
  0x50   : > { %v1010_v13 = vor.u32 %v1009_v9, %v1006_v8  ;;  %v1584_v8 = vor.u32 %v1583_v3, %v1580_v2  ;;  %v1587_v9 = vshrl.u32 %v3579_v4, 16 }
  0x52   : > { %v1589_v14 = vrot.slane %v1587_v9, 2 }
  0x55   : > { %2659 = vmatmul.mubr.bf16.vlgmr.msra.gmra.mxu0 %v616_v16  ;;  %v1016_v16 = vshll.u32 %v3384_v27, 16 }
  0x56   : > { %2695 = vmatmul.mubr.bf16.vlgmr.msra.gmra.mxu1 %v819_v18  ;;  %2715 = vmatpush3.bf16.msra.mxu0 %v2979_v17  ;;  %v1200_v17 = vrot.slane %v3358_v19, 2  ;;  %v3004_v18 = vld [vmem:[%s3818_s1 + $0x1f0] sm:$0xff]  }
  0x57   : > { %2716 = vmatprep.subr.bf16.mxu0 %v3097_v1  ;;  %2662 = vmatprep.mubr.msk.bf16.mxu0 %vm3098_vm0, %v3097_v1  ;;  %v1018_v22 = vrot.slane %v1016_v16, 2 }
  0x58   : > { %2698 = vmatprep.mubr.msk.bf16.mxu1 %vm3098_vm0, %v3097_v1  ;;  %2751 = vmatpush3.bf16.msra.mxu1 %v2982_v15  ;;  %v1011_v15 = vsel %vm985_vm3, %v1001_v0, %v1010_v13  ;;  %v1201_v19 = vsel %vm1196_vm4, %v1198_v5, %v1200_v17  ;;  %v1203_v27 = vsel %vm1196_vm4, %v1200_v17, %v1202_v29  ;;  %v3596_v17 = vld [vmem:[%s3179_s8 + $0x20] sm:$0xff]  }
  0x59   : > { %2752 = vmatprep.subr.bf16.mxu1 %v3097_v1 }
  0x5a   : > { %2717 = vmatpush3.bf16.msra.mxu0 %v2980_v20  ;;  %v3003_v20 = vld [vmem:[%s3818_s1 + $0x1a8] sm:$0xff]  }
  0x5b   : > { %2718 = vmatprep.subr.bf16.mxu0 %v3097_v1 }
  0x5c   : > { %2753 = vmatpush3.bf16.msra.mxu1 %v2984_v23  ;;  %v3006_v23 = vld [vmem:[%s3818_s1 + $0x1e8] sm:$0xff]  }
  0x5d   : > { %2663 = vmatmul.mubr.bf16.gmra.mxu0 %v618_v24  ;;  %2754 = vmatprep.subr.bf16.mxu1 %v3097_v1  ;;  %v1019_v24 = vor.u32 %v1018_v22, %v1015_v21  ;;  %v1596_v21 = vshrl.u32 %v3596_v17, 16  ;;  %v1599_v22 = vshll.u32 %v3596_v17, 16 }
  0x5e   : > { %2699 = vmatmul.mubr.bf16.gmra.mxu1 %v821_v26  ;;  %2719 = vmatpush3.bf16.msra.mxu0 %v2983_v25  ;;  %v3005_v25 = vld [vmem:[%s3818_s1 + $0x1a0] sm:$0xff]   ;;  %v1022_v26 = vshrl.u32 %v3411_v36, 16 }
  0x5f   : > { %2666 = vmatprep.mubr.msk.bf16.mxu0 %vm3098_vm0, %v3097_v1  ;;  %2702 = vmatprep.mubr.msk.bf16.mxu1 %vm3098_vm0, %v3097_v1  ;;  %v1020_v31 = vsel %vm985_vm3, %v1010_v13, %v1019_v24 }
  0x60   : > { %2720 = vmatprep.subr.bf16.mxu0 %v3097_v1  ;;  %2755 = vmatpush3.bf16.msra.mxu1 %v2987_v28  ;;  %v1025_v28 = vshll.u32 %v3411_v36, 16 }
  0x61   : > { %2756 = vmatprep.subr.bf16.mxu1 %v3097_v1 }
  0x62   : > { %2721 = vmatpush3.bf16.msra.mxu0 %v2986_v30  ;;  %v3008_v30 = vld [vmem:[%s3818_s1 + $0x1e0] sm:$0xff]  }
  0x63   : > { %2722 = vmatprep.subr.bf16.mxu0 %v3097_v1 }
  0x64   : > { %2757 = vmatpush3.bf16.msra.mxu1 %v2989_v32  ;;  %v3007_v32 = vld [vmem:[%s3818_s1 + $0x198] sm:$0xff]  }
  0x65   : > { %2667 = vmatmul.mubr.bf16.gmra.mxu0 %v620_v33  ;;  %2758 = vmatprep.subr.bf16.mxu1 %v3097_v1  ;;  %v1024_v33 = vrot.slane %v1022_v26, 1  ;;  %v1601_v26 = vrot.slane %v1599_v22, 3 }
  0x66   : > { %2703 = vmatmul.mubr.bf16.gmra.mxu1 %v823_v35  ;;  %2723 = vmatpush3.bf16.msra.mxu0 %v2988_v34  ;;  %v1027_v34 = vrot.slane %v1025_v28, 2  ;;  %v3013_v35 = vld [vmem:[%s3179_s8 + $0x2c] ss:$0 sps:$4 sm:$0x33]  }
  0x67   : > { %2670 = vmatprep.mubr.msk.bf16.mxu0 %vm3098_vm0, %v3097_v1  ;;  %2706 = vmatprep.mubr.msk.bf16.mxu1 %vm3098_vm0, %v3097_v1  ;;  %v1031_v40 = vshrl.u32 %v3013_v35, 16  ;;  %v3617_v28 = vld [vmem:[%s3179_s8 + $0x28] sm:$0xff]  }
  0x68   : > { %2724 = vmatprep.subr.bf16.mxu0 %v3097_v1  ;;  %2759 = vmatpush3.bf16.msra.mxu1 %v2991_v37  ;;  %v3009_v37 = vld [vmem:[%s3818_s1 + $0x1d8] sm:$0xff]   ;;  %v1028_v38 = vor.u32 %v1027_v34, %v1024_v33  ;;  %v1608_v33 = vshll.u32 %v3617_v28, 16 }
  0x69   : > { %2760 = vmatprep.subr.bf16.mxu1 %v3097_v1  ;;  %v1033_v47 = vrot.slane %v1031_v40, 1  ;;  %v1407_v40 = vrot.slane %v3617_v28, 2 }
  0x6a   : > { %2725 = vmatpush3.bf16.msra.mxu0 %v2992_v39  ;;  %v3010_v39 = vld [vmem:[%s3818_s1 + $0x190] sm:$0xff]  }
  0x6b   : > { %2726 = vmatprep.subr.bf16.mxu0 %v3097_v1 }
  0x6c   : > { %2761 = vmatpush3.bf16.msra.mxu1 %v2993_v41  ;;  %v1034_v41 = vshll.u32 %v3013_v35, 16 }
  0x6d   : > { %2671 = vmatmul.mubr.bf16.gmra.mxu0 %v622_v42  ;;  %2762 = vmatprep.subr.bf16.mxu1 %v3097_v1  ;;  %v1204_v42 = vrot.slane %v3411_v36, 2  ;;  %v3012_v36 = vld [vmem:[%s3818_s1 + $0x188] sm:$0xff]  }
  0x6e   : > { %2707 = vmatmul.mubr.bf16.gmra.mxu1 %v825_v44  ;;  %2674 = vmatprep.mubr.msk.bf16.mxu0 %vm3098_vm0, %v3097_v1  ;;  %v1344_v44 = vld [vmem:[%s3179_s8 + $0x8] sm:$0xc]  ;;  %v1036_v48 = vrot.slane %v1034_v41, 2  ;;  %v3027_v41 = vld [vmem:[%s3818_s1 + $0x210] sm:$0xff]  }
  0x6f   : > { %2710 = vmatprep.mubr.msk.bf16.mxu1 %vm3098_vm0, %v3097_v1  ;;  %2727 = vmatpush3.bf16.msra.mxu0 %v2994_v45  ;;  %v3545_v45 = vld [vmem:[%s3179_s8 + $0xc] sm:$0xf]  ;;  %v1205_v49 = vsel %vm1196_vm4, %v1202_v29, %v1204_v42  ;;  %v1405_v29 = vrot.slane %v3596_v17, 2 }
  0x70   : > { %2763 = vmatpush3.bf16.msra.mxu1 %v2996_v46  ;;  %2728 = vmatprep.subr.bf16.mxu0 %v3097_v1  ;;  %v1029_v46 = vsel %vm985_vm3, %v1019_v24, %v1028_v38  ;;  %v2337_v50 = vcombine.low %v1344_v44, %v3545_v45 }
  0x71   : > { %2764 = vmatprep.subr.bf16.mxu1 %v3097_v1 }
  0x72   : > { %v1573_v57 = vshll.u32 %v2337_v50, 16  ;;  %v1400_v5 = vrot.slane %v2337_v50, 2 }
  0x73   : > { %2729 = vmatpush3.bf16.msra.mxu0 %v2997_v53  ;;  %v1037_v53 = vor.u32 %v1036_v48, %v1033_v47  ;;  %v3029_v47 = vld [vmem:[%s3179_s8 + $0x30] ss:$0 sps:$4 sm:$0x33]  }
  0x74   : > { %2765 = vmatpush3.bf16.msra.mxu1 %v2998_v54  ;;  %2786 = vmatprep.subr.bf16.mxu0 %v3097_v1  ;;  %v1206_v54 = vrot.slane %v3013_v35, 2  ;;  %v1575_v0 = vrot.slane %v1573_v57, 3  ;;  %v3025_v35 = vld [vmem:[%s3818_s1 + $0x218] sm:$0xff]  }
  0x75   : > { %2675 = vmatmul.mubr.bf16.gmra.mxu0 %v624_v56  ;;  %2822 = vmatprep.subr.bf16.mxu1 %v3097_v1  ;;  %v1570_v56 = vshrl.u32 %v2337_v50, 16 }
  0x76   : > { %2711 = vmatmul.mubr.bf16.gmra.mxu1 %v827_v61  ;;  %2730 = vmatprep.mubr.msk.bf16.mxu0 %vm3098_vm0, %v3097_v1  ;;  %v1038_v61 = vsel %vm985_vm3, %v1028_v38, %v1037_v53  ;;  %v1207_v62 = vsel %vm1196_vm4, %v1204_v42, %v1206_v54  ;;  %v1610_v38 = vrot.slane %v1608_v33, 3  ;;  %v3031_v54 = vld [vmem:[%s3818_s1 + $0x200] sm:$0xff]  }
  0x77   : > { %2766 = vmatprep.mubr.msk.bf16.mxu1 %vm3098_vm0, %v3097_v1  ;;  %v1572_v63 = vrot.slane %v1570_v56, 2 }
  0x7d   : > { %2731 = vmatmul.mubr.bf16.vlgmr.msra.gmra.mxu0 %v1002_v6  ;;  %v1401_v6 = vrot.slane %v3556_v51, 2 }
  0x7e   : > { %2767 = vmatmul.mubr.bf16.vlgmr.msra.gmra.mxu1 %v1199_v11  ;;  %2787 = vmatpush3.bf16.msra.mxu0 %v3000_v7  ;;  %v1576_v7 = vor.u32 %v1575_v0, %v1572_v63  ;;  %v1590_v11 = vshll.u32 %v3579_v4, 16  ;;  %v1783_v0 = vrot.slane %v3579_v4, 3 }
  0x7f   : > { %2788 = vmatprep.subr.bf16.mxu0 %v3097_v1  ;;  %2734 = vmatprep.mubr.msk.bf16.mxu0 %vm3098_vm0, %v3097_v1 }
  0x80   : > { %2770 = vmatprep.mubr.msk.bf16.mxu1 %vm3098_vm0, %v3097_v1  ;;  %2823 = vmatpush3.bf16.msra.mxu1 %v3002_v12  ;;  %v1402_v12 = vsel %vm1196_vm4, %v1400_v5, %v1401_v6  ;;  %v1585_v13 = vsel %vm1568_vm5, %v1576_v7, %v1584_v8  ;;  %v1592_v16 = vrot.slane %v1590_v11, 3 }
  0x81   : > { %2824 = vmatprep.subr.bf16.mxu1 %v3097_v1 }
  0x82   : > { %2789 = vmatpush3.bf16.msra.mxu0 %v3001_v10  ;;  %v3019_v10 = vld [vmem:[%s3818_s1 + $0x238] sm:$0xff]  }
  0x83   : > { %2790 = vmatprep.subr.bf16.mxu0 %v3097_v1 }
  0x84   : > { %2825 = vmatpush3.bf16.msra.mxu1 %v3004_v18  ;;  %v3020_v18 = vld [vmem:[%s3818_s1 + $0x230] sm:$0xff]  }
  0x85   : > { %2735 = vmatmul.mubr.bf16.gmra.mxu0 %v1011_v15  ;;  %2826 = vmatprep.subr.bf16.mxu1 %v3097_v1  ;;  %v1403_v15 = vrot.slane %v3579_v4, 2 }
  0x86   : > { %2771 = vmatmul.mubr.bf16.gmra.mxu1 %v1201_v19  ;;  %2791 = vmatpush3.bf16.msra.mxu0 %v3003_v20  ;;  %v1593_v20 = vor.u32 %v1592_v16, %v1589_v14 }
  0x87   : > { %2738 = vmatprep.mubr.msk.bf16.mxu0 %vm3098_vm0, %v3097_v1  ;;  %2774 = vmatprep.mubr.msk.bf16.mxu1 %vm3098_vm0, %v3097_v1  ;;  %v1404_v19 = vsel %vm1196_vm4, %v1401_v6, %v1403_v15  ;;  %v1406_v34 = vsel %vm1196_vm4, %v1403_v15, %v1405_v29 }
  0x88   : > { %2792 = vmatprep.subr.bf16.mxu0 %v3097_v1  ;;  %2827 = vmatpush3.bf16.msra.mxu1 %v3006_v23  ;;  %v3022_v23 = vld [vmem:[%s3818_s1 + $0x228] sm:$0xff]   ;;  %v1594_v24 = vsel %vm1568_vm5, %v1584_v8, %v1593_v20 }
  0x89   : > { %2828 = vmatprep.subr.bf16.mxu1 %v3097_v1 }
  0x8a   : > { %2793 = vmatpush3.bf16.msra.mxu0 %v3005_v25  ;;  %v1598_v25 = vrot.slane %v1596_v21, 2 }
  0x8b   : > { %2794 = vmatprep.subr.bf16.mxu0 %v3097_v1 }
  0x8c   : > { %2829 = vmatpush3.bf16.msra.mxu1 %v3008_v30  ;;  %v3024_v30 = vld [vmem:[%s3818_s1 + $0x220] sm:$0xff]  }
  0x8d   : > { %2739 = vmatmul.mubr.bf16.gmra.mxu0 %v1020_v31  ;;  %2830 = vmatprep.subr.bf16.mxu1 %v3097_v1  ;;  %v1602_v31 = vor.u32 %v1601_v26, %v1598_v25 }
  0x8e   : > { %2775 = vmatmul.mubr.bf16.gmra.mxu1 %v1203_v27  ;;  %2795 = vmatpush3.bf16.msra.mxu0 %v3007_v32  ;;  %v1605_v32 = vshrl.u32 %v3617_v28, 16 }
  0x8f   : > { %2742 = vmatprep.mubr.msk.bf16.mxu0 %vm3098_vm0, %v3097_v1  ;;  %2778 = vmatprep.mubr.msk.bf16.mxu1 %vm3098_vm0, %v3097_v1  ;;  %v1603_v27 = vsel %vm1568_vm5, %v1593_v20, %v1602_v31 }
  0x90   : > { %2796 = vmatprep.subr.bf16.mxu0 %v3097_v1  ;;  %2831 = vmatpush3.bf16.msra.mxu1 %v3009_v37  ;;  %v1607_v37 = vrot.slane %v1605_v32, 2 }
  0x91   : > { %2832 = vmatprep.subr.bf16.mxu1 %v3097_v1 }
  0x92   : > { %2797 = vmatpush3.bf16.msra.mxu0 %v3010_v39  ;;  %v3639_v39 = vld [vmem:[%s3179_s8 + $0x30] ss:$0 sps:$4 sm:$0x77]   ;;  %v1611_v42 = vor.u32 %v1610_v38, %v1607_v37 }
  0x93   : > { %2798 = vmatprep.subr.bf16.mxu0 %v3097_v1  ;;  %v1617_v44 = vshll.u32 %v3639_v39, 16 }
  0x94   : > { %2833 = vmatpush3.bf16.msra.mxu1 %v3011_v43  ;;  %v1614_v43 = vshrl.u32 %v3639_v39, 16  ;;  %v1612_v48 = vsel %vm1568_vm5, %v1602_v31, %v1611_v42 }
  0x95   : > { %2743 = vmatmul.mubr.bf16.gmra.mxu0 %v1029_v46  ;;  %2834 = vmatprep.subr.bf16.mxu1 %v3097_v1  ;;  %v1408_v46 = vsel %vm1196_vm4, %v1405_v29, %v1407_v40  ;;  %v1619_v50 = vrot.slane %v1617_v44, 3 }
  0x96   : > { %2779 = vmatmul.mubr.bf16.gmra.mxu1 %v1205_v49  ;;  %2746 = vmatprep.mubr.msk.bf16.mxu0 %vm3098_vm0, %v3097_v1  ;;  %v3028_v49 = vld [vmem:[%s3818_s1 + $0x208] sm:$0xff]  }
  0x97   : > { %2782 = vmatprep.mubr.msk.bf16.mxu1 %vm3098_vm0, %v3097_v1  ;;  %2799 = vmatpush3.bf16.msra.mxu0 %v3012_v36  ;;  %v1616_v36 = vrot.slane %v1614_v43, 2 }
  0x98   : > { %2835 = vmatpush3.bf16.msra.mxu1 %v3014_v52  ;;  %2800 = vmatprep.subr.bf16.mxu0 %v3097_v1  ;;  %v1409_v52 = vrot.slane %v3029_v47, 2 }
  0x99   : > { %2836 = vmatprep.subr.bf16.mxu1 %v3097_v1  ;;  %v1620_v53 = vor.u32 %v1619_v50, %v1616_v36 }
  0x9a   : > { %v1410_v56 = vsel %vm1196_vm4, %v1407_v40, %v1409_v52 }
  0x9b   : > { %2801 = vmatpush3.bf16.msra.mxu0 %v3015_v55  ;;  %v1758_v55 = vld [vmem:[%s3179_s8 + $0x8] sm:$0x8]  ;;  %v1621_v58 = vsel %vm1568_vm5, %v1611_v42, %v1620_v53 }
  0x9c   : > { %2837 = vmatpush3.bf16.msra.mxu1 %v3016_v60  ;;  %2858 = vmatprep.subr.bf16.mxu0 %v3097_v1  ;;  %v2392_v57 = vcombine.low %v1758_v55, %v3545_v45  ;;  %v1781_v60 = vrot.slane %v3556_v51, 3  ;;  %v1787_v45 = vrot.slane %v3617_v28, 3  ;;  %v1789_v51 = vrot.slane %v3639_v39, 3 }
  0x9d   : > { %2747 = vmatmul.mubr.bf16.gmra.mxu0 %v1038_v61  ;;  %2894 = vmatprep.subr.bf16.mxu1 %v3097_v1  ;;  %v1785_v61 = vrot.slane %v3596_v17, 3 }
  0x9e   : > { %2783 = vmatmul.mubr.bf16.gmra.mxu1 %v1207_v62  ;;  %2802 = vmatprep.mubr.msk.bf16.mxu0 %vm3098_vm0, %v3097_v1  ;;  %v1780_v59 = vrot.slane %v2392_v57, 3  ;;  %v1784_v2 = vsel %vm1779_vm6, %v1781_v60, %v1783_v0  ;;  %v1790_v3 = vsel %vm1779_vm6, %v1787_v45, %v1789_v51 }
  0x9f   : > { %2838 = vmatprep.mubr.msk.bf16.mxu1 %vm3098_vm0, %v3097_v1  ;;  %v1788_v63 = vsel %vm1779_vm6, %v1785_v61, %v1787_v45  ;;  %v1786_v5 = vsel %vm1779_vm6, %v1783_v0, %v1785_v61 }
  0xa0   : > { %v1782_v62 = vsel %vm1779_vm6, %v1780_v59, %v1781_v60 }
  0xa5   : > { %2803 = vmatmul.mubr.bf16.vlgmr.msra.gmra.mxu0 %v1402_v12 }
  0xa6   : > { %2839 = vmatmul.mubr.bf16.vlgmr.msra.gmra.mxu1 %v1585_v13  ;;  %2859 = vmatpush3.bf16.msra.mxu0 %v3019_v10 }
  0xa7   : > { %2860 = vmatprep.subr.bf16.mxu0 %v3097_v1  ;;  %2806 = vmatprep.mubr.msk.bf16.mxu0 %vm3098_vm0, %v3097_v1 }
  0xa8   : > { %2842 = vmatprep.mubr.msk.bf16.mxu1 %vm3098_vm0, %v3097_v1  ;;  %2902 = vmatpush3.bf16.msra.mxu1 %v3019_v10 }
  0xa9   : > { %2895 = vmatprep.subr.bf16.mxu1 %v3097_v1 }
  0xaa   : > { %2861 = vmatpush3.bf16.msra.mxu0 %v3020_v18 }
  0xab   : > { %2862 = vmatprep.subr.bf16.mxu0 %v3097_v1 }
  0xac   : > { %2903 = vmatpush3.bf16.msra.mxu1 %v3020_v18 }
  0xad   : > { %2807 = vmatmul.mubr.bf16.gmra.mxu0 %v1404_v19  ;;  %2896 = vmatprep.subr.bf16.mxu1 %v3097_v1 }
  0xae   : > { %2843 = vmatmul.mubr.bf16.gmra.mxu1 %v1594_v24  ;;  %2863 = vmatpush3.bf16.msra.mxu0 %v3022_v23 }
  0xaf   : > { %2810 = vmatprep.mubr.msk.bf16.mxu0 %vm3098_vm0, %v3097_v1  ;;  %2846 = vmatprep.mubr.msk.bf16.mxu1 %vm3098_vm0, %v3097_v1 }
  0xb0   : > { %2864 = vmatprep.subr.bf16.mxu0 %v3097_v1  ;;  %2904 = vmatpush3.bf16.msra.mxu1 %v3022_v23 }
  0xb1   : > { %2897 = vmatprep.subr.bf16.mxu1 %v3097_v1 }
  0xb2   : > { %2865 = vmatpush3.bf16.msra.mxu0 %v3024_v30 }
  0xb3   : > { %2866 = vmatprep.subr.bf16.mxu0 %v3097_v1 }
  0xb4   : > { %2905 = vmatpush3.bf16.msra.mxu1 %v3024_v30 }
  0xb5   : > { %2811 = vmatmul.mubr.bf16.gmra.mxu0 %v1406_v34  ;;  %2898 = vmatprep.subr.bf16.mxu1 %v3097_v1 }
  0xb6   : > { %2847 = vmatmul.mubr.bf16.gmra.mxu1 %v1603_v27  ;;  %2867 = vmatpush3.bf16.msra.mxu0 %v3025_v35 }
  0xb7   : > { %2814 = vmatprep.mubr.msk.bf16.mxu0 %vm3098_vm0, %v3097_v1  ;;  %2850 = vmatprep.mubr.msk.bf16.mxu1 %vm3098_vm0, %v3097_v1 }
  0xb8   : > { %2906 = vmatpush3.bf16.msra.mxu1 %v3025_v35  ;;  %2868 = vmatprep.subr.bf16.mxu0 %v3097_v1 }
  0xb9   : > { %2899 = vmatprep.subr.bf16.mxu1 %v3097_v1 }
  0xba   : > { %2869 = vmatpush3.bf16.msra.mxu0 %v3027_v41 }
  0xbb   : > { %2870 = vmatprep.subr.bf16.mxu0 %v3097_v1 }
  0xbc   : > { %2907 = vmatpush3.bf16.msra.mxu1 %v3027_v41 }
  0xbd   : > { %2815 = vmatmul.mubr.bf16.gmra.mxu0 %v1408_v46  ;;  %2900 = vmatprep.subr.bf16.mxu1 %v3097_v1 }
  0xbe   : > { %2851 = vmatmul.mubr.bf16.gmra.mxu1 %v1612_v48  ;;  %2818 = vmatprep.mubr.msk.bf16.mxu0 %vm3098_vm0, %v3097_v1 }
  0xbf   : > { %2854 = vmatprep.mubr.msk.bf16.mxu1 %vm3098_vm0, %v3097_v1  ;;  %2871 = vmatpush3.bf16.msra.mxu0 %v3028_v49 }
  0xc0   : > { %2908 = vmatpush3.bf16.msra.mxu1 %v3028_v49  ;;  %2872 = vmatprep.subr.bf16.mxu0 %v3097_v1 }
  0xc1   : > { %2901 = vmatprep.subr.bf16.mxu1 %v3097_v1 }
  0xc3   : > { %2873 = vmatpush3.bf16.msra.mxu0 %v3031_v54 }
  0xc4   : > { %2909 = vmatpush3.bf16.msra.mxu1 %v3031_v54 }
  0xc5   : > { %2819 = vmatmul.mubr.bf16.gmra.mxu0 %v1410_v56 }
  0xc6   : > { %2855 = vmatmul.mubr.bf16.gmra.mxu1 %v1621_v58  ;;  %2874 = vmatprep.mubr.msk.bf16.mxu0 %vm3098_vm0, %v3097_v1 }
  0xc7   : > { %2886 = vmatprep.mubr.msk.bf16.mxu1 %vm3098_vm0, %v3097_v1 }
  0xcd   : > { %2875 = vmatmul.mubr.bf16.vlgmr.msra.gmra.mxu0 %v1782_v62 }
  0xce   : > { %2887 = vmatmul.mubr.bf16.vlgmr.msra.gmra.mxu1 %v1788_v63  ;;  %2878 = vmatprep.mubr.msk.bf16.mxu0 %vm3098_vm0, %v3097_v1 }
  0xcf   : > { %2890 = vmatprep.mubr.msk.bf16.mxu1 %vm3098_vm0, %v3097_v1 }
  0xd5   : > { %2879 = vmatmul.mubr.bf16.gmra.mxu0 %v1784_v2 }
  0xd6   : > { %2891 = vmatmul.mubr.bf16.gmra.mxu1 %v1790_v3  ;;  %2882 = vmatprep.mubr.msk.bf16.mxu0 %vm3098_vm0, %v3097_v1 }
  0xdd   : > { %2883 = vmatmul.mubr.bf16.gmra.mxu0 %v1786_v5 }
  0xed   : > { %v427_v6 = vpop.f32.mrf.mxu0 }
  0xee   : > { %v553_v7 = vpop.f32.mrf.mxu1 }
  0xef   : > { %v554_v4 = vadd.f32 %v553_v7, %v427_v6  ;;  %v2588_v8 = vpop.f32.mrf.mxu0 }
  0xf0   : > { %v2624_v9 = vpop.f32.mrf.mxu1 }
  0xf1   : > { %v430_v11 = vpop.f32.mrf.mxu0 }
  0xf2   : > { %v556_v12 = vpop.f32.mrf.mxu1 }
  0xf3   : > { %v557_v10 = vadd.f32 %v556_v12, %v430_v11  ;;  %v2589_v13 = vpop.f32.mrf.mxu0 }
  0xf4   : > { %v2625_v14 = vpop.f32.mrf.mxu1 }
  0xf5   : > { %v435_v16 = vpop.f32.mrf.mxu0 }
  0xf6   : > { %v561_v17 = vpop.f32.mrf.mxu1 }
  0xf7   : > { %v562_v18 = vadd.f32 %v561_v17, %v435_v16  ;;  %v2592_v15 = vpop.f32.mrf.mxu0 }
  0xf8   : > { %v2628_v20 = vpop.f32.mrf.mxu1 }
  0xf9   : > { %v438_v21 = vpop.f32.mrf.mxu0 }
  0xfa   : > { %v564_v1 = vpop.f32.mrf.mxu1 }
  0xfb   : > { %v565_v22 = vadd.f32 %v564_v1, %v438_v21  ;;  %v2593_v19 = vpop.f32.mrf.mxu0 }
  0xfc   : > { %v2629_v23 = vpop.f32.mrf.mxu1 }
  0xfd   : > { %v443_v24 = vpop.f32.mrf.mxu0 }
  0xfe   : > { %v569_v25 = vpop.f32.mrf.mxu1 }
  0xff   : > { %v570_v26 = vadd.f32 %v569_v25, %v443_v24  ;;  %v2596_v28 = vpop.f32.mrf.mxu0 }
 0x100   : > { %v2632_v29 = vpop.f32.mrf.mxu1 }
 0x101   : > { %v446_v30 = vpop.f32.mrf.mxu0 }
 0x102   : > { %v572_v31 = vpop.f32.mrf.mxu1 }
 0x103   : > { %v573_v32 = vadd.f32 %v572_v31, %v446_v30  ;;  %v2597_v33 = vpop.f32.mrf.mxu0 }
 0x104   : > { %v2633_v34 = vpop.f32.mrf.mxu1 }
 0x105   : > { %v451_v35 = vpop.f32.mrf.mxu0 }
 0x106   : > { %v577_v27 = vpop.f32.mrf.mxu1 }
 0x107   : > { %v578_v37 = vadd.f32 %v577_v27, %v451_v35  ;;  %v2600_v38 = vpop.f32.mrf.mxu0 }
 0x108   : > { %v2636_v39 = vpop.f32.mrf.mxu1 }
 0x109   : > { %v454_v40 = vpop.f32.mrf.mxu0 }
 0x10a   : > { %v580_v41 = vpop.f32.mrf.mxu1 }
 0x10b   : > { %v581_v42 = vadd.f32 %v580_v41, %v454_v40  ;;  %v2601_v43 = vpop.f32.mrf.mxu0 }
 0x10c   : > { %v2637_v44 = vpop.f32.mrf.mxu1 }
 0x10d   : > { %v459_v46 = vpop.f32.mrf.mxu0 }
 0x10e   : > { %v585_v47 = vpop.f32.mrf.mxu1 }
 0x10f   : > { %v586_v48 = vadd.f32 %v585_v47, %v459_v46  ;;  %v2604_v49 = vpop.f32.mrf.mxu0 }
 0x110   : > { %v2640_v36 = vpop.f32.mrf.mxu1 }
 0x111   : > { %v462_v50 = vpop.f32.mrf.mxu0 }
 0x112   : > { %v588_v52 = vpop.f32.mrf.mxu1 }
 0x113   : > { %v589_v53 = vadd.f32 %v588_v52, %v462_v50  ;;  %v2605_v54 = vpop.f32.mrf.mxu0 }
 0x114   : > { %v2641_v55 = vpop.f32.mrf.mxu1 }
 0x115   : > { %v712_v56 = vpop.f32.mrf.mxu0 }
 0x116   : > { %v751_v57 = vadd.f32 %v712_v56, %v554_v4  ;;  %v915_v58 = vpop.f32.mrf.mxu1 }
 0x117   : > { %v2660_v59 = vpop.f32.mrf.mxu0 }
 0x118   : > { %v954_v60 = vadd.f32 %v915_v58, %v751_v57  ;;  %v2696_v61 = vpop.f32.mrf.mxu1 }
 0x119   : > { %v715_v45 = vpop.f32.mrf.mxu0 }
 0x11a   : > { %v752_v62 = vadd.f32 %v715_v45, %v557_v10  ;;  %v918_v63 = vpop.f32.mrf.mxu1 }
 0x11b   : > { %v2661_v0 = vpop.f32.mrf.mxu0 }
 0x11c   : > { %v955_v51 = vadd.f32 %v918_v63, %v752_v62  ;;  %v2697_v2 = vpop.f32.mrf.mxu1 }
 0x11d   : > { %v720_v3 = vpop.f32.mrf.mxu0 }
 0x11e   : > { %v753_v5 = vadd.f32 %v720_v3, %v562_v18  ;;  %v923_v6 = vpop.f32.mrf.mxu1 }
 0x11f   : > { %v2664_v7 = vpop.f32.mrf.mxu0 }
 0x120   : > { %v956_v8 = vadd.f32 %v923_v6, %v753_v5  ;;  %v2700_v9 = vpop.f32.mrf.mxu1 }
 0x121   : > { %v723_v11 = vpop.f32.mrf.mxu0 }
 0x122   : > { %v754_v12 = vadd.f32 %v723_v11, %v565_v22  ;;  %v926_v13 = vpop.f32.mrf.mxu1 }
 0x123   : > { %v2665_v4 = vpop.f32.mrf.mxu0 }
 0x124   : > { %v957_v14 = vadd.f32 %v926_v13, %v754_v12  ;;  %v2701_v16 = vpop.f32.mrf.mxu1 }
 0x125   : > { %v728_v17 = vpop.f32.mrf.mxu0 }
 0x126   : > { %v755_v15 = vadd.f32 %v728_v17, %v570_v26  ;;  %v931_v20 = vpop.f32.mrf.mxu1 }
 0x127   : > { %v2668_v10 = vpop.f32.mrf.mxu0 }
 0x128   : > { %v958_v21 = vadd.f32 %v931_v20, %v755_v15  ;;  %v2704_v1 = vpop.f32.mrf.mxu1 }
 0x129   : > { %v731_v19 = vpop.f32.mrf.mxu0 }
 0x12a   : > { %v756_v23 = vadd.f32 %v731_v19, %v573_v32  ;;  %v934_v24 = vpop.f32.mrf.mxu1 }
 0x12b   : > { %v2669_v18 = vpop.f32.mrf.mxu0 }
 0x12c   : > { %v959_v25 = vadd.f32 %v934_v24, %v756_v23  ;;  %v2705_v28 = vpop.f32.mrf.mxu1 }
 0x12d   : > { %v736_v29 = vpop.f32.mrf.mxu0 }
 0x12e   : > { %v757_v30 = vadd.f32 %v736_v29, %v578_v37  ;;  %v939_v31 = vpop.f32.mrf.mxu1 }
 0x12f   : > { %v2672_v22 = vpop.f32.mrf.mxu0 }
 0x130   : > { %v3695_v33 = vadd.f32 %v939_v31, %v757_v30  ;;  %v2708_v34 = vpop.f32.mrf.mxu1 }
 0x131   : > { %v739_v35 = vpop.f32.mrf.mxu0 }
 0x132   : > { %v758_v27 = vadd.f32 %v739_v35, %v581_v42  ;;  %v942_v26 = vpop.f32.mrf.mxu1 }
 0x133   : > { %v2673_v38 = vpop.f32.mrf.mxu0 }
 0x134   : > { %v3697_v39 = vadd.f32 %v942_v26, %v758_v27  ;;  %v2709_v40 = vpop.f32.mrf.mxu1 }
 0x135   : > { %v744_v41 = vpop.f32.mrf.mxu0 }
 0x136   : > { %v759_v32 = vadd.f32 %v744_v41, %v586_v48  ;;  %v947_v43 = vpop.f32.mrf.mxu1 }
 0x137   : > { %v2676_v44 = vpop.f32.mrf.mxu0 }
 0x138   : > { %v3699_v46 = vadd.f32 %v947_v43, %v759_v32  ;;  %v2712_v47 = vpop.f32.mrf.mxu1 }
 0x139   : > { %v747_v37 = vpop.f32.mrf.mxu0 }
 0x13a   : > { %v760_v49 = vadd.f32 %v747_v37, %v589_v53  ;;  %v950_v36 = vpop.f32.mrf.mxu1 }
 0x13b   : > { %v2677_v50 = vpop.f32.mrf.mxu0 }
 0x13c   : > { %v3701_v52 = vadd.f32 %v950_v36, %v760_v49  ;;  %v2713_v54 = vpop.f32.mrf.mxu1 }
 0x13d   : > { %v1126_v42 = vpop.f32.mrf.mxu0 }
 0x13e   : > { %v1165_v55 = vadd.f32 %v1126_v42, %v954_v60  ;;  %v1295_v56 = vpop.f32.mrf.mxu1 }
 0x13f   : > { %v2732_v57 = vpop.f32.mrf.mxu0 }
 0x140   : > { %v3703_v58 = vadd.f32 %v1295_v56, %v1165_v55  ;;  %v2768_v59 = vpop.f32.mrf.mxu1 }
 0x141   : > { %v1129_v48 = vpop.f32.mrf.mxu0 }
 0x142   : > { %v1166_v61 = vadd.f32 %v1129_v48, %v955_v51  ;;  %v1298_v45 = vpop.f32.mrf.mxu1 }
 0x143   : > { %v2733_v62 = vpop.f32.mrf.mxu0 }
 0x144   : > { %v3705_v63 = vadd.f32 %v1298_v45, %v1166_v61  ;;  %v2769_v0 = vpop.f32.mrf.mxu1 }
 0x145   : > { %v1134_v53 = vpop.f32.mrf.mxu0 }
 0x146   : > { %v1167_v2 = vadd.f32 %v1134_v53, %v956_v8  ;;  %v1303_v3 = vpop.f32.mrf.mxu1 }
 0x147   : > { %v2736_v5 = vpop.f32.mrf.mxu0 }
 0x148   : > { %v3707_v6 = vadd.f32 %v1303_v3, %v1167_v2  ;;  %v2772_v7 = vpop.f32.mrf.mxu1 }
 0x149   : > { %v1137_v60 = vpop.f32.mrf.mxu0 }
 0x14a   : > { %v1168_v9 = vadd.f32 %v1137_v60, %v957_v14  ;;  %v1306_v11 = vpop.f32.mrf.mxu1 }
 0x14b   : > { %v2737_v12 = vpop.f32.mrf.mxu0 }
 0x14c   : > { %v3709_v13 = vadd.f32 %v1306_v11, %v1168_v9  ;;  %v2773_v4 = vpop.f32.mrf.mxu1 }
 0x14d   : > { %v1142_v51 = vpop.f32.mrf.mxu0 }
 0x14e   : > { %v1169_v16 = vadd.f32 %v1142_v51, %v958_v21  ;;  %v1311_v17 = vpop.f32.mrf.mxu1 }
 0x14f   : > { %v2740_v15 = vpop.f32.mrf.mxu0 }
 0x150   : > { %v3711_v20 = vadd.f32 %v1311_v17, %v1169_v16  ;;  %v2776_v10 = vpop.f32.mrf.mxu1 }
 0x151   : > { %v1145_v8 = vpop.f32.mrf.mxu0 }
 0x152   : > { %v1170_v1 = vadd.f32 %v1145_v8, %v959_v25  ;;  %v1314_v19 = vpop.f32.mrf.mxu1 }
 0x153   : > { %v2741_v23 = vpop.f32.mrf.mxu0 }
 0x154   : > { %v3713_v24 = vadd.f32 %v1314_v19, %v1170_v1  ;;  %v2777_v18 = vpop.f32.mrf.mxu1 }
 0x155   : > { %v1150_v14 = vpop.f32.mrf.mxu0 }
 0x156   : > { %v1319_v28 = vpop.f32.mrf.mxu1  ;;  %v1171_v17 = vadd.f32 %v1150_v14, %v3695_v33 }
 0x157   : > { %v2744_v29 = vpop.f32.mrf.mxu0 }
 0x158   : > { %v2780_v30 = vpop.f32.mrf.mxu1  ;;  %v1340_v19 = vadd.f32 %v1319_v28, %v1171_v17 }
 0x159   : > { %v1153_v31 = vpop.f32.mrf.mxu0 }
 0x15a   : > { %v1322_v22 = vpop.f32.mrf.mxu1  ;;  %v1172_v23 = vadd.f32 %v1153_v31, %v3697_v39  ;;  %v3739_v39 = vld [vmem:[%s3819_s2] ss:$0 sm:$0xff] }
 0x15b   : > { %v2745_v34 = vpop.f32.mrf.mxu0 }
 0x15c   : > { %v2781_v21 = vpop.f32.mrf.mxu1 }
 0x15d   : > { %v1158_v35 = vpop.f32.mrf.mxu0 }
 0x15e   : > { %v1327_v27 = vpop.f32.mrf.mxu1 }
 0x15f   : > { %v2748_v26 = vpop.f32.mrf.mxu0 }
 0x160   : > { %v2784_v38 = vpop.f32.mrf.mxu1 }
 0x161   : > { %v1161_v40 = vpop.f32.mrf.mxu0  ;;  %v1341_v38 = vadd.f32 %v1322_v22, %v1172_v23 }
 0x162   : > { %v3715_v41 = vpop.f32.mrf.mxu1  ;;  %v1174_v22 = vadd.f32 %v1161_v40, %v3701_v52 }
 0x163   : > { %v2749_v25 = vpop.f32.mrf.mxu0 }
 0x164   : > { %v2785_v32 = vpop.f32.mrf.mxu1  ;;  %v1173_v25 = vadd.f32 %v1158_v35, %v3699_v46  ;;  %v1343_v52 = vadd.f32 %v3715_v41, %v1174_v22 }
 0x165   : > { %v1498_v43 = vpop.f32.mrf.mxu0 }
 0x166   : > { %v1709_v44 = vpop.f32.mrf.mxu1  ;;  %v1537_v29 = vadd.f32 %v1498_v43, %v3703_v58  ;;  %v1342_v43 = vadd.f32 %v1327_v27, %v1173_v25 }
 0x167   : > { %v2804_v47 = vpop.f32.mrf.mxu0 }
 0x168   : > { %v2840_v37 = vpop.f32.mrf.mxu1  ;;  %v1748_v47 = vadd.f32 %v1709_v44, %v1537_v29 }
 0x169   : > { %v1501_v49 = vpop.f32.mrf.mxu0 }
 0x16a   : > { %v1712_v36 = vpop.f32.mrf.mxu1  ;;  %v1538_v33 = vadd.f32 %v1501_v49, %v3705_v63 }
 0x16b   : > { %v2805_v50 = vpop.f32.mrf.mxu0 }
 0x16c   : > { %v2841_v54 = vpop.f32.mrf.mxu1  ;;  %v1749_v35 = vadd.f32 %v1712_v36, %v1538_v33 }
 0x16d   : > { %v1506_v42 = vpop.f32.mrf.mxu0 }
 0x16e   : > { %v3717_v55 = vpop.f32.mrf.mxu1  ;;  %v1539_v44 = vadd.f32 %v1506_v42, %v3707_v6 }
 0x16f   : > { %v2808_v56 = vpop.f32.mrf.mxu0 }
 0x170   : > { %v2844_v57 = vpop.f32.mrf.mxu1  ;;  %v1750_v42 = vadd.f32 %v3717_v55, %v1539_v44 }
 0x171   : > { %v3719_v59 = vpop.f32.mrf.mxu0 }
 0x172   : > { %v3721_v48 = vpop.f32.mrf.mxu1 }
 0x173   : > { %v2809_v61 = vpop.f32.mrf.mxu0 }
 0x174   : > { %v2845_v45 = vpop.f32.mrf.mxu1 }
 0x175   : > { %v3723_v62 = vpop.f32.mrf.mxu0 }
 0x176   : > { %v3725_v0 = vpop.f32.mrf.mxu1 }
 0x177   : > { %v2812_v53 = vpop.f32.mrf.mxu0 }
 0x178   : > { %v2848_v2 = vpop.f32.mrf.mxu1 }
 0x179   : > { %v3727_v3 = vpop.f32.mrf.mxu0 }
 0x17a   : > { %v3729_v5 = vpop.f32.mrf.mxu1 }
 0x17b   : > { %v2813_v7 = vpop.f32.mrf.mxu0 }
 0x17c   : > { %v2849_v60 = vpop.f32.mrf.mxu1  ;;  %v1540_v7 = vadd.f32 %v3719_v59, %v3709_v13  ;;  %v1541_v13 = vadd.f32 %v3723_v62, %v3711_v20 }
 0x17d   : > { %v1522_v9 = vpop.f32.mrf.mxu0 }
 0x17e   : > { %v1733_v11 = vpop.f32.mrf.mxu1  ;;  %v1543_v34 = vadd.f32 %v1522_v9, %v1340_v19 }
 0x17f   : > { %v2816_v12 = vpop.f32.mrf.mxu0 }
 0x180   : > { %v2852_v4 = vpop.f32.mrf.mxu1  ;;  %v1754_v37 = vadd.f32 %v1733_v11, %v1543_v34 }
 0x181   : > { %v1525_v51 = vpop.f32.mrf.mxu0 }
 0x182   : > { %v1736_v16 = vpop.f32.mrf.mxu1  ;;  %v1544_v50 = vadd.f32 %v1525_v51, %v1341_v38 }
 0x183   : > { %v2817_v15 = vpop.f32.mrf.mxu0 }
 0x184   : > { %v2853_v10 = vpop.f32.mrf.mxu1  ;;  %v1755_v56 = vadd.f32 %v1736_v16, %v1544_v50 }
 0x185   : > { %v1530_v8 = vpop.f32.mrf.mxu0 }
 0x186   : > { %v1741_v1 = vpop.f32.mrf.mxu1  ;;  %v1545_v57 = vadd.f32 %v1530_v8, %v1342_v43 }
 0x187   : > { %v2820_v18 = vpop.f32.mrf.mxu0 }
 0x188   : > { %v2856_v30 = vpop.f32.mrf.mxu1  ;;  %v1756_v12 = vadd.f32 %v1741_v1, %v1545_v57  ;;  %v1751_v1 = vadd.f32 %v3721_v48, %v1540_v7  ;;  %v1752_v48 = vadd.f32 %v3725_v0, %v1541_v13 }
 0x189   : > { %v1533_v21 = vpop.f32.mrf.mxu0 }
 0x18a   : > { %v1744_v26 = vpop.f32.mrf.mxu1  ;;  %v1546_v4 = vadd.f32 %v1533_v21, %v1343_v52 }
 0x18b   : > { %v2821_v32 = vpop.f32.mrf.mxu0 }
 0x18c   : > { %v2857_v14 = vpop.f32.mrf.mxu1  ;;  %v1757_v34 = vadd.f32 %v1744_v26, %v1546_v4  ;;  %v1542_v26 = vadd.f32 %v3727_v3, %v3713_v24 }
 0x18d   : > { %v1878_v28 = vpop.f32.mrf.mxu0 }
 0x18e   : > { %v1917_v58 = vadd.f32 %v1878_v28, %v1748_v47  ;;  %v1902_v31 = vpop.f32.mrf.mxu1  ;;  %v1753_v3 = vadd.f32 %v3729_v5, %v1542_v26 }
 0x18f   : > { %v1923_v54 = vadd.f32 %v1902_v31, %v1754_v37  ;;  %v2876_v46 = vpop.f32.mrf.mxu0 }
 0x190   : > { %v3744_v63 = vadd.f32 %v3739_v39, %v1917_v58  ;;  %v2888_v49 = vpop.f32.mrf.mxu1 }
 0x191   : > { %v3747_v61 = vadd.f32 %v3739_v39, %v1923_v54  ;;  %v1881_v45 = vpop.f32.mrf.mxu0 }
 0x192   : > { %v1944_v53 = vmax.f32 %v3744_v63, -60.0  ;;  %v1918_v27 = vadd.f32 %v1881_v45, %v1749_v35  ;;  %v1905_v2 = vpop.f32.mrf.mxu1 }
 0x193   : > { %v1950_v40 = vmax.f32 %v3747_v61, -60.0  ;;  %v1924_v36 = vadd.f32 %v1905_v2, %v1755_v56  ;;  %v2877_v6 = vpop.f32.mrf.mxu0 }
 0x194   : > { %v1954_v60 = vsub.f32 0.0, %v1944_v53  ;;  %v3756_v9 = vadd.f32 %v3739_v39, %v1918_v27  ;;  %v2889_v11 = vpop.f32.mrf.mxu1 }
 0x195   : > { %v1960_v51 = vsub.f32 0.0, %v1950_v40  ;;  %v3759_v16 = vadd.f32 %v3739_v39, %v1924_v36  ;;  %v1886_v41 = vpop.f32.mrf.mxu0 }
 0x196   : > { %v1964_v17 = vmul.f32 1.442695, %v1954_v60  ;;  %v1945_v15 = vmax.f32 %v3756_v9, -60.0  ;;  %v1919_v10 = vadd.f32 %v1886_v41, %v1750_v42  ;;  %v1910_v55 = vpop.f32.mrf.mxu1 }
 0x197   : > { %v1976_v59 = vmul.f32 1.442695, %v1960_v51  ;;  %v1951_v8 = vmax.f32 %v3759_v16, -60.0  ;;  %v1925_v19 = vadd.f32 %v1910_v55, %v1756_v12  ;;  %v2880_v23 = vpop.f32.mrf.mxu0 }
 0x198   : > { %3033 = vpow2.f32 %v1964_v17  ;;  %v1955_v18 = vsub.f32 0.0, %v1945_v15  ;;  %v3767_v29 = vadd.f32 %v3739_v39, %v1919_v10  ;;  %v2892_v30 = vpop.f32.mrf.mxu1 }
 0x199   : > { %3035 = vpow2.f32 %v1976_v59  ;;  %v1961_v21 = vsub.f32 0.0, %v1951_v8  ;;  %v3770_v38 = vadd.f32 %v3739_v39, %v1925_v19  ;;  %v1889_v20 = vpop.f32.mrf.mxu0 }
 0x19a   : > { %v1966_v62 = vmul.f32 1.442695, %v1955_v18  ;;  %v1946_v25 = vmax.f32 %v3767_v29, -60.0  ;;  %v1920_v32 = vadd.f32 %v1889_v20, %v1751_v1  ;;  %v1913_v47 = vpop.f32.mrf.mxu1 }
 0x19b   : > { %v1978_v33 = vmul.f32 1.442695, %v1961_v21  ;;  %v1952_v14 = vmax.f32 %v3770_v38, -60.0  ;;  %v1926_v37 = vadd.f32 %v1913_v47, %v1757_v34  ;;  %v2881_v50 = vpop.f32.mrf.mxu0 }
 0x19c   : > { %3037 = vpow2.f32 %v1966_v62  ;;  %v1956_v28 = vsub.f32 0.0, %v1946_v25  ;;  %v3778_v58 = vadd.f32 %v3739_v39, %v1920_v32  ;;  %v2893_v31 = vpop.f32.mrf.mxu1 }
 0x19d   : > { %3039 = vpow2.f32 %v1978_v33  ;;  %v1962_v43 = vsub.f32 0.0, %v1952_v14  ;;  %v3781_v22 = vadd.f32 %v3739_v39, %v1926_v37  ;;  %v1894_v0 = vpop.f32.mrf.mxu0 }
 0x19e   : > { %v1968_v54 = vmul.f32 1.442695, %v1956_v28  ;;  %v1947_v46 = vmax.f32 %v3778_v58, -60.0  ;;  %v1921_v35 = vadd.f32 %v1894_v0, %v1752_v48 }
 0x19f   : > { %v1980_v44 = vmul.f32 1.442695, %v1962_v43  ;;  %v1953_v49 = vmax.f32 %v3781_v22, -60.0  ;;  %v2884_v24 = vpop.f32.mrf.mxu0 }
 0x1a0   : > { %3041 = vpow2.f32 %v1968_v54  ;;  %v1957_v56 = vsub.f32 0.0, %v1947_v46  ;;  %v3787_v57 = vadd.f32 %v3739_v39, %v1921_v35 }
 0x1a1   : > { %3043 = vpow2.f32 %v1980_v44  ;;  %v1963_v45 = vsub.f32 0.0, %v1953_v49  ;;  %v1897_v53 = vpop.f32.mrf.mxu0 }
 0x1a2   : > { %v1970_v27 = vmul.f32 1.442695, %v1957_v56  ;;  %v1948_v2 = vmax.f32 %v3787_v57, -60.0  ;;  %v1922_v52 = vadd.f32 %v1897_v53, %v1753_v3 }
 0x1a3   : > { %v1982_v40 = vmul.f32 1.442695, %v1963_v45  ;;  %v2885_v36 = vpop.f32.mrf.mxu0 }
 0x1a4   : > { %3045 = vpow2.f32 %v1970_v27  ;;  %v1958_v6 = vsub.f32 0.0, %v1948_v2  ;;  %v3791_v42 = vadd.f32 %v3739_v39, %v1922_v52 }
 0x1a5   : > { %v3034_v5 = vpop.eup %3033  ;;  %3047 = vpow2.f32 %v1982_v40 }
 0x1a6   : > { %v3036_v7 = vpop.eup %3035  ;;  %v1984_v60 = vadd.f32 1.0, %v3034_v5  ;;  %v1972_v11 = vmul.f32 1.442695, %v1958_v6  ;;  %v1949_v12 = vmax.f32 %v3791_v42, -60.0 }
 0x1a7   : > { %v1990_v4 = vadd.f32 1.0, %v3036_v7 }
 0x1a8   : > { %v1959_v51 = vsub.f32 0.0, %v1949_v12  ;;  %3049 = vrcp.f32 %v1984_v60 }
 0x1a9   : > { %v3038_v41 = vpop.eup %3037  ;;  %3051 = vpow2.f32 %v1972_v11 }
 0x1aa   : > { %v3040_v17 = vpop.eup %3039  ;;  %v1985_v15 = vadd.f32 1.0, %v3038_v41  ;;  %v1974_v10 = vmul.f32 1.442695, %v1959_v51  ;;  %3053 = vrcp.f32 %v1990_v4 }
 0x1ab   : > { %v1991_v55 = vadd.f32 1.0, %v3040_v17 }
 0x1ac   : > { %3055 = vrcp.f32 %v1985_v15 }
 0x1ad   : > { %v3042_v39 = vpop.eup %3041  ;;  %3057 = vrcp.f32 %v1991_v55 }
 0x1ae   : > { %v3044_v13 = vpop.eup %3043  ;;  %v1986_v59 = vadd.f32 1.0, %v3042_v39  ;;  %3059 = vpow2.f32 %v1974_v10 }
 0x1af   : > { %v1992_v8 = vadd.f32 1.0, %v3044_v13 }
 0x1b0   : > { %3061 = vrcp.f32 %v1986_v59 }
 0x1b1   : > { %v3046_v19 = vpop.eup %3045  ;;  %3063 = vrcp.f32 %v1992_v8 }
 0x1b2   : > { %v3048_v23 = vpop.eup %3047  ;;  %v1987_v1 = vadd.f32 1.0, %v3046_v19 }
 0x1b3   : > { %v1993_v18 = vadd.f32 1.0, %v3048_v23 }
 0x1b4   : > { %3065 = vrcp.f32 %v1987_v1 }
 0x1b5   : > { %3067 = vrcp.f32 %v1993_v18  ;;  %v3050_v30 = vpop.eup %3049 }
 0x1b6   : > { %v3052_v34 = vpop.eup %3051  ;;  %v2004_v32 = vmul.f32 %v3050_v30, %v3744_v63 }
 0x1b7   : > { %v3054_v21 = vpop.eup %3053  ;;  %v1988_v20 = vadd.f32 1.0, %v3052_v34 }
 0x1b8   : > { %v2010_v33 = vmul.f32 %v3054_v21, %v3747_v61 }
 0x1b9   : > { %v3056_v62 = vpop.eup %3055  ;;  %3069 = vrcp.f32 %v1988_v20 }
 0x1ba   : > { %v3058_v25 = vpop.eup %3057  ;;  %v2005_v47 = vmul.f32 %v3056_v62, %v3756_v9 }
 0x1bb   : > { %v3060_v48 = vpop.eup %3059  ;;  %v2011_v14 = vmul.f32 %v3058_v25, %v3759_v16 }
 0x1bc   : > { %v2427_v37 = vpack.c.bf16 %v2005_v47, %v2004_v32  ;;  %v1989_v50 = vadd.f32 1.0, %v3060_v48 }
 0x1bd   : > { %v2442_v26 = vpack.c.bf16 %v2011_v14, %v2010_v33  ;;  %v3062_v28 = vpop.eup %3061 }
 0x1be   : > { %2428 = vst [vmem:[%s221_s9] sm:$0xff] %v2427_v37   ;;  %3071 = vrcp.f32 %v1989_v50  ;;  %v3064_v63 = vpop.eup %3063  ;;  %v2006_v43 = vmul.f32 %v3062_v28, %v3767_v29 }
 0x1bf   : > { %2451 = vst [vmem:[%s221_s9 + $0x18] sm:$0xff] %v2442_v26   ;;  %v2012_v0 = vmul.f32 %v3064_v63, %v3770_v38 }
 0x1c1   : > { %v3066_v31 = vpop.eup %3065 }
 0x1c2   : > { %v3068_v9 = vpop.eup %3067  ;;  %v2007_v61 = vmul.f32 %v3066_v31, %v3778_v58 }
 0x1c3   : > { %v2013_v54 = vmul.f32 %v3068_v9, %v3781_v22 }
 0x1c4   : > { %v2432_v16 = vpack.c.bf16 %v2007_v61, %v2006_v43 }
 0x1c5   : > { %v2447_v46 = vpack.c.bf16 %v2013_v54, %v2012_v0 }
 0x1c6   : > { %2449 = vst [vmem:[%s221_s9 + $0x8] sm:$0xff] %v2432_v16   ;;  %v3070_v35 = vpop.eup %3069 }
 0x1c7   : > { %2452 = vst [vmem:[%s221_s9 + $0x20] sm:$0xff] %v2447_v46   ;;  %v2008_v49 = vmul.f32 %v3070_v35, %v3787_v57 }
 0x1cb   : > { %v3072_v44 = vpop.eup %3071 }
 0x1cc   : > { %v2009_v24 = vmul.f32 %v3072_v44, %v3791_v42 }
 0x1ce   : > { %v2437_v3 = vpack.c.bf16 %v2009_v24, %v2008_v49 }
 0x1d0   : > { %2450 = vst [vmem:[%s221_s9 + $0x10] sm:$0xff] %v2437_v3  }
 0x1d1 PF: > { %s13_s14 = sadd.s32 1, %s3095_s14   ;;  %s3821_s12 = smov %s3091_s13 }
 0x1d2   : > { %p10_p5 = scmp.ge.s32.totalorder %s13_s14, 4   ;;  %s3822_s13 = smov %s3824_s15 }
 0x1d4   :  { %12 = sbr.rel (!%p10_p5) target bundleno = 2 (0x2), region = 76 }

// kernel: yolov7_backbone.18
= control target key start
LH: loop header
LB: loop body
LE: loop exit
PB: predicated region body
PF: predicated region fallthrough
CT: control target
= control target key end

     0   :  { %s2907_s12 = smov 0   ;;  %s2909_s13 = smov 0   ;;  %s3439_s0 = inlined_call_operand.vmem [shape: bf16[2,32,512], index: 0, kind: input, shape index: {}]   ;;  %s3440_s1 = inlined_call_operand.vmem [shape: bf16[4,512,128], index: 1, kind: input, shape index: {}]   ;;  %s3441_s2 = inlined_call_operand.vmem [shape: f32[1,128], index: 2, kind: input, shape index: {}]   ;;  %s3442_s3 = inlined_call_operand.vmem [shape: bf16[2,24,128], index: 3, kind: output, shape index: {}]  }
   0x1   :  { %s2911_s14 = smov 0  }
   0x2 LB: > { %s25_s15 = sadd.s32 1, %s2881_s13  ;;  %p2081_p0 = scmp.ge.s32.totalorder %s2885_s14, 1  ;;  %s2885_s14 = sphi %s2911_s14, %s13_s14   ;;  %s2881_s13 = sphi %s2909_s13, %s3444_s13   ;;  %s2877_s12 = sphi %s2907_s12, %s3443_s12  }
   0x3   : > { %p27_p1 = scmp.ge.s32.totalorder %s25_s15, 2  ;;  %p168_p2 = scmp.lt.s32.totalorder %s2885_s14, 3 }
   0x5   : > { %s3446_s15 = smov (%p27_p1, %s25_s15), 0  ;;  %p169_p3 = pnand %p2081_p0, %p168_p2 }
   0x6   : > { %p202_p4 = scmp.lt.s32.totalorder (!%p169_p3), %s2877_s12, 1 }
   0x7   : > { %172 = sbr.rel (%p169_p3) target bundleno = 396 (0x18c), region = 32 }
   0xc   : > { %v2697_v0 = vld [vmem:[%s3440_s1 + $0x178] sm:$0xff]   ;;  %v2701_v4 = vld [vmem:[%s3440_s1 + $0x170] sm:$0xff]   ;;  %v2705_v8 = vld [vmem:[%s3440_s1 + $0x168] sm:$0xff]   ;;  %s3448_s12 = smov (!%p202_p4, %s2877_s12), 1  ;;  %vm398_vm0 = vsmask.f32 7424 }
   0xd   : > { %v2698_v1 = vld [vmem:[%s3440_s1 + $0x1f8] sm:$0xff]   ;;  %2448 = vmatprep.subr.bf16.mxu0 %v2697_v0  ;;  %v2702_v5 = vld [vmem:[%s3440_s1 + $0x1f0] sm:$0xff]   ;;  %v2706_v9 = vld [vmem:[%s3440_s1 + $0x1e8] sm:$0xff]   ;;  %s2439_s24 = sshll.u32 %s3448_s12, 6  ;;  %vm1166_vm1 = vsmask.f32 5376 }
   0xe   : > { %v2699_v2 = vld [vmem:[%s3440_s1 + $0x138] sm:$0xff]   ;;  %2476 = vmatprep.subr.bf16.mxu1 %v2698_v1  ;;  %v2703_v6 = vld [vmem:[%s3440_s1 + $0x130] sm:$0xff]   ;;  %v2707_v10 = vld [vmem:[%s3440_s1 + $0x128] sm:$0xff]   ;;  %s3025_s6 = scalar_lea.vmem %s3439_s0, %s2439_s24  ;;  %vm1611_vm2 = vcmask 1044480   ;;  %s2672_s5 = smul.u32 12, %s3448_s12 }
   0xf   : > { %v2700_v3 = vld [vmem:[%s3440_s1 + $0x1b8] sm:$0xff]   ;;  %2449 = vmatpush3.bf16.msra.mxu0 %v2699_v2  ;;  %v2704_v7 = vld [vmem:[%s3440_s1 + $0x1b0] sm:$0xff]   ;;  %v2708_v11 = vld [vmem:[%s3440_s1 + $0x1a8] sm:$0xff]  }
  0x10   : > { %2477 = vmatpush3.bf16.msra.mxu1 %v2700_v3  ;;  %2450 = vmatprep.subr.bf16.mxu0 %v2701_v4  ;;  %v2709_v12 = vld [vmem:[%s3440_s1 + $0x160] sm:$0xff]   ;;  %v2713_v16 = vld [vmem:[%s3440_s1 + $0x158] sm:$0xff]   ;;  %v2717_v20 = vld [vmem:[%s3440_s1 + $0x150] sm:$0xff]   ;;  %s221_s9 = scalar_lea.vmem %s3442_s3, %s2672_s5 }
  0x11   : > { %2478 = vmatprep.subr.bf16.mxu1 %v2702_v5  ;;  %v2710_v13 = vld [vmem:[%s3440_s1 + $0x1e0] sm:$0xff]   ;;  %v2714_v17 = vld [vmem:[%s3440_s1 + $0x1d8] sm:$0xff]   ;;  %v2718_v21 = vld [vmem:[%s3440_s1 + $0x1d0] sm:$0xff]  }
  0x12   : > { %v2711_v14 = vld [vmem:[%s3440_s1 + $0x120] sm:$0xff]   ;;  %v2715_v18 = vld [vmem:[%s3440_s1 + $0x118] sm:$0xff]   ;;  %v2719_v22 = vld [vmem:[%s3440_s1 + $0x110] sm:$0xff]  }
  0x13   : > { %2451 = vmatpush3.bf16.msra.mxu0 %v2703_v6  ;;  %v2712_v15 = vld [vmem:[%s3440_s1 + $0x1a0] sm:$0xff]   ;;  %v2716_v19 = vld [vmem:[%s3440_s1 + $0x198] sm:$0xff]   ;;  %v2720_v23 = vld [vmem:[%s3440_s1 + $0x190] sm:$0xff]  }
  0x14   : > { %2479 = vmatpush3.bf16.msra.mxu1 %v2704_v7  ;;  %2452 = vmatprep.subr.bf16.mxu0 %v2705_v8  ;;  %v2721_v24 = vld [vmem:[%s3440_s1 + $0x148] sm:$0xff]   ;;  %v2725_v28 = vld [vmem:[%s3440_s1 + $0x140] sm:$0xff]   ;;  %v3035_v33 = vld [vmem:[%s3025_s6 + $0x10] sm:$0xff] }
  0x15   : > { %2480 = vmatprep.subr.bf16.mxu1 %v2706_v9  ;;  %v2722_v25 = vld [vmem:[%s3440_s1 + $0x1c8] sm:$0xff]   ;;  %v2726_v29 = vld [vmem:[%s3440_s1 + $0x1c0] sm:$0xff]   ;;  %v299_v35 = vld [vmem:[%s3025_s6 + $0x30] sm:$0x11] }
  0x16   : > { %v2723_v26 = vld [vmem:[%s3440_s1 + $0x108] sm:$0xff]   ;;  %v2727_v30 = vld [vmem:[%s3440_s1 + $0x100] sm:$0xff]   ;;  %v3046_v38 = vld [vmem:[%s3025_s6 + $0x18] sm:$0xff] }
  0x17   : > { %2453 = vmatpush3.bf16.msra.mxu0 %v2707_v10  ;;  %v2724_v27 = vld [vmem:[%s3440_s1 + $0x188] sm:$0xff]   ;;  %v2728_v31 = vld [vmem:[%s3440_s1 + $0x180] sm:$0xff]   ;;  %v300_v42 = vld [vmem:[%s3025_s6 + $0x38] sm:$0x11] }
  0x18   : > { %2481 = vmatpush3.bf16.msra.mxu1 %v2708_v11  ;;  %2454 = vmatprep.subr.bf16.mxu0 %v2709_v12  ;;  %v293_v32 = vld [vmem:[%s3025_s6] sm:$0xff]  ;;  %v294_v37 = vld [vmem:[%s3025_s6 + $0x8] sm:$0xff]  ;;  %v2737_v50 = vld [vmem:[%s3440_s1 + $0x78] sm:$0xff]  }
  0x19   : > { %2482 = vmatprep.subr.bf16.mxu1 %v2710_v13  ;;  %v3038_v34 = vld [vmem:[%s3025_s6 + $0x20] sm:$0xff]  ;;  %v3042_v36 = vcombine.high %v293_v32, %v3035_v33  ;;  %v3049_v39 = vcombine.low %v293_v32, %v3035_v33  ;;  %v3053_v41 = vld [vmem:[%s3025_s6 + $0x28] sm:$0xff]  ;;  %v3057_v43 = vcombine.high %v294_v37, %v3046_v38  ;;  %v3061_v45 = vcombine.low %v294_v37, %v3046_v38  ;;  %v2738_v59 = vld [vmem:[%s3440_s1 + $0xf8] sm:$0xff]  }
  0x1a   : > { %v2154_v40 = vcombine.high %v3038_v34, %v299_v35  ;;  %v2153_v44 = vcombine.low %v3038_v34, %v299_v35  ;;  %v2156_v48 = vcombine.high %v3053_v41, %v300_v42  ;;  %v2155_v58 = vcombine.low %v3053_v41, %v300_v42  ;;  %v2739_v7 = vld [vmem:[%s3440_s1 + $0x38] sm:$0xff]   ;;  %v2741_v10 = vld [vmem:[%s3440_s1 + $0x70] sm:$0xff]   ;;  %v2750_v35 = vld [vmem:[%s3440_s1 + $0xe0] sm:$0xff]  }
  0x1b   : > { %2455 = vmatpush3.bf16.msra.mxu0 %v2711_v14  ;;  %v412_v46 = vshrl.u32 %v3042_v36, 16  ;;  %v414_v47 = vshll.u32 %v3042_v36, 16  ;;  %v400_v49 = vshrl.u32 %v3049_v39, 16  ;;  %v436_v52 = vshrl.u32 %v3057_v43, 16  ;;  %v2740_v14 = vld [vmem:[%s3440_s1 + $0xb8] sm:$0xff]   ;;  %v2751_v37 = vld [vmem:[%s3440_s1 + $0x20] sm:$0xff]  }
  0x1c   : > { %2483 = vmatpush3.bf16.msra.mxu1 %v2712_v15  ;;  %2456 = vmatprep.subr.bf16.mxu0 %v2713_v16  ;;  %v419_v51 = vshll.u32 %v2154_v40, 16  ;;  %v438_v53 = vshll.u32 %v3057_v43, 16  ;;  %v402_v54 = vshll.u32 %v3049_v39, 16  ;;  %v443_v56 = vshll.u32 %v2156_v48, 16  ;;  %v2742_v16 = vld [vmem:[%s3440_s1 + $0xf0] sm:$0xff]   ;;  %v2752_v42 = vld [vmem:[%s3440_s1 + $0xa0] sm:$0xff]  }
  0x1d   : > { %2484 = vmatprep.subr.bf16.mxu1 %v2714_v17  ;;  %v416_v55 = vrot.slane %v414_v47, 1  ;;  %v407_v57 = vshll.u32 %v2153_v44, 16  ;;  %v424_v63 = vshrl.u32 %v3061_v45, 16  ;;  %v426_v3 = vshll.u32 %v3061_v45, 16  ;;  %v2756_v47 = vld [vmem:[%s3440_s1 + $0x98] sm:$0xff]  }
  0x1e   : > { %v421_v60 = vrot.slane %v419_v51, 1  ;;  %v440_v61 = vrot.slane %v438_v53, 1  ;;  %v404_v62 = vrot.slane %v402_v54, 1  ;;  %v445_v1 = vrot.slane %v443_v56, 1  ;;  %v2762_v51 = vld [vmem:[%s3440_s1 + $0xc8] sm:$0xff]   ;;  %v2765_v53 = vld [vmem:[%s3440_s1 + $0x40] sm:$0xff]  }
  0x1f   : > { %2457 = vmatpush3.bf16.msra.mxu0 %v2715_v18  ;;  %v417_v0 = vor.u32 %v416_v55, %v412_v46  ;;  %v409_v2 = vrot.slane %v407_v57, 1  ;;  %v431_v6 = vshll.u32 %v2155_v58, 16  ;;  %v428_v9 = vrot.slane %v426_v3, 1  ;;  %v2743_v18 = vld [vmem:[%s3440_s1 + $0x30] sm:$0xff]   ;;  %v2755_v46 = vld [vmem:[%s3440_s1 + $0x18] sm:$0xff]   ;;  %v2764_v54 = vld [vmem:[%s3440_s1 + $0x88] sm:$0xff]  }
  0x20   : > { %2485 = vmatpush3.bf16.msra.mxu1 %v2716_v19  ;;  %2458 = vmatprep.subr.bf16.mxu0 %v2717_v20  ;;  %v441_v4 = vor.u32 %v440_v61, %v436_v52  ;;  %v405_v5 = vor.u32 %v404_v62, %v400_v49  ;;  %v450_v17 = vshrl.u32 %v2154_v40, 16  ;;  %v456_v19 = vshrl.u32 %v2156_v48, 16  ;;  %v2753_v40 = vld [vmem:[%s3440_s1 + $0x58] sm:$0xff]   ;;  %v2759_v48 = vld [vmem:[%s3440_s1 + $0x10] sm:$0xff]   ;;  %v2761_v49 = vld [vmem:[%s3440_s1 + $0x48] sm:$0xff]  }
  0x21   : > { %2486 = vmatprep.subr.bf16.mxu1 %v2718_v21  ;;  %v422_v8 = vsel %vm398_vm0, %v417_v0, %v421_v60  ;;  %v433_v13 = vrot.slane %v431_v6, 1  ;;  %v429_v15 = vor.u32 %v428_v9, %v424_v63  ;;  %v2745_v21 = vld [vmem:[%s3440_s1 + $0x68] sm:$0xff]   ;;  %v2766_v55 = vld [vmem:[%s3440_s1 + $0xc0] sm:$0xff]   ;;  %v2769_v57 = vld [vmem:[%s3440_s1 + $0x278] sm:$0xff]   ;;  %v2194_v62 = vcombine.high %v3038_v34, %v3038_v34 }
  0x22   : > { %691 = vmatprep.mubr.bf16.mxu0 %v422_v8  ;;  %v446_v11 = vsel %vm398_vm0, %v441_v4, %v445_v1  ;;  %v410_v12 = vsel %vm398_vm0, %v405_v5, %v409_v2  ;;  %v2763_v52 = vld [vmem:[%s3440_s1 + $0x8] sm:$0xff]   ;;  %v2767_v56 = vld [vmem:[%s3440_s1] sm:$0xff]   ;;  %v2773_v61 = vld [vmem:[%s3440_s1 + $0x270] sm:$0xff]   ;;  %v2193_v4 = vcombine.low %v3038_v34, %v3038_v34  ;;  %v2195_v8 = vcombine.low %v3053_v41, %v3053_v41 }
  0x23   : > { %2459 = vmatpush3.bf16.msra.mxu0 %v2719_v22  ;;  %739 = vmatprep.mubr.bf16.mxu1 %v446_v11  ;;  %v434_v20 = vsel %vm398_vm0, %v429_v15, %v433_v13  ;;  %v452_v22 = vor.u32 %v450_v17, %v421_v60  ;;  %v2771_v60 = vld [vmem:[%s3440_s1 + $0x238] sm:$0xff]   ;;  %v2774_v0 = vld [vmem:[%s3440_s1 + $0x2f0] sm:$0xff]   ;;  %v2779_v3 = vld [vmem:[%s3440_s1 + $0x268] sm:$0xff]  }
  0x24   : > { %2487 = vmatpush3.bf16.msra.mxu1 %v2720_v23  ;;  %2460 = vmatprep.subr.bf16.mxu0 %v2721_v24  ;;  %v447_v23 = vshrl.u32 %v2153_v44, 16  ;;  %v2744_v24 = vld [vmem:[%s3440_s1 + $0xb0] sm:$0xff]   ;;  %v2754_v44 = vld [vmem:[%s3440_s1 + $0xd8] sm:$0xff]   ;;  %v2780_v5 = vld [vmem:[%s3440_s1 + $0x2e8] sm:$0xff]  }
  0x25   : > { %2488 = vmatprep.subr.bf16.mxu1 %v2722_v25  ;;  %v458_v25 = vor.u32 %v456_v19, %v445_v1  ;;  %v2772_v63 = vld [vmem:[%s3440_s1 + $0x2b8] sm:$0xff]   ;;  %v2196_v1 = vcombine.high %v3053_v41, %v3053_v41  ;;  %v2782_v6 = vld [vmem:[%s3440_s1 + $0x228] sm:$0xff]   ;;  %v2786_v9 = vld [vmem:[%s3440_s1 + $0x2e0] sm:$0xff]  }
  0x26   : > { %v2789_v11 = vld [vmem:[%s3440_s1 + $0x258] sm:$0xff]   ;;  %v2793_v15 = vld [vmem:[%s3440_s1 + $0x250] sm:$0xff]   ;;  %v2797_v19 = vld [vmem:[%s3440_s1 + $0x248] sm:$0xff]  }
  0x27   : > { %2461 = vmatpush3.bf16.msra.mxu0 %v2723_v26  ;;  %v453_v26 = vshrl.u32 %v2155_v58, 16  ;;  %v2768_v58 = vld [vmem:[%s3440_s1 + $0x80] sm:$0xff]   ;;  %v2794_v17 = vld [vmem:[%s3440_s1 + $0x2d0] sm:$0xff]  }
  0x28   : > { %2489 = vmatpush3.bf16.msra.mxu1 %v2724_v27  ;;  %2462 = vmatprep.subr.bf16.mxu0 %v2725_v28  ;;  %v2746_v27 = vld [vmem:[%s3440_s1 + $0xe8] sm:$0xff]   ;;  %v449_v28 = vor.u32 %v447_v23, %v409_v2  ;;  %v2775_v2 = vld [vmem:[%s3440_s1 + $0x230] sm:$0xff]   ;;  %v2801_v23 = vld [vmem:[%s3440_s1 + $0x240] sm:$0xff]  }
  0x29   : > { %2490 = vmatprep.subr.bf16.mxu1 %v2726_v29  ;;  %v2747_v29 = vld [vmem:[%s3440_s1 + $0x28] sm:$0xff]   ;;  %v455_v32 = vor.u32 %v453_v26, %v433_v13  ;;  %v2790_v13 = vld [vmem:[%s3440_s1 + $0x2d8] sm:$0xff]   ;;  %v2803_v26 = vld [vmem:[%s3440_s1 + $0x200] sm:$0xff]  }
  0x2b   : > { %2463 = vmatpush3.bf16.msra.mxu0 %v2727_v30  ;;  %v2749_v30 = vld [vmem:[%s3440_s1 + $0x60] sm:$0xff]  }
  0x2c   : > { %2491 = vmatpush3.bf16.msra.mxu1 %v2728_v31  ;;  %2504 = vmatprep.subr.bf16.mxu0 %v2737_v50  ;;  %v2748_v31 = vld [vmem:[%s3440_s1 + $0xa8] sm:$0xff]   ;;  %v2760_v50 = vld [vmem:[%s3440_s1 + $0x90] sm:$0xff]  }
  0x2d   : > { %2532 = vmatprep.subr.bf16.mxu1 %v2738_v59  ;;  %v2770_v59 = vld [vmem:[%s3440_s1 + $0x2f8] sm:$0xff]  }
  0x2e   : > { %692 = vmatmul.mubr.bf16.vlgmr.msra.gmra.mxu0 %v410_v12  ;;  %v2788_v12 = vld [vmem:[%s3440_s1 + $0x2a0] sm:$0xff]  }
  0x2f   : > { %2505 = vmatpush3.bf16.msra.mxu0 %v2739_v7  ;;  %740 = vmatmul.mubr.bf16.vlgmr.msra.gmra.mxu1 %v434_v20  ;;  %v2783_v7 = vld [vmem:[%s3440_s1 + $0x2a8] sm:$0xff]   ;;  %v2796_v20 = vld [vmem:[%s3440_s1 + $0x290] sm:$0xff]  }
  0x30   : > { %2506 = vmatprep.subr.bf16.mxu0 %v2741_v10  ;;  %2533 = vmatpush3.bf16.msra.mxu1 %v2740_v14  ;;  %v2787_v10 = vld [vmem:[%s3440_s1 + $0x220] sm:$0xff]   ;;  %v2791_v14 = vld [vmem:[%s3440_s1 + $0x218] sm:$0xff]  }
  0x31   : > { %699 = vmatprep.mubr.bf16.mxu0 %v452_v22  ;;  %2534 = vmatprep.subr.bf16.mxu1 %v2742_v16  ;;  %v2792_v16 = vld [vmem:[%s3440_s1 + $0x298] sm:$0xff]   ;;  %v2799_v22 = vld [vmem:[%s3440_s1 + $0x208] sm:$0xff]  }
  0x32   : > { %747 = vmatprep.mubr.bf16.mxu1 %v458_v25  ;;  %v2802_v25 = vld [vmem:[%s3440_s1 + $0x2c0] sm:$0xff]  }
  0x33   : > { %2507 = vmatpush3.bf16.msra.mxu0 %v2743_v18  ;;  %v2795_v18 = vld [vmem:[%s3440_s1 + $0x210] sm:$0xff]  }
  0x34   : > { %2508 = vmatprep.subr.bf16.mxu0 %v2745_v21  ;;  %2535 = vmatpush3.bf16.msra.mxu1 %v2744_v24  ;;  %v2798_v21 = vld [vmem:[%s3440_s1 + $0x2c8] sm:$0xff]  }
  0x35   : > { %2536 = vmatprep.subr.bf16.mxu1 %v2746_v27  ;;  %v2800_v24 = vld [vmem:[%s3440_s1 + $0x288] sm:$0xff]   ;;  %v2804_v27 = vld [vmem:[%s3440_s1 + $0x280] sm:$0xff]  }
  0x36   : > { %700 = vmatmul.mubr.bf16.gmra.mxu0 %v449_v28  ;;  %v1077_v28 = vld [vmem:[%s3025_s6] sm:$0xcc] }
  0x37   : > { %2509 = vmatpush3.bf16.msra.mxu0 %v2747_v29  ;;  %1013 = vmatprep.mubr.bf16.mxu0 %v3042_v36  ;;  %v2757_v36 = vld [vmem:[%s3440_s1 + $0x50] sm:$0xff]  }
  0x38   : > { %2510 = vmatprep.subr.bf16.mxu0 %v2749_v30  ;;  %748 = vmatmul.mubr.bf16.gmra.mxu1 %v455_v32  ;;  %v1079_v29 = vld [vmem:[%s3025_s6 + $0x30] sm:$0x77]  ;;  %v2293_v30 = vcombine.low %v1077_v28, %v3035_v33 }
  0x39   : > { %2537 = vmatpush3.bf16.msra.mxu1 %v2748_v31  ;;  %1061 = vmatprep.mubr.bf16.mxu1 %v3057_v43  ;;  %v2758_v43 = vld [vmem:[%s3440_s1 + $0xd0] sm:$0xff]   ;;  %v2294_v31 = vcombine.high %v1077_v28, %v3035_v33  ;;  %v3286_v32 = vcombine.low %v3038_v34, %v1079_v29 }
  0x3a   : > { %2538 = vmatprep.subr.bf16.mxu1 %v2750_v35  ;;  %v3289_v35 = vcombine.high %v3038_v34, %v1079_v29  ;;  %v2821_v29 = vld [vmem:[%s3440_s1 + $0x368] sm:$0xff]  }
  0x3b   : > { %2511 = vmatpush3.bf16.msra.mxu0 %v2751_v37  ;;  %v1078_v37 = vld [vmem:[%s3025_s6 + $0x8] sm:$0xcc]  ;;  %v1185_v34 = vshrl.u32 %v2294_v31, 16 }
  0x3c   : > { %2512 = vmatprep.subr.bf16.mxu0 %v2753_v40  ;;  %v1080_v40 = vld [vmem:[%s3025_s6 + $0x38] sm:$0x77] }
  0x3d   : > { %2539 = vmatpush3.bf16.msra.mxu1 %v2752_v42  ;;  %v2295_v42 = vcombine.low %v1078_v37, %v3046_v38 }
  0x3e   : > { %2540 = vmatprep.subr.bf16.mxu1 %v2754_v44  ;;  %v2296_v44 = vcombine.high %v1078_v37, %v3046_v38  ;;  %v2823_v37 = vld [vmem:[%s3440_s1 + $0x328] sm:$0xff]  }
  0x3f   : > { %2513 = vmatpush3.bf16.msra.mxu0 %v2755_v46  ;;  %v3296_v46 = vcombine.low %v3053_v41, %v1080_v40 }
  0x40   : > { %2514 = vmatprep.subr.bf16.mxu0 %v2757_v36  ;;  %v3299_v36 = vcombine.high %v3053_v41, %v1080_v40  ;;  %v2814_v41 = vld [vmem:[%s3440_s1 + $0x3f8] sm:$0xff]   ;;  %v2825_v40 = vld [vmem:[%s3440_s1 + $0x360] sm:$0xff]  }
  0x41   : > { %2541 = vmatpush3.bf16.msra.mxu1 %v2756_v47  ;;  %v2813_v47 = vld [vmem:[%s3440_s1 + $0x378] sm:$0xff]  }
  0x42   : > { %2542 = vmatprep.subr.bf16.mxu1 %v2758_v43  ;;  %v1188_v43 = vshll.u32 %v2294_v31, 16  ;;  %v2822_v31 = vld [vmem:[%s3440_s1 + $0x3e8] sm:$0xff]  }
  0x43   : > { %2515 = vmatpush3.bf16.msra.mxu0 %v2759_v48  ;;  %v1193_v48 = vshrl.u32 %v3289_v35, 16 }
  0x44   : > { %2516 = vmatprep.subr.bf16.mxu0 %v2761_v49  ;;  %v1196_v49 = vshll.u32 %v3289_v35, 16 }
  0x45   : > { %2543 = vmatpush3.bf16.msra.mxu1 %v2760_v50  ;;  %v1219_v50 = vshrl.u32 %v2296_v44, 16 }
  0x46   : > { %2544 = vmatprep.subr.bf16.mxu1 %v2762_v51  ;;  %v1222_v51 = vshll.u32 %v2296_v44, 16  ;;  %v2826_v44 = vld [vmem:[%s3440_s1 + $0x3e0] sm:$0xff]  }
  0x47   : > { %2517 = vmatpush3.bf16.msra.mxu0 %v2763_v52  ;;  %v1227_v52 = vshrl.u32 %v3299_v36, 16 }
  0x48   : > { %2518 = vmatprep.subr.bf16.mxu0 %v2765_v53  ;;  %v1230_v53 = vshll.u32 %v3299_v36, 16 }
  0x49   : > { %2545 = vmatpush3.bf16.msra.mxu1 %v2764_v54  ;;  %v1187_v54 = vrot.slane %v1185_v34, 2  ;;  %v2829_v34 = vld [vmem:[%s3440_s1 + $0x358] sm:$0xff]  }
  0x4a   : > { %2546 = vmatprep.subr.bf16.mxu1 %v2766_v55  ;;  %v1190_v55 = vrot.slane %v1188_v43, 3  ;;  %v2828_v43 = vld [vmem:[%s3440_s1 + $0x3a0] sm:$0xff]  }
  0x4b   : > { %2519 = vmatpush3.bf16.msra.mxu0 %v2767_v56  ;;  %v1195_v56 = vrot.slane %v1193_v48, 2  ;;  %v2830_v48 = vld [vmem:[%s3440_s1 + $0x3d8] sm:$0xff]  }
  0x4c   : > { %2560 = vmatprep.subr.bf16.mxu0 %v2769_v57  ;;  %v1198_v57 = vrot.slane %v1196_v49, 3  ;;  %v2831_v49 = vld [vmem:[%s3440_s1 + $0x318] sm:$0xff]  }
  0x4d   : > { %2547 = vmatpush3.bf16.msra.mxu1 %v2768_v58  ;;  %v1221_v58 = vrot.slane %v1219_v50, 2  ;;  %v2833_v50 = vld [vmem:[%s3440_s1 + $0x350] sm:$0xff]  }
  0x4e   : > { %1014 = vmatmul.mubr.bf16.vlgmr.msra.gmra.mxu0 %v3049_v39  ;;  %2588 = vmatprep.subr.bf16.mxu1 %v2770_v59  ;;  %v2776_v39 = vld [vmem:[%s3440_s1 + $0x2b0] sm:$0xff]   ;;  %v1224_v59 = vrot.slane %v1222_v51, 3  ;;  %v2832_v51 = vld [vmem:[%s3440_s1 + $0x398] sm:$0xff]  }
  0x4f   : > { %2561 = vmatpush3.bf16.msra.mxu0 %v2771_v60  ;;  %1021 = vmatprep.mubr.bf16.mxu0 %v2194_v62  ;;  %v1229_v60 = vrot.slane %v1227_v52, 2  ;;  %v1191_v62 = vor.u32 %v1190_v55, %v1187_v54  ;;  %v2834_v52 = vld [vmem:[%s3440_s1 + $0x3d0] sm:$0xff]   ;;  %v2838_v55 = vld [vmem:[%s3440_s1 + $0x3c8] sm:$0xff]  }
  0x50   : > { %2562 = vmatprep.subr.bf16.mxu0 %v2773_v61  ;;  %1062 = vmatmul.mubr.bf16.vlgmr.msra.gmra.mxu1 %v3061_v45  ;;  %v2785_v45 = vld [vmem:[%s3440_s1 + $0x260] sm:$0xff]   ;;  %v1232_v61 = vrot.slane %v1230_v53, 3  ;;  %v2835_v53 = vld [vmem:[%s3440_s1 + $0x310] sm:$0xff]  }
  0x51   : > { %2589 = vmatpush3.bf16.msra.mxu1 %v2772_v63  ;;  %1069 = vmatprep.mubr.bf16.mxu1 %v2196_v1  ;;  %v1199_v63 = vor.u32 %v1198_v57, %v1195_v56  ;;  %v1171_v1 = vshll.u32 %v2293_v30, 16  ;;  %v2836_v54 = vld [vmem:[%s3440_s1 + $0x390] sm:$0xff]   ;;  %v2839_v56 = vld [vmem:[%s3440_s1 + $0x308] sm:$0xff]   ;;  %v2841_v57 = vld [vmem:[%s3440_s1 + $0x340] sm:$0xff]  }
  0x52   : > { %2590 = vmatprep.subr.bf16.mxu1 %v2774_v0  ;;  %v1168_v0 = vshrl.u32 %v2293_v30, 16  ;;  %v2820_v30 = vld [vmem:[%s3440_s1 + $0x3b0] sm:$0xff]  }
  0x53   : > { %2563 = vmatpush3.bf16.msra.mxu0 %v2775_v2  ;;  %v1225_v2 = vor.u32 %v1224_v59, %v1221_v58  ;;  %v1534_v58 = vld [vmem:[%s3025_s6] sm:$0x88] }
  0x54   : > { %2564 = vmatprep.subr.bf16.mxu0 %v2779_v3  ;;  %v1233_v3 = vor.u32 %v1232_v61, %v1229_v60  ;;  %v2397_v59 = vcombine.low %v1534_v58, %v3035_v33  ;;  %v2861_v60 = vld [vmem:[%s3025_s6 + $0x10] sm:$0xff]  ;;  %v2842_v33 = vld [vmem:[%s3440_s1 + $0x3c0] sm:$0xff]  }
  0x55   : > { %2591 = vmatpush3.bf16.msra.mxu1 %v2776_v39  ;;  %v1176_v39 = vshrl.u32 %v3286_v32, 16  ;;  %v2398_v61 = vcombine.high %v1534_v58, %v2861_v60 }
  0x56   : > { %1022 = vmatmul.mubr.bf16.gmra.mxu0 %v2193_v4  ;;  %2592 = vmatprep.subr.bf16.mxu1 %v2780_v5  ;;  %v1179_v4 = vshll.u32 %v3286_v32, 16  ;;  %v1200_v5 = vsel %vm1166_vm1, %v1191_v62, %v1199_v63  ;;  %v1616_v62 = vrot.slane %v3289_v35, 3  ;;  %v2843_v35 = vld [vmem:[%s3440_s1 + $0x300] sm:$0xff]  }
  0x57   : > { %2565 = vmatpush3.bf16.msra.mxu0 %v2782_v6  ;;  %v1170_v6 = vrot.slane %v1168_v0, 2  ;;  %1467 = vmatprep.mubr.bf16.mxu0 %v1200_v5  ;;  %v2840_v0 = vld [vmem:[%s3440_s1 + $0x388] sm:$0xff]   ;;  %v1615_v5 = vrot.slane %v2398_v61, 3 }
  0x58   : > { %2566 = vmatprep.subr.bf16.mxu0 %v2785_v45  ;;  %1070 = vmatmul.mubr.bf16.gmra.mxu1 %v2195_v8  ;;  %v1173_v45 = vrot.slane %v1171_v1, 3  ;;  %v1234_v8 = vsel %vm1166_vm1, %v1225_v2, %v1233_v3  ;;  %v2862_v2 = vld [vmem:[%s3025_s6 + $0x18] sm:$0xff] }
  0x59   : > { %2593 = vmatpush3.bf16.msra.mxu1 %v2783_v7  ;;  %v1202_v7 = vshrl.u32 %v2295_v42, 16  ;;  %1515 = vmatprep.mubr.bf16.mxu1 %v1234_v8 }
  0x5a   : > { %2594 = vmatprep.subr.bf16.mxu1 %v2786_v9  ;;  %v1178_v9 = vrot.slane %v1176_v39, 2  ;;  %v1622_v39 = vrot.slane %v3299_v36, 3  ;;  %v2844_v36 = vld [vmem:[%s3440_s1 + $0x380] sm:$0xff]  }
  0x5b   : > { %2567 = vmatpush3.bf16.msra.mxu0 %v2787_v10  ;;  %v1181_v10 = vrot.slane %v1179_v4, 3  ;;  %v1612_v4 = vrot.slane %v2397_v59, 3 }
  0x5c   : > { %2568 = vmatprep.subr.bf16.mxu0 %v2789_v11  ;;  %v1205_v11 = vshll.u32 %v2295_v42, 16  ;;  %v2824_v42 = vld [vmem:[%s3440_s1 + $0x3a8] sm:$0xff]  }
  0x5d   : > { %2595 = vmatpush3.bf16.msra.mxu1 %v2788_v12  ;;  %v1174_v12 = vor.u32 %v1173_v45, %v1170_v6  ;;  %v1613_v6 = vrot.slane %v3286_v32, 3  ;;  %v1617_v45 = vsel %vm1611_vm2, %v1615_v5, %v1616_v62 }
  0x5e   : > { %2596 = vmatprep.subr.bf16.mxu1 %v2790_v13  ;;  %v1204_v13 = vrot.slane %v1202_v7, 2 }
  0x5f   : > { %2569 = vmatpush3.bf16.msra.mxu0 %v2791_v14  ;;  %v1210_v14 = vshrl.u32 %v3296_v46, 16 }
  0x60   : > { %2570 = vmatprep.subr.bf16.mxu0 %v2793_v15  ;;  %v1213_v15 = vshll.u32 %v3296_v46, 16 }
  0x61   : > { %2597 = vmatpush3.bf16.msra.mxu1 %v2792_v16  ;;  %v2815_v16 = vld [vmem:[%s3440_s1 + $0x338] sm:$0xff]  }
  0x62   : > { %2598 = vmatprep.subr.bf16.mxu1 %v2794_v17  ;;  %v1182_v17 = vor.u32 %v1181_v10, %v1178_v9  ;;  %v1619_v9 = vrot.slane %v3296_v46, 3  ;;  %v1614_v10 = vsel %vm1611_vm2, %v1612_v4, %v1613_v6 }
  0x63   : > { %2571 = vmatpush3.bf16.msra.mxu0 %v2795_v18  ;;  %v1207_v18 = vrot.slane %v1205_v11, 3 }
  0x64   : > { %2572 = vmatprep.subr.bf16.mxu0 %v2797_v19  ;;  %v2817_v19 = vld [vmem:[%s3440_s1 + $0x370] sm:$0xff]  }
  0x65   : > { %2599 = vmatpush3.bf16.msra.mxu1 %v2796_v20  ;;  %v1212_v20 = vrot.slane %v1210_v14, 2 }
  0x66   : > { %2600 = vmatprep.subr.bf16.mxu1 %v2798_v21  ;;  %v1215_v21 = vrot.slane %v1213_v15, 3 }
  0x67   : > { %2573 = vmatpush3.bf16.msra.mxu0 %v2799_v22  ;;  %v2816_v22 = vld [vmem:[%s3440_s1 + $0x3b8] sm:$0xff]  }
  0x68   : > { %2574 = vmatprep.subr.bf16.mxu0 %v2801_v23  ;;  %v1183_v23 = vsel %vm1166_vm1, %v1174_v12, %v1182_v17 }
  0x69   : > { %2601 = vmatpush3.bf16.msra.mxu1 %v2800_v24  ;;  %v1208_v24 = vor.u32 %v1207_v18, %v1204_v13 }
  0x6a   : > { %2602 = vmatprep.subr.bf16.mxu1 %v2802_v25  ;;  %v1216_v25 = vor.u32 %v1215_v21, %v1212_v20 }
  0x6b   : > { %2575 = vmatpush3.bf16.msra.mxu0 %v2803_v26  ;;  %v2818_v26 = vld [vmem:[%s3440_s1 + $0x3f0] sm:$0xff]  }
  0x6c   : > { %2616 = vmatprep.subr.bf16.mxu0 %v2813_v47  ;;  %v1217_v28 = vsel %vm1166_vm1, %v1208_v24, %v1216_v25  ;;  %v2827_v47 = vld [vmem:[%s3440_s1 + $0x320] sm:$0xff]  }
  0x6d   : > { %2603 = vmatpush3.bf16.msra.mxu1 %v2804_v27  ;;  %v2819_v27 = vld [vmem:[%s3440_s1 + $0x330] sm:$0xff]  }
  0x6e   : > { %2644 = vmatprep.subr.bf16.mxu1 %v2814_v41  ;;  %1468 = vmatmul.mubr.bf16.vlgmr.msra.gmra.mxu0 %v1183_v23  ;;  %v2837_v41 = vld [vmem:[%s3440_s1 + $0x348] sm:$0xff]  }
  0x6f   : > { %2617 = vmatpush3.bf16.msra.mxu0 %v2815_v16  ;;  %1475 = vmatprep.mubr.bf16.mxu0 %v1199_v63  ;;  %v1535_v63 = vld [vmem:[%s3025_s6 + $0x8] sm:$0x88] }
  0x70   : > { %2618 = vmatprep.subr.bf16.mxu0 %v2817_v19  ;;  %1516 = vmatmul.mubr.bf16.vlgmr.msra.gmra.mxu1 %v1217_v28  ;;  %v2399_v1 = vcombine.low %v1535_v63, %v3046_v38 }
  0x71   : > { %2645 = vmatpush3.bf16.msra.mxu1 %v2816_v22  ;;  %1523 = vmatprep.mubr.bf16.mxu1 %v1233_v3  ;;  %v2400_v3 = vcombine.high %v1535_v63, %v2862_v2 }
  0x72   : > { %2646 = vmatprep.subr.bf16.mxu1 %v2818_v26  ;;  %v1618_v7 = vrot.slane %v2399_v1, 3 }
  0x73   : > { %2619 = vmatpush3.bf16.msra.mxu0 %v2819_v27  ;;  %v1621_v38 = vrot.slane %v2400_v3, 3 }
  0x74   : > { %2620 = vmatprep.subr.bf16.mxu0 %v2821_v29  ;;  %v1620_v32 = vsel %vm1611_vm2, %v1618_v7, %v1619_v9 }
  0x75   : > { %2647 = vmatpush3.bf16.msra.mxu1 %v2820_v30  ;;  %v1623_v8 = vsel %vm1611_vm2, %v1621_v38, %v1622_v39 }
  0x76   : > { %1476 = vmatmul.mubr.bf16.gmra.mxu0 %v1182_v17  ;;  %2648 = vmatprep.subr.bf16.mxu1 %v2822_v31 }
  0x77   : > { %2621 = vmatpush3.bf16.msra.mxu0 %v2823_v37  ;;  %1856 = vmatprep.mubr.bf16.mxu0 %v1617_v45 }
  0x78   : > { %2622 = vmatprep.subr.bf16.mxu0 %v2825_v40  ;;  %1524 = vmatmul.mubr.bf16.gmra.mxu1 %v1216_v25 }
  0x79   : > { %2649 = vmatpush3.bf16.msra.mxu1 %v2824_v42  ;;  %1904 = vmatprep.mubr.bf16.mxu1 %v1623_v8 }
  0x7a   : > { %2650 = vmatprep.subr.bf16.mxu1 %v2826_v44 }
  0x7b   : > { %2623 = vmatpush3.bf16.msra.mxu0 %v2827_v47 }
  0x7c   : > { %2624 = vmatprep.subr.bf16.mxu0 %v2829_v34 }
  0x7d   : > { %2651 = vmatpush3.bf16.msra.mxu1 %v2828_v43 }
  0x7e   : > { %2652 = vmatprep.subr.bf16.mxu1 %v2830_v48 }
  0x7f   : > { %2625 = vmatpush3.bf16.msra.mxu0 %v2831_v49 }
  0x80   : > { %2626 = vmatprep.subr.bf16.mxu0 %v2833_v50 }
  0x81   : > { %2653 = vmatpush3.bf16.msra.mxu1 %v2832_v51 }
  0x82   : > { %2654 = vmatprep.subr.bf16.mxu1 %v2834_v52 }
  0x83   : > { %2627 = vmatpush3.bf16.msra.mxu0 %v2835_v53 }
  0x84   : > { %2628 = vmatprep.subr.bf16.mxu0 %v2837_v41 }
  0x85   : > { %2655 = vmatpush3.bf16.msra.mxu1 %v2836_v54 }
  0x86   : > { %2656 = vmatprep.subr.bf16.mxu1 %v2838_v55 }
  0x87   : > { %2629 = vmatpush3.bf16.msra.mxu0 %v2839_v56 }
  0x88   : > { %2630 = vmatprep.subr.bf16.mxu0 %v2841_v57 }
  0x89   : > { %2657 = vmatpush3.bf16.msra.mxu1 %v2840_v0 }
  0x8a   : > { %2658 = vmatprep.subr.bf16.mxu1 %v2842_v33 }
  0x8b   : > { %2631 = vmatpush3.bf16.msra.mxu0 %v2843_v35 }
  0x8d   : > { %2659 = vmatpush3.bf16.msra.mxu1 %v2844_v36 }
  0x8e   : > { %1857 = vmatmul.mubr.bf16.vlgmr.msra.gmra.mxu0 %v1614_v10 }
  0x8f   : > { %1864 = vmatprep.mubr.bf16.mxu0 %v1616_v62 }
  0x90   : > { %1905 = vmatmul.mubr.bf16.vlgmr.msra.gmra.mxu1 %v1620_v32 }
  0x91   : > { %1912 = vmatprep.mubr.bf16.mxu1 %v1622_v39 }
  0x96   : > { %1865 = vmatmul.mubr.bf16.gmra.mxu0 %v1613_v6 }
  0x98   : > { %1913 = vmatmul.mubr.bf16.gmra.mxu1 %v1619_v9 }
  0xee   : > { %v2464_v11 = vpop.f32.mrf.mxu0 }
  0xef   : > { %v2492_v13 = vpop.f32.mrf.mxu1 }
  0xf0   : > { %v2465_v12 = vpop.f32.mrf.mxu0 }
  0xf1   : > { %v2466_v14 = vadd.f32 %v2465_v12, %v2464_v11  ;;  %v2493_v46 = vpop.f32.mrf.mxu1 }
  0xf2   : > { %v2467_v15 = vpop.f32.mrf.mxu0  ;;  %v2494_v16 = vadd.f32 %v2493_v46, %v2492_v13 }
  0xf3   : > { %v2495_v18 = vpop.f32.mrf.mxu1 }
  0xf4   : > { %v2468_v17 = vpop.f32.mrf.mxu0  ;;  %v742_v20 = vadd.f32 %v2494_v16, %v2466_v14 }
  0xf5   : > { %v2469_v19 = vadd.f32 %v2468_v17, %v2467_v15  ;;  %v2496_v22 = vpop.f32.mrf.mxu1 }
  0xf6   : > { %v2470_v21 = vpop.f32.mrf.mxu0  ;;  %v2497_v23 = vadd.f32 %v2496_v22, %v2495_v18 }
  0xf8   : > { %v2471_v24 = vpop.f32.mrf.mxu0  ;;  %v2498_v25 = vpop.f32.mrf.mxu1  ;;  %v745_v27 = vadd.f32 %v2497_v23, %v2469_v19 }
  0xf9   : > { %v2472_v26 = vadd.f32 %v2471_v24, %v2470_v21 }
  0xfa   : > { %v2473_v28 = vpop.f32.mrf.mxu0  ;;  %v2499_v29 = vpop.f32.mrf.mxu1 }
  0xfb   : > { %v2500_v30 = vadd.f32 %v2499_v29, %v2498_v25 }
  0xfc   : > { %v2474_v31 = vpop.f32.mrf.mxu0  ;;  %v2501_v37 = vpop.f32.mrf.mxu1 }
  0xfd   : > { %v750_v40 = vadd.f32 %v2500_v30, %v2472_v26 }
  0xfe   : > { %v2502_v42 = vpop.f32.mrf.mxu1 }
 0x10e   : > { %v2520_v44 = vpop.f32.mrf.mxu0 }
 0x110   : > { %v2521_v47 = vpop.f32.mrf.mxu0  ;;  %v2548_v34 = vpop.f32.mrf.mxu1 }
 0x111   : > { %v2522_v43 = vadd.f32 %v2521_v47, %v2520_v44  ;;  %v2433_v47 = vld [vmem:[%s3441_s2] ss:$0 sm:$0xff] }
 0x112   : > { %v2523_v48 = vpop.f32.mrf.mxu0  ;;  %v2549_v50 = vpop.f32.mrf.mxu1 }
 0x113   : > { %v1016_v49 = vadd.f32 %v2522_v43, %v742_v20  ;;  %v2550_v51 = vadd.f32 %v2549_v50, %v2548_v34 }
 0x114   : > { %v2524_v52 = vpop.f32.mrf.mxu0  ;;  %v2551_v53 = vpop.f32.mrf.mxu1 }
 0x115   : > { %v2525_v41 = vadd.f32 %v2524_v52, %v2523_v48  ;;  %v1064_v54 = vadd.f32 %v2550_v51, %v1016_v49 }
 0x116   : > { %v2526_v55 = vpop.f32.mrf.mxu0  ;;  %v2552_v57 = vpop.f32.mrf.mxu1 }
 0x117   : > { %v1019_v56 = vadd.f32 %v2525_v41, %v745_v27  ;;  %v2553_v58 = vadd.f32 %v2552_v57, %v2551_v53 }
 0x118   : > { %v2527_v59 = vpop.f32.mrf.mxu0  ;;  %v2554_v61 = vpop.f32.mrf.mxu1 }
 0x119   : > { %v2528_v60 = vadd.f32 %v2527_v59, %v2526_v55  ;;  %v1067_v62 = vadd.f32 %v2553_v58, %v1019_v56 }
 0x11a   : > { %v2529_v63 = vpop.f32.mrf.mxu0  ;;  %v2555_v1 = vpop.f32.mrf.mxu1 }
 0x11b   : > { %v1024_v0 = vadd.f32 %v2528_v60, %v750_v40  ;;  %v2556_v2 = vadd.f32 %v2555_v1, %v2554_v61 }
 0x11c   : > { %v2530_v3 = vpop.f32.mrf.mxu0  ;;  %v2557_v39 = vpop.f32.mrf.mxu1 }
 0x11d   : > { %v1072_v33 = vadd.f32 %v2556_v2, %v1024_v0 }
 0x11e   : > { %v2558_v35 = vpop.f32.mrf.mxu1 }
 0x12e   : > { %v2576_v4 = vpop.f32.mrf.mxu0 }
 0x130   : > { %v2577_v5 = vpop.f32.mrf.mxu0  ;;  %v2604_v6 = vpop.f32.mrf.mxu1 }
 0x131   : > { %v2578_v46 = vadd.f32 %v2577_v5, %v2576_v4 }
 0x132   : > { %v2579_v38 = vpop.f32.mrf.mxu0  ;;  %v2605_v45 = vpop.f32.mrf.mxu1 }
 0x133   : > { %v2606_v16 = vadd.f32 %v2605_v45, %v2604_v6 }
 0x134   : > { %v2580_v36 = vpop.f32.mrf.mxu0  ;;  %v2607_v7 = vpop.f32.mrf.mxu1 }
 0x135   : > { %v1518_v19 = vadd.f32 %v2606_v16, %v2578_v46  ;;  %v2581_v20 = vadd.f32 %v2580_v36, %v2579_v38 }
 0x136   : > { %v2582_v8 = vpop.f32.mrf.mxu0  ;;  %v2608_v9 = vpop.f32.mrf.mxu1 }
 0x137   : > { %v2609_v21 = vadd.f32 %v2608_v9, %v2607_v7  ;;  %v1531_v28 = vadd.f32 %v1518_v19, %v1064_v54 }
 0x138   : > { %v2583_v10 = vpop.f32.mrf.mxu0  ;;  %v2610_v32 = vpop.f32.mrf.mxu1 }
 0x139   : > { %v1521_v29 = vadd.f32 %v2609_v21, %v2581_v20  ;;  %v2584_v31 = vadd.f32 %v2583_v10, %v2582_v8 }
 0x13a   : > { %v2585_v11 = vpop.f32.mrf.mxu0  ;;  %v2611_v12 = vpop.f32.mrf.mxu1 }
 0x13b   : > { %v2612_v37 = vadd.f32 %v2611_v12, %v2610_v32  ;;  %v1532_v50 = vadd.f32 %v1521_v29, %v1067_v62 }
 0x13c   : > { %v2586_v13 = vpop.f32.mrf.mxu0  ;;  %v2613_v14 = vpop.f32.mrf.mxu1 }
 0x13d   : > { %v1526_v52 = vadd.f32 %v2612_v37, %v2584_v31 }
 0x13e   : > { %v2614_v15 = vpop.f32.mrf.mxu1 }
 0x13f   : > { %v1533_v63 = vadd.f32 %v1526_v52, %v1072_v33 }
 0x14e   : > { %v2632_v17 = vpop.f32.mrf.mxu0 }
 0x150   : > { %v2633_v18 = vpop.f32.mrf.mxu0  ;;  %v2660_v22 = vpop.f32.mrf.mxu1 }
 0x151   : > { %v2634_v23 = vadd.f32 %v2633_v18, %v2632_v17 }
 0x152   : > { %v2635_v24 = vpop.f32.mrf.mxu0  ;;  %v2661_v25 = vpop.f32.mrf.mxu1 }
 0x153   : > { %v2662_v26 = vadd.f32 %v2661_v25, %v2660_v22 }
 0x154   : > { %v2636_v27 = vpop.f32.mrf.mxu0  ;;  %v2663_v30 = vpop.f32.mrf.mxu1 }
 0x155   : > { %v1907_v40 = vadd.f32 %v2662_v26, %v2634_v23  ;;  %v2637_v42 = vadd.f32 %v2636_v27, %v2635_v24 }
 0x156   : > { %v2638_v44 = vpop.f32.mrf.mxu0  ;;  %v2664_v34 = vpop.f32.mrf.mxu1 }
 0x157   : > { %v1920_v43 = vadd.f32 %v1907_v40, %v1531_v28  ;;  %v2665_v48 = vadd.f32 %v2664_v34, %v2663_v30 }
 0x158   : > { %v2639_v49 = vpop.f32.mrf.mxu0  ;;  %v2666_v51 = vpop.f32.mrf.mxu1 }
 0x159   : > { %v1930_v53 = vadd.f32 %v2433_v47, %v1920_v43  ;;  %v1910_v41 = vadd.f32 %v2665_v48, %v2637_v42  ;;  %v2640_v54 = vadd.f32 %v2639_v49, %v2638_v44 }
 0x15a   : > { %v2641_v55 = vpop.f32.mrf.mxu0  ;;  %v2667_v56 = vpop.f32.mrf.mxu1 }
 0x15b   : > { %v1933_v57 = vmax.f32 %v1930_v53, -60.0  ;;  %v1921_v58 = vadd.f32 %v1910_v41, %v1532_v50  ;;  %v2668_v59 = vadd.f32 %v2667_v56, %v2666_v51 }
 0x15c   : > { %v2642_v60 = vpop.f32.mrf.mxu0  ;;  %v2669_v61 = vpop.f32.mrf.mxu1 }
 0x15d   : > { %v1936_v0 = vsub.f32 0.0, %v1933_v57  ;;  %v1931_v1 = vadd.f32 %v2433_v47, %v1921_v58  ;;  %v1915_v2 = vadd.f32 %v2668_v59, %v2640_v54 }
 0x15e   : > { %v2670_v3 = vpop.f32.mrf.mxu1 }
 0x15f   : > { %v1939_v39 = vmul.f32 1.442695, %v1936_v0  ;;  %v1934_v35 = vmax.f32 %v1931_v1, -60.0  ;;  %v1922_v62 = vadd.f32 %v1915_v2, %v1533_v63 }
 0x161   : > { %2849 = vpow2.f32 %v1939_v39  ;;  %v1937_v4 = vsub.f32 0.0, %v1934_v35  ;;  %v1932_v5 = vadd.f32 %v2433_v47, %v1922_v62 }
 0x163   : > { %v1941_v6 = vmul.f32 1.442695, %v1937_v4  ;;  %v1935_v38 = vmax.f32 %v1932_v5, -60.0 }
 0x165   : > { %2851 = vpow2.f32 %v1941_v6  ;;  %v1938_v45 = vsub.f32 0.0, %v1935_v38 }
 0x167   : > { %v1943_v36 = vmul.f32 1.442695, %v1938_v45 }
 0x169   : > { %2853 = vpow2.f32 %v1943_v36 }
 0x16e   : > { %v2850_v7 = vpop.eup %2849 }
 0x16f   : > { %v1945_v8 = vadd.f32 1.0, %v2850_v7 }
 0x171   : > { %2855 = vrcp.f32 %v1945_v8 }
 0x172   : > { %v2852_v33 = vpop.eup %2851 }
 0x173   : > { %v1946_v9 = vadd.f32 1.0, %v2852_v33 }
 0x175   : > { %2857 = vrcp.f32 %v1946_v9 }
 0x176   : > { %v2854_v10 = vpop.eup %2853 }
 0x177   : > { %v1947_v32 = vadd.f32 1.0, %v2854_v10 }
 0x179   : > { %2859 = vrcp.f32 %v1947_v32 }
 0x17e   : > { %v2856_v11 = vpop.eup %2855 }
 0x17f   : > { %v1951_v13 = vmul.f32 %v2856_v11, %v1930_v53 }
 0x182   : > { %v2858_v12 = vpop.eup %2857 }
 0x183   : > { %v1952_v14 = vmul.f32 %v2858_v12, %v1931_v1 }
 0x185   : > { %v2446_v15 = vpack.c.bf16 %v1952_v14, %v1951_v13 }
 0x186   : > { %v2860_v46 = vpop.eup %2859 }
 0x187   : > { %v1953_v16 = vmul.f32 %v2860_v46, %v1932_v5  ;;  %2447 = vst [vmem:[%s221_s9] sm:$0xff] %v2446_v15  }
 0x189   : > { %v2442_v17 = vpack.c.bf16 %v1953_v16, %v1953_v16 }
 0x18b   : > { %1969 = vst [vmem:[%s221_s9 + $0x8] sm:$0xf] %v2442_v17 }
 0x18c PF: > { %s13_s14 = sadd.s32 1, %s2885_s14   ;;  %s3443_s12 = smov %s2881_s13 }
 0x18d   : > { %p10_p5 = scmp.ge.s32.totalorder %s13_s14, 4   ;;  %s3444_s13 = smov %s3446_s15 }
 0x18f   :  { %12 = sbr.rel (!%p10_p5) target bundleno = 2 (0x2), region = 71 }

// kernel: yolov7_backbone.21
= control target key start
LH: loop header
LB: loop body
LE: loop exit
PB: predicated region body
PF: predicated region fallthrough
CT: control target
= control target key end

     0   :  { %s2225_s12 = smov 0   ;;  %s2227_s13 = smov 0   ;;  %s2549_s0 = inlined_call_operand.vmem [shape: bf16[2,40,128], index: 0, kind: input, shape index: {}]   ;;  %s2550_s1 = inlined_call_operand.vmem [shape: bf16[9,128,128], index: 1, kind: input, shape index: {}]   ;;  %s2551_s2 = inlined_call_operand.vmem [shape: f32[1,128], index: 2, kind: input, shape index: {}]   ;;  %s2552_s3 = inlined_call_operand.vmem [shape: bf16[2,24,128], index: 3, kind: output, shape index: {}]  }
   0x1   :  { %s2229_s14 = smov 0  }
   0x2 LB: > { %s25_s15 = sadd.s32 1, %s2199_s13  ;;  %p1558_p0 = scmp.ge.s32.totalorder %s2203_s14, 1  ;;  %s2203_s14 = sphi %s2229_s14, %s13_s14   ;;  %s2199_s13 = sphi %s2227_s13, %s2554_s13   ;;  %s2195_s12 = sphi %s2225_s12, %s2553_s12  }
   0x3   : > { %p27_p1 = scmp.ge.s32.totalorder %s25_s15, 2  ;;  %p168_p2 = scmp.lt.s32.totalorder %s2203_s14, 3 }
   0x5   : > { %s2556_s15 = smov (%p27_p1, %s25_s15), 0  ;;  %p169_p3 = pnand %p1558_p0, %p168_p2 }
   0x6   : > { %p202_p4 = scmp.lt.s32.totalorder (!%p169_p3), %s2195_s12, 1 }
   0x7   : > { %172 = sbr.rel (%p169_p3) target bundleno = 417 (0x1a1), region = 32 }
   0xc   : > { %v2084_v0 = vld [vmem:[%s2550_s1 + $0x78] sm:$0xff]   ;;  %v2086_v2 = vld [vmem:[%s2550_s1 + $0x70] sm:$0xff]   ;;  %v2088_v4 = vld [vmem:[%s2550_s1 + $0x68] sm:$0xff]   ;;  %s2558_s12 = smov (!%p202_p4, %s2195_s12), 1  ;;  %vm270_vm0 = vsmask.f32 7424 }
   0xd   : > { %v2085_v1 = vld [vmem:[%s2550_s1 + $0x38] sm:$0xff]   ;;  %1878 = vmatprep.subr.bf16.mxu0 %v2084_v0  ;;  %v2087_v3 = vld [vmem:[%s2550_s1 + $0x30] sm:$0xff]   ;;  %v2089_v5 = vld [vmem:[%s2550_s1 + $0x28] sm:$0xff]   ;;  %s2058_s5 = smul.u32 20, %s2558_s12  ;;  %vm504_vm1 = vcmask 1046528   ;;  %vm634_vm2 = vcmask 1044480  }
   0xe   : > { %1898 = vmatprep.subr.bf16.mxu1 %v2085_v1  ;;  %1879 = vmatpush3.bf16.msra.mxu0 %v2084_v0  ;;  %v2090_v6 = vld [vmem:[%s2550_s1 + $0x60] sm:$0xff]   ;;  %v2092_v8 = vld [vmem:[%s2550_s1 + $0x58] sm:$0xff]   ;;  %v2094_v10 = vld [vmem:[%s2550_s1 + $0x50] sm:$0xff]   ;;  %vm760_vm3 = vsmask.f32 4352  ;;  %vm1030_vm4 = vcmask 1045504  }
   0xf   : > { %1899 = vmatpush3.bf16.msra.mxu1 %v2085_v1  ;;  %1880 = vmatprep.subr.bf16.mxu0 %v2086_v2  ;;  %v2091_v7 = vld [vmem:[%s2550_s1 + $0x20] sm:$0xff]   ;;  %v2093_v9 = vld [vmem:[%s2550_s1 + $0x18] sm:$0xff]   ;;  %s2279_s16 = scalar_lea.vmem %s2549_s0, %s2058_s5  ;;  %v2095_v14 = vld [vmem:[%s2550_s1 + $0x10] sm:$0xff]   ;;  %vm1156_vm5 = vsmask.f32 5376  ;;  %s2059_s30 = smul.u32 12, %s2558_s12 }
  0x10   : > { %1900 = vmatprep.subr.bf16.mxu1 %v2087_v3  ;;  %v223_v11 = vld [vmem:[%s2279_s16] sm:$0xf]  ;;  %v2286_v12 = vld [vmem:[%s2279_s16 + $0x4] sm:$0xf]  ;;  %v2289_v13 = vld [vmem:[%s2279_s16 + $0x8] sm:$0xf] }
  0x11   : > { %v242_v15 = vld [vmem:[%s2279_s16 + $0xc] sm:$0x1]  ;;  %v1577_v16 = vcombine.low %v223_v11, %v2286_v12  ;;  %v2098_v26 = vld [vmem:[%s2550_s1 + $0x40] sm:$0xff]   ;;  %v2103_v30 = vld [vmem:[%s2550_s1 + $0xb8] sm:$0xff]   ;;  %v1587_v33 = vcombine.low %v2289_v13, %v2289_v13  ;;  %s221_s6 = scalar_lea.vmem %s2552_s3, %s2059_s30 }
  0x12   : > { %1881 = vmatpush3.bf16.msra.mxu0 %v2086_v2  ;;  %v2297_v17 = vcombine.low %v2289_v13, %v242_v15  ;;  %v2096_v20 = vld [vmem:[%s2550_s1 + $0x48] sm:$0xff]   ;;  %v2099_v27 = vld [vmem:[%s2550_s1] sm:$0xff]   ;;  %v2104_v31 = vld [vmem:[%s2550_s1 + $0xf8] sm:$0xff]   ;;  %v1688_v15 = vcombine.low %v2286_v12, %v2289_v13 }
  0x13   : > { %1901 = vmatpush3.bf16.msra.mxu1 %v2087_v3  ;;  %1882 = vmatprep.subr.bf16.mxu0 %v2088_v4  ;;  %v272_v18 = vshrl.u32 %v1577_v16, 16  ;;  %v274_v19 = vshll.u32 %v1577_v16, 16  ;;  %v2097_v22 = vld [vmem:[%s2550_s1 + $0x8] sm:$0xff]   ;;  %v2105_v34 = vld [vmem:[%s2550_s1 + $0xb0] sm:$0xff]   ;;  %v483_v36 = vld [vmem:[%s2279_s16] sm:$0xe] }
  0x14   : > { %1902 = vmatprep.subr.bf16.mxu1 %v2089_v5  ;;  %1914 = vmatprep.mubr.bf16.mxu1 %v1577_v16  ;;  %v279_v21 = vshll.u32 %v2297_v17, 16  ;;  %v283_v29 = vshrl.u32 %v2297_v17, 16  ;;  %v2106_v35 = vld [vmem:[%s2550_s1 + $0xf0] sm:$0xff]   ;;  %v1612_v37 = vcombine.low %v483_v36, %v2286_v12  ;;  %v506_v38 = vrot.slane %v2297_v17, 1  ;;  %v609_v39 = vld [vmem:[%s2279_s16] sm:$0x8] }
  0x15   : > { %v276_v23 = vrot.slane %v274_v19, 1  ;;  %v610_v40 = vld [vmem:[%s2279_s16 + $0xc] sm:$0x7]  ;;  %v1637_v42 = vcombine.low %v609_v39, %v2286_v12  ;;  %v2109_v49 = vld [vmem:[%s2550_s1 + $0xa0] sm:$0xff]   ;;  %v2111_v52 = vld [vmem:[%s2550_s1 + $0x98] sm:$0xff]  }
  0x16   : > { %1883 = vmatpush3.bf16.msra.mxu0 %v2088_v4  ;;  %v281_v24 = vrot.slane %v279_v21, 1  ;;  %v2107_v41 = vld [vmem:[%s2550_s1 + $0xa8] sm:$0xff]   ;;  %v1638_v43 = vcombine.low %v2289_v13, %v610_v40  ;;  %v505_v45 = vrot.slane %v1612_v37, 1  ;;  %v2110_v51 = vld [vmem:[%s2550_s1 + $0xe0] sm:$0xff]   ;;  %v2112_v53 = vld [vmem:[%s2550_s1 + $0xd8] sm:$0xff]  }
  0x17   : > { %1903 = vmatpush3.bf16.msra.mxu1 %v2089_v5  ;;  %1884 = vmatprep.subr.bf16.mxu0 %v2090_v6  ;;  %v277_v25 = vor.u32 %v276_v23, %v272_v18  ;;  %v2108_v44 = vld [vmem:[%s2550_s1 + $0xe8] sm:$0xff]   ;;  %v635_v46 = vrot.slane %v1637_v42, 3  ;;  %v2113_v54 = vld [vmem:[%s2550_s1 + $0x90] sm:$0xff]   ;;  %v762_v58 = vshrl.u32 %v1637_v42, 16  ;;  %v765_v59 = vshll.u32 %v1637_v42, 16  ;;  %v2117_v0 = vld [vmem:[%s2550_s1 + $0x80] sm:$0xff]  }
  0x18   : > { %1904 = vmatprep.subr.bf16.mxu1 %v2091_v7  ;;  %v285_v32 = vor.u32 %v283_v29, %v281_v24  ;;  %v2341_v47 = vrot.slane %v1638_v43, 3  ;;  %v507_v48 = vsel %vm504_vm1, %v505_v45, %v506_v38  ;;  %v2114_v55 = vld [vmem:[%s2550_s1 + $0xd0] sm:$0xff]   ;;  %v2115_v56 = vld [vmem:[%s2550_s1 + $0x88] sm:$0xff]   ;;  %v2118_v1 = vld [vmem:[%s2550_s1 + $0xc0] sm:$0xff]  }
  0x19   : > { %v282_v28 = vsel %vm270_vm0, %v277_v25, %v281_v24  ;;  %v2370_v57 = vld [vmem:[%s2279_s16 + $0xc] sm:$0xf]  ;;  %v764_v2 = vrot.slane %v762_v58, 3  ;;  %v767_v3 = vrot.slane %v765_v59, 4  ;;  %v2125_v11 = vld [vmem:[%s2550_s1 + $0x170] sm:$0xff]   ;;  %v2128_v12 = vld [vmem:[%s2550_s1 + $0x120] sm:$0xff]  }
  0x1a   : > { %1885 = vmatpush3.bf16.msra.mxu0 %v2090_v6  ;;  %1894 = vmatprep.mubr.bf16.mxu0 %v282_v28  ;;  %v637_v50 = vsel %vm634_vm2, %v635_v46, %v2341_v47  ;;  %v1663_v60 = vcombine.low %v2289_v13, %v2370_v57  ;;  %v2116_v61 = vld [vmem:[%s2550_s1 + $0xc8] sm:$0xff]   ;;  %v2120_v6 = vld [vmem:[%s2550_s1 + $0x138] sm:$0xff]   ;;  %v2129_v13 = vld [vmem:[%s2550_s1 + $0x160] sm:$0xff]  }
  0x1b   : > { %1905 = vmatpush3.bf16.msra.mxu1 %v2091_v7  ;;  %1886 = vmatprep.subr.bf16.mxu0 %v2092_v8  ;;  %v2123_v7 = vld [vmem:[%s2550_s1 + $0x178] sm:$0xff]   ;;  %v2126_v16 = vld [vmem:[%s2550_s1 + $0x128] sm:$0xff]   ;;  %v1135_v19 = vld [vmem:[%s2279_s16 + $0x10] sm:$0x7] }
  0x1c   : > { %1906 = vmatprep.subr.bf16.mxu1 %v2093_v9  ;;  %v770_v62 = vshrl.u32 %v1663_v60, 16  ;;  %v773_v63 = vshll.u32 %v1663_v60, 16  ;;  %v2127_v17 = vld [vmem:[%s2550_s1 + $0x168] sm:$0xff]   ;;  %v2131_v21 = vld [vmem:[%s2550_s1 + $0x158] sm:$0xff]   ;;  %v1275_v24 = vld [vmem:[%s2279_s16 + $0x4] sm:$0x8] }
  0x1d   : > { %v1001_v18 = vld [vmem:[%s2279_s16 + $0xc] sm:$0xf]  ;;  %v1000_v23 = vld [vmem:[%s2279_s16 + $0x8] sm:$0xf]  ;;  %v999_v28 = vld [vmem:[%s2279_s16 + $0x4] sm:$0xc] }
  0x1e   : > { %1887 = vmatpush3.bf16.msra.mxu0 %v2092_v8  ;;  %v772_v4 = vrot.slane %v770_v62, 3  ;;  %v775_v5 = vrot.slane %v773_v63, 4  ;;  %v768_v8 = vor.u32 %v767_v3, %v764_v2  ;;  %v1765_v25 = vcombine.low %v1275_v24, %v1000_v23  ;;  %v2133_v29 = vld [vmem:[%s2550_s1 + $0x150] sm:$0xff]   ;;  %v2136_v40 = vld [vmem:[%s2550_s1 + $0x100] sm:$0xff]   ;;  %v2145_v58 = vld [vmem:[%s2550_s1 + $0x1a8] sm:$0xff]  }
  0x1f   : > { %1907 = vmatpush3.bf16.msra.mxu1 %v2093_v9  ;;  %1888 = vmatprep.subr.bf16.mxu0 %v2094_v10  ;;  %v2146_v59 = vld [vmem:[%s2550_s1 + $0x1e8] sm:$0xff]   ;;  %v2147_v60 = vld [vmem:[%s2550_s1 + $0x1a0] sm:$0xff]   ;;  %v2149_v62 = vld [vmem:[%s2550_s1 + $0x198] sm:$0xff]  }
  0x20   : > { %1908 = vmatprep.subr.bf16.mxu1 %v2095_v14  ;;  %v2389_v9 = vor.u32 %v775_v5, %v772_v4  ;;  %v2150_v63 = vld [vmem:[%s2550_s1 + $0x1d8] sm:$0xff]   ;;  %v2153_v2 = vld [vmem:[%s2550_s1 + $0x188] sm:$0xff]   ;;  %v2155_v4 = vld [vmem:[%s2550_s1 + $0x180] sm:$0xff]  }
  0x21   : > { %v2154_v3 = vld [vmem:[%s2550_s1 + $0x1c8] sm:$0xff]   ;;  %v2156_v5 = vld [vmem:[%s2550_s1 + $0x1c0] sm:$0xff]  }
  0x22   : > { %1889 = vmatpush3.bf16.msra.mxu0 %v2094_v10  ;;  %v2124_v10 = vld [vmem:[%s2550_s1 + $0x130] sm:$0xff]  }
  0x23   : > { %1909 = vmatpush3.bf16.msra.mxu1 %v2095_v14  ;;  %1890 = vmatprep.subr.bf16.mxu0 %v2096_v20  ;;  %v777_v14 = vsel %vm760_vm3, %v768_v8, %v2389_v9  ;;  %v2162_v8 = vld [vmem:[%s2550_s1 + $0x228] sm:$0xff]  }
  0x24   : > { %1910 = vmatprep.subr.bf16.mxu1 %v2097_v22 }
  0x26   : > { %1891 = vmatpush3.bf16.msra.mxu0 %v2096_v20  ;;  %v2130_v20 = vld [vmem:[%s2550_s1 + $0x118] sm:$0xff]  }
  0x27   : > { %1911 = vmatpush3.bf16.msra.mxu1 %v2097_v22  ;;  %1892 = vmatprep.subr.bf16.mxu0 %v2098_v26  ;;  %v2423_v22 = vcombine.low %v1001_v18, %v1135_v19 }
  0x28   : > { %1912 = vmatprep.subr.bf16.mxu1 %v2099_v27 }
  0x29   : > { %v1169_v39 = vshll.u32 %v2423_v22, 16 }
  0x2a   : > { %1893 = vmatpush3.bf16.msra.mxu0 %v2098_v26  ;;  %v1297_v26 = vrot.slane %v2423_v22, 3 }
  0x2b   : > { %1913 = vmatpush3.bf16.msra.mxu1 %v2099_v27  ;;  %1918 = vmatprep.subr.bf16.mxu0 %v2103_v30  ;;  %v2132_v27 = vld [vmem:[%s2550_s1 + $0x110] sm:$0xff]   ;;  %v1171_v46 = vrot.slane %v1169_v39, 3 }
  0x2c   : > { %1938 = vmatprep.subr.bf16.mxu1 %v2104_v31 }
  0x2d   : > { %1895 = vmatmul.mubr.bf16.vlgmr.msra.gmra.mxu0 %v285_v32 }
  0x2e   : > { %1915 = vmatmul.mubr.bf16.vlgmr.msra.gmra.mxu1 %v1587_v33  ;;  %1919 = vmatpush3.bf16.msra.mxu0 %v2103_v30  ;;  %v1296_v30 = vrot.slane %v1765_v25, 3  ;;  %v2134_v33 = vld [vmem:[%s2550_s1 + $0x108] sm:$0xff]  }
  0x2f   : > { %1939 = vmatpush3.bf16.msra.mxu1 %v2104_v31  ;;  %1920 = vmatprep.subr.bf16.mxu0 %v2105_v34  ;;  %v1714_v31 = vcombine.low %v999_v28, %v1000_v23 }
  0x30   : > { %1940 = vmatprep.subr.bf16.mxu1 %v2106_v35  ;;  %1934 = vmatprep.mubr.bf16.mxu0 %v507_v48  ;;  %v2438_v32 = vsel %vm634_vm2, %v1296_v30, %v1297_v26  ;;  %v2142_v48 = vld [vmem:[%s2550_s1 + $0x1f8] sm:$0xff]  }
  0x31   : > { %1954 = vmatprep.mubr.bf16.mxu1 %v637_v50  ;;  %v1158_v36 = vshrl.u32 %v1714_v31, 16  ;;  %v1161_v37 = vshll.u32 %v1714_v31, 16 }
  0x32   : > { %1921 = vmatpush3.bf16.msra.mxu0 %v2105_v34  ;;  %v2135_v34 = vld [vmem:[%s2550_s1 + $0x148] sm:$0xff]  }
  0x33   : > { %1941 = vmatpush3.bf16.msra.mxu1 %v2106_v35  ;;  %1922 = vmatprep.subr.bf16.mxu0 %v2107_v41  ;;  %v1002_v35 = vld [vmem:[%s2279_s16 + $0x10] sm:$0x3]  ;;  %v1160_v43 = vrot.slane %v1158_v36, 2 }
  0x34   : > { %1942 = vmatprep.subr.bf16.mxu1 %v2108_v44  ;;  %v1715_v42 = vcombine.low %v1001_v18, %v1002_v35 }
  0x36   : > { %1923 = vmatpush3.bf16.msra.mxu0 %v2107_v41  ;;  %v2137_v41 = vld [vmem:[%s2550_s1 + $0x140] sm:$0xff]   ;;  %v1032_v50 = vrot.slane %v1715_v42, 2 }
  0x37   : > { %1943 = vmatpush3.bf16.msra.mxu1 %v2108_v44  ;;  %1924 = vmatprep.subr.bf16.mxu0 %v2109_v49  ;;  %v1163_v44 = vrot.slane %v1161_v37, 3 }
  0x38   : > { %1944 = vmatprep.subr.bf16.mxu1 %v2110_v51 }
  0x3a   : > { %1925 = vmatpush3.bf16.msra.mxu0 %v2109_v49  ;;  %v1031_v49 = vrot.slane %v1714_v31, 2 }
  0x3b   : > { %1945 = vmatpush3.bf16.msra.mxu1 %v2110_v51  ;;  %1926 = vmatprep.subr.bf16.mxu0 %v2111_v52  ;;  %v1689_v51 = vcombine.low %v2370_v57, %v2370_v57 }
  0x3c   : > { %1946 = vmatprep.subr.bf16.mxu1 %v2112_v53 }
  0x3e   : > { %1927 = vmatpush3.bf16.msra.mxu0 %v2111_v52  ;;  %v1164_v52 = vor.u32 %v1163_v44, %v1160_v43 }
  0x3f   : > { %1947 = vmatpush3.bf16.msra.mxu1 %v2112_v53  ;;  %1928 = vmatprep.subr.bf16.mxu0 %v2113_v54 }
  0x40   : > { %1948 = vmatprep.subr.bf16.mxu1 %v2114_v55 }
  0x42   : > { %1929 = vmatpush3.bf16.msra.mxu0 %v2113_v54  ;;  %v2143_v54 = vld [vmem:[%s2550_s1 + $0x1b0] sm:$0xff]  }
  0x43   : > { %1949 = vmatpush3.bf16.msra.mxu1 %v2114_v55  ;;  %1930 = vmatprep.subr.bf16.mxu0 %v2115_v56  ;;  %v2144_v55 = vld [vmem:[%s2550_s1 + $0x1f0] sm:$0xff]  }
  0x44   : > { %1950 = vmatprep.subr.bf16.mxu1 %v2116_v61 }
  0x46   : > { %1931 = vmatpush3.bf16.msra.mxu0 %v2115_v56  ;;  %v1033_v56 = vsel %vm1030_vm4, %v1031_v49, %v1032_v50 }
  0x47   : > { %1951 = vmatpush3.bf16.msra.mxu1 %v2116_v61  ;;  %1932 = vmatprep.subr.bf16.mxu0 %v2117_v0  ;;  %v2148_v61 = vld [vmem:[%s2550_s1 + $0x1e0] sm:$0xff]  }
  0x48   : > { %1952 = vmatprep.subr.bf16.mxu1 %v2118_v1 }
  0x4a   : > { %1933 = vmatpush3.bf16.msra.mxu0 %v2117_v0  ;;  %v2151_v0 = vld [vmem:[%s2550_s1 + $0x190] sm:$0xff]  }
  0x4b   : > { %1953 = vmatpush3.bf16.msra.mxu1 %v2118_v1  ;;  %1958 = vmatprep.subr.bf16.mxu0 %v2120_v6  ;;  %v2152_v1 = vld [vmem:[%s2550_s1 + $0x1d0] sm:$0xff]  }
  0x4c   : > { %1978 = vmatprep.subr.bf16.mxu1 %v2123_v7 }
  0x4d   : > { %1935 = vmatmul.mubr.bf16.vlgmr.msra.gmra.mxu0 %v506_v38  ;;  %v1166_v38 = vshrl.u32 %v2423_v22, 16 }
  0x4e   : > { %1959 = vmatpush3.bf16.msra.mxu0 %v2120_v6  ;;  %1955 = vmatmul.mubr.bf16.vlgmr.msra.gmra.mxu1 %v2341_v47  ;;  %v2139_v47 = vld [vmem:[%s2550_s1 + $0x1b8] sm:$0xff]  }
  0x4f   : > { %1979 = vmatpush3.bf16.msra.mxu1 %v2123_v7  ;;  %1960 = vmatprep.subr.bf16.mxu0 %v2124_v10  ;;  %v1168_v45 = vrot.slane %v1166_v38, 2  ;;  %v2160_v6 = vld [vmem:[%s2550_s1 + $0x238] sm:$0xff]   ;;  %v2161_v7 = vld [vmem:[%s2550_s1 + $0x230] sm:$0xff]  }
  0x50   : > { %1980 = vmatprep.subr.bf16.mxu1 %v2125_v11  ;;  %1974 = vmatprep.mubr.bf16.mxu0 %v777_v14  ;;  %v2166_v14 = vld [vmem:[%s2550_s1 + $0x208] sm:$0xff]  }
  0x51   : > { %1994 = vmatprep.mubr.bf16.mxu1 %v1688_v15  ;;  %v1172_v53 = vor.u32 %v1171_v46, %v1168_v45  ;;  %v2167_v15 = vld [vmem:[%s2550_s1 + $0x200] sm:$0xff]  }
  0x52   : > { %1961 = vmatpush3.bf16.msra.mxu0 %v2124_v10  ;;  %v2164_v10 = vld [vmem:[%s2550_s1 + $0x218] sm:$0xff]  }
  0x53   : > { %1981 = vmatpush3.bf16.msra.mxu1 %v2125_v11  ;;  %1962 = vmatprep.subr.bf16.mxu0 %v2126_v16  ;;  %v1173_v57 = vsel %vm1156_vm5, %v1164_v52, %v1172_v53  ;;  %v2165_v11 = vld [vmem:[%s2550_s1 + $0x210] sm:$0xff]  }
  0x54   : > { %1982 = vmatprep.subr.bf16.mxu1 %v2127_v17 }
  0x56   : > { %1963 = vmatpush3.bf16.msra.mxu0 %v2126_v16 }
  0x57   : > { %1983 = vmatpush3.bf16.msra.mxu1 %v2127_v17  ;;  %1964 = vmatprep.subr.bf16.mxu0 %v2128_v12 }
  0x58   : > { %1984 = vmatprep.subr.bf16.mxu1 %v2129_v13 }
  0x5a   : > { %1965 = vmatpush3.bf16.msra.mxu0 %v2128_v12 }
  0x5b   : > { %1985 = vmatpush3.bf16.msra.mxu1 %v2129_v13  ;;  %1966 = vmatprep.subr.bf16.mxu0 %v2130_v20 }
  0x5c   : > { %1986 = vmatprep.subr.bf16.mxu1 %v2131_v21 }
  0x5e   : > { %1967 = vmatpush3.bf16.msra.mxu0 %v2130_v20 }
  0x5f   : > { %1987 = vmatpush3.bf16.msra.mxu1 %v2131_v21  ;;  %1968 = vmatprep.subr.bf16.mxu0 %v2132_v27 }
  0x60   : > { %1988 = vmatprep.subr.bf16.mxu1 %v2133_v29 }
  0x62   : > { %1969 = vmatpush3.bf16.msra.mxu0 %v2132_v27 }
  0x63   : > { %1989 = vmatpush3.bf16.msra.mxu1 %v2133_v29  ;;  %1970 = vmatprep.subr.bf16.mxu0 %v2134_v33 }
  0x64   : > { %1990 = vmatprep.subr.bf16.mxu1 %v2135_v34 }
  0x66   : > { %1971 = vmatpush3.bf16.msra.mxu0 %v2134_v33 }
  0x67   : > { %1991 = vmatpush3.bf16.msra.mxu1 %v2135_v34  ;;  %1972 = vmatprep.subr.bf16.mxu0 %v2136_v40 }
  0x68   : > { %1992 = vmatprep.subr.bf16.mxu1 %v2137_v41 }
  0x6a   : > { %1973 = vmatpush3.bf16.msra.mxu0 %v2136_v40 }
  0x6b   : > { %1993 = vmatpush3.bf16.msra.mxu1 %v2137_v41  ;;  %1998 = vmatprep.subr.bf16.mxu0 %v2139_v47 }
  0x6c   : > { %2018 = vmatprep.subr.bf16.mxu1 %v2142_v48 }
  0x6d   : > { %1975 = vmatmul.mubr.bf16.vlgmr.msra.gmra.mxu0 %v2389_v9  ;;  %v2163_v9 = vld [vmem:[%s2550_s1 + $0x220] sm:$0xff]  }
  0x6e   : > { %1999 = vmatpush3.bf16.msra.mxu0 %v2139_v47  ;;  %1995 = vmatmul.mubr.bf16.vlgmr.msra.gmra.mxu1 %v1689_v51 }
  0x6f   : > { %2019 = vmatpush3.bf16.msra.mxu1 %v2142_v48  ;;  %2000 = vmatprep.subr.bf16.mxu0 %v2143_v54 }
  0x70   : > { %2020 = vmatprep.subr.bf16.mxu1 %v2144_v55  ;;  %2014 = vmatprep.mubr.bf16.mxu0 %v1033_v56 }
  0x71   : > { %2034 = vmatprep.mubr.bf16.mxu1 %v1173_v57 }
  0x72   : > { %2001 = vmatpush3.bf16.msra.mxu0 %v2143_v54 }
  0x73   : > { %2021 = vmatpush3.bf16.msra.mxu1 %v2144_v55  ;;  %2002 = vmatprep.subr.bf16.mxu0 %v2145_v58 }
  0x74   : > { %2022 = vmatprep.subr.bf16.mxu1 %v2146_v59 }
  0x76   : > { %2003 = vmatpush3.bf16.msra.mxu0 %v2145_v58 }
  0x77   : > { %2023 = vmatpush3.bf16.msra.mxu1 %v2146_v59  ;;  %2004 = vmatprep.subr.bf16.mxu0 %v2147_v60 }
  0x78   : > { %2024 = vmatprep.subr.bf16.mxu1 %v2148_v61 }
  0x7a   : > { %2005 = vmatpush3.bf16.msra.mxu0 %v2147_v60 }
  0x7b   : > { %2025 = vmatpush3.bf16.msra.mxu1 %v2148_v61  ;;  %2006 = vmatprep.subr.bf16.mxu0 %v2149_v62 }
  0x7c   : > { %2026 = vmatprep.subr.bf16.mxu1 %v2150_v63 }
  0x7e   : > { %2007 = vmatpush3.bf16.msra.mxu0 %v2149_v62 }
  0x7f   : > { %2027 = vmatpush3.bf16.msra.mxu1 %v2150_v63  ;;  %2008 = vmatprep.subr.bf16.mxu0 %v2151_v0 }
  0x80   : > { %2028 = vmatprep.subr.bf16.mxu1 %v2152_v1 }
  0x82   : > { %2009 = vmatpush3.bf16.msra.mxu0 %v2151_v0  ;;  %v1774_v0 = vld [vmem:[%s2551_s2] ss:$0 sm:$0xff] }
  0x83   : > { %2029 = vmatpush3.bf16.msra.mxu1 %v2152_v1  ;;  %2010 = vmatprep.subr.bf16.mxu0 %v2153_v2 }
  0x84   : > { %2030 = vmatprep.subr.bf16.mxu1 %v2154_v3 }
  0x86   : > { %2011 = vmatpush3.bf16.msra.mxu0 %v2153_v2 }
  0x87   : > { %2031 = vmatpush3.bf16.msra.mxu1 %v2154_v3  ;;  %2012 = vmatprep.subr.bf16.mxu0 %v2155_v4 }
  0x88   : > { %2032 = vmatprep.subr.bf16.mxu1 %v2156_v5 }
  0x8a   : > { %2013 = vmatpush3.bf16.msra.mxu0 %v2155_v4 }
  0x8b   : > { %2033 = vmatpush3.bf16.msra.mxu1 %v2156_v5  ;;  %2038 = vmatprep.subr.bf16.mxu0 %v2160_v6 }
  0x8d   : > { %2015 = vmatmul.mubr.bf16.vlgmr.msra.gmra.mxu0 %v1032_v50 }
  0x8e   : > { %2039 = vmatpush3.bf16.msra.mxu0 %v2160_v6  ;;  %2035 = vmatmul.mubr.bf16.vlgmr.msra.gmra.mxu1 %v1172_v53 }
  0x8f   : > { %2040 = vmatprep.subr.bf16.mxu0 %v2161_v7  ;;  %2054 = vmatprep.mubr.bf16.mxu0 %v2438_v32 }
  0x92   : > { %2041 = vmatpush3.bf16.msra.mxu0 %v2161_v7 }
  0x93   : > { %2042 = vmatprep.subr.bf16.mxu0 %v2162_v8 }
  0x96   : > { %2043 = vmatpush3.bf16.msra.mxu0 %v2162_v8 }
  0x97   : > { %2044 = vmatprep.subr.bf16.mxu0 %v2163_v9 }
  0x9a   : > { %2045 = vmatpush3.bf16.msra.mxu0 %v2163_v9 }
  0x9b   : > { %2046 = vmatprep.subr.bf16.mxu0 %v2164_v10 }
  0x9e   : > { %2047 = vmatpush3.bf16.msra.mxu0 %v2164_v10 }
  0x9f   : > { %2048 = vmatprep.subr.bf16.mxu0 %v2165_v11 }
  0xa2   : > { %2049 = vmatpush3.bf16.msra.mxu0 %v2165_v11 }
  0xa3   : > { %2050 = vmatprep.subr.bf16.mxu0 %v2166_v14 }
  0xa6   : > { %2051 = vmatpush3.bf16.msra.mxu0 %v2166_v14 }
  0xa7   : > { %2052 = vmatprep.subr.bf16.mxu0 %v2167_v15 }
  0xaa   : > { %2053 = vmatpush3.bf16.msra.mxu0 %v2167_v15 }
  0xad   : > { %2055 = vmatmul.mubr.bf16.vlgmr.msra.gmra.mxu0 %v1297_v26 }
  0xed   : > { %v1896_v16 = vpop.f32.mrf.mxu0 }
  0xee   : > { %v1916_v17 = vpop.f32.mrf.mxu1 }
  0xef   : > { %v478_v12 = vadd.f32 %v1916_v17, %v1896_v16  ;;  %v370_v13 = vpop.f32.mrf.mxu0 }
  0xf0   : > { %v469_v18 = vpop.f32.mrf.mxu1 }
  0xf1   : > { %v470_v19 = vadd.f32 %v469_v18, %v370_v13  ;;  %v1897_v20 = vpop.f32.mrf.mxu0 }
  0xf2   : > { %v1917_v21 = vpop.f32.mrf.mxu1 }
  0xf3   : > { %v373_v23 = vpop.f32.mrf.mxu0 }
  0xf4   : > { %v472_v24 = vpop.f32.mrf.mxu1 }
  0xf5   : > { %v473_v25 = vadd.f32 %v472_v24, %v373_v23 }
 0x10d   : > { %v1936_v27 = vpop.f32.mrf.mxu0 }
 0x10e   : > { %v608_v28 = vadd.f32 %v1936_v27, %v478_v12  ;;  %v1956_v29 = vpop.f32.mrf.mxu1 }
 0x10f   : > { %v592_v30 = vpop.f32.mrf.mxu0 }
 0x110   : > { %v606_v31 = vadd.f32 %v592_v30, %v470_v19  ;;  %v738_v32 = vadd.f32 %v1956_v29, %v608_v28  ;;  %v722_v33 = vpop.f32.mrf.mxu1 }
 0x111   : > { %v1937_v22 = vpop.f32.mrf.mxu0 }
 0x112   : > { %v736_v26 = vadd.f32 %v722_v33, %v606_v31  ;;  %v1957_v34 = vpop.f32.mrf.mxu1 }
 0x113   : > { %v595_v35 = vpop.f32.mrf.mxu0 }
 0x114   : > { %v725_v36 = vpop.f32.mrf.mxu1  ;;  %v607_v51 = vadd.f32 %v595_v35, %v473_v25 }
 0x116   : > { %v737_v54 = vadd.f32 %v725_v36, %v607_v51 }
 0x12d   : > { %v1976_v37 = vpop.f32.mrf.mxu0 }
 0x12e   : > { %v1996_v38 = vpop.f32.mrf.mxu1  ;;  %v878_v52 = vadd.f32 %v1976_v37, %v738_v32 }
 0x12f   : > { %v862_v39 = vpop.f32.mrf.mxu0 }
 0x130   : > { %v982_v40 = vpop.f32.mrf.mxu1  ;;  %v876_v53 = vadd.f32 %v862_v39, %v736_v26  ;;  %v998_v55 = vadd.f32 %v1996_v38, %v878_v52 }
 0x131   : > { %v1977_v41 = vpop.f32.mrf.mxu0 }
 0x132   : > { %v1997_v42 = vpop.f32.mrf.mxu1  ;;  %v996_v56 = vadd.f32 %v982_v40, %v876_v53 }
 0x133   : > { %v865_v43 = vpop.f32.mrf.mxu0 }
 0x134   : > { %v985_v44 = vpop.f32.mrf.mxu1  ;;  %v877_v57 = vadd.f32 %v865_v43, %v737_v54 }
 0x136   : > { %v997_v61 = vadd.f32 %v985_v44, %v877_v57 }
 0x14d   : > { %v2016_v45 = vpop.f32.mrf.mxu0 }
 0x14e   : > { %v2036_v46 = vpop.f32.mrf.mxu1  ;;  %v1134_v58 = vadd.f32 %v2016_v45, %v998_v55 }
 0x14f   : > { %v1118_v47 = vpop.f32.mrf.mxu0 }
 0x150   : > { %v1258_v48 = vpop.f32.mrf.mxu1  ;;  %v1132_v59 = vadd.f32 %v1118_v47, %v996_v56  ;;  %v1274_v62 = vadd.f32 %v2036_v46, %v1134_v58 }
 0x151   : > { %v2017_v49 = vpop.f32.mrf.mxu0 }
 0x152   : > { %v2037_v50 = vpop.f32.mrf.mxu1  ;;  %v1272_v1 = vadd.f32 %v1258_v48, %v1132_v59 }
 0x153   : > { %v1121_v60 = vpop.f32.mrf.mxu0 }
 0x154   : > { %v1133_v2 = vadd.f32 %v1121_v60, %v997_v61  ;;  %v1261_v4 = vpop.f32.mrf.mxu1 }
 0x156   : > { %v1273_v9 = vadd.f32 %v1261_v4, %v1133_v2 }
 0x16d   : > { %v2056_v63 = vpop.f32.mrf.mxu0 }
 0x16e   : > { %v1399_v3 = vadd.f32 %v2056_v63, %v1274_v62 }
 0x16f   : > { %v1383_v5 = vpop.f32.mrf.mxu0 }
 0x170   : > { %v1409_v6 = vadd.f32 %v1774_v0, %v1399_v3  ;;  %v1397_v7 = vadd.f32 %v1383_v5, %v1272_v1 }
 0x171   : > { %v2057_v8 = vpop.f32.mrf.mxu0 }
 0x172   : > { %v1412_v10 = vmax.f32 %v1409_v6, -60.0  ;;  %v1407_v11 = vadd.f32 %v1774_v0, %v1397_v7 }
 0x173   : > { %v1386_v14 = vpop.f32.mrf.mxu0 }
 0x174   : > { %v1415_v15 = vsub.f32 0.0, %v1412_v10  ;;  %v1410_v16 = vmax.f32 %v1407_v11, -60.0  ;;  %v1398_v17 = vadd.f32 %v1386_v14, %v1273_v9 }
 0x176   : > { %v1420_v12 = vmul.f32 1.442695, %v1415_v15  ;;  %v1413_v13 = vsub.f32 0.0, %v1410_v16  ;;  %v1408_v18 = vadd.f32 %v1774_v0, %v1398_v17 }
 0x178   : > { %2169 = vpow2.f32 %v1420_v12  ;;  %v1416_v19 = vmul.f32 1.442695, %v1413_v13  ;;  %v1411_v20 = vmax.f32 %v1408_v18, -60.0 }
 0x17a   : > { %2171 = vpow2.f32 %v1416_v19  ;;  %v1414_v21 = vsub.f32 0.0, %v1411_v20 }
 0x17c   : > { %v1418_v23 = vmul.f32 1.442695, %v1414_v21 }
 0x17e   : > { %2173 = vpow2.f32 %v1418_v23 }
 0x185   : > { %v2170_v24 = vpop.eup %2169 }
 0x186   : > { %v1424_v25 = vadd.f32 1.0, %v2170_v24 }
 0x187   : > { %v2172_v27 = vpop.eup %2171 }
 0x188   : > { %2175 = vrcp.f32 %v1424_v25  ;;  %v1422_v28 = vadd.f32 1.0, %v2172_v27 }
 0x18a   : > { %2177 = vrcp.f32 %v1422_v28 }
 0x18b   : > { %v2174_v29 = vpop.eup %2173 }
 0x18c   : > { %v1423_v30 = vadd.f32 1.0, %v2174_v29 }
 0x18e   : > { %2179 = vrcp.f32 %v1423_v30 }
 0x195   : > { %v2176_v31 = vpop.eup %2175 }
 0x196   : > { %v1430_v32 = vmul.f32 %v2176_v31, %v1409_v6 }
 0x197   : > { %v2178_v22 = vpop.eup %2177 }
 0x198   : > { %v1782_v33 = vpack.c.bf16 %v1430_v32, %v1430_v32  ;;  %v1428_v34 = vmul.f32 %v2178_v22, %v1407_v11 }
 0x19a   : > { %1446 = vst [vmem:[%s221_s6 + $0x8] sm:$0xf] %v1782_v33 }
 0x19b   : > { %v2180_v26 = vpop.eup %2179 }
 0x19c   : > { %v1429_v35 = vmul.f32 %v2180_v26, %v1408_v18 }
 0x19e   : > { %v1786_v36 = vpack.c.bf16 %v1429_v35, %v1428_v34 }
 0x1a0   : > { %1787 = vst [vmem:[%s221_s6] sm:$0xff] %v1786_v36  }
 0x1a1 PF: > { %s13_s14 = sadd.s32 1, %s2203_s14   ;;  %s2553_s12 = smov %s2199_s13 }
 0x1a2   : > { %p10_p5 = scmp.ge.s32.totalorder %s13_s14, 4   ;;  %s2554_s13 = smov %s2556_s15 }
 0x1a4   :  { %12 = sbr.rel (!%p10_p5) target bundleno = 2 (0x2), region = 76 }

// kernel: yolov7_backbone.25
= control target key start
LH: loop header
LB: loop body
LE: loop exit
PB: predicated region body
PF: predicated region fallthrough
CT: control target
= control target key end

     0   :  { %s1362_s21 = smov 0   ;;  %s1364_s22 = smov 0   ;;  %s1564_s0 = inlined_call_operand.vmem [shape: bf16[2,16,128], index: 0, kind: input, shape index: {}]   ;;  %s1565_s1 = inlined_call_operand.vmem [shape: bf16[2,16,128], index: 1, kind: input, shape index: {}]   ;;  %s1566_s2 = inlined_call_operand.vmem [shape: bf16[2,16,128], index: 2, kind: input, shape index: {}]   ;;  %s1567_s3 = inlined_call_operand.vmem [shape: bf16[2,16,128], index: 3, kind: input, shape index: {}]   ;;  %s1568_s4 = inlined_call_operand.vmem [shape: bf16[4,128,128], index: 4, kind: input, shape index: {}]   ;;  %s1569_s5 = inlined_call_operand.vmem [shape: f32[1,128], index: 5, kind: input, shape index: {}]   ;;  %s1570_s6 = inlined_call_operand.vmem [shape: bf16[2,16,128], index: 6, kind: output, shape index: {}]  }
   0x1   :  { %s1366_s23 = smov 0  }
   0x2 LB: > { %s28_s24 = sadd.s32 1, %s1319_s22  ;;  %p1003_p0 = scmp.ge.s32.totalorder %s1323_s23, 1  ;;  %s1323_s23 = sphi %s1366_s23, %s16_s23   ;;  %s1319_s22 = sphi %s1364_s22, %s1572_s22   ;;  %s1315_s21 = sphi %s1362_s21, %s1571_s21  }
   0x3   : > { %p30_p1 = scmp.ge.s32.totalorder %s28_s24, 2  ;;  %p273_p2 = scmp.lt.s32.totalorder %s1323_s23, 3 }
   0x5   : > { %s1574_s24 = smov (%p30_p1, %s28_s24), 0  ;;  %p274_p3 = pnand %p1003_p0, %p273_p2 }
   0x6   : > { %p328_p4 = scmp.lt.s32.totalorder (!%p274_p3), %s1315_s21, 1 }
   0x7   : > { %277 = sbr.rel (%p274_p3) target bundleno = 321 (0x141), region = 44 }
   0xc   : > { %v1257_v0 = vld [vmem:[%s1568_s4 + $0x78] sm:$0xff]   ;;  %v1325_v1 = vmov 0.0   ;;  %v1259_v3 = vld [vmem:[%s1568_s4 + $0x70] sm:$0xff]   ;;  %vm1326_vm0 = vmmov 0   ;;  %v1261_v5 = vld [vmem:[%s1568_s4 + $0x68] sm:$0xff]   ;;  %s1576_s21 = smov (!%p328_p4, %s1315_s21), 1 }
   0xd   : > { %1151 = vmatprep.subr.bf16.mxu0 %v1325_v1  ;;  %1171 = vmatprep.subr.bf16.mxu1 %v1325_v1  ;;  %v1258_v2 = vld [vmem:[%s1568_s4 + $0x38] sm:$0xff]   ;;  %v1260_v4 = vld [vmem:[%s1568_s4 + $0x30] sm:$0xff]   ;;  %v1262_v6 = vld [vmem:[%s1568_s4 + $0x28] sm:$0xff]   ;;  %s1420_s17 = sshll.u32 %s1576_s21, 3 }
   0xe   : > { %1152 = vmatpush3.bf16.msra.mxu0 %v1257_v0  ;;  %1167 = vmatprep.mubr.msk.bf16.mxu0 %vm1326_vm0, %v1325_v1  ;;  %v1263_v7 = vld [vmem:[%s1568_s4 + $0x60] sm:$0xff]   ;;  %v1265_v9 = vld [vmem:[%s1568_s4 + $0x58] sm:$0xff]   ;;  %s337_s28 = scalar_lea.vmem %s1565_s1, %s1420_s17  ;;  %s332_s30 = scalar_lea.vmem %s1564_s0, %s1420_s17  ;;  %v1267_v11 = vld [vmem:[%s1568_s4 + $0x50] sm:$0xff]  }
   0xf   : > { %1172 = vmatpush3.bf16.msra.mxu1 %v1258_v2  ;;  %1153 = vmatprep.subr.bf16.mxu0 %v1325_v1  ;;  %v1264_v8 = vld [vmem:[%s1568_s4 + $0x20] sm:$0xff]   ;;  %v1266_v10 = vld [vmem:[%s1568_s4 + $0x18] sm:$0xff]   ;;  %v1268_v12 = vld [vmem:[%s1568_s4 + $0x10] sm:$0xff]   ;;  %s347_s10 = scalar_lea.vmem %s1567_s3, %s1420_s17 }
  0x10   : > { %1173 = vmatprep.subr.bf16.mxu1 %v1325_v1  ;;  %1187 = vmatprep.mubr.msk.bf16.mxu1 %vm1326_vm0, %v1325_v1  ;;  %v1269_v13 = vld [vmem:[%s1568_s4 + $0x48] sm:$0xff]   ;;  %v1271_v15 = vld [vmem:[%s1568_s4 + $0x40] sm:$0xff]   ;;  %v1275_v19 = vld [vmem:[%s1568_s4 + $0xb8] sm:$0xff]  }
  0x11   : > { %v1270_v14 = vld [vmem:[%s1568_s4 + $0x8] sm:$0xff]   ;;  %v1272_v16 = vld [vmem:[%s1568_s4] sm:$0xff]   ;;  %v1276_v20 = vld [vmem:[%s1568_s4 + $0xf8] sm:$0xff]  }
  0x12   : > { %1154 = vmatpush3.bf16.msra.mxu0 %v1259_v3  ;;  %v1273_v17 = vld [vmem:[%s337_s28] sm:$0xff]   ;;  %s342_s28 = scalar_lea.vmem %s1566_s2, %s1420_s17  ;;  %v1277_v21 = vld [vmem:[%s1568_s4 + $0xb0] sm:$0xff]   ;;  %v1279_v23 = vld [vmem:[%s1568_s4 + $0xa8] sm:$0xff]  }
  0x13   : > { %1174 = vmatpush3.bf16.msra.mxu1 %v1260_v4  ;;  %1155 = vmatprep.subr.bf16.mxu0 %v1325_v1  ;;  %v1274_v18 = vld [vmem:[%s332_s30] sm:$0xff]   ;;  %v1278_v22 = vld [vmem:[%s1568_s4 + $0xf0] sm:$0xff]   ;;  %v1280_v24 = vld [vmem:[%s1568_s4 + $0xe8] sm:$0xff]   ;;  %s362_s30 = scalar_lea.vmem %s1570_s6, %s1420_s17 }
  0x14   : > { %1175 = vmatprep.subr.bf16.mxu1 %v1325_v1  ;;  %v1281_v25 = vld [vmem:[%s1568_s4 + $0xa0] sm:$0xff]   ;;  %v1283_v27 = vld [vmem:[%s1568_s4 + $0x98] sm:$0xff]   ;;  %v1285_v29 = vld [vmem:[%s1568_s4 + $0x90] sm:$0xff]  }
  0x15   : > { %v1282_v26 = vld [vmem:[%s1568_s4 + $0xe0] sm:$0xff]   ;;  %v1284_v28 = vld [vmem:[%s1568_s4 + $0xd8] sm:$0xff]   ;;  %v1286_v30 = vld [vmem:[%s1568_s4 + $0xd0] sm:$0xff]  }
  0x16   : > { %1156 = vmatpush3.bf16.msra.mxu0 %v1261_v5  ;;  %v1287_v31 = vld [vmem:[%s1568_s4 + $0x88] sm:$0xff]   ;;  %v1289_v33 = vld [vmem:[%s1568_s4 + $0x80] sm:$0xff]  }
  0x17   : > { %1176 = vmatpush3.bf16.msra.mxu1 %v1262_v6  ;;  %1157 = vmatprep.subr.bf16.mxu0 %v1325_v1  ;;  %v1288_v32 = vld [vmem:[%s1568_s4 + $0xc8] sm:$0xff]   ;;  %v1290_v34 = vld [vmem:[%s1568_s4 + $0xc0] sm:$0xff]  }
  0x18   : > { %1177 = vmatprep.subr.bf16.mxu1 %v1325_v1  ;;  %v1291_v35 = vld [vmem:[%s342_s28] sm:$0xff]  }
  0x19   : > { %v1292_v36 = vld [vmem:[%s347_s10] sm:$0xff]  }
  0x1a   : > { %1158 = vmatpush3.bf16.msra.mxu0 %v1263_v7  ;;  %v1098_v49 = vld [vmem:[%s1569_s5] ss:$0 sm:$0xff] }
  0x1b   : > { %1178 = vmatpush3.bf16.msra.mxu1 %v1264_v8  ;;  %1159 = vmatprep.subr.bf16.mxu0 %v1325_v1 }
  0x1c   : > { %1179 = vmatprep.subr.bf16.mxu1 %v1325_v1 }
  0x1e   : > { %1160 = vmatpush3.bf16.msra.mxu0 %v1265_v9 }
  0x1f   : > { %1180 = vmatpush3.bf16.msra.mxu1 %v1266_v10  ;;  %1161 = vmatprep.subr.bf16.mxu0 %v1325_v1 }
  0x20   : > { %1181 = vmatprep.subr.bf16.mxu1 %v1325_v1 }
  0x22   : > { %1162 = vmatpush3.bf16.msra.mxu0 %v1267_v11 }
  0x23   : > { %1182 = vmatpush3.bf16.msra.mxu1 %v1268_v12  ;;  %1163 = vmatprep.subr.bf16.mxu0 %v1325_v1 }
  0x24   : > { %1183 = vmatprep.subr.bf16.mxu1 %v1325_v1 }
  0x26   : > { %1164 = vmatpush3.bf16.msra.mxu0 %v1269_v13 }
  0x27   : > { %1184 = vmatpush3.bf16.msra.mxu1 %v1270_v14  ;;  %1165 = vmatprep.subr.bf16.mxu0 %v1325_v1 }
  0x28   : > { %1185 = vmatprep.subr.bf16.mxu1 %v1325_v1 }
  0x2a   : > { %1166 = vmatpush3.bf16.msra.mxu0 %v1271_v15 }
  0x2b   : > { %1186 = vmatpush3.bf16.msra.mxu1 %v1272_v16  ;;  %1191 = vmatprep.subr.bf16.mxu0 %v1325_v1 }
  0x2c   : > { %1211 = vmatprep.subr.bf16.mxu1 %v1325_v1 }
  0x2d   : > { %1168 = vmatmul.mubr.bf16.vlgmr.msra.gmra.mxu0 %v1273_v17 }
  0x2e   : > { %1188 = vmatmul.mubr.bf16.vlgmr.msra.gmra.mxu1 %v1274_v18  ;;  %1192 = vmatpush3.bf16.msra.mxu0 %v1275_v19 }
  0x2f   : > { %1212 = vmatpush3.bf16.msra.mxu1 %v1276_v20  ;;  %1193 = vmatprep.subr.bf16.mxu0 %v1325_v1 }
  0x30   : > { %1213 = vmatprep.subr.bf16.mxu1 %v1325_v1  ;;  %1207 = vmatprep.mubr.msk.bf16.mxu0 %vm1326_vm0, %v1325_v1 }
  0x31   : > { %1227 = vmatprep.mubr.msk.bf16.mxu1 %vm1326_vm0, %v1325_v1 }
  0x32   : > { %1194 = vmatpush3.bf16.msra.mxu0 %v1277_v21 }
  0x33   : > { %1214 = vmatpush3.bf16.msra.mxu1 %v1278_v22  ;;  %1195 = vmatprep.subr.bf16.mxu0 %v1325_v1 }
  0x34   : > { %1215 = vmatprep.subr.bf16.mxu1 %v1325_v1 }
  0x36   : > { %1196 = vmatpush3.bf16.msra.mxu0 %v1279_v23 }
  0x37   : > { %1216 = vmatpush3.bf16.msra.mxu1 %v1280_v24  ;;  %1197 = vmatprep.subr.bf16.mxu0 %v1325_v1 }
  0x38   : > { %1217 = vmatprep.subr.bf16.mxu1 %v1325_v1 }
  0x3a   : > { %1198 = vmatpush3.bf16.msra.mxu0 %v1281_v25 }
  0x3b   : > { %1218 = vmatpush3.bf16.msra.mxu1 %v1282_v26  ;;  %1199 = vmatprep.subr.bf16.mxu0 %v1325_v1 }
  0x3c   : > { %1219 = vmatprep.subr.bf16.mxu1 %v1325_v1 }
  0x3e   : > { %1200 = vmatpush3.bf16.msra.mxu0 %v1283_v27 }
  0x3f   : > { %1220 = vmatpush3.bf16.msra.mxu1 %v1284_v28  ;;  %1201 = vmatprep.subr.bf16.mxu0 %v1325_v1 }
  0x40   : > { %1221 = vmatprep.subr.bf16.mxu1 %v1325_v1 }
  0x42   : > { %1202 = vmatpush3.bf16.msra.mxu0 %v1285_v29 }
  0x43   : > { %1222 = vmatpush3.bf16.msra.mxu1 %v1286_v30  ;;  %1203 = vmatprep.subr.bf16.mxu0 %v1325_v1 }
  0x44   : > { %1223 = vmatprep.subr.bf16.mxu1 %v1325_v1 }
  0x46   : > { %1204 = vmatpush3.bf16.msra.mxu0 %v1287_v31 }
  0x47   : > { %1224 = vmatpush3.bf16.msra.mxu1 %v1288_v32  ;;  %1205 = vmatprep.subr.bf16.mxu0 %v1325_v1 }
  0x48   : > { %1225 = vmatprep.subr.bf16.mxu1 %v1325_v1 }
  0x4a   : > { %1206 = vmatpush3.bf16.msra.mxu0 %v1289_v33 }
  0x4b   : > { %1226 = vmatpush3.bf16.msra.mxu1 %v1290_v34 }
  0x4d   : > { %1208 = vmatmul.mubr.bf16.vlgmr.msra.gmra.mxu0 %v1291_v35 }
  0x4e   : > { %1228 = vmatmul.mubr.bf16.vlgmr.msra.gmra.mxu1 %v1292_v36 }
  0xed   : > { %v489_v37 = vpop.f32.mrf.mxu0 }
  0xee   : > { %v584_v38 = vpop.f32.mrf.mxu1 }
  0xef   : > { %v1169_v39 = vpop.f32.mrf.mxu0  ;;  %v585_v45 = vadd.f32 %v584_v38, %v489_v37 }
  0xf0   : > { %v1189_v40 = vpop.f32.mrf.mxu1 }
  0xf1   : > { %v492_v41 = vpop.f32.mrf.mxu0 }
  0xf2   : > { %v587_v42 = vpop.f32.mrf.mxu1 }
  0xf3   : > { %v1170_v43 = vpop.f32.mrf.mxu0  ;;  %v588_v51 = vadd.f32 %v587_v42, %v492_v41 }
  0xf4   : > { %v1190_v44 = vpop.f32.mrf.mxu1 }
 0x10d   : > { %v698_v46 = vpop.f32.mrf.mxu0 }
 0x10e   : > { %v705_v47 = vadd.f32 %v698_v46, %v585_v45  ;;  %v814_v48 = vpop.f32.mrf.mxu1 }
 0x10f   : > { %v1209_v50 = vpop.f32.mrf.mxu0 }
 0x110   : > { %v821_v52 = vadd.f32 %v814_v48, %v705_v47  ;;  %v1229_v53 = vpop.f32.mrf.mxu1 }
 0x111   : > { %v701_v54 = vpop.f32.mrf.mxu0 }
 0x112   : > { %v830_v55 = vadd.f32 %v1098_v49, %v821_v52  ;;  %v706_v56 = vadd.f32 %v701_v54, %v588_v51  ;;  %v817_v57 = vpop.f32.mrf.mxu1 }
 0x113   : > { %v1210_v58 = vpop.f32.mrf.mxu0 }
 0x114   : > { %v832_v59 = vmax.f32 %v830_v55, -60.0  ;;  %v822_v60 = vadd.f32 %v817_v57, %v706_v56  ;;  %v1230_v61 = vpop.f32.mrf.mxu1 }
 0x116   : > { %v834_v62 = vsub.f32 0.0, %v832_v59  ;;  %v831_v63 = vadd.f32 %v1098_v49, %v822_v60 }
 0x118   : > { %v836_v0 = vmul.f32 1.442695, %v834_v62  ;;  %v833_v1 = vmax.f32 %v831_v63, -60.0 }
 0x11a   : > { %1293 = vpow2.f32 %v836_v0  ;;  %v835_v2 = vsub.f32 0.0, %v833_v1 }
 0x11c   : > { %v838_v3 = vmul.f32 1.442695, %v835_v2 }
 0x11e   : > { %1295 = vpow2.f32 %v838_v3 }
 0x127   : > { %v1294_v4 = vpop.eup %1293 }
 0x128   : > { %v840_v5 = vadd.f32 1.0, %v1294_v4 }
 0x12a   : > { %1297 = vrcp.f32 %v840_v5 }
 0x12b   : > { %v1296_v6 = vpop.eup %1295 }
 0x12c   : > { %v841_v7 = vadd.f32 1.0, %v1296_v6 }
 0x12e   : > { %1299 = vrcp.f32 %v841_v7 }
 0x137   : > { %v1298_v8 = vpop.eup %1297 }
 0x138   : > { %v844_v10 = vmul.f32 %v1298_v8, %v830_v55 }
 0x13b   : > { %v1300_v9 = vpop.eup %1299 }
 0x13c   : > { %v845_v11 = vmul.f32 %v1300_v9, %v831_v63 }
 0x13e   : > { %v1113_v12 = vpack.c.bf16 %v845_v11, %v844_v10 }
 0x140   : > { %1114 = vst [vmem:[%s362_s30] sm:$0xff] %v1113_v12  }
 0x141 PF: > { %s16_s23 = sadd.s32 1, %s1323_s23   ;;  %s1571_s21 = smov %s1319_s22 }
 0x142   : > { %p13_p5 = scmp.ge.s32.totalorder %s16_s23, 4   ;;  %s1572_s22 = smov %s1574_s24 }
 0x144   :  { %15 = sbr.rel (!%p13_p5) target bundleno = 2 (0x2), region = 92 }

// kernel: yolov7_backbone.28
= control target key start
LH: loop header
LB: loop body
LE: loop exit
PB: predicated region body
PF: predicated region fallthrough
CT: control target
= control target key end

     0   :  { %s571_s12 = smov 0   ;;  %s573_s13 = smov 0   ;;  %s635_s0 = inlined_call_operand.vmem [shape: bf16[2,8,128], index: 0, kind: input, shape index: {}]   ;;  %s636_s1 = inlined_call_operand.vmem [shape: bf16[1,128,128], index: 1, kind: input, shape index: {}]   ;;  %s637_s2 = inlined_call_operand.vmem [shape: f32[1,128], index: 2, kind: input, shape index: {}]   ;;  %s638_s3 = inlined_call_operand.vmem [shape: bf16[2,8,128], index: 3, kind: output, shape index: {}]  }
   0x1   :  { %s575_s14 = smov 0  }
   0x2 LB: > { %s25_s15 = sadd.s32 1, %s543_s13  ;;  %p444_p0 = scmp.ge.s32.totalorder %s547_s14, 1  ;;  %s547_s14 = sphi %s575_s14, %s13_s14   ;;  %s543_s13 = sphi %s573_s13, %s640_s13   ;;  %s539_s12 = sphi %s571_s12, %s639_s12  }
   0x3   : > { %p27_p1 = scmp.ge.s32.totalorder %s25_s15, 2  ;;  %p167_p2 = scmp.lt.s32.totalorder %s547_s14, 3 }
   0x5   : > { %s642_s15 = smov (%p27_p1, %s25_s15), 0  ;;  %p168_p3 = pnand %p444_p0, %p167_p2 }
   0x6   : > { %p199_p4 = scmp.lt.s32.totalorder (!%p168_p3), %s539_s12, 1 }
   0x7   : > { %171 = sbr.rel (%p168_p3) target bundleno = 281 (0x119), region = 32 }
   0xc   : > { %v513_v0 = vld [vmem:[%s636_s1 + $0x38] sm:$0xff]   ;;  %v549_v1 = vmov 0.0   ;;  %v514_v2 = vld [vmem:[%s636_s1 + $0x30] sm:$0xff]   ;;  %vm550_vm0 = vmmov 0   ;;  %v515_v3 = vld [vmem:[%s636_s1 + $0x28] sm:$0xff]   ;;  %s644_s12 = smov (!%p199_p4, %s539_s12), 1 }
   0xd   : > { %467 = vmatprep.subr.bf16.mxu0 %v549_v1  ;;  %483 = vmatprep.mubr.msk.bf16.mxu0 %vm550_vm0, %v549_v1  ;;  %v516_v4 = vld [vmem:[%s636_s1 + $0x20] sm:$0xff]   ;;  %v517_v5 = vld [vmem:[%s636_s1 + $0x18] sm:$0xff]   ;;  %v518_v6 = vld [vmem:[%s636_s1 + $0x10] sm:$0xff]   ;;  %s445_s30 = sshll.u32 %s644_s12, 2 }
   0xe   : > { %468 = vmatpush3.bf16.msra.mxu0 %v513_v0  ;;  %v519_v7 = vld [vmem:[%s636_s1 + $0x8] sm:$0xff]   ;;  %v520_v8 = vld [vmem:[%s636_s1] sm:$0xff]   ;;  %s202_s8 = scalar_lea.vmem %s635_s0, %s445_s30  ;;  %s216_s16 = scalar_lea.vmem %s638_s3, %s445_s30 }
   0xf   : > { %469 = vmatprep.subr.bf16.mxu0 %v549_v1  ;;  %v218_v9 = vld [vmem:[%s202_s8] sm:$0xf] }
  0x10   : > { %v447_v10 = vld [vmem:[%s637_s2] ss:$0 sm:$0xff] }
  0x12   : > { %470 = vmatpush3.bf16.msra.mxu0 %v514_v2 }
  0x13   : > { %471 = vmatprep.subr.bf16.mxu0 %v549_v1 }
  0x16   : > { %472 = vmatpush3.bf16.msra.mxu0 %v515_v3 }
  0x17   : > { %473 = vmatprep.subr.bf16.mxu0 %v549_v1 }
  0x1a   : > { %474 = vmatpush3.bf16.msra.mxu0 %v516_v4 }
  0x1b   : > { %475 = vmatprep.subr.bf16.mxu0 %v549_v1 }
  0x1e   : > { %476 = vmatpush3.bf16.msra.mxu0 %v517_v5 }
  0x1f   : > { %477 = vmatprep.subr.bf16.mxu0 %v549_v1 }
  0x22   : > { %478 = vmatpush3.bf16.msra.mxu0 %v518_v6 }
  0x23   : > { %479 = vmatprep.subr.bf16.mxu0 %v549_v1 }
  0x26   : > { %480 = vmatpush3.bf16.msra.mxu0 %v519_v7 }
  0x27   : > { %481 = vmatprep.subr.bf16.mxu0 %v549_v1 }
  0x2a   : > { %482 = vmatpush3.bf16.msra.mxu0 %v520_v8 }
  0x2d   : > { %484 = vmatmul.mubr.bf16.vlgmr.msra.gmra.mxu0 %v218_v9 }
  0xed   : > { %v324_v11 = vpop.f32.mrf.mxu0 }
  0xee   : > { %v325_v12 = vadd.f32 %v447_v10, %v324_v11 }
  0xef   : > { %v485_v13 = vpop.f32.mrf.mxu0 }
  0xf0   : > { %v330_v14 = vmax.f32 %v325_v12, -60.0 }
  0xf1   : > { %v327_v15 = vpop.f32.mrf.mxu0 }
  0xf2   : > { %v331_v16 = vsub.f32 0.0, %v330_v14 }
  0xf3   : > { %v486_v17 = vpop.f32.mrf.mxu0 }
  0xf4   : > { %v332_v18 = vmul.f32 1.442695, %v331_v16 }
  0xf6   : > { %521 = vpow2.f32 %v332_v18 }
 0x103   : > { %v522_v19 = vpop.eup %521 }
 0x104   : > { %v334_v20 = vadd.f32 1.0, %v522_v19 }
 0x106   : > { %523 = vrcp.f32 %v334_v20 }
 0x113   : > { %v524_v21 = vpop.eup %523 }
 0x114   : > { %v336_v22 = vmul.f32 %v524_v21, %v325_v12 }
 0x116   : > { %v337_v23 = vpack.c.bf16 %v336_v22, %v336_v22 }
 0x118   : > { %338 = vst [vmem:[%s216_s16] sm:$0xf] %v337_v23 }
 0x119 PF: > { %s13_s14 = sadd.s32 1, %s547_s14   ;;  %s639_s12 = smov %s543_s13 }
 0x11a   : > { %p10_p5 = scmp.ge.s32.totalorder %s13_s14, 4   ;;  %s640_s13 = smov %s642_s15 }
 0x11c   :  { %12 = sbr.rel (!%p10_p5) target bundleno = 2 (0x2), region = 68 }

// kernel: yolov7_backbone.33
= control target key start
LH: loop header
LB: loop body
LE: loop exit
PB: predicated region body
PF: predicated region fallthrough
CT: control target
= control target key end

     0   :  { %s1261_s21 = smov 0   ;;  %s1263_s22 = smov 0   ;;  %s1453_s0 = inlined_call_operand.vmem [shape: bf16[2,8,128], index: 0, kind: input, shape index: {}]   ;;  %s1454_s1 = inlined_call_operand.vmem [shape: bf16[2,8,128], index: 1, kind: input, shape index: {}]   ;;  %s1455_s2 = inlined_call_operand.vmem [shape: bf16[2,8,128], index: 2, kind: input, shape index: {}]   ;;  %s1456_s3 = inlined_call_operand.vmem [shape: bf16[2,8,128], index: 3, kind: input, shape index: {}]   ;;  %s1457_s4 = inlined_call_operand.vmem [shape: bf16[4,128,128], index: 4, kind: input, shape index: {}]   ;;  %s1458_s5 = inlined_call_operand.vmem [shape: f32[1,128], index: 5, kind: input, shape index: {}]   ;;  %s1459_s6 = inlined_call_operand.vmem [shape: bf16[2,8,128], index: 6, kind: output, shape index: {}]  }
   0x1   :  { %s1265_s23 = smov 0  }
   0x2 LB: > { %s28_s24 = sadd.s32 1, %s1218_s22  ;;  %p933_p0 = scmp.ge.s32.totalorder %s1222_s23, 1  ;;  %s1222_s23 = sphi %s1265_s23, %s16_s23   ;;  %s1218_s22 = sphi %s1263_s22, %s1461_s22   ;;  %s1214_s21 = sphi %s1261_s21, %s1460_s21  }
   0x3   : > { %p30_p1 = scmp.ge.s32.totalorder %s28_s24, 2  ;;  %p269_p2 = scmp.lt.s32.totalorder %s1222_s23, 3 }
   0x5   : > { %s1463_s24 = smov (%p30_p1, %s28_s24), 0  ;;  %p270_p3 = pnand %p933_p0, %p269_p2 }
   0x6   : > { %p319_p4 = scmp.lt.s32.totalorder (!%p270_p3), %s1214_s21, 1 }
   0x7   : > { %273 = sbr.rel (%p270_p3) target bundleno = 317 (0x13d), region = 44 }
   0xc   : > { %v1164_v0 = vld [vmem:[%s1457_s4 + $0x78] sm:$0xff]   ;;  %v1224_v1 = vmov 0.0   ;;  %v1166_v3 = vld [vmem:[%s1457_s4 + $0x70] sm:$0xff]   ;;  %vm1225_vm0 = vmmov 0   ;;  %v1168_v5 = vld [vmem:[%s1457_s4 + $0x68] sm:$0xff]   ;;  %s1465_s21 = smov (!%p319_p4, %s1214_s21), 1 }
   0xd   : > { %1058 = vmatprep.subr.bf16.mxu0 %v1224_v1  ;;  %1078 = vmatprep.subr.bf16.mxu1 %v1224_v1  ;;  %v1165_v2 = vld [vmem:[%s1457_s4 + $0x38] sm:$0xff]   ;;  %v1167_v4 = vld [vmem:[%s1457_s4 + $0x30] sm:$0xff]   ;;  %v1169_v6 = vld [vmem:[%s1457_s4 + $0x28] sm:$0xff]   ;;  %s1338_s7 = sshll.u32 %s1465_s21, 2 }
   0xe   : > { %1059 = vmatpush3.bf16.msra.mxu0 %v1164_v0  ;;  %1074 = vmatprep.mubr.msk.bf16.mxu0 %vm1225_vm0, %v1224_v1  ;;  %v1170_v7 = vld [vmem:[%s1457_s4 + $0x60] sm:$0xff]   ;;  %v1172_v9 = vld [vmem:[%s1457_s4 + $0x58] sm:$0xff]   ;;  %v1174_v11 = vld [vmem:[%s1457_s4 + $0x50] sm:$0xff]   ;;  %s326_s12 = scalar_lea.vmem %s1454_s1, %s1338_s7  ;;  %s322_s16 = scalar_lea.vmem %s1453_s0, %s1338_s7 }
   0xf   : > { %1079 = vmatpush3.bf16.msra.mxu1 %v1165_v2  ;;  %1060 = vmatprep.subr.bf16.mxu0 %v1224_v1  ;;  %v1171_v8 = vld [vmem:[%s1457_s4 + $0x20] sm:$0xff]   ;;  %v1173_v10 = vld [vmem:[%s1457_s4 + $0x18] sm:$0xff]   ;;  %v1175_v12 = vld [vmem:[%s1457_s4 + $0x10] sm:$0xff]   ;;  %s330_s14 = scalar_lea.vmem %s1455_s2, %s1338_s7  ;;  %s348_s25 = scalar_lea.vmem %s1459_s6, %s1338_s7 }
  0x10   : > { %1080 = vmatprep.subr.bf16.mxu1 %v1224_v1  ;;  %1094 = vmatprep.mubr.msk.bf16.mxu1 %vm1225_vm0, %v1224_v1  ;;  %v1176_v13 = vld [vmem:[%s1457_s4 + $0x48] sm:$0xff]   ;;  %v1178_v15 = vld [vmem:[%s1457_s4 + $0x40] sm:$0xff]   ;;  %v1180_v19 = vld [vmem:[%s1457_s4 + $0xb8] sm:$0xff]  }
  0x11   : > { %v1177_v14 = vld [vmem:[%s1457_s4 + $0x8] sm:$0xff]   ;;  %v1179_v16 = vld [vmem:[%s1457_s4] sm:$0xff]   ;;  %v1181_v20 = vld [vmem:[%s1457_s4 + $0xf8] sm:$0xff]  }
  0x12   : > { %1061 = vmatpush3.bf16.msra.mxu0 %v1166_v3  ;;  %v367_v17 = vld [vmem:[%s326_s12] sm:$0xf]  ;;  %v1182_v21 = vld [vmem:[%s1457_s4 + $0xb0] sm:$0xff]   ;;  %v1184_v23 = vld [vmem:[%s1457_s4 + $0xa8] sm:$0xff]  }
  0x13   : > { %1081 = vmatpush3.bf16.msra.mxu1 %v1167_v4  ;;  %1062 = vmatprep.subr.bf16.mxu0 %v1224_v1  ;;  %v350_v18 = vld [vmem:[%s322_s16] sm:$0xf]  ;;  %v1183_v22 = vld [vmem:[%s1457_s4 + $0xf0] sm:$0xff]   ;;  %v1185_v24 = vld [vmem:[%s1457_s4 + $0xe8] sm:$0xff]   ;;  %s334_s16 = scalar_lea.vmem %s1456_s3, %s1338_s7 }
  0x14   : > { %1082 = vmatprep.subr.bf16.mxu1 %v1224_v1  ;;  %v1186_v25 = vld [vmem:[%s1457_s4 + $0xa0] sm:$0xff]   ;;  %v1188_v27 = vld [vmem:[%s1457_s4 + $0x98] sm:$0xff]   ;;  %v1190_v29 = vld [vmem:[%s1457_s4 + $0x90] sm:$0xff]  }
  0x15   : > { %v1187_v26 = vld [vmem:[%s1457_s4 + $0xe0] sm:$0xff]   ;;  %v1189_v28 = vld [vmem:[%s1457_s4 + $0xd8] sm:$0xff]   ;;  %v1191_v30 = vld [vmem:[%s1457_s4 + $0xd0] sm:$0xff]  }
  0x16   : > { %1063 = vmatpush3.bf16.msra.mxu0 %v1168_v5  ;;  %v1192_v31 = vld [vmem:[%s1457_s4 + $0x88] sm:$0xff]   ;;  %v1194_v33 = vld [vmem:[%s1457_s4 + $0x80] sm:$0xff]  }
  0x17   : > { %1083 = vmatpush3.bf16.msra.mxu1 %v1169_v6  ;;  %1064 = vmatprep.subr.bf16.mxu0 %v1224_v1  ;;  %v1193_v32 = vld [vmem:[%s1457_s4 + $0xc8] sm:$0xff]   ;;  %v1195_v34 = vld [vmem:[%s1457_s4 + $0xc0] sm:$0xff]  }
  0x18   : > { %1084 = vmatprep.subr.bf16.mxu1 %v1224_v1  ;;  %v561_v35 = vld [vmem:[%s330_s14] sm:$0xf] }
  0x19   : > { %v668_v36 = vld [vmem:[%s334_s16] sm:$0xf] }
  0x1a   : > { %1065 = vmatpush3.bf16.msra.mxu0 %v1170_v7  ;;  %v1019_v49 = vld [vmem:[%s1458_s5] ss:$0 sm:$0xff] }
  0x1b   : > { %1085 = vmatpush3.bf16.msra.mxu1 %v1171_v8  ;;  %1066 = vmatprep.subr.bf16.mxu0 %v1224_v1 }
  0x1c   : > { %1086 = vmatprep.subr.bf16.mxu1 %v1224_v1 }
  0x1e   : > { %1067 = vmatpush3.bf16.msra.mxu0 %v1172_v9 }
  0x1f   : > { %1087 = vmatpush3.bf16.msra.mxu1 %v1173_v10  ;;  %1068 = vmatprep.subr.bf16.mxu0 %v1224_v1 }
  0x20   : > { %1088 = vmatprep.subr.bf16.mxu1 %v1224_v1 }
  0x22   : > { %1069 = vmatpush3.bf16.msra.mxu0 %v1174_v11 }
  0x23   : > { %1089 = vmatpush3.bf16.msra.mxu1 %v1175_v12  ;;  %1070 = vmatprep.subr.bf16.mxu0 %v1224_v1 }
  0x24   : > { %1090 = vmatprep.subr.bf16.mxu1 %v1224_v1 }
  0x26   : > { %1071 = vmatpush3.bf16.msra.mxu0 %v1176_v13 }
  0x27   : > { %1091 = vmatpush3.bf16.msra.mxu1 %v1177_v14  ;;  %1072 = vmatprep.subr.bf16.mxu0 %v1224_v1 }
  0x28   : > { %1092 = vmatprep.subr.bf16.mxu1 %v1224_v1 }
  0x2a   : > { %1073 = vmatpush3.bf16.msra.mxu0 %v1178_v15 }
  0x2b   : > { %1093 = vmatpush3.bf16.msra.mxu1 %v1179_v16  ;;  %1098 = vmatprep.subr.bf16.mxu0 %v1224_v1 }
  0x2c   : > { %1118 = vmatprep.subr.bf16.mxu1 %v1224_v1 }
  0x2d   : > { %1075 = vmatmul.mubr.bf16.vlgmr.msra.gmra.mxu0 %v367_v17 }
  0x2e   : > { %1095 = vmatmul.mubr.bf16.vlgmr.msra.gmra.mxu1 %v350_v18  ;;  %1099 = vmatpush3.bf16.msra.mxu0 %v1180_v19 }
  0x2f   : > { %1119 = vmatpush3.bf16.msra.mxu1 %v1181_v20  ;;  %1100 = vmatprep.subr.bf16.mxu0 %v1224_v1 }
  0x30   : > { %1120 = vmatprep.subr.bf16.mxu1 %v1224_v1  ;;  %1114 = vmatprep.mubr.msk.bf16.mxu0 %vm1225_vm0, %v1224_v1 }
  0x31   : > { %1134 = vmatprep.mubr.msk.bf16.mxu1 %vm1225_vm0, %v1224_v1 }
  0x32   : > { %1101 = vmatpush3.bf16.msra.mxu0 %v1182_v21 }
  0x33   : > { %1121 = vmatpush3.bf16.msra.mxu1 %v1183_v22  ;;  %1102 = vmatprep.subr.bf16.mxu0 %v1224_v1 }
  0x34   : > { %1122 = vmatprep.subr.bf16.mxu1 %v1224_v1 }
  0x36   : > { %1103 = vmatpush3.bf16.msra.mxu0 %v1184_v23 }
  0x37   : > { %1123 = vmatpush3.bf16.msra.mxu1 %v1185_v24  ;;  %1104 = vmatprep.subr.bf16.mxu0 %v1224_v1 }
  0x38   : > { %1124 = vmatprep.subr.bf16.mxu1 %v1224_v1 }
  0x3a   : > { %1105 = vmatpush3.bf16.msra.mxu0 %v1186_v25 }
  0x3b   : > { %1125 = vmatpush3.bf16.msra.mxu1 %v1187_v26  ;;  %1106 = vmatprep.subr.bf16.mxu0 %v1224_v1 }
  0x3c   : > { %1126 = vmatprep.subr.bf16.mxu1 %v1224_v1 }
  0x3e   : > { %1107 = vmatpush3.bf16.msra.mxu0 %v1188_v27 }
  0x3f   : > { %1127 = vmatpush3.bf16.msra.mxu1 %v1189_v28  ;;  %1108 = vmatprep.subr.bf16.mxu0 %v1224_v1 }
  0x40   : > { %1128 = vmatprep.subr.bf16.mxu1 %v1224_v1 }
  0x42   : > { %1109 = vmatpush3.bf16.msra.mxu0 %v1190_v29 }
  0x43   : > { %1129 = vmatpush3.bf16.msra.mxu1 %v1191_v30  ;;  %1110 = vmatprep.subr.bf16.mxu0 %v1224_v1 }
  0x44   : > { %1130 = vmatprep.subr.bf16.mxu1 %v1224_v1 }
  0x46   : > { %1111 = vmatpush3.bf16.msra.mxu0 %v1192_v31 }
  0x47   : > { %1131 = vmatpush3.bf16.msra.mxu1 %v1193_v32  ;;  %1112 = vmatprep.subr.bf16.mxu0 %v1224_v1 }
  0x48   : > { %1132 = vmatprep.subr.bf16.mxu1 %v1224_v1 }
  0x4a   : > { %1113 = vmatpush3.bf16.msra.mxu0 %v1194_v33 }
  0x4b   : > { %1133 = vmatpush3.bf16.msra.mxu1 %v1195_v34 }
  0x4d   : > { %1115 = vmatmul.mubr.bf16.vlgmr.msra.gmra.mxu0 %v561_v35 }
  0x4e   : > { %1135 = vmatmul.mubr.bf16.vlgmr.msra.gmra.mxu1 %v668_v36 }
  0xed   : > { %v467_v37 = vpop.f32.mrf.mxu0 }
  0xee   : > { %v555_v38 = vpop.f32.mrf.mxu1 }
  0xef   : > { %v1076_v39 = vpop.f32.mrf.mxu0  ;;  %v556_v45 = vadd.f32 %v555_v38, %v467_v37 }
  0xf0   : > { %v1096_v40 = vpop.f32.mrf.mxu1 }
  0xf1   : > { %v470_v41 = vpop.f32.mrf.mxu0 }
  0xf2   : > { %v558_v42 = vpop.f32.mrf.mxu1 }
  0xf3   : > { %v1077_v43 = vpop.f32.mrf.mxu0 }
  0xf4   : > { %v1097_v44 = vpop.f32.mrf.mxu1 }
 0x10d   : > { %v661_v46 = vpop.f32.mrf.mxu0 }
 0x10e   : > { %v667_v47 = vadd.f32 %v661_v46, %v556_v45  ;;  %v768_v48 = vpop.f32.mrf.mxu1 }
 0x10f   : > { %v1116_v50 = vpop.f32.mrf.mxu0 }
 0x110   : > { %v774_v51 = vadd.f32 %v768_v48, %v667_v47  ;;  %v1136_v52 = vpop.f32.mrf.mxu1 }
 0x111   : > { %v664_v53 = vpop.f32.mrf.mxu0 }
 0x112   : > { %v782_v54 = vadd.f32 %v1019_v49, %v774_v51  ;;  %v771_v55 = vpop.f32.mrf.mxu1 }
 0x113   : > { %v1117_v56 = vpop.f32.mrf.mxu0 }
 0x114   : > { %v783_v57 = vmax.f32 %v782_v54, -60.0  ;;  %v1137_v58 = vpop.f32.mrf.mxu1 }
 0x116   : > { %v784_v59 = vsub.f32 0.0, %v783_v57 }
 0x118   : > { %v785_v60 = vmul.f32 1.442695, %v784_v59 }
 0x11a   : > { %1196 = vpow2.f32 %v785_v60 }
 0x127   : > { %v1197_v61 = vpop.eup %1196 }
 0x128   : > { %v787_v62 = vadd.f32 1.0, %v1197_v61 }
 0x12a   : > { %1198 = vrcp.f32 %v787_v62 }
 0x137   : > { %v1199_v63 = vpop.eup %1198 }
 0x138   : > { %v789_v0 = vmul.f32 %v1199_v63, %v782_v54 }
 0x13a   : > { %v790_v1 = vpack.c.bf16 %v789_v0, %v789_v0 }
 0x13c   : > { %791 = vst [vmem:[%s348_s25] sm:$0xf] %v790_v1 }
 0x13d PF: > { %s16_s23 = sadd.s32 1, %s1222_s23   ;;  %s1460_s21 = smov %s1218_s22 }
 0x13e   : > { %p13_p5 = scmp.ge.s32.totalorder %s16_s23, 4   ;;  %s1461_s22 = smov %s1463_s24 }
 0x140   :  { %15 = sbr.rel (!%p13_p5) target bundleno = 2 (0x2), region = 92 }

// kernel: yolov7_backbone.26
= control target key start
LH: loop header
LB: loop body
LE: loop exit
PB: predicated region body
PF: predicated region fallthrough
CT: control target
= control target key end

     0   :  { %s2572_s12 = smov 0   ;;  %s2574_s13 = smov 0   ;;  %s3040_s0 = inlined_call_operand.vmem [shape: bf16[2,16,512], index: 0, kind: input, shape index: {}]   ;;  %s3041_s1 = inlined_call_operand.vmem [shape: bf16[4,512,128], index: 1, kind: input, shape index: {}]   ;;  %s3042_s2 = inlined_call_operand.vmem [shape: f32[1,128], index: 2, kind: input, shape index: {}]   ;;  %s3043_s3 = inlined_call_operand.vmem [shape: bf16[2,8,128], index: 3, kind: output, shape index: {}]  }
   0x1   :  { %s2576_s14 = smov 0  }
   0x2 LB: > { %s25_s15 = sadd.s32 1, %s2546_s13  ;;  %p1836_p0 = scmp.ge.s32.totalorder %s2550_s14, 1  ;;  %s2550_s14 = sphi %s2576_s14, %s13_s14   ;;  %s2546_s13 = sphi %s2574_s13, %s3045_s13   ;;  %s2542_s12 = sphi %s2572_s12, %s3044_s12  }
   0x3   : > { %p27_p1 = scmp.ge.s32.totalorder %s25_s15, 2  ;;  %p168_p2 = scmp.lt.s32.totalorder %s2550_s14, 3 }
   0x5   : > { %s3047_s15 = smov (%p27_p1, %s25_s15), 0  ;;  %p169_p3 = pnand %p1836_p0, %p168_p2 }
   0x6   : > { %p201_p4 = scmp.lt.s32.totalorder (!%p169_p3), %s2542_s12, 1 }
   0x7   : > { %172 = sbr.rel (%p169_p3) target bundleno = 387 (0x183), region = 32 }
   0xc   : > { %v2380_v0 = vld [vmem:[%s3041_s1 + $0x178] sm:$0xff]   ;;  %v2384_v4 = vld [vmem:[%s3041_s1 + $0x170] sm:$0xff]   ;;  %v2388_v8 = vld [vmem:[%s3041_s1 + $0x168] sm:$0xff]   ;;  %s3049_s12 = smov (!%p201_p4, %s2542_s12), 1 }
   0xd   : > { %v2381_v1 = vld [vmem:[%s3041_s1 + $0x1f8] sm:$0xff]   ;;  %2180 = vmatprep.subr.bf16.mxu0 %v2380_v0  ;;  %v2385_v5 = vld [vmem:[%s3041_s1 + $0x1f0] sm:$0xff]   ;;  %v2389_v9 = vld [vmem:[%s3041_s1 + $0x1e8] sm:$0xff]   ;;  %s2179_s24 = sshll.u32 %s3049_s12, 5  ;;  %s1839_s5 = sshll.u32 %s3049_s12, 2 }
   0xe   : > { %v2382_v2 = vld [vmem:[%s3041_s1 + $0x138] sm:$0xff]   ;;  %2202 = vmatprep.subr.bf16.mxu1 %v2381_v1  ;;  %v2386_v6 = vld [vmem:[%s3041_s1 + $0x130] sm:$0xff]   ;;  %v2390_v10 = vld [vmem:[%s3041_s1 + $0x128] sm:$0xff]   ;;  %s2690_s6 = scalar_lea.vmem %s3040_s0, %s2179_s24  ;;  %s219_s9 = scalar_lea.vmem %s3043_s3, %s1839_s5 }
   0xf   : > { %v2383_v3 = vld [vmem:[%s3041_s1 + $0x1b8] sm:$0xff]   ;;  %2181 = vmatpush3.bf16.msra.mxu0 %v2382_v2  ;;  %v2387_v7 = vld [vmem:[%s3041_s1 + $0x1b0] sm:$0xff]   ;;  %v2391_v11 = vld [vmem:[%s3041_s1 + $0x1a8] sm:$0xff]  }
  0x10   : > { %2203 = vmatpush3.bf16.msra.mxu1 %v2383_v3  ;;  %2182 = vmatprep.subr.bf16.mxu0 %v2384_v4  ;;  %v2392_v12 = vld [vmem:[%s3041_s1 + $0x160] sm:$0xff]   ;;  %v2396_v16 = vld [vmem:[%s3041_s1 + $0x158] sm:$0xff]   ;;  %v2400_v20 = vld [vmem:[%s3041_s1 + $0x150] sm:$0xff]  }
  0x11   : > { %2204 = vmatprep.subr.bf16.mxu1 %v2385_v5  ;;  %v2393_v13 = vld [vmem:[%s3041_s1 + $0x1e0] sm:$0xff]   ;;  %v2397_v17 = vld [vmem:[%s3041_s1 + $0x1d8] sm:$0xff]   ;;  %v2401_v21 = vld [vmem:[%s3041_s1 + $0x1d0] sm:$0xff]  }
  0x12   : > { %v2394_v14 = vld [vmem:[%s3041_s1 + $0x120] sm:$0xff]   ;;  %v2398_v18 = vld [vmem:[%s3041_s1 + $0x118] sm:$0xff]   ;;  %v2402_v22 = vld [vmem:[%s3041_s1 + $0x110] sm:$0xff]  }
  0x13   : > { %2183 = vmatpush3.bf16.msra.mxu0 %v2386_v6  ;;  %v2395_v15 = vld [vmem:[%s3041_s1 + $0x1a0] sm:$0xff]   ;;  %v2399_v19 = vld [vmem:[%s3041_s1 + $0x198] sm:$0xff]   ;;  %v2403_v23 = vld [vmem:[%s3041_s1 + $0x190] sm:$0xff]  }
  0x14   : > { %2205 = vmatpush3.bf16.msra.mxu1 %v2387_v7  ;;  %2184 = vmatprep.subr.bf16.mxu0 %v2388_v8  ;;  %v2404_v24 = vld [vmem:[%s3041_s1 + $0x148] sm:$0xff]   ;;  %v2408_v28 = vld [vmem:[%s3041_s1 + $0x140] sm:$0xff]   ;;  %v289_v33 = vld [vmem:[%s2690_s6 + $0x10] sm:$0x11] }
  0x15   : > { %2206 = vmatprep.subr.bf16.mxu1 %v2389_v9  ;;  %v2405_v25 = vld [vmem:[%s3041_s1 + $0x1c8] sm:$0xff]   ;;  %v2409_v29 = vld [vmem:[%s3041_s1 + $0x1c0] sm:$0xff]   ;;  %v290_v37 = vld [vmem:[%s2690_s6 + $0x18] sm:$0x11] }
  0x16   : > { %v2406_v26 = vld [vmem:[%s3041_s1 + $0x108] sm:$0xff]   ;;  %v2410_v30 = vld [vmem:[%s3041_s1 + $0x100] sm:$0xff]   ;;  %v2416_v40 = vld [vmem:[%s3041_s1 + $0x78] sm:$0xff]  }
  0x17   : > { %2185 = vmatpush3.bf16.msra.mxu0 %v2390_v10  ;;  %v2407_v27 = vld [vmem:[%s3041_s1 + $0x188] sm:$0xff]   ;;  %v2411_v31 = vld [vmem:[%s3041_s1 + $0x180] sm:$0xff]   ;;  %v2417_v45 = vld [vmem:[%s3041_s1 + $0xf8] sm:$0xff]  }
  0x18   : > { %2207 = vmatpush3.bf16.msra.mxu1 %v2391_v11  ;;  %2186 = vmatprep.subr.bf16.mxu0 %v2392_v12  ;;  %v2699_v32 = vld [vmem:[%s2690_s6] sm:$0xff]  ;;  %v2703_v34 = vld [vmem:[%s2690_s6 + $0x8] sm:$0xff]  ;;  %v2418_v52 = vld [vmem:[%s3041_s1 + $0x38] sm:$0xff]  }
  0x19   : > { %2208 = vmatprep.subr.bf16.mxu1 %v2393_v13  ;;  %v1904_v35 = vcombine.low %v2699_v32, %v289_v33  ;;  %v1905_v36 = vcombine.high %v2699_v32, %v289_v33  ;;  %v1906_v38 = vcombine.low %v2703_v34, %v290_v37  ;;  %v1907_v39 = vcombine.high %v2703_v34, %v290_v37  ;;  %v2419_v55 = vld [vmem:[%s3041_s1 + $0xb8] sm:$0xff]   ;;  %v2420_v56 = vld [vmem:[%s3041_s1 + $0x70] sm:$0xff]   ;;  %v2424_v2 = vld [vmem:[%s3041_s1 + $0x68] sm:$0xff]  }
  0x1a   : > { %v2421_v61 = vld [vmem:[%s3041_s1 + $0xf0] sm:$0xff]   ;;  %v1941_v63 = vcombine.high %v2699_v32, %v2699_v32  ;;  %v1943_v1 = vcombine.high %v2703_v34, %v2703_v34  ;;  %v2425_v3 = vld [vmem:[%s3041_s1 + $0xe8] sm:$0xff]   ;;  %v2428_v6 = vld [vmem:[%s3041_s1 + $0x60] sm:$0xff]  }
  0x1b   : > { %2187 = vmatpush3.bf16.msra.mxu0 %v2394_v14  ;;  %v380_v41 = vshrl.u32 %v1905_v36, 16  ;;  %v382_v42 = vshll.u32 %v1905_v36, 16  ;;  %v373_v43 = vshrl.u32 %v1904_v35, 16  ;;  %v375_v44 = vshll.u32 %v1904_v35, 16  ;;  %v2422_v62 = vld [vmem:[%s3041_s1 + $0x30] sm:$0xff]   ;;  %v2426_v4 = vld [vmem:[%s3041_s1 + $0x28] sm:$0xff]  }
  0x1c   : > { %2209 = vmatpush3.bf16.msra.mxu1 %v2395_v15  ;;  %2188 = vmatprep.subr.bf16.mxu0 %v2396_v16  ;;  %v394_v46 = vshrl.u32 %v1907_v39, 16  ;;  %v396_v47 = vshll.u32 %v1907_v39, 16  ;;  %v387_v48 = vshrl.u32 %v1906_v38, 16  ;;  %v389_v49 = vshll.u32 %v1906_v38, 16  ;;  %v2423_v0 = vld [vmem:[%s3041_s1 + $0xb0] sm:$0xff]   ;;  %v2427_v5 = vld [vmem:[%s3041_s1 + $0xa8] sm:$0xff]  }
  0x1d   : > { %2210 = vmatprep.subr.bf16.mxu1 %v2397_v17  ;;  %v384_v50 = vrot.slane %v382_v42, 1  ;;  %v377_v51 = vrot.slane %v375_v44, 1  ;;  %v2429_v7 = vld [vmem:[%s3041_s1 + $0xe0] sm:$0xff]   ;;  %v2432_v10 = vld [vmem:[%s3041_s1 + $0x58] sm:$0xff]   ;;  %v2436_v14 = vld [vmem:[%s3041_s1 + $0x50] sm:$0xff]  }
  0x1e   : > { %v398_v53 = vrot.slane %v396_v47, 1  ;;  %v391_v54 = vrot.slane %v389_v49, 1  ;;  %v2430_v8 = vld [vmem:[%s3041_s1 + $0x20] sm:$0xff]   ;;  %v2433_v11 = vld [vmem:[%s3041_s1 + $0xd8] sm:$0xff]   ;;  %v2437_v15 = vld [vmem:[%s3041_s1 + $0xd0] sm:$0xff]  }
  0x1f   : > { %2189 = vmatpush3.bf16.msra.mxu0 %v2398_v18  ;;  %v385_v57 = vor.u32 %v384_v50, %v380_v41  ;;  %v378_v58 = vor.u32 %v377_v51, %v373_v43  ;;  %v2431_v9 = vld [vmem:[%s3041_s1 + $0xa0] sm:$0xff]   ;;  %v2434_v12 = vld [vmem:[%s3041_s1 + $0x18] sm:$0xff]   ;;  %v2438_v16 = vld [vmem:[%s3041_s1 + $0x10] sm:$0xff]  }
  0x20   : > { %2211 = vmatpush3.bf16.msra.mxu1 %v2399_v19  ;;  %2190 = vmatprep.subr.bf16.mxu0 %v2400_v20  ;;  %v399_v59 = vor.u32 %v398_v53, %v394_v46  ;;  %v392_v60 = vor.u32 %v391_v54, %v387_v48  ;;  %v2435_v13 = vld [vmem:[%s3041_s1 + $0x98] sm:$0xff]   ;;  %v2439_v17 = vld [vmem:[%s3041_s1 + $0x90] sm:$0xff]   ;;  %v2440_v18 = vld [vmem:[%s3041_s1 + $0x48] sm:$0xff]  }
  0x21   : > { %2212 = vmatprep.subr.bf16.mxu1 %v2401_v21  ;;  %628 = vmatprep.mubr.bf16.mxu0 %v385_v57  ;;  %v2441_v19 = vld [vmem:[%s3041_s1 + $0xc8] sm:$0xff]   ;;  %v2456_v33 = vld [vmem:[%s3041_s1 + $0x270] sm:$0xff]   ;;  %v2465_v41 = vld [vmem:[%s3041_s1 + $0x2e0] sm:$0xff]  }
  0x22   : > { %668 = vmatprep.mubr.bf16.mxu1 %v399_v59  ;;  %v2442_v20 = vld [vmem:[%s3041_s1 + $0x8] sm:$0xff]   ;;  %v2457_v35 = vld [vmem:[%s3041_s1 + $0x2f0] sm:$0xff]   ;;  %v2466_v42 = vld [vmem:[%s3041_s1 + $0x220] sm:$0xff]  }
  0x23   : > { %2191 = vmatpush3.bf16.msra.mxu0 %v2402_v22  ;;  %v2443_v21 = vld [vmem:[%s3041_s1 + $0x88] sm:$0xff]   ;;  %v2444_v22 = vld [vmem:[%s3041_s1 + $0x40] sm:$0xff]   ;;  %v2468_v44 = vld [vmem:[%s3041_s1 + $0x258] sm:$0xff]  }
  0x24   : > { %2213 = vmatpush3.bf16.msra.mxu1 %v2403_v23  ;;  %2192 = vmatprep.subr.bf16.mxu0 %v2404_v24  ;;  %v2445_v23 = vld [vmem:[%s3041_s1 + $0xc0] sm:$0xff]   ;;  %v2460_v36 = vld [vmem:[%s3041_s1 + $0x268] sm:$0xff]   ;;  %v2470_v46 = vld [vmem:[%s3041_s1 + $0x218] sm:$0xff]  }
  0x25   : > { %2214 = vmatprep.subr.bf16.mxu1 %v2405_v25  ;;  %v2446_v24 = vld [vmem:[%s3041_s1] sm:$0xff]   ;;  %v2461_v37 = vld [vmem:[%s3041_s1 + $0x2e8] sm:$0xff]   ;;  %v2471_v47 = vld [vmem:[%s3041_s1 + $0x298] sm:$0xff]  }
  0x26   : > { %v2447_v25 = vld [vmem:[%s3041_s1 + $0x80] sm:$0xff]   ;;  %v2462_v38 = vld [vmem:[%s3041_s1 + $0x228] sm:$0xff]   ;;  %v2472_v48 = vld [vmem:[%s3041_s1 + $0x250] sm:$0xff]  }
  0x27   : > { %2193 = vmatpush3.bf16.msra.mxu0 %v2406_v26  ;;  %v2452_v26 = vld [vmem:[%s3041_s1 + $0x278] sm:$0xff]   ;;  %v2463_v39 = vld [vmem:[%s3041_s1 + $0x2a8] sm:$0xff]   ;;  %v2467_v43 = vld [vmem:[%s3041_s1 + $0x2a0] sm:$0xff]  }
  0x28   : > { %2215 = vmatpush3.bf16.msra.mxu1 %v2407_v27  ;;  %2194 = vmatprep.subr.bf16.mxu0 %v2408_v28  ;;  %v2453_v27 = vld [vmem:[%s3041_s1 + $0x2f8] sm:$0xff]   ;;  %v2473_v49 = vld [vmem:[%s3041_s1 + $0x2d0] sm:$0xff]   ;;  %v2477_v53 = vld [vmem:[%s3041_s1 + $0x2c8] sm:$0xff]  }
  0x29   : > { %2216 = vmatprep.subr.bf16.mxu1 %v2409_v29  ;;  %v2454_v28 = vld [vmem:[%s3041_s1 + $0x238] sm:$0xff]   ;;  %v1940_v29 = vcombine.low %v2699_v32, %v2699_v32  ;;  %v2458_v32 = vld [vmem:[%s3041_s1 + $0x230] sm:$0xff]   ;;  %v2478_v54 = vld [vmem:[%s3041_s1 + $0x208] sm:$0xff]  }
  0x2a   : > { %v2474_v50 = vld [vmem:[%s3041_s1 + $0x210] sm:$0xff]   ;;  %v2481_v57 = vld [vmem:[%s3041_s1 + $0x2c0] sm:$0xff]  }
  0x2b   : > { %2195 = vmatpush3.bf16.msra.mxu0 %v2410_v30  ;;  %v2455_v30 = vld [vmem:[%s3041_s1 + $0x2b8] sm:$0xff]   ;;  %v2475_v51 = vld [vmem:[%s3041_s1 + $0x290] sm:$0xff]   ;;  %v2483_v59 = vld [vmem:[%s3041_s1 + $0x280] sm:$0xff]  }
  0x2c   : > { %2217 = vmatpush3.bf16.msra.mxu1 %v2411_v31  ;;  %2224 = vmatprep.subr.bf16.mxu0 %v2416_v40  ;;  %v1942_v31 = vcombine.low %v2703_v34, %v2703_v34  ;;  %v2459_v34 = vld [vmem:[%s3041_s1 + $0x2b0] sm:$0xff]   ;;  %v2464_v40 = vld [vmem:[%s3041_s1 + $0x260] sm:$0xff]  }
  0x2d   : > { %2246 = vmatprep.subr.bf16.mxu1 %v2417_v45  ;;  %v2469_v45 = vld [vmem:[%s3041_s1 + $0x2d8] sm:$0xff]  }
  0x2e   : > { %629 = vmatmul.mubr.bf16.vlgmr.msra.gmra.mxu0 %v378_v58  ;;  %v2482_v58 = vld [vmem:[%s3041_s1 + $0x200] sm:$0xff]  }
  0x2f   : > { %669 = vmatmul.mubr.bf16.vlgmr.msra.gmra.mxu1 %v392_v60  ;;  %2225 = vmatpush3.bf16.msra.mxu0 %v2418_v52  ;;  %v2476_v52 = vld [vmem:[%s3041_s1 + $0x248] sm:$0xff]   ;;  %v962_v60 = vld [vmem:[%s2690_s6] sm:$0xee] }
  0x30   : > { %2247 = vmatpush3.bf16.msra.mxu1 %v2419_v55  ;;  %2226 = vmatprep.subr.bf16.mxu0 %v2420_v56  ;;  %v2479_v55 = vld [vmem:[%s3041_s1 + $0x288] sm:$0xff]   ;;  %v2480_v56 = vld [vmem:[%s3041_s1 + $0x240] sm:$0xff]  }
  0x31   : > { %2248 = vmatprep.subr.bf16.mxu1 %v2421_v61  ;;  %914 = vmatprep.mubr.bf16.mxu0 %v1941_v63  ;;  %v2912_v61 = vld [vmem:[%s2690_s6 + $0x10] sm:$0x33]  ;;  %v2916_v63 = vld [vmem:[%s2690_s6 + $0x18] sm:$0x33] }
  0x32   : > { %954 = vmatprep.mubr.bf16.mxu1 %v1943_v1  ;;  %v2041_v1 = vcombine.high %v962_v60, %v2912_v61 }
  0x33   : > { %2227 = vmatpush3.bf16.msra.mxu0 %v2422_v62  ;;  %v963_v62 = vld [vmem:[%s2690_s6 + $0x8] sm:$0xee] }
  0x34   : > { %2249 = vmatpush3.bf16.msra.mxu1 %v2423_v0  ;;  %2228 = vmatprep.subr.bf16.mxu0 %v2424_v2  ;;  %v2040_v0 = vcombine.low %v962_v60, %v2912_v61  ;;  %v2042_v2 = vcombine.low %v963_v62, %v2916_v63 }
  0x35   : > { %2250 = vmatprep.subr.bf16.mxu1 %v2425_v3  ;;  %v2488_v3 = vld [vmem:[%s3041_s1 + $0x378] sm:$0xff]  }
  0x37   : > { %2229 = vmatpush3.bf16.msra.mxu0 %v2426_v4  ;;  %v2043_v4 = vcombine.high %v963_v62, %v2916_v63 }
  0x38   : > { %2251 = vmatpush3.bf16.msra.mxu1 %v2427_v5  ;;  %2230 = vmatprep.subr.bf16.mxu0 %v2428_v6  ;;  %v2489_v5 = vld [vmem:[%s3041_s1 + $0x3f8] sm:$0xff]   ;;  %v1056_v6 = vshrl.u32 %v2041_v1, 16 }
  0x39   : > { %2252 = vmatprep.subr.bf16.mxu1 %v2429_v7  ;;  %v1059_v7 = vshll.u32 %v2041_v1, 16 }
  0x3b   : > { %2231 = vmatpush3.bf16.msra.mxu0 %v2430_v8  ;;  %v1048_v8 = vshrl.u32 %v2040_v0, 16 }
  0x3c   : > { %2253 = vmatpush3.bf16.msra.mxu1 %v2431_v9  ;;  %2232 = vmatprep.subr.bf16.mxu0 %v2432_v10  ;;  %v1051_v9 = vshll.u32 %v2040_v0, 16  ;;  %v1072_v10 = vshrl.u32 %v2043_v4, 16 }
  0x3d   : > { %2254 = vmatprep.subr.bf16.mxu1 %v2433_v11  ;;  %v1075_v11 = vshll.u32 %v2043_v4, 16 }
  0x3f   : > { %2233 = vmatpush3.bf16.msra.mxu0 %v2434_v12  ;;  %v1064_v12 = vshrl.u32 %v2042_v2, 16 }
  0x40   : > { %2255 = vmatpush3.bf16.msra.mxu1 %v2435_v13  ;;  %2234 = vmatprep.subr.bf16.mxu0 %v2436_v14  ;;  %v1067_v13 = vshll.u32 %v2042_v2, 16  ;;  %v1058_v14 = vrot.slane %v1056_v6, 1 }
  0x41   : > { %2256 = vmatprep.subr.bf16.mxu1 %v2437_v15  ;;  %v1061_v15 = vrot.slane %v1059_v7, 2 }
  0x43   : > { %2235 = vmatpush3.bf16.msra.mxu0 %v2438_v16  ;;  %v1050_v16 = vrot.slane %v1048_v8, 1 }
  0x44   : > { %2257 = vmatpush3.bf16.msra.mxu1 %v2439_v17  ;;  %2236 = vmatprep.subr.bf16.mxu0 %v2440_v18  ;;  %v1053_v17 = vrot.slane %v1051_v9, 2  ;;  %v2490_v18 = vld [vmem:[%s3041_s1 + $0x338] sm:$0xff]  }
  0x45   : > { %2258 = vmatprep.subr.bf16.mxu1 %v2441_v19  ;;  %v1074_v19 = vrot.slane %v1072_v10, 1 }
  0x47   : > { %2237 = vmatpush3.bf16.msra.mxu0 %v2442_v20  ;;  %v1077_v20 = vrot.slane %v1075_v11, 2 }
  0x48   : > { %2259 = vmatpush3.bf16.msra.mxu1 %v2443_v21  ;;  %2238 = vmatprep.subr.bf16.mxu0 %v2444_v22  ;;  %v1066_v21 = vrot.slane %v1064_v12, 1  ;;  %v1069_v22 = vrot.slane %v1067_v13, 2 }
  0x49   : > { %2260 = vmatprep.subr.bf16.mxu1 %v2445_v23  ;;  %v2491_v23 = vld [vmem:[%s3041_s1 + $0x3b8] sm:$0xff]  }
  0x4b   : > { %2239 = vmatpush3.bf16.msra.mxu0 %v2446_v24  ;;  %v1062_v24 = vor.u32 %v1061_v15, %v1058_v14 }
  0x4c   : > { %2261 = vmatpush3.bf16.msra.mxu1 %v2447_v25  ;;  %2268 = vmatprep.subr.bf16.mxu0 %v2452_v26  ;;  %v1054_v25 = vor.u32 %v1053_v17, %v1050_v16  ;;  %v1078_v26 = vor.u32 %v1077_v20, %v1074_v19 }
  0x4d   : > { %2290 = vmatprep.subr.bf16.mxu1 %v2453_v27  ;;  %v1070_v27 = vor.u32 %v1069_v22, %v1066_v21 }
  0x4e   : > { %915 = vmatmul.mubr.bf16.vlgmr.msra.gmra.mxu0 %v1940_v29  ;;  %v2493_v29 = vld [vmem:[%s3041_s1 + $0x3f0] sm:$0xff]  }
  0x4f   : > { %955 = vmatmul.mubr.bf16.vlgmr.msra.gmra.mxu1 %v1942_v31  ;;  %2269 = vmatpush3.bf16.msra.mxu0 %v2454_v28  ;;  %v2492_v28 = vld [vmem:[%s3041_s1 + $0x370] sm:$0xff]  }
  0x50   : > { %2291 = vmatpush3.bf16.msra.mxu1 %v2455_v30  ;;  %2270 = vmatprep.subr.bf16.mxu0 %v2456_v33  ;;  %v2494_v30 = vld [vmem:[%s3041_s1 + $0x330] sm:$0xff]   ;;  %v2496_v33 = vld [vmem:[%s3041_s1 + $0x368] sm:$0xff]  }
  0x51   : > { %2292 = vmatprep.subr.bf16.mxu1 %v2457_v35  ;;  %1307 = vmatprep.mubr.bf16.mxu0 %v1062_v24  ;;  %v2495_v31 = vld [vmem:[%s3041_s1 + $0x3b0] sm:$0xff]   ;;  %v2497_v35 = vld [vmem:[%s3041_s1 + $0x3e8] sm:$0xff]  }
  0x52   : > { %1347 = vmatprep.mubr.bf16.mxu1 %v1078_v26 }
  0x53   : > { %2271 = vmatpush3.bf16.msra.mxu0 %v2458_v32  ;;  %v2498_v32 = vld [vmem:[%s3041_s1 + $0x328] sm:$0xff]  }
  0x54   : > { %2293 = vmatpush3.bf16.msra.mxu1 %v2459_v34  ;;  %2272 = vmatprep.subr.bf16.mxu0 %v2460_v36  ;;  %v2499_v34 = vld [vmem:[%s3041_s1 + $0x3a8] sm:$0xff]   ;;  %v2500_v36 = vld [vmem:[%s3041_s1 + $0x360] sm:$0xff]  }
  0x55   : > { %2294 = vmatprep.subr.bf16.mxu1 %v2461_v37  ;;  %v2501_v37 = vld [vmem:[%s3041_s1 + $0x3e0] sm:$0xff]  }
  0x57   : > { %2273 = vmatpush3.bf16.msra.mxu0 %v2462_v38  ;;  %v2502_v38 = vld [vmem:[%s3041_s1 + $0x320] sm:$0xff]  }
  0x58   : > { %2295 = vmatpush3.bf16.msra.mxu1 %v2463_v39  ;;  %2274 = vmatprep.subr.bf16.mxu0 %v2464_v40  ;;  %v2503_v39 = vld [vmem:[%s3041_s1 + $0x3a0] sm:$0xff]   ;;  %v2504_v40 = vld [vmem:[%s3041_s1 + $0x358] sm:$0xff]  }
  0x59   : > { %2296 = vmatprep.subr.bf16.mxu1 %v2465_v41  ;;  %v2505_v41 = vld [vmem:[%s3041_s1 + $0x3d8] sm:$0xff]  }
  0x5b   : > { %2275 = vmatpush3.bf16.msra.mxu0 %v2466_v42  ;;  %v2506_v42 = vld [vmem:[%s3041_s1 + $0x318] sm:$0xff]  }
  0x5c   : > { %2297 = vmatpush3.bf16.msra.mxu1 %v2467_v43  ;;  %2276 = vmatprep.subr.bf16.mxu0 %v2468_v44  ;;  %v2507_v43 = vld [vmem:[%s3041_s1 + $0x398] sm:$0xff]   ;;  %v2508_v44 = vld [vmem:[%s3041_s1 + $0x350] sm:$0xff]  }
  0x5d   : > { %2298 = vmatprep.subr.bf16.mxu1 %v2469_v45  ;;  %v2509_v45 = vld [vmem:[%s3041_s1 + $0x3d0] sm:$0xff]  }
  0x5f   : > { %2277 = vmatpush3.bf16.msra.mxu0 %v2470_v46  ;;  %v2510_v46 = vld [vmem:[%s3041_s1 + $0x310] sm:$0xff]  }
  0x60   : > { %2299 = vmatpush3.bf16.msra.mxu1 %v2471_v47  ;;  %2278 = vmatprep.subr.bf16.mxu0 %v2472_v48  ;;  %v2511_v47 = vld [vmem:[%s3041_s1 + $0x390] sm:$0xff]   ;;  %v2512_v48 = vld [vmem:[%s3041_s1 + $0x348] sm:$0xff]  }
  0x61   : > { %2300 = vmatprep.subr.bf16.mxu1 %v2473_v49  ;;  %v2513_v49 = vld [vmem:[%s3041_s1 + $0x3c8] sm:$0xff]  }
  0x63   : > { %2279 = vmatpush3.bf16.msra.mxu0 %v2474_v50  ;;  %v2514_v50 = vld [vmem:[%s3041_s1 + $0x308] sm:$0xff]  }
  0x64   : > { %2301 = vmatpush3.bf16.msra.mxu1 %v2475_v51  ;;  %2280 = vmatprep.subr.bf16.mxu0 %v2476_v52  ;;  %v2515_v51 = vld [vmem:[%s3041_s1 + $0x388] sm:$0xff]   ;;  %v2516_v52 = vld [vmem:[%s3041_s1 + $0x340] sm:$0xff]  }
  0x65   : > { %2302 = vmatprep.subr.bf16.mxu1 %v2477_v53  ;;  %v2517_v53 = vld [vmem:[%s3041_s1 + $0x3c0] sm:$0xff]  }
  0x67   : > { %2281 = vmatpush3.bf16.msra.mxu0 %v2478_v54  ;;  %v2518_v54 = vld [vmem:[%s3041_s1 + $0x300] sm:$0xff]  }
  0x68   : > { %2303 = vmatpush3.bf16.msra.mxu1 %v2479_v55  ;;  %2282 = vmatprep.subr.bf16.mxu0 %v2480_v56  ;;  %v1356_v55 = vld [vmem:[%s2690_s6] sm:$0xcc]  ;;  %v1357_v56 = vld [vmem:[%s2690_s6 + $0x8] sm:$0xcc] }
  0x69   : > { %2304 = vmatprep.subr.bf16.mxu1 %v2481_v57  ;;  %v2519_v57 = vld [vmem:[%s3041_s1 + $0x380] sm:$0xff]   ;;  %v2142_v60 = vcombine.low %v1357_v56, %v2916_v63  ;;  %v2143_v62 = vcombine.high %v1357_v56, %v2916_v63 }
  0x6b   : > { %2283 = vmatpush3.bf16.msra.mxu0 %v2482_v58  ;;  %v2140_v58 = vcombine.low %v1356_v55, %v2912_v61  ;;  %v1435_v2 = vrot.slane %v2142_v60, 2 }
  0x6c   : > { %2305 = vmatpush3.bf16.msra.mxu1 %v2483_v59  ;;  %2312 = vmatprep.subr.bf16.mxu0 %v2488_v3  ;;  %v2141_v59 = vcombine.high %v1356_v55, %v2912_v61  ;;  %v1436_v3 = vrot.slane %v2143_v62, 2 }
  0x6d   : > { %2334 = vmatprep.subr.bf16.mxu1 %v2489_v5  ;;  %v1433_v0 = vrot.slane %v2140_v58, 2 }
  0x6e   : > { %1308 = vmatmul.mubr.bf16.vlgmr.msra.gmra.mxu0 %v1054_v25  ;;  %v1434_v1 = vrot.slane %v2141_v59, 2 }
  0x6f   : > { %1348 = vmatmul.mubr.bf16.vlgmr.msra.gmra.mxu1 %v1070_v27  ;;  %2313 = vmatpush3.bf16.msra.mxu0 %v2490_v18 }
  0x70   : > { %2335 = vmatpush3.bf16.msra.mxu1 %v2491_v23  ;;  %2314 = vmatprep.subr.bf16.mxu0 %v2492_v28 }
  0x71   : > { %2336 = vmatprep.subr.bf16.mxu1 %v2493_v29  ;;  %1665 = vmatprep.mubr.bf16.mxu0 %v1434_v1 }
  0x72   : > { %1705 = vmatprep.mubr.bf16.mxu1 %v1436_v3 }
  0x73   : > { %2315 = vmatpush3.bf16.msra.mxu0 %v2494_v30 }
  0x74   : > { %2337 = vmatpush3.bf16.msra.mxu1 %v2495_v31  ;;  %2316 = vmatprep.subr.bf16.mxu0 %v2496_v33 }
  0x75   : > { %2338 = vmatprep.subr.bf16.mxu1 %v2497_v35 }
  0x77   : > { %2317 = vmatpush3.bf16.msra.mxu0 %v2498_v32 }
  0x78   : > { %2339 = vmatpush3.bf16.msra.mxu1 %v2499_v34  ;;  %2318 = vmatprep.subr.bf16.mxu0 %v2500_v36 }
  0x79   : > { %2340 = vmatprep.subr.bf16.mxu1 %v2501_v37 }
  0x7b   : > { %2319 = vmatpush3.bf16.msra.mxu0 %v2502_v38 }
  0x7c   : > { %2341 = vmatpush3.bf16.msra.mxu1 %v2503_v39  ;;  %2320 = vmatprep.subr.bf16.mxu0 %v2504_v40 }
  0x7d   : > { %2342 = vmatprep.subr.bf16.mxu1 %v2505_v41 }
  0x7f   : > { %2321 = vmatpush3.bf16.msra.mxu0 %v2506_v42 }
  0x80   : > { %2343 = vmatpush3.bf16.msra.mxu1 %v2507_v43  ;;  %2322 = vmatprep.subr.bf16.mxu0 %v2508_v44 }
  0x81   : > { %2344 = vmatprep.subr.bf16.mxu1 %v2509_v45 }
  0x83   : > { %2323 = vmatpush3.bf16.msra.mxu0 %v2510_v46 }
  0x84   : > { %2345 = vmatpush3.bf16.msra.mxu1 %v2511_v47  ;;  %2324 = vmatprep.subr.bf16.mxu0 %v2512_v48  ;;  %v2176_v47 = vld [vmem:[%s3042_s2] ss:$0 sm:$0xff] }
  0x85   : > { %2346 = vmatprep.subr.bf16.mxu1 %v2513_v49 }
  0x87   : > { %2325 = vmatpush3.bf16.msra.mxu0 %v2514_v50 }
  0x88   : > { %2347 = vmatpush3.bf16.msra.mxu1 %v2515_v51  ;;  %2326 = vmatprep.subr.bf16.mxu0 %v2516_v52 }
  0x89   : > { %2348 = vmatprep.subr.bf16.mxu1 %v2517_v53 }
  0x8b   : > { %2327 = vmatpush3.bf16.msra.mxu0 %v2518_v54 }
  0x8c   : > { %2349 = vmatpush3.bf16.msra.mxu1 %v2519_v57 }
  0x8e   : > { %1666 = vmatmul.mubr.bf16.vlgmr.msra.gmra.mxu0 %v1433_v0 }
  0x8f   : > { %1706 = vmatmul.mubr.bf16.vlgmr.msra.gmra.mxu1 %v1435_v2 }
  0xee   : > { %v2196_v4 = vpop.f32.mrf.mxu0 }
  0xef   : > { %v2218_v5 = vpop.f32.mrf.mxu1 }
  0xf0   : > { %v2197_v6 = vpop.f32.mrf.mxu0 }
  0xf1   : > { %v2198_v7 = vadd.f32 %v2197_v6, %v2196_v4  ;;  %v2219_v61 = vpop.f32.mrf.mxu1 }
  0xf2   : > { %v2220_v8 = vadd.f32 %v2219_v61, %v2218_v5  ;;  %v2199_v9 = vpop.f32.mrf.mxu0 }
  0xf3   : > { %v2221_v10 = vpop.f32.mrf.mxu1 }
  0xf4   : > { %v671_v11 = vadd.f32 %v2220_v8, %v2198_v7  ;;  %v2200_v63 = vpop.f32.mrf.mxu0 }
  0xf5   : > { %v2222_v12 = vpop.f32.mrf.mxu1 }
 0x10e   : > { %v2240_v13 = vpop.f32.mrf.mxu0 }
 0x10f   : > { %v2262_v14 = vpop.f32.mrf.mxu1 }
 0x110   : > { %v2241_v15 = vpop.f32.mrf.mxu0 }
 0x111   : > { %v2242_v16 = vadd.f32 %v2241_v15, %v2240_v13  ;;  %v2263_v17 = vpop.f32.mrf.mxu1 }
 0x112   : > { %v2264_v18 = vadd.f32 %v2263_v17, %v2262_v14  ;;  %v2243_v19 = vpop.f32.mrf.mxu0 }
 0x113   : > { %v917_v20 = vadd.f32 %v2242_v16, %v671_v11  ;;  %v2265_v21 = vpop.f32.mrf.mxu1 }
 0x114   : > { %v2244_v22 = vpop.f32.mrf.mxu0 }
 0x115   : > { %v957_v23 = vadd.f32 %v2264_v18, %v917_v20  ;;  %v2266_v24 = vpop.f32.mrf.mxu1 }
 0x12e   : > { %v2284_v25 = vpop.f32.mrf.mxu0 }
 0x12f   : > { %v2306_v26 = vpop.f32.mrf.mxu1 }
 0x130   : > { %v2285_v27 = vpop.f32.mrf.mxu0 }
 0x131   : > { %v2307_v28 = vpop.f32.mrf.mxu1  ;;  %v2286_v35 = vadd.f32 %v2285_v27, %v2284_v25 }
 0x132   : > { %v2287_v29 = vpop.f32.mrf.mxu0  ;;  %v2308_v32 = vadd.f32 %v2307_v28, %v2306_v26 }
 0x133   : > { %v2309_v30 = vpop.f32.mrf.mxu1 }
 0x134   : > { %v2288_v31 = vpop.f32.mrf.mxu0  ;;  %v1350_v37 = vadd.f32 %v2308_v32, %v2286_v35 }
 0x135   : > { %v2310_v33 = vpop.f32.mrf.mxu1 }
 0x136   : > { %v1355_v44 = vadd.f32 %v1350_v37, %v957_v23 }
 0x14e   : > { %v2328_v34 = vpop.f32.mrf.mxu0 }
 0x14f   : > { %v2350_v36 = vpop.f32.mrf.mxu1 }
 0x150   : > { %v2329_v38 = vpop.f32.mrf.mxu0 }
 0x151   : > { %v2330_v39 = vadd.f32 %v2329_v38, %v2328_v34  ;;  %v2351_v40 = vpop.f32.mrf.mxu1 }
 0x152   : > { %v2352_v41 = vadd.f32 %v2351_v40, %v2350_v36  ;;  %v2331_v42 = vpop.f32.mrf.mxu0 }
 0x153   : > { %v2353_v43 = vpop.f32.mrf.mxu1 }
 0x154   : > { %v1708_v45 = vadd.f32 %v2352_v41, %v2330_v39  ;;  %v2332_v46 = vpop.f32.mrf.mxu0 }
 0x155   : > { %v2354_v48 = vpop.f32.mrf.mxu1 }
 0x156   : > { %v1713_v49 = vadd.f32 %v1708_v45, %v1355_v44 }
 0x158   : > { %v1721_v50 = vadd.f32 %v2176_v47, %v1713_v49 }
 0x15a   : > { %v1722_v51 = vmax.f32 %v1721_v50, -60.0 }
 0x15c   : > { %v1723_v52 = vsub.f32 0.0, %v1722_v51 }
 0x15e   : > { %v1724_v53 = vmul.f32 1.442695, %v1723_v52 }
 0x160   : > { %2524 = vpow2.f32 %v1724_v53 }
 0x16d   : > { %v2525_v54 = vpop.eup %2524 }
 0x16e   : > { %v1726_v55 = vadd.f32 1.0, %v2525_v54 }
 0x170   : > { %2526 = vrcp.f32 %v1726_v55 }
 0x17d   : > { %v2527_v56 = vpop.eup %2526 }
 0x17e   : > { %v1728_v57 = vmul.f32 %v2527_v56, %v1721_v50 }
 0x180   : > { %v1729_v58 = vpack.c.bf16 %v1728_v57, %v1728_v57 }
 0x182   : > { %1730 = vst [vmem:[%s219_s9] sm:$0xf] %v1729_v58 }
 0x183 PF: > { %s13_s14 = sadd.s32 1, %s2550_s14   ;;  %s3044_s12 = smov %s2546_s13 }
 0x184   : > { %p10_p5 = scmp.ge.s32.totalorder %s13_s14, 4   ;;  %s3045_s13 = smov %s3047_s15 }
 0x186   :  { %12 = sbr.rel (!%p10_p5) target bundleno = 2 (0x2), region = 71 }

// kernel: yolov7_backbone.29
= control target key start
LH: loop header
LB: loop body
LE: loop exit
PB: predicated region body
PF: predicated region fallthrough
CT: control target
= control target key end

     0   :  { %s1995_s12 = smov 0   ;;  %s1997_s13 = smov 0   ;;  %s2358_s0 = inlined_call_operand.vmem [shape: bf16[2,24,128], index: 0, kind: input, shape index: {}]   ;;  %s2359_s1 = inlined_call_operand.vmem [shape: bf16[9,128,128], index: 1, kind: input, shape index: {}]   ;;  %s2360_s2 = inlined_call_operand.vmem [shape: f32[1,128], index: 2, kind: input, shape index: {}]   ;;  %s2361_s3 = inlined_call_operand.vmem [shape: bf16[2,8,128], index: 3, kind: output, shape index: {}]  }
   0x1   :  { %s1999_s14 = smov 0  }
   0x2 LB: > { %s25_s15 = sadd.s32 1, %s1967_s13  ;;  %p1365_p0 = scmp.ge.s32.totalorder %s1971_s14, 1  ;;  %s1971_s14 = sphi %s1999_s14, %s13_s14   ;;  %s1967_s13 = sphi %s1997_s13, %s2363_s13   ;;  %s1963_s12 = sphi %s1995_s12, %s2362_s12  }
   0x3   : > { %p27_p1 = scmp.ge.s32.totalorder %s25_s15, 2  ;;  %p168_p2 = scmp.lt.s32.totalorder %s1971_s14, 3 }
   0x5   : > { %s2365_s15 = smov (%p27_p1, %s25_s15), 0  ;;  %p169_p3 = pnand %p1365_p0, %p168_p2 }
   0x6   : > { %p201_p4 = scmp.lt.s32.totalorder (!%p169_p3), %s1963_s12, 1 }
   0x7   : > { %172 = sbr.rel (%p169_p3) target bundleno = 411 (0x19b), region = 32 }
   0xc   : > { %v1866_v0 = vld [vmem:[%s2359_s1 + $0x78] sm:$0xff]   ;;  %v1973_v1 = vmov 0.0   ;;  %v1868_v3 = vld [vmem:[%s2359_s1 + $0x70] sm:$0xff]   ;;  %vm1974_vm0 = vmmov 0   ;;  %s2367_s12 = smov (!%p201_p4, %s1963_s12), 1  ;;  %v1870_v5 = vld [vmem:[%s2359_s1 + $0x68] sm:$0xff]  }
   0xd   : > { %1659 = vmatprep.subr.bf16.mxu0 %v1973_v1  ;;  %1679 = vmatprep.subr.bf16.mxu1 %v1973_v1  ;;  %v1867_v2 = vld [vmem:[%s2359_s1 + $0x38] sm:$0xff]   ;;  %v1869_v4 = vld [vmem:[%s2359_s1 + $0x30] sm:$0xff]   ;;  %v1871_v6 = vld [vmem:[%s2359_s1 + $0x28] sm:$0xff]   ;;  %s1839_s28 = smul.u32 12, %s2367_s12  ;;  %s1367_s5 = sshll.u32 %s2367_s12, 2 }
   0xe   : > { %1660 = vmatpush3.bf16.msra.mxu0 %v1866_v0  ;;  %1675 = vmatprep.mubr.msk.bf16.mxu0 %vm1974_vm0, %v1973_v1  ;;  %v1872_v7 = vld [vmem:[%s2359_s1 + $0x60] sm:$0xff]   ;;  %v1874_v9 = vld [vmem:[%s2359_s1 + $0x58] sm:$0xff]   ;;  %v1876_v14 = vld [vmem:[%s2359_s1 + $0x50] sm:$0xff]   ;;  %s219_s9 = scalar_lea.vmem %s2361_s3, %s1367_s5 }
   0xf   : > { %1680 = vmatpush3.bf16.msra.mxu1 %v1867_v2  ;;  %1661 = vmatprep.subr.bf16.mxu0 %v1973_v1  ;;  %v1873_v8 = vld [vmem:[%s2359_s1 + $0x20] sm:$0xff]   ;;  %s2055_s8 = scalar_lea.vmem %s2358_s0, %s1839_s28  ;;  %v1875_v10 = vld [vmem:[%s2359_s1 + $0x18] sm:$0xff]   ;;  %v1877_v15 = vld [vmem:[%s2359_s1 + $0x10] sm:$0xff]  }
  0x10   : > { %1681 = vmatprep.subr.bf16.mxu1 %v1973_v1  ;;  %1695 = vmatprep.mubr.msk.bf16.mxu1 %vm1974_vm0, %v1973_v1  ;;  %v221_v11 = vld [vmem:[%s2055_s8] sm:$0xf]  ;;  %v2067_v12 = vld [vmem:[%s2055_s8 + $0x4] sm:$0x1]  ;;  %v1878_v17 = vld [vmem:[%s2359_s1 + $0x48] sm:$0xff]  }
  0x11   : > { %v1384_v13 = vcombine.low %v221_v11, %v2067_v12  ;;  %v1879_v18 = vld [vmem:[%s2359_s1 + $0x8] sm:$0xff]   ;;  %v1880_v21 = vld [vmem:[%s2359_s1 + $0x40] sm:$0xff]   ;;  %v1883_v24 = vld [vmem:[%s2359_s1 + $0xb8] sm:$0xff]  }
  0x12   : > { %1662 = vmatpush3.bf16.msra.mxu0 %v1868_v3  ;;  %v1881_v22 = vld [vmem:[%s2359_s1] sm:$0xff]   ;;  %v1884_v25 = vld [vmem:[%s2359_s1 + $0xf8] sm:$0xff]   ;;  %v1885_v26 = vld [vmem:[%s2359_s1 + $0xb0] sm:$0xff]  }
  0x13   : > { %1682 = vmatpush3.bf16.msra.mxu1 %v1869_v4  ;;  %1663 = vmatprep.subr.bf16.mxu0 %v1973_v1  ;;  %v264_v16 = vshll.u32 %v1384_v13, 16  ;;  %v262_v19 = vshrl.u32 %v1384_v13, 16  ;;  %v1886_v27 = vld [vmem:[%s2359_s1 + $0xf0] sm:$0xff]   ;;  %v1887_v28 = vld [vmem:[%s2359_s1 + $0xa8] sm:$0xff]   ;;  %v1889_v30 = vld [vmem:[%s2359_s1 + $0xa0] sm:$0xff]  }
  0x14   : > { %1683 = vmatprep.subr.bf16.mxu1 %v1973_v1  ;;  %v1888_v29 = vld [vmem:[%s2359_s1 + $0xe8] sm:$0xff]   ;;  %v1890_v31 = vld [vmem:[%s2359_s1 + $0xe0] sm:$0xff]   ;;  %v1891_v32 = vld [vmem:[%s2359_s1 + $0x98] sm:$0xff]  }
  0x15   : > { %v266_v20 = vrot.slane %v264_v16, 1  ;;  %v1892_v33 = vld [vmem:[%s2359_s1 + $0xd8] sm:$0xff]   ;;  %v1893_v34 = vld [vmem:[%s2359_s1 + $0x90] sm:$0xff]   ;;  %v1895_v36 = vld [vmem:[%s2359_s1 + $0x88] sm:$0xff]  }
  0x16   : > { %1664 = vmatpush3.bf16.msra.mxu0 %v1870_v5  ;;  %v1894_v35 = vld [vmem:[%s2359_s1 + $0xd0] sm:$0xff]   ;;  %v1896_v37 = vld [vmem:[%s2359_s1 + $0xc8] sm:$0xff]   ;;  %v445_v38 = vld [vmem:[%s2055_s8] sm:$0xe] }
  0x17   : > { %1684 = vmatpush3.bf16.msra.mxu1 %v1871_v6  ;;  %1665 = vmatprep.subr.bf16.mxu0 %v1973_v1  ;;  %v267_v23 = vor.u32 %v266_v20, %v262_v19  ;;  %v557_v39 = vld [vmem:[%s2055_s8] sm:$0xc]  ;;  %v558_v40 = vld [vmem:[%s2055_s8 + $0x4] sm:$0x3]  ;;  %v1417_v41 = vcombine.low %v445_v38, %v2067_v12  ;;  %v1900_v46 = vld [vmem:[%s2359_s1 + $0x138] sm:$0xff]  }
  0x18   : > { %1685 = vmatprep.subr.bf16.mxu1 %v1973_v1  ;;  %v1897_v42 = vld [vmem:[%s2359_s1 + $0x80] sm:$0xff]   ;;  %v1442_v43 = vcombine.low %v557_v39, %v558_v40  ;;  %v1903_v48 = vld [vmem:[%s2359_s1 + $0x178] sm:$0xff]   ;;  %v1904_v49 = vld [vmem:[%s2359_s1 + $0x130] sm:$0xff]  }
  0x19   : > { %v1898_v44 = vld [vmem:[%s2359_s1 + $0xc0] sm:$0xff]   ;;  %v466_v45 = vrot.slane %v1417_v41, 1  ;;  %v1905_v50 = vld [vmem:[%s2359_s1 + $0x170] sm:$0xff]   ;;  %v1906_v51 = vld [vmem:[%s2359_s1 + $0x128] sm:$0xff]  }
  0x1a   : > { %1666 = vmatpush3.bf16.msra.mxu0 %v1872_v7  ;;  %v581_v47 = vrot.slane %v1442_v43, 2  ;;  %v1907_v52 = vld [vmem:[%s2359_s1 + $0x168] sm:$0xff]   ;;  %v1908_v53 = vld [vmem:[%s2359_s1 + $0x120] sm:$0xff]   ;;  %v1910_v56 = vld [vmem:[%s2359_s1 + $0x118] sm:$0xff]  }
  0x1b   : > { %1686 = vmatpush3.bf16.msra.mxu1 %v1873_v8  ;;  %1667 = vmatprep.subr.bf16.mxu0 %v1973_v1  ;;  %v1909_v54 = vld [vmem:[%s2359_s1 + $0x160] sm:$0xff]   ;;  %v1911_v57 = vld [vmem:[%s2359_s1 + $0x158] sm:$0xff]   ;;  %v1912_v59 = vld [vmem:[%s2359_s1 + $0x110] sm:$0xff]  }
  0x1c   : > { %1687 = vmatprep.subr.bf16.mxu1 %v1973_v1  ;;  %v672_v55 = vld [vmem:[%s2055_s8 + $0x4] sm:$0x7]  ;;  %v1913_v60 = vld [vmem:[%s2359_s1 + $0x150] sm:$0xff]   ;;  %v1914_v63 = vld [vmem:[%s2359_s1 + $0x108] sm:$0xff]  }
  0x1d   : > { %v1467_v58 = vcombine.low %v557_v39, %v672_v55  ;;  %v1915_v0 = vld [vmem:[%s2359_s1 + $0x148] sm:$0xff]   ;;  %v791_v2 = vld [vmem:[%s2055_s8] sm:$0x8]  ;;  %v1921_v12 = vld [vmem:[%s2359_s1 + $0x1b0] sm:$0xff]  }
  0x1e   : > { %1668 = vmatpush3.bf16.msra.mxu0 %v1874_v9  ;;  %v1916_v5 = vld [vmem:[%s2359_s1 + $0x100] sm:$0xff]   ;;  %v1492_v6 = vcombine.low %v791_v2, %v672_v55  ;;  %v1918_v9 = vld [vmem:[%s2359_s1 + $0x1b8] sm:$0xff]   ;;  %v1922_v13 = vld [vmem:[%s2359_s1 + $0x1f0] sm:$0xff]  }
  0x1f   : > { %1688 = vmatpush3.bf16.msra.mxu1 %v1875_v10  ;;  %1669 = vmatprep.subr.bf16.mxu0 %v1973_v1  ;;  %v694_v61 = vshrl.u32 %v1467_v58, 16  ;;  %v697_v62 = vshll.u32 %v1467_v58, 16  ;;  %v1917_v7 = vld [vmem:[%s2359_s1 + $0x140] sm:$0xff]   ;;  %v1928_v19 = vld [vmem:[%s2359_s1 + $0x1d8] sm:$0xff]   ;;  %v1941_v39 = vld [vmem:[%s2359_s1 + $0x210] sm:$0xff]  }
  0x20   : > { %1689 = vmatprep.subr.bf16.mxu1 %v1973_v1  ;;  %v812_v10 = vrot.slane %v1492_v6, 3  ;;  %v1925_v16 = vld [vmem:[%s2359_s1 + $0x1a0] sm:$0xff]   ;;  %v1940_v38 = vld [vmem:[%s2359_s1 + $0x218] sm:$0xff]   ;;  %v1942_v40 = vld [vmem:[%s2359_s1 + $0x208] sm:$0xff]  }
  0x21   : > { %v696_v3 = vrot.slane %v694_v61, 2  ;;  %v699_v4 = vrot.slane %v697_v62, 3  ;;  %v1010_v20 = vld [vmem:[%s2055_s8 + $0x4] sm:$0xf] }
  0x22   : > { %1670 = vmatpush3.bf16.msra.mxu0 %v1876_v14  ;;  %v1923_v14 = vld [vmem:[%s2359_s1 + $0x1a8] sm:$0xff]   ;;  %v1131_v41 = vld [vmem:[%s2055_s8 + $0x4] sm:$0xe] }
  0x23   : > { %1690 = vmatpush3.bf16.msra.mxu1 %v1877_v15  ;;  %1671 = vmatprep.subr.bf16.mxu0 %v1973_v1  ;;  %v700_v8 = vor.u32 %v699_v4, %v696_v3  ;;  %v1924_v15 = vld [vmem:[%s2359_s1 + $0x1e8] sm:$0xff]   ;;  %v1943_v43 = vld [vmem:[%s2359_s1 + $0x200] sm:$0xff]  }
  0x24   : > { %1691 = vmatprep.subr.bf16.mxu1 %v1973_v1 }
  0x26   : > { %1672 = vmatpush3.bf16.msra.mxu0 %v1878_v17  ;;  %v1926_v17 = vld [vmem:[%s2359_s1 + $0x1e0] sm:$0xff]  }
  0x27   : > { %1692 = vmatpush3.bf16.msra.mxu1 %v1879_v18  ;;  %1673 = vmatprep.subr.bf16.mxu0 %v1973_v1  ;;  %v1927_v18 = vld [vmem:[%s2359_s1 + $0x198] sm:$0xff]  }
  0x28   : > { %1693 = vmatprep.subr.bf16.mxu1 %v1973_v1 }
  0x2a   : > { %1674 = vmatpush3.bf16.msra.mxu0 %v1880_v21  ;;  %v1011_v21 = vld [vmem:[%s2055_s8 + $0x8] sm:$0x1] }
  0x2b   : > { %1694 = vmatpush3.bf16.msra.mxu1 %v1881_v22  ;;  %1699 = vmatprep.subr.bf16.mxu0 %v1973_v1  ;;  %v1929_v22 = vld [vmem:[%s2359_s1 + $0x190] sm:$0xff]  }
  0x2c   : > { %1719 = vmatprep.subr.bf16.mxu1 %v1973_v1 }
  0x2d   : > { %1676 = vmatmul.mubr.bf16.vlgmr.msra.gmra.mxu0 %v267_v23  ;;  %v1541_v23 = vcombine.low %v1010_v20, %v1011_v21 }
  0x2e   : > { %1696 = vmatmul.mubr.bf16.vlgmr.msra.gmra.mxu1 %v221_v11  ;;  %1700 = vmatpush3.bf16.msra.mxu0 %v1883_v24  ;;  %v1920_v11 = vld [vmem:[%s2359_s1 + $0x1f8] sm:$0xff]   ;;  %v1930_v24 = vld [vmem:[%s2359_s1 + $0x1d0] sm:$0xff]  }
  0x2f   : > { %1720 = vmatpush3.bf16.msra.mxu1 %v1884_v25  ;;  %1701 = vmatprep.subr.bf16.mxu0 %v1973_v1  ;;  %v1931_v25 = vld [vmem:[%s2359_s1 + $0x188] sm:$0xff]  }
  0x30   : > { %1721 = vmatprep.subr.bf16.mxu1 %v1973_v1  ;;  %1715 = vmatprep.mubr.msk.bf16.mxu0 %vm1974_vm0, %v1973_v1 }
  0x31   : > { %1735 = vmatprep.mubr.msk.bf16.mxu1 %vm1974_vm0, %v1973_v1 }
  0x32   : > { %1702 = vmatpush3.bf16.msra.mxu0 %v1885_v26  ;;  %v1037_v26 = vshll.u32 %v1541_v23, 16 }
  0x33   : > { %1722 = vmatpush3.bf16.msra.mxu1 %v1886_v27  ;;  %1703 = vmatprep.subr.bf16.mxu0 %v1973_v1  ;;  %v1932_v27 = vld [vmem:[%s2359_s1 + $0x1c8] sm:$0xff]  }
  0x34   : > { %1723 = vmatprep.subr.bf16.mxu1 %v1973_v1 }
  0x36   : > { %1704 = vmatpush3.bf16.msra.mxu0 %v1887_v28  ;;  %v1933_v28 = vld [vmem:[%s2359_s1 + $0x180] sm:$0xff]  }
  0x37   : > { %1724 = vmatpush3.bf16.msra.mxu1 %v1888_v29  ;;  %1705 = vmatprep.subr.bf16.mxu0 %v1973_v1  ;;  %v1035_v29 = vshrl.u32 %v1541_v23, 16 }
  0x38   : > { %1725 = vmatprep.subr.bf16.mxu1 %v1973_v1 }
  0x3a   : > { %1706 = vmatpush3.bf16.msra.mxu0 %v1889_v30  ;;  %v1039_v30 = vrot.slane %v1037_v26, 1 }
  0x3b   : > { %1726 = vmatpush3.bf16.msra.mxu1 %v1890_v31  ;;  %1707 = vmatprep.subr.bf16.mxu0 %v1973_v1  ;;  %v1934_v31 = vld [vmem:[%s2359_s1 + $0x1c0] sm:$0xff]  }
  0x3c   : > { %1727 = vmatprep.subr.bf16.mxu1 %v1973_v1 }
  0x3e   : > { %1708 = vmatpush3.bf16.msra.mxu0 %v1891_v32  ;;  %v903_v32 = vld [vmem:[%s2055_s8 + $0x4] sm:$0xf] }
  0x3f   : > { %1728 = vmatpush3.bf16.msra.mxu1 %v1892_v33  ;;  %1709 = vmatprep.subr.bf16.mxu0 %v1973_v1  ;;  %v1935_v33 = vld [vmem:[%s2359_s1 + $0x238] sm:$0xff]  }
  0x40   : > { %1729 = vmatprep.subr.bf16.mxu1 %v1973_v1 }
  0x42   : > { %1710 = vmatpush3.bf16.msra.mxu0 %v1893_v34  ;;  %v1040_v34 = vor.u32 %v1039_v30, %v1035_v29 }
  0x43   : > { %1730 = vmatpush3.bf16.msra.mxu1 %v1894_v35  ;;  %1711 = vmatprep.subr.bf16.mxu0 %v1973_v1  ;;  %v1937_v35 = vld [vmem:[%s2359_s1 + $0x230] sm:$0xff]  }
  0x44   : > { %1731 = vmatprep.subr.bf16.mxu1 %v1973_v1 }
  0x46   : > { %1712 = vmatpush3.bf16.msra.mxu0 %v1895_v36  ;;  %v1938_v36 = vld [vmem:[%s2359_s1 + $0x228] sm:$0xff]  }
  0x47   : > { %1732 = vmatpush3.bf16.msra.mxu1 %v1896_v37  ;;  %1713 = vmatprep.subr.bf16.mxu0 %v1973_v1  ;;  %v1939_v37 = vld [vmem:[%s2359_s1 + $0x220] sm:$0xff]  }
  0x48   : > { %1733 = vmatprep.subr.bf16.mxu1 %v1973_v1 }
  0x4a   : > { %1714 = vmatpush3.bf16.msra.mxu0 %v1897_v42  ;;  %v1566_v42 = vcombine.low %v1131_v41, %v1011_v21  ;;  %v1575_v21 = vld [vmem:[%s2360_s2] ss:$0 sm:$0xff] }
  0x4b   : > { %1734 = vmatpush3.bf16.msra.mxu1 %v1898_v44  ;;  %1739 = vmatprep.subr.bf16.mxu0 %v1973_v1 }
  0x4c   : > { %1759 = vmatprep.subr.bf16.mxu1 %v1973_v1  ;;  %v1152_v44 = vrot.slane %v1566_v42, 1 }
  0x4d   : > { %1716 = vmatmul.mubr.bf16.vlgmr.msra.gmra.mxu0 %v466_v45 }
  0x4e   : > { %1740 = vmatpush3.bf16.msra.mxu0 %v1900_v46  ;;  %1736 = vmatmul.mubr.bf16.vlgmr.msra.gmra.mxu1 %v581_v47 }
  0x4f   : > { %1760 = vmatpush3.bf16.msra.mxu1 %v1903_v48  ;;  %1741 = vmatprep.subr.bf16.mxu0 %v1973_v1 }
  0x50   : > { %1761 = vmatprep.subr.bf16.mxu1 %v1973_v1  ;;  %1755 = vmatprep.mubr.msk.bf16.mxu0 %vm1974_vm0, %v1973_v1 }
  0x51   : > { %1775 = vmatprep.mubr.msk.bf16.mxu1 %vm1974_vm0, %v1973_v1 }
  0x52   : > { %1742 = vmatpush3.bf16.msra.mxu0 %v1904_v49 }
  0x53   : > { %1762 = vmatpush3.bf16.msra.mxu1 %v1905_v50  ;;  %1743 = vmatprep.subr.bf16.mxu0 %v1973_v1 }
  0x54   : > { %1763 = vmatprep.subr.bf16.mxu1 %v1973_v1 }
  0x56   : > { %1744 = vmatpush3.bf16.msra.mxu0 %v1906_v51 }
  0x57   : > { %1764 = vmatpush3.bf16.msra.mxu1 %v1907_v52  ;;  %1745 = vmatprep.subr.bf16.mxu0 %v1973_v1 }
  0x58   : > { %1765 = vmatprep.subr.bf16.mxu1 %v1973_v1 }
  0x5a   : > { %1746 = vmatpush3.bf16.msra.mxu0 %v1908_v53 }
  0x5b   : > { %1766 = vmatpush3.bf16.msra.mxu1 %v1909_v54  ;;  %1747 = vmatprep.subr.bf16.mxu0 %v1973_v1 }
  0x5c   : > { %1767 = vmatprep.subr.bf16.mxu1 %v1973_v1 }
  0x5e   : > { %1748 = vmatpush3.bf16.msra.mxu0 %v1910_v56 }
  0x5f   : > { %1768 = vmatpush3.bf16.msra.mxu1 %v1911_v57  ;;  %1749 = vmatprep.subr.bf16.mxu0 %v1973_v1 }
  0x60   : > { %1769 = vmatprep.subr.bf16.mxu1 %v1973_v1 }
  0x62   : > { %1750 = vmatpush3.bf16.msra.mxu0 %v1912_v59 }
  0x63   : > { %1770 = vmatpush3.bf16.msra.mxu1 %v1913_v60  ;;  %1751 = vmatprep.subr.bf16.mxu0 %v1973_v1 }
  0x64   : > { %1771 = vmatprep.subr.bf16.mxu1 %v1973_v1 }
  0x66   : > { %1752 = vmatpush3.bf16.msra.mxu0 %v1914_v63 }
  0x67   : > { %1772 = vmatpush3.bf16.msra.mxu1 %v1915_v0  ;;  %1753 = vmatprep.subr.bf16.mxu0 %v1973_v1 }
  0x68   : > { %1773 = vmatprep.subr.bf16.mxu1 %v1973_v1 }
  0x6a   : > { %1754 = vmatpush3.bf16.msra.mxu0 %v1916_v5 }
  0x6b   : > { %1774 = vmatpush3.bf16.msra.mxu1 %v1917_v7  ;;  %1779 = vmatprep.subr.bf16.mxu0 %v1973_v1 }
  0x6c   : > { %1799 = vmatprep.subr.bf16.mxu1 %v1973_v1 }
  0x6d   : > { %1756 = vmatmul.mubr.bf16.vlgmr.msra.gmra.mxu0 %v700_v8 }
  0x6e   : > { %1780 = vmatpush3.bf16.msra.mxu0 %v1918_v9  ;;  %1776 = vmatmul.mubr.bf16.vlgmr.msra.gmra.mxu1 %v812_v10 }
  0x6f   : > { %1800 = vmatpush3.bf16.msra.mxu1 %v1920_v11  ;;  %1781 = vmatprep.subr.bf16.mxu0 %v1973_v1 }
  0x70   : > { %1801 = vmatprep.subr.bf16.mxu1 %v1973_v1  ;;  %1795 = vmatprep.mubr.msk.bf16.mxu0 %vm1974_vm0, %v1973_v1 }
  0x71   : > { %1815 = vmatprep.mubr.msk.bf16.mxu1 %vm1974_vm0, %v1973_v1 }
  0x72   : > { %1782 = vmatpush3.bf16.msra.mxu0 %v1921_v12 }
  0x73   : > { %1802 = vmatpush3.bf16.msra.mxu1 %v1922_v13  ;;  %1783 = vmatprep.subr.bf16.mxu0 %v1973_v1 }
  0x74   : > { %1803 = vmatprep.subr.bf16.mxu1 %v1973_v1 }
  0x76   : > { %1784 = vmatpush3.bf16.msra.mxu0 %v1923_v14 }
  0x77   : > { %1804 = vmatpush3.bf16.msra.mxu1 %v1924_v15  ;;  %1785 = vmatprep.subr.bf16.mxu0 %v1973_v1 }
  0x78   : > { %1805 = vmatprep.subr.bf16.mxu1 %v1973_v1 }
  0x7a   : > { %1786 = vmatpush3.bf16.msra.mxu0 %v1925_v16 }
  0x7b   : > { %1806 = vmatpush3.bf16.msra.mxu1 %v1926_v17  ;;  %1787 = vmatprep.subr.bf16.mxu0 %v1973_v1 }
  0x7c   : > { %1807 = vmatprep.subr.bf16.mxu1 %v1973_v1 }
  0x7e   : > { %1788 = vmatpush3.bf16.msra.mxu0 %v1927_v18 }
  0x7f   : > { %1808 = vmatpush3.bf16.msra.mxu1 %v1928_v19  ;;  %1789 = vmatprep.subr.bf16.mxu0 %v1973_v1 }
  0x80   : > { %1809 = vmatprep.subr.bf16.mxu1 %v1973_v1 }
  0x82   : > { %1790 = vmatpush3.bf16.msra.mxu0 %v1929_v22 }
  0x83   : > { %1810 = vmatpush3.bf16.msra.mxu1 %v1930_v24  ;;  %1791 = vmatprep.subr.bf16.mxu0 %v1973_v1 }
  0x84   : > { %1811 = vmatprep.subr.bf16.mxu1 %v1973_v1 }
  0x86   : > { %1792 = vmatpush3.bf16.msra.mxu0 %v1931_v25 }
  0x87   : > { %1812 = vmatpush3.bf16.msra.mxu1 %v1932_v27  ;;  %1793 = vmatprep.subr.bf16.mxu0 %v1973_v1 }
  0x88   : > { %1813 = vmatprep.subr.bf16.mxu1 %v1973_v1 }
  0x8a   : > { %1794 = vmatpush3.bf16.msra.mxu0 %v1933_v28 }
  0x8b   : > { %1814 = vmatpush3.bf16.msra.mxu1 %v1934_v31  ;;  %1819 = vmatprep.subr.bf16.mxu0 %v1973_v1 }
  0x8d   : > { %1796 = vmatmul.mubr.bf16.vlgmr.msra.gmra.mxu0 %v903_v32 }
  0x8e   : > { %1820 = vmatpush3.bf16.msra.mxu0 %v1935_v33  ;;  %1816 = vmatmul.mubr.bf16.vlgmr.msra.gmra.mxu1 %v1040_v34 }
  0x8f   : > { %1821 = vmatprep.subr.bf16.mxu0 %v1973_v1  ;;  %1835 = vmatprep.mubr.msk.bf16.mxu0 %vm1974_vm0, %v1973_v1 }
  0x92   : > { %1822 = vmatpush3.bf16.msra.mxu0 %v1937_v35 }
  0x93   : > { %1823 = vmatprep.subr.bf16.mxu0 %v1973_v1 }
  0x96   : > { %1824 = vmatpush3.bf16.msra.mxu0 %v1938_v36 }
  0x97   : > { %1825 = vmatprep.subr.bf16.mxu0 %v1973_v1 }
  0x9a   : > { %1826 = vmatpush3.bf16.msra.mxu0 %v1939_v37 }
  0x9b   : > { %1827 = vmatprep.subr.bf16.mxu0 %v1973_v1 }
  0x9e   : > { %1828 = vmatpush3.bf16.msra.mxu0 %v1940_v38 }
  0x9f   : > { %1829 = vmatprep.subr.bf16.mxu0 %v1973_v1 }
  0xa2   : > { %1830 = vmatpush3.bf16.msra.mxu0 %v1941_v39 }
  0xa3   : > { %1831 = vmatprep.subr.bf16.mxu0 %v1973_v1 }
  0xa6   : > { %1832 = vmatpush3.bf16.msra.mxu0 %v1942_v40 }
  0xa7   : > { %1833 = vmatprep.subr.bf16.mxu0 %v1973_v1 }
  0xaa   : > { %1834 = vmatpush3.bf16.msra.mxu0 %v1943_v43 }
  0xad   : > { %1836 = vmatmul.mubr.bf16.vlgmr.msra.gmra.mxu0 %v1152_v44 }
  0xed   : > { %v351_v45 = vpop.f32.mrf.mxu0 }
  0xee   : > { %v439_v46 = vpop.f32.mrf.mxu1 }
  0xef   : > { %v440_v47 = vadd.f32 %v439_v46, %v351_v45  ;;  %v1677_v48 = vpop.f32.mrf.mxu0 }
  0xf0   : > { %v1697_v49 = vpop.f32.mrf.mxu1 }
  0xf1   : > { %v354_v50 = vpop.f32.mrf.mxu0 }
  0xf2   : > { %v442_v51 = vpop.f32.mrf.mxu1 }
  0xf3   : > { %v1678_v52 = vpop.f32.mrf.mxu0 }
  0xf4   : > { %v1698_v53 = vpop.f32.mrf.mxu1 }
 0x10d   : > { %v550_v54 = vpop.f32.mrf.mxu0 }
 0x10e   : > { %v556_v55 = vadd.f32 %v550_v54, %v440_v47  ;;  %v665_v56 = vpop.f32.mrf.mxu1 }
 0x10f   : > { %v1717_v57 = vpop.f32.mrf.mxu0 }
 0x110   : > { %v671_v58 = vadd.f32 %v665_v56, %v556_v55  ;;  %v1737_v59 = vpop.f32.mrf.mxu1 }
 0x111   : > { %v553_v60 = vpop.f32.mrf.mxu0 }
 0x112   : > { %v668_v1 = vpop.f32.mrf.mxu1 }
 0x113   : > { %v1718_v61 = vpop.f32.mrf.mxu0 }
 0x114   : > { %v1738_v62 = vpop.f32.mrf.mxu1 }
 0x12d   : > { %v784_v63 = vpop.f32.mrf.mxu0 }
 0x12e   : > { %v896_v0 = vpop.f32.mrf.mxu1  ;;  %v790_v16 = vadd.f32 %v784_v63, %v671_v58 }
 0x12f   : > { %v1757_v2 = vpop.f32.mrf.mxu0 }
 0x130   : > { %v1777_v3 = vpop.f32.mrf.mxu1  ;;  %v902_v17 = vadd.f32 %v896_v0, %v790_v16 }
 0x131   : > { %v787_v4 = vpop.f32.mrf.mxu0 }
 0x132   : > { %v899_v5 = vpop.f32.mrf.mxu1 }
 0x133   : > { %v1758_v6 = vpop.f32.mrf.mxu0 }
 0x134   : > { %v1778_v7 = vpop.f32.mrf.mxu1 }
 0x14d   : > { %v1003_v8 = vpop.f32.mrf.mxu0 }
 0x14e   : > { %v1124_v9 = vpop.f32.mrf.mxu1  ;;  %v1009_v18 = vadd.f32 %v1003_v8, %v902_v17 }
 0x14f   : > { %v1797_v10 = vpop.f32.mrf.mxu0 }
 0x150   : > { %v1817_v11 = vpop.f32.mrf.mxu1  ;;  %v1130_v19 = vadd.f32 %v1124_v9, %v1009_v18 }
 0x151   : > { %v1006_v12 = vpop.f32.mrf.mxu0 }
 0x152   : > { %v1127_v13 = vpop.f32.mrf.mxu1 }
 0x153   : > { %v1798_v14 = vpop.f32.mrf.mxu0 }
 0x154   : > { %v1818_v15 = vpop.f32.mrf.mxu1 }
 0x16d   : > { %v1236_v20 = vpop.f32.mrf.mxu0 }
 0x16e   : > { %v1242_v22 = vadd.f32 %v1236_v20, %v1130_v19 }
 0x16f   : > { %v1837_v23 = vpop.f32.mrf.mxu0 }
 0x170   : > { %v1250_v24 = vadd.f32 %v1575_v21, %v1242_v22 }
 0x171   : > { %v1239_v25 = vpop.f32.mrf.mxu0 }
 0x172   : > { %v1251_v26 = vmax.f32 %v1250_v24, -60.0 }
 0x173   : > { %v1838_v27 = vpop.f32.mrf.mxu0 }
 0x174   : > { %v1252_v28 = vsub.f32 0.0, %v1251_v26 }
 0x176   : > { %v1253_v29 = vmul.f32 1.442695, %v1252_v28 }
 0x178   : > { %1945 = vpow2.f32 %v1253_v29 }
 0x185   : > { %v1946_v30 = vpop.eup %1945 }
 0x186   : > { %v1255_v31 = vadd.f32 1.0, %v1946_v30 }
 0x188   : > { %1947 = vrcp.f32 %v1255_v31 }
 0x195   : > { %v1948_v32 = vpop.eup %1947 }
 0x196   : > { %v1257_v33 = vmul.f32 %v1948_v32, %v1250_v24 }
 0x198   : > { %v1258_v34 = vpack.c.bf16 %v1257_v33, %v1257_v33 }
 0x19a   : > { %1259 = vst [vmem:[%s219_s9] sm:$0xf] %v1258_v34 }
 0x19b PF: > { %s13_s14 = sadd.s32 1, %s1971_s14   ;;  %s2362_s12 = smov %s1967_s13 }
 0x19c   : > { %p10_p5 = scmp.ge.s32.totalorder %s13_s14, 4   ;;  %s2363_s13 = smov %s2365_s15 }
 0x19e   :  { %12 = sbr.rel (!%p10_p5) target bundleno = 2 (0x2), region = 76 }

</bundles_post_ra>
